<compile_context>
chip_gen: v6e
topology: v6e:2x2x1
jax: 0.10.0
libtpu: 0.0.40
codegen_flags: <defaults>
</compile_context>

<pallas_src>
import functools

import jax
import jax.numpy as jnp
import numpy as np
from jax import lax
from jax.experimental import pallas as pl
from jax.experimental.pallas import tpu as pltpu


def _silu(x):
    return x * jax.nn.sigmoid(x)


def _resnet_block_kernel(
    xpad_ref, t_ref,
    w1_ref, b1_ref, g1w_ref, g1b_ref, gm1_ref, gm1t_ref,
    w2_ref, b2_ref, g2w_ref, g2b_ref, gm2_ref, gm2t_ref,
    wm_ref, bm_ref, wr_ref, br_ref,
    out_ref,
    hpad_ref,
    *, use_res_conv,
):
    H = out_ref.shape[1]
    W = out_ref.shape[2]
    Cout = out_ref.shape[3]
    Cin = xpad_ref.shape[3]
    Ch = w1_ref.shape[2]
    N = H * W
    eps = 1e-5  # GroupNorm eps (f32 path)

    # ---- time-embedding MLP: SiLU -> Linear -> (scale, shift) ----
    t = t_ref[0]                                                 # (1, T) f32
    emb = jnp.dot(_silu(t), wm_ref[...],
                  preferred_element_type=jnp.float32) + bm_ref[...]   # (1, 2*Cout)
    scale = emb[:, :Cout]
    shift = emb[:, Cout:]

    def conv3x3(xp_f32, w_ref, b_ref, cin, cout):
        # Weights are pre-standardized in the wrapper (batch-invariant) and bf16.
        # TODO(synk): for large channel counts, switch to im2col / channel tiles
        # that are multiples of the MXU width instead of 9 tiny per-tap matmuls.
        acc = jnp.zeros((N, cout), jnp.float32)
        for ky in range(3):
            for kx in range(3):
                xs = xp_f32[ky:ky + H, kx:kx + W, :].reshape(N, cin)
                acc = acc + jnp.dot(xs.astype(jnp.bfloat16), w_ref[ky * 3 + kx],
                                    preferred_element_type=jnp.float32)
        return acc + b_ref[...]

    def group_norm(h, gm_ref, gmt_ref, gw_ref, gb_ref):
        # h: (N, C) f32; gm: (C, G) one-hot group matrix; gmt: (G, C)
        C = h.shape[1]
        G = gm_ref.shape[1]
        cnt = float(N * (C // G))
        s = jnp.sum(h, axis=0, keepdims=True)                    # (1, C)
        ss = jnp.sum(h * h, axis=0, keepdims=True)               # (1, C)
        gmean = jnp.dot(s, gm_ref[...], preferred_element_type=jnp.float32) / cnt
        gmsq = jnp.dot(ss, gm_ref[...], preferred_element_type=jnp.float32) / cnt
        mean_c = jnp.dot(gmean, gmt_ref[...], preferred_element_type=jnp.float32)
        msq_c = jnp.dot(gmsq, gmt_ref[...], preferred_element_type=jnp.float32)
        var_c = jnp.maximum(msq_c - mean_c * mean_c, 0.0)        # clamp cancellation
        hn = (h - mean_c) * lax.rsqrt(var_c + eps)
        return hn * gw_ref[...] + gb_ref[...]

    # Input block is DMA'd as bf16; upcast once so the shifted-window slicing below
    # operates on an f32 value (same slicing pattern as the validated original).
    xp = xpad_ref[0].astype(jnp.float32)                         # (H+2, W+2, Cin)

    # ---- block1: WS-conv3x3 -> GroupNorm -> (scale+1)*x + shift -> SiLU ----
    h1 = conv3x3(xp, w1_ref, b1_ref, Cin, Ch)                    # (N, Ch)
    h1 = group_norm(h1, gm1_ref, gm1t_ref, g1w_ref, g1b_ref)
    h1 = h1 * (scale + 1.0) + shift                              # requires Ch == Cout
    h1 = _silu(h1)

    # Stash block1 output in the padded scratch; only the 1-pixel frame must be
    # zero, so re-zero just the border strips instead of the whole buffer.
    hpad_ref[0:1, :, :] = jnp.zeros((1, W + 2, Ch), jnp.float32)
    hpad_ref[H + 1:H + 2, :, :] = jnp.zeros((1, W + 2, Ch), jnp.float32)
    hpad_ref[:, 0:1, :] = jnp.zeros((H + 2, 1, Ch), jnp.float32)
    hpad_ref[:, W + 1:W + 2, :] = jnp.zeros((H + 2, 1, Ch), jnp.float32)
    hpad_ref[1:H + 1, 1:W + 1, :] = h1.reshape(H, W, Ch)

    # ---- block2: WS-conv3x3 -> GroupNorm -> SiLU ----
    hp = hpad_ref[...]
    h2 = conv3x3(hp, w2_ref, b2_ref, Ch, Cout)                   # (N, Cout)
    h2 = group_norm(h2, gm2_ref, gm2t_ref, g2w_ref, g2b_ref)
    h2 = _silu(h2)

    # ---- residual branch ----
    xc = xp[1:H + 1, 1:W + 1, :].reshape(N, Cin)
    if use_res_conv:
        res = jnp.dot(xc.astype(jnp.bfloat16), wr_ref[...],
                      preferred_element_type=jnp.float32) + br_ref[...]
    else:
        res = xc                                                 # identity (Cin == Cout)

    out_ref[...] = (h2 + res).reshape(1, H, W, Cout)


def make_params(key, in_channels, out_channels, time_emb_dim, res_hidden=None):
    if not res_hidden:
        res_hidden = out_channels
    ks = jax.random.split(key, 12)

    def init(k, shape, scale=0.2):
        return jax.random.normal(k, shape, jnp.float32) * scale

    params = dict(
        w1=init(ks[0], (res_hidden, in_channels, 3, 3)),
        b1=init(ks[1], (res_hidden,)),
        gn1_w=1.0 + init(ks[2], (res_hidden,)),
        gn1_b=init(ks[3], (res_hidden,)),
        w2=init(ks[4], (out_channels, res_hidden, 3, 3)),
        b2=init(ks[5], (out_channels,)),
        gn2_w=1.0 + init(ks[6], (out_channels,)),
        gn2_b=init(ks[7], (out_channels,)),
        wm=init(ks[8], (out_channels * 2, time_emb_dim)),
        bm=init(ks[9], (out_channels * 2,)),
    )
    if in_channels != out_channels:
        params['wr'] = init(ks[10], (out_channels, in_channels, 1, 1))
        params['br'] = init(ks[11], (out_channels,))
    # in_channels == out_channels -> nn.Identity(): no residual-conv params at all.
    return params


def resnet_block_forward(x_nchw, time_emb, params, groups):
    B, Cin, H, W = x_nchw.shape
    Ch = params['w1'].shape[0]
    Cout = params['w2'].shape[0]
    T = params['wm'].shape[1]

    # PyTorch broadcasts the (Cout-wide) time-emb scale/shift onto block1's
    # (res_hidden-wide) output; that only works when res_hidden == out_channels.
    assert Ch == Cout, "time-emb scale/shift requires res_hidden == out_channels"
    assert Ch % groups == 0 and Cout % groups == 0

    use_res_conv = 'wr' in params

    x = jnp.transpose(x_nchw, (0, 2, 3, 1)).astype(jnp.float32)       # NHWC
    xpad = jnp.pad(x, ((0, 0), (1, 1), (1, 1), (0, 0))).astype(jnp.bfloat16)
    t3 = time_emb.astype(jnp.float32).reshape(B, 1, T)

    def ws(w):  # weight standardization, hoisted out of the kernel (f32, eps=1e-5)
        mean = jnp.mean(w, axis=(1, 2, 3), keepdims=True)
        var = jnp.mean((w - mean) ** 2, axis=(1, 2, 3), keepdims=True)
        return (w - mean) * lax.rsqrt(var + 1e-5)

    def conv_w_to_taps(w):   # (Co, Ci, 3, 3) -> (9, Ci, Co), taps ordered (ky, kx)
        co, ci, _, _ = w.shape
        return jnp.transpose(w, (2, 3, 1, 0)).reshape(9, ci, co)

    def gmat(C, G):
        c = jnp.arange(C)
        return ((c[:, None] // (C // G)) == jnp.arange(G)[None, :]).astype(jnp.float32)

    row = lambda v: v.reshape(1, -1).astype(jnp.float32)

    w1t = conv_w_to_taps(ws(params['w1'])).astype(jnp.bfloat16)
    w2t = conv_w_to_taps(ws(params['w2'])).astype(jnp.bfloat16)
    wmm = jnp.transpose(params['wm'], (1, 0))                          # (T, 2*Cout)
    gm1 = gmat(Ch, groups)
    gm2 = gmat(Cout, groups)

    if use_res_conv:
        wrm = jnp.transpose(params['wr'][:, :, 0, 0], (1, 0)).astype(jnp.bfloat16)
        brr = row(params['br'])
    else:  # identity residual: tiny unused placeholders (no weight traffic)
        wrm = jnp.zeros((1, 1), jnp.bfloat16)
        brr = jnp.zeros((1, 1), jnp.float32)

    args = (
        xpad, t3,
        w1t, row(params['b1']), row(params['gn1_w']), row(params['gn1_b']),
        gm1, gm1.T,
        w2t, row(params['b2']), row(params['gn2_w']), row(params['gn2_b']),
        gm2, gm2.T,
        wmm, row(params['bm']),
        wrm, brr,
    )

    def full_spec(a):
        nd = a.ndim
        return pl.BlockSpec(a.shape, lambda b, _nd=nd: (0,) * _nd)

    in_specs = [
        pl.BlockSpec((1, H + 2, W + 2, Cin), lambda b: (b, 0, 0, 0)),
        pl.BlockSpec((1, 1, T), lambda b: (b, 0, 0)),
    ] + [full_spec(a) for a in args[2:]]

    kernel = functools.partial(_resnet_block_kernel, use_res_conv=use_res_conv)

    out_nhwc = pl.pallas_call(
        kernel,
        out_shape=jax.ShapeDtypeStruct((B, H, W, Cout), jnp.float32),
        grid_spec=pltpu.PrefetchScalarGridSpec(
            num_scalar_prefetch=0,
            grid=(B,),
            in_specs=in_specs,
            out_specs=pl.BlockSpec((1, H, W, Cout), lambda b: (b, 0, 0, 0)),
            scratch_shapes=[pltpu.VMEM((H + 2, W + 2, Ch), jnp.float32)],
        ),
        compiler_params=pltpu.CompilerParams(
            dimension_semantics=("parallel",),     # batch elements are independent
            vmem_limit_bytes=48 * 1024 * 1024,
        ),
    )(*args)
    return jnp.transpose(out_nhwc, (0, 3, 1, 2))                      # back to NCHW


def reference_forward(x_nchw, time_emb, params, groups):
    """Pure-JAX f32 reference with PyTorch semantics (sanity check)."""
    x = jnp.transpose(x_nchw, (0, 2, 3, 1)).astype(jnp.float32)
    silu = lambda z: z * jax.nn.sigmoid(z)

    def ws_conv(h, w, b):
        mean = jnp.mean(w, axis=(1, 2, 3), keepdims=True)
        var = jnp.mean((w - mean) ** 2, axis=(1, 2, 3), keepdims=True)
        wn = (w - mean) / jnp.sqrt(var + 1e-5)
        w_hwio = jnp.transpose(wn, (2, 3, 1, 0))
        out = lax.conv_general_dilated(h, w_hwio, (1, 1), 'SAME',
                                       dimension_numbers=('NHWC', 'HWIO', 'NHWC'))
        return out + b

    def gn(h, gw, gb):
        B, H, W, C = h.shape
        hg = h.reshape(B, H, W, groups, C // groups)
        m = jnp.mean(hg, axis=(1, 2, 4), keepdims=True)
        v = jnp.mean((hg - m) ** 2, axis=(1, 2, 4), keepdims=True)
        hn = ((hg - m) / jnp.sqrt(v + 1e-5)).reshape(B, H, W, C)
        return hn * gw + gb

    Cout = params['w2'].shape[0]
    emb = silu(time_emb) @ params['wm'].T + params['bm']
    scale = emb[:, :Cout][:, None, None, :]
    shift = emb[:, Cout:][:, None, None, :]

    h = ws_conv(x, params['w1'], params['b1'])
    h = gn(h, params['gn1_w'], params['gn1_b'])
    h = h * (scale + 1.0) + shift
    h = silu(h)
    h = ws_conv(h, params['w2'], params['b2'])
    h = gn(h, params['gn2_w'], params['gn2_b'])
    h = silu(h)

    if 'wr' in params:
        wr = jnp.transpose(params['wr'][:, :, 0, 0], (1, 0))
        res = x @ wr + params['br']
    else:
        res = x
    return jnp.transpose(h + res, (0, 3, 1, 2))


if __name__ == "__main__":
    B, Cin, Cout, H, W, T, G = 2, 4, 8, 16, 16, 16, 4  # groups=4 divides out_channels=8
    key = jax.random.PRNGKey(0)
    kx, kt, kp = jax.random.split(key, 3)
    x = jax.random.normal(kx, (B, Cin, H, W), jnp.float32)
    time_emb = jax.random.normal(kt, (B, T), jnp.float32)
    params = make_params(kp, Cin, Cout, T)

    out = resnet_block_forward(x, time_emb, params, G)
    out = jax.block_until_ready(out)
    assert out.shape == (B, Cout, H, W)

    ref = jax.block_until_ready(reference_forward(x, time_emb, params, G))
    # bf16 MXU operands (f32 accumulation) -> slightly looser tolerance than pure f32
    np.testing.assert_allclose(np.asarray(out), np.asarray(ref), rtol=5e-2, atol=5e-2)
    print("KERNEL_OK")
</pallas_src>

<mosaic_0001>
module attributes {stable_mosaic.version = 11 : i64} {
  func.func @_resnet_block_kernel(%arg0: i32, %arg1: memref<1x18x18x4xbf16, #tpu.memory_space<vmem>>, %arg2: memref<1x1x16xf32, #tpu.memory_space<vmem>>, %arg3: memref<9x4x8xbf16, #tpu.memory_space<vmem>>, %arg4: memref<1x8xf32, #tpu.memory_space<vmem>>, %arg5: memref<1x8xf32, #tpu.memory_space<vmem>>, %arg6: memref<1x8xf32, #tpu.memory_space<vmem>>, %arg7: memref<8x4xf32, #tpu.memory_space<vmem>>, %arg8: memref<4x8xf32, #tpu.memory_space<vmem>>, %arg9: memref<9x8x8xbf16, #tpu.memory_space<vmem>>, %arg10: memref<1x8xf32, #tpu.memory_space<vmem>>, %arg11: memref<1x8xf32, #tpu.memory_space<vmem>>, %arg12: memref<1x8xf32, #tpu.memory_space<vmem>>, %arg13: memref<8x4xf32, #tpu.memory_space<vmem>>, %arg14: memref<4x8xf32, #tpu.memory_space<vmem>>, %arg15: memref<16x16xf32, #tpu.memory_space<vmem>>, %arg16: memref<1x16xf32, #tpu.memory_space<vmem>>, %arg17: memref<4x8xbf16, #tpu.memory_space<vmem>>, %arg18: memref<1x8xf32, #tpu.memory_space<vmem>>, %arg19: memref<1x16x16x8xf32, #tpu.memory_space<vmem>>, %arg20: memref<18x18x8xf32, #tpu.memory_space<vmem>>) attributes {dimension_semantics = [#tpu.dimension_semantics<parallel>], iteration_bounds = array<i64: 2>, scalar_prefetch = 0 : i64, scratch_operands = 1 : i64, tpu.core_type = #tpu.core_type<tc>, window_params = [{transform_indices = @transform_0, window_bounds = array<i64: 1, 18, 18, 4>}, {transform_indices = @transform_1, window_bounds = array<i64: 1, 1, 16>}, {pipeline_mode = #tpu.pipeline_mode<synchronous>, transform_indices = @transform_2, window_bounds = array<i64: 9, 4, 8>}, {pipeline_mode = #tpu.pipeline_mode<synchronous>, transform_indices = @transform_3, window_bounds = array<i64: 1, 8>}, {pipeline_mode = #tpu.pipeline_mode<synchronous>, transform_indices = @transform_4, window_bounds = array<i64: 1, 8>}, {pipeline_mode = #tpu.pipeline_mode<synchronous>, transform_indices = @transform_5, window_bounds = array<i64: 1, 8>}, {pipeline_mode = #tpu.pipeline_mode<synchronous>, transform_indices = @transform_6, window_bounds = array<i64: 8, 4>}, {pipeline_mode = #tpu.pipeline_mode<synchronous>, transform_indices = @transform_7, window_bounds = array<i64: 4, 8>}, {pipeline_mode = #tpu.pipeline_mode<synchronous>, transform_indices = @transform_8, window_bounds = array<i64: 9, 8, 8>}, {pipeline_mode = #tpu.pipeline_mode<synchronous>, transform_indices = @transform_9, window_bounds = array<i64: 1, 8>}, {pipeline_mode = #tpu.pipeline_mode<synchronous>, transform_indices = @transform_10, window_bounds = array<i64: 1, 8>}, {pipeline_mode = #tpu.pipeline_mode<synchronous>, transform_indices = @transform_11, window_bounds = array<i64: 1, 8>}, {pipeline_mode = #tpu.pipeline_mode<synchronous>, transform_indices = @transform_12, window_bounds = array<i64: 8, 4>}, {pipeline_mode = #tpu.pipeline_mode<synchronous>, transform_indices = @transform_13, window_bounds = array<i64: 4, 8>}, {pipeline_mode = #tpu.pipeline_mode<synchronous>, transform_indices = @transform_14, window_bounds = array<i64: 16, 16>}, {pipeline_mode = #tpu.pipeline_mode<synchronous>, transform_indices = @transform_15, window_bounds = array<i64: 1, 16>}, {pipeline_mode = #tpu.pipeline_mode<synchronous>, transform_indices = @transform_16, window_bounds = array<i64: 4, 8>}, {pipeline_mode = #tpu.pipeline_mode<synchronous>, transform_indices = @transform_17, window_bounds = array<i64: 1, 8>}, {transform_indices = @transform_18, window_bounds = array<i64: 1, 16, 16, 8>}]} {
    %c0 = arith.constant 0 : index
    %c0_0 = arith.constant 0 : index
    %c0_1 = arith.constant 0 : index
    %0 = vector.load %arg2[%c0, %c0_0, %c0_1] : memref<1x1x16xf32, #tpu.memory_space<vmem>>, vector<1x1x16xf32>
    %1 = vector.shape_cast %0 : vector<1x1x16xf32> to vector<1x16xf32>
    %2 = arith.negf %1 : vector<1x16xf32>
    %3 = math.exp %2 : vector<1x16xf32>
    %cst = arith.constant 1.000000e+00 : f32
    %4 = vector.broadcast %cst : f32 to vector<1x16xf32>
    %5 = arith.addf %4, %3 : vector<1x16xf32>
    %6 = arith.divf %4, %5 : vector<1x16xf32>
    %7 = arith.mulf %1, %6 : vector<1x16xf32>
    %c0_2 = arith.constant 0 : index
    %c0_3 = arith.constant 0 : index
    %8 = vector.load %arg15[%c0_2, %c0_3] : memref<16x16xf32, #tpu.memory_space<vmem>>, vector<16x16xf32>
    %cst_4 = arith.constant dense<0.000000e+00> : vector<1x16xf32>
    %9 = tpu.matmul %7, %8, %cst_4 {dimension_numbers = #tpu.dot_dimension_numbers<[1], [0], [0], [1], [0, 0, 1, 1], [], []>} : vector<1x16xf32>, vector<16x16xf32>, vector<1x16xf32> -> vector<1x16xf32>
    %c0_5 = arith.constant 0 : index
    %c0_6 = arith.constant 0 : index
    %10 = vector.load %arg16[%c0_5, %c0_6] : memref<1x16xf32, #tpu.memory_space<vmem>>, vector<1x16xf32>
    %11 = arith.addf %9, %10 : vector<1x16xf32>
    %12 = vector.extract_strided_slice %11 {offsets = [0, 0], sizes = [1, 8], strides = [1, 1]} : vector<1x16xf32> to vector<1x8xf32>
    %13 = vector.extract_strided_slice %11 {offsets = [0, 8], sizes = [1, 8], strides = [1, 1]} : vector<1x16xf32> to vector<1x8xf32>
    %c0_7 = arith.constant 0 : index
    %c0_8 = arith.constant 0 : index
    %c0_9 = arith.constant 0 : index
    %c0_10 = arith.constant 0 : index
    %14 = vector.load %arg1[%c0_7, %c0_8, %c0_9, %c0_10] : memref<1x18x18x4xbf16, #tpu.memory_space<vmem>>, vector<1x18x18x4xbf16>
    %15 = vector.shape_cast %14 : vector<1x18x18x4xbf16> to vector<18x18x4xbf16>
    %16 = arith.extf %15 : vector<18x18x4xbf16> to vector<18x18x4xf32>
    %cst_11 = arith.constant 0.000000e+00 : f32
    %17 = vector.broadcast %cst_11 : f32 to vector<256x8xf32>
    %18 = vector.extract_strided_slice %16 {offsets = [0, 0, 0], sizes = [16, 16, 4], strides = [1, 1, 1]} : vector<18x18x4xf32> to vector<16x16x4xf32>
    %19 = vector.shape_cast %18 : vector<16x16x4xf32> to vector<256x4xf32>
    %20 = arith.truncf %19 : vector<256x4xf32> to vector<256x4xbf16>
    %c0_12 = arith.constant 0 : index
    %c0_13 = arith.constant 0 : index
    %c0_14 = arith.constant 0 : index
    %21 = vector.load %arg3[%c0_12, %c0_13, %c0_14] : memref<9x4x8xbf16, #tpu.memory_space<vmem>>, vector<1x4x8xbf16>
    %22 = vector.shape_cast %21 : vector<1x4x8xbf16> to vector<4x8xbf16>
    %cst_15 = arith.constant dense<0.000000e+00> : vector<256x8xf32>
    %23 = tpu.matmul %20, %22, %cst_15 {dimension_numbers = #tpu.dot_dimension_numbers<[1], [0], [0], [1], [0, 0, 1, 1], [], []>} : vector<256x4xbf16>, vector<4x8xbf16>, vector<256x8xf32> -> vector<256x8xf32>
    %24 = arith.addf %17, %23 : vector<256x8xf32>
    %25 = vector.extract_strided_slice %16 {offsets = [0, 1, 0], sizes = [16, 16, 4], strides = [1, 1, 1]} : vector<18x18x4xf32> to vector<16x16x4xf32>
    %26 = vector.shape_cast %25 : vector<16x16x4xf32> to vector<256x4xf32>
    %27 = arith.truncf %26 : vector<256x4xf32> to vector<256x4xbf16>
    %c1 = arith.constant 1 : index
    %c0_16 = arith.constant 0 : index
    %c0_17 = arith.constant 0 : index
    %28 = vector.load %arg3[%c1, %c0_16, %c0_17] : memref<9x4x8xbf16, #tpu.memory_space<vmem>>, vector<1x4x8xbf16>
    %29 = vector.shape_cast %28 : vector<1x4x8xbf16> to vector<4x8xbf16>
    %cst_18 = arith.constant dense<0.000000e+00> : vector<256x8xf32>
    %30 = tpu.matmul %27, %29, %cst_18 {dimension_numbers = #tpu.dot_dimension_numbers<[1], [0], [0], [1], [0, 0, 1, 1], [], []>} : vector<256x4xbf16>, vector<4x8xbf16>, vector<256x8xf32> -> vector<256x8xf32>
    %31 = arith.addf %24, %30 : vector<256x8xf32>
    %32 = vector.extract_strided_slice %16 {offsets = [0, 2, 0], sizes = [16, 16, 4], strides = [1, 1, 1]} : vector<18x18x4xf32> to vector<16x16x4xf32>
    %33 = vector.shape_cast %32 : vector<16x16x4xf32> to vector<256x4xf32>
    %34 = arith.truncf %33 : vector<256x4xf32> to vector<256x4xbf16>
    %c2 = arith.constant 2 : index
    %c0_19 = arith.constant 0 : index
    %c0_20 = arith.constant 0 : index
    %35 = vector.load %arg3[%c2, %c0_19, %c0_20] : memref<9x4x8xbf16, #tpu.memory_space<vmem>>, vector<1x4x8xbf16>
    %36 = vector.shape_cast %35 : vector<1x4x8xbf16> to vector<4x8xbf16>
    %cst_21 = arith.constant dense<0.000000e+00> : vector<256x8xf32>
    %37 = tpu.matmul %34, %36, %cst_21 {dimension_numbers = #tpu.dot_dimension_numbers<[1], [0], [0], [1], [0, 0, 1, 1], [], []>} : vector<256x4xbf16>, vector<4x8xbf16>, vector<256x8xf32> -> vector<256x8xf32>
    %38 = arith.addf %31, %37 : vector<256x8xf32>
    %39 = vector.extract_strided_slice %16 {offsets = [1, 0, 0], sizes = [16, 16, 4], strides = [1, 1, 1]} : vector<18x18x4xf32> to vector<16x16x4xf32>
    %40 = vector.shape_cast %39 : vector<16x16x4xf32> to vector<256x4xf32>
    %41 = arith.truncf %40 : vector<256x4xf32> to vector<256x4xbf16>
    %c3 = arith.constant 3 : index
    %c0_22 = arith.constant 0 : index
    %c0_23 = arith.constant 0 : index
    %42 = vector.load %arg3[%c3, %c0_22, %c0_23] : memref<9x4x8xbf16, #tpu.memory_space<vmem>>, vector<1x4x8xbf16>
    %43 = vector.shape_cast %42 : vector<1x4x8xbf16> to vector<4x8xbf16>
    %cst_24 = arith.constant dense<0.000000e+00> : vector<256x8xf32>
    %44 = tpu.matmul %41, %43, %cst_24 {dimension_numbers = #tpu.dot_dimension_numbers<[1], [0], [0], [1], [0, 0, 1, 1], [], []>} : vector<256x4xbf16>, vector<4x8xbf16>, vector<256x8xf32> -> vector<256x8xf32>
    %45 = arith.addf %38, %44 : vector<256x8xf32>
    %46 = vector.extract_strided_slice %16 {offsets = [1, 1, 0], sizes = [16, 16, 4], strides = [1, 1, 1]} : vector<18x18x4xf32> to vector<16x16x4xf32>
    %47 = vector.shape_cast %46 : vector<16x16x4xf32> to vector<256x4xf32>
    %48 = arith.truncf %47 : vector<256x4xf32> to vector<256x4xbf16>
    %c4 = arith.constant 4 : index
    %c0_25 = arith.constant 0 : index
    %c0_26 = arith.constant 0 : index
    %49 = vector.load %arg3[%c4, %c0_25, %c0_26] : memref<9x4x8xbf16, #tpu.memory_space<vmem>>, vector<1x4x8xbf16>
    %50 = vector.shape_cast %49 : vector<1x4x8xbf16> to vector<4x8xbf16>
    %cst_27 = arith.constant dense<0.000000e+00> : vector<256x8xf32>
    %51 = tpu.matmul %48, %50, %cst_27 {dimension_numbers = #tpu.dot_dimension_numbers<[1], [0], [0], [1], [0, 0, 1, 1], [], []>} : vector<256x4xbf16>, vector<4x8xbf16>, vector<256x8xf32> -> vector<256x8xf32>
    %52 = arith.addf %45, %51 : vector<256x8xf32>
    %53 = vector.extract_strided_slice %16 {offsets = [1, 2, 0], sizes = [16, 16, 4], strides = [1, 1, 1]} : vector<18x18x4xf32> to vector<16x16x4xf32>
    %54 = vector.shape_cast %53 : vector<16x16x4xf32> to vector<256x4xf32>
    %55 = arith.truncf %54 : vector<256x4xf32> to vector<256x4xbf16>
    %c5 = arith.constant 5 : index
    %c0_28 = arith.constant 0 : index
    %c0_29 = arith.constant 0 : index
    %56 = vector.load %arg3[%c5, %c0_28, %c0_29] : memref<9x4x8xbf16, #tpu.memory_space<vmem>>, vector<1x4x8xbf16>
    %57 = vector.shape_cast %56 : vector<1x4x8xbf16> to vector<4x8xbf16>
    %cst_30 = arith.constant dense<0.000000e+00> : vector<256x8xf32>
    %58 = tpu.matmul %55, %57, %cst_30 {dimension_numbers = #tpu.dot_dimension_numbers<[1], [0], [0], [1], [0, 0, 1, 1], [], []>} : vector<256x4xbf16>, vector<4x8xbf16>, vector<256x8xf32> -> vector<256x8xf32>
    %59 = arith.addf %52, %58 : vector<256x8xf32>
    %60 = vector.extract_strided_slice %16 {offsets = [2, 0, 0], sizes = [16, 16, 4], strides = [1, 1, 1]} : vector<18x18x4xf32> to vector<16x16x4xf32>
    %61 = vector.shape_cast %60 : vector<16x16x4xf32> to vector<256x4xf32>
    %62 = arith.truncf %61 : vector<256x4xf32> to vector<256x4xbf16>
    %c6 = arith.constant 6 : index
    %c0_31 = arith.constant 0 : index
    %c0_32 = arith.constant 0 : index
    %63 = vector.load %arg3[%c6, %c0_31, %c0_32] : memref<9x4x8xbf16, #tpu.memory_space<vmem>>, vector<1x4x8xbf16>
    %64 = vector.shape_cast %63 : vector<1x4x8xbf16> to vector<4x8xbf16>
    %cst_33 = arith.constant dense<0.000000e+00> : vector<256x8xf32>
    %65 = tpu.matmul %62, %64, %cst_33 {dimension_numbers = #tpu.dot_dimension_numbers<[1], [0], [0], [1], [0, 0, 1, 1], [], []>} : vector<256x4xbf16>, vector<4x8xbf16>, vector<256x8xf32> -> vector<256x8xf32>
    %66 = arith.addf %59, %65 : vector<256x8xf32>
    %67 = vector.extract_strided_slice %16 {offsets = [2, 1, 0], sizes = [16, 16, 4], strides = [1, 1, 1]} : vector<18x18x4xf32> to vector<16x16x4xf32>
    %68 = vector.shape_cast %67 : vector<16x16x4xf32> to vector<256x4xf32>
    %69 = arith.truncf %68 : vector<256x4xf32> to vector<256x4xbf16>
    %c7 = arith.constant 7 : index
    %c0_34 = arith.constant 0 : index
    %c0_35 = arith.constant 0 : index
    %70 = vector.load %arg3[%c7, %c0_34, %c0_35] : memref<9x4x8xbf16, #tpu.memory_space<vmem>>, vector<1x4x8xbf16>
    %71 = vector.shape_cast %70 : vector<1x4x8xbf16> to vector<4x8xbf16>
    %cst_36 = arith.constant dense<0.000000e+00> : vector<256x8xf32>
    %72 = tpu.matmul %69, %71, %cst_36 {dimension_numbers = #tpu.dot_dimension_numbers<[1], [0], [0], [1], [0, 0, 1, 1], [], []>} : vector<256x4xbf16>, vector<4x8xbf16>, vector<256x8xf32> -> vector<256x8xf32>
    %73 = arith.addf %66, %72 : vector<256x8xf32>
    %74 = vector.extract_strided_slice %16 {offsets = [2, 2, 0], sizes = [16, 16, 4], strides = [1, 1, 1]} : vector<18x18x4xf32> to vector<16x16x4xf32>
    %75 = vector.shape_cast %74 : vector<16x16x4xf32> to vector<256x4xf32>
    %76 = arith.truncf %75 : vector<256x4xf32> to vector<256x4xbf16>
    %c8 = arith.constant 8 : index
    %c0_37 = arith.constant 0 : index
    %c0_38 = arith.constant 0 : index
    %77 = vector.load %arg3[%c8, %c0_37, %c0_38] : memref<9x4x8xbf16, #tpu.memory_space<vmem>>, vector<1x4x8xbf16>
    %78 = vector.shape_cast %77 : vector<1x4x8xbf16> to vector<4x8xbf16>
    %cst_39 = arith.constant dense<0.000000e+00> : vector<256x8xf32>
    %79 = tpu.matmul %76, %78, %cst_39 {dimension_numbers = #tpu.dot_dimension_numbers<[1], [0], [0], [1], [0, 0, 1, 1], [], []>} : vector<256x4xbf16>, vector<4x8xbf16>, vector<256x8xf32> -> vector<256x8xf32>
    %80 = arith.addf %73, %79 : vector<256x8xf32>
    %c0_40 = arith.constant 0 : index
    %c0_41 = arith.constant 0 : index
    %81 = vector.load %arg4[%c0_40, %c0_41] : memref<1x8xf32, #tpu.memory_space<vmem>>, vector<1x8xf32>
    %82 = vector.broadcast %81 : vector<1x8xf32> to vector<256x8xf32>
    %83 = arith.addf %80, %82 : vector<256x8xf32>
    %cst_42 = arith.constant dense<0.000000e+00> : vector<8xf32>
    %84 = vector.multi_reduction <add>, %83, %cst_42 [0] : vector<256x8xf32> to vector<8xf32>
    %85 = vector.shape_cast %84 : vector<8xf32> to vector<1x8xf32>
    %86 = arith.mulf %83, %83 : vector<256x8xf32>
    %cst_43 = arith.constant dense<0.000000e+00> : vector<8xf32>
    %87 = vector.multi_reduction <add>, %86, %cst_43 [0] : vector<256x8xf32> to vector<8xf32>
    %88 = vector.shape_cast %87 : vector<8xf32> to vector<1x8xf32>
    %c0_44 = arith.constant 0 : index
    %c0_45 = arith.constant 0 : index
    %89 = vector.load %arg7[%c0_44, %c0_45] : memref<8x4xf32, #tpu.memory_space<vmem>>, vector<8x4xf32>
    %cst_46 = arith.constant dense<0.000000e+00> : vector<1x4xf32>
    %90 = tpu.matmul %85, %89, %cst_46 {dimension_numbers = #tpu.dot_dimension_numbers<[1], [0], [0], [1], [0, 0, 1, 1], [], []>} : vector<1x8xf32>, vector<8x4xf32>, vector<1x4xf32> -> vector<1x4xf32>
    %cst_47 = arith.constant 5.120000e+02 : f32
    %91 = vector.broadcast %cst_47 : f32 to vector<1x4xf32>
    %92 = arith.divf %90, %91 : vector<1x4xf32>
    %c0_48 = arith.constant 0 : index
    %c0_49 = arith.constant 0 : index
    %93 = vector.load %arg7[%c0_48, %c0_49] : memref<8x4xf32, #tpu.memory_space<vmem>>, vector<8x4xf32>
    %cst_50 = arith.constant dense<0.000000e+00> : vector<1x4xf32>
    %94 = tpu.matmul %88, %93, %cst_50 {dimension_numbers = #tpu.dot_dimension_numbers<[1], [0], [0], [1], [0, 0, 1, 1], [], []>} : vector<1x8xf32>, vector<8x4xf32>, vector<1x4xf32> -> vector<1x4xf32>
    %cst_51 = arith.constant 5.120000e+02 : f32
    %95 = vector.broadcast %cst_51 : f32 to vector<1x4xf32>
    %96 = arith.divf %94, %95 : vector<1x4xf32>
    %c0_52 = arith.constant 0 : index
    %c0_53 = arith.constant 0 : index
    %97 = vector.load %arg8[%c0_52, %c0_53] : memref<4x8xf32, #tpu.memory_space<vmem>>, vector<4x8xf32>
    %cst_54 = arith.constant dense<0.000000e+00> : vector<1x8xf32>
    %98 = tpu.matmul %92, %97, %cst_54 {dimension_numbers = #tpu.dot_dimension_numbers<[1], [0], [0], [1], [0, 0, 1, 1], [], []>} : vector<1x4xf32>, vector<4x8xf32>, vector<1x8xf32> -> vector<1x8xf32>
    %c0_55 = arith.constant 0 : index
    %c0_56 = arith.constant 0 : index
    %99 = vector.load %arg8[%c0_55, %c0_56] : memref<4x8xf32, #tpu.memory_space<vmem>>, vector<4x8xf32>
    %cst_57 = arith.constant dense<0.000000e+00> : vector<1x8xf32>
    %100 = tpu.matmul %96, %99, %cst_57 {dimension_numbers = #tpu.dot_dimension_numbers<[1], [0], [0], [1], [0, 0, 1, 1], [], []>} : vector<1x4xf32>, vector<4x8xf32>, vector<1x8xf32> -> vector<1x8xf32>
    %101 = arith.mulf %98, %98 : vector<1x8xf32>
    %102 = arith.subf %100, %101 : vector<1x8xf32>
    %cst_58 = arith.constant 0.000000e+00 : f32
    %103 = vector.broadcast %cst_58 : f32 to vector<1x8xf32>
    %104 = arith.maximumf %102, %103 : vector<1x8xf32>
    %105 = vector.broadcast %98 : vector<1x8xf32> to vector<256x8xf32>
    %106 = arith.subf %83, %105 : vector<256x8xf32>
    %cst_59 = arith.constant 9.99999974E-6 : f32
    %107 = vector.broadcast %cst_59 : f32 to vector<1x8xf32>
    %108 = arith.addf %104, %107 : vector<1x8xf32>
    %109 = math.rsqrt %108 : vector<1x8xf32>
    %110 = vector.broadcast %109 : vector<1x8xf32> to vector<256x8xf32>
    %111 = arith.mulf %106, %110 : vector<256x8xf32>
    %c0_60 = arith.constant 0 : index
    %c0_61 = arith.constant 0 : index
    %112 = vector.load %arg5[%c0_60, %c0_61] : memref<1x8xf32, #tpu.memory_space<vmem>>, vector<1x8xf32>
    %113 = vector.broadcast %112 : vector<1x8xf32> to vector<256x8xf32>
    %114 = arith.mulf %111, %113 : vector<256x8xf32>
    %c0_62 = arith.constant 0 : index
    %c0_63 = arith.constant 0 : index
    %115 = vector.load %arg6[%c0_62, %c0_63] : memref<1x8xf32, #tpu.memory_space<vmem>>, vector<1x8xf32>
    %116 = vector.broadcast %115 : vector<1x8xf32> to vector<256x8xf32>
    %117 = arith.addf %114, %116 : vector<256x8xf32>
    %cst_64 = arith.constant 1.000000e+00 : f32
    %118 = vector.broadcast %cst_64 : f32 to vector<1x8xf32>
    %119 = arith.addf %12, %118 : vector<1x8xf32>
    %120 = vector.broadcast %119 : vector<1x8xf32> to vector<256x8xf32>
    %121 = arith.mulf %117, %120 : vector<256x8xf32>
    %122 = vector.broadcast %13 : vector<1x8xf32> to vector<256x8xf32>
    %123 = arith.addf %121, %122 : vector<256x8xf32>
    %124 = arith.negf %123 : vector<256x8xf32>
    %125 = math.exp %124 : vector<256x8xf32>
    %cst_65 = arith.constant 1.000000e+00 : f32
    %126 = vector.broadcast %cst_65 : f32 to vector<256x8xf32>
    %127 = arith.addf %126, %125 : vector<256x8xf32>
    %128 = arith.divf %126, %127 : vector<256x8xf32>
    %129 = arith.mulf %123, %128 : vector<256x8xf32>
    %cst_66 = arith.constant 0.000000e+00 : f32
    %130 = vector.broadcast %cst_66 : f32 to vector<1x18x8xf32>
    %c0_67 = arith.constant 0 : index
    %c0_68 = arith.constant 0 : index
    %c0_69 = arith.constant 0 : index
    %131 = vector.load %arg20[%c0_67, %c0_68, %c0_69] : memref<18x18x8xf32, #tpu.memory_space<vmem>>, vector<1x18x8xf32>
    tpu.vector_store %arg20[%c0_67, %c0_68, %c0_69], %130 {strides = array<i32>} : memref<18x18x8xf32, #tpu.memory_space<vmem>>, vector<1x18x8xf32>,
    %cst_70 = arith.constant 0.000000e+00 : f32
    %132 = vector.broadcast %cst_70 : f32 to vector<1x18x8xf32>
    %c17 = arith.constant 17 : index
    %c0_71 = arith.constant 0 : index
    %c0_72 = arith.constant 0 : index
    %133 = vector.load %arg20[%c17, %c0_71, %c0_72] : memref<18x18x8xf32, #tpu.memory_space<vmem>>, vector<1x18x8xf32>
    tpu.vector_store %arg20[%c17, %c0_71, %c0_72], %132 {strides = array<i32>} : memref<18x18x8xf32, #tpu.memory_space<vmem>>, vector<1x18x8xf32>,
    %cst_73 = arith.constant 0.000000e+00 : f32
    %134 = vector.broadcast %cst_73 : f32 to vector<18x1x8xf32>
    %c0_74 = arith.constant 0 : index
    %c0_75 = arith.constant 0 : index
    %c0_76 = arith.constant 0 : index
    %135 = vector.load %arg20[%c0_74, %c0_75, %c0_76] : memref<18x18x8xf32, #tpu.memory_space<vmem>>, vector<18x1x8xf32>
    tpu.vector_store %arg20[%c0_74, %c0_75, %c0_76], %134 {strides = array<i32>} : memref<18x18x8xf32, #tpu.memory_space<vmem>>, vector<18x1x8xf32>,
    %cst_77 = arith.constant 0.000000e+00 : f32
    %136 = vector.broadcast %cst_77 : f32 to vector<18x1x8xf32>
    %c0_78 = arith.constant 0 : index
    %c17_79 = arith.constant 17 : index
    %c0_80 = arith.constant 0 : index
    %137 = vector.load %arg20[%c0_78, %c17_79, %c0_80] : memref<18x18x8xf32, #tpu.memory_space<vmem>>, vector<18x1x8xf32>
    tpu.vector_store %arg20[%c0_78, %c17_79, %c0_80], %136 {strides = array<i32>} : memref<18x18x8xf32, #tpu.memory_space<vmem>>, vector<18x1x8xf32>,
    %138 = vector.shape_cast %129 : vector<256x8xf32> to vector<16x16x8xf32>
    %c1_81 = arith.constant 1 : index
    %c1_82 = arith.constant 1 : index
    %c0_83 = arith.constant 0 : index
    %139 = vector.load %arg20[%c1_81, %c1_82, %c0_83] : memref<18x18x8xf32, #tpu.memory_space<vmem>>, vector<16x16x8xf32>
    tpu.vector_store %arg20[%c1_81, %c1_82, %c0_83], %138 {strides = array<i32>} : memref<18x18x8xf32, #tpu.memory_space<vmem>>, vector<16x16x8xf32>,
    %c0_84 = arith.constant 0 : index
    %c0_85 = arith.constant 0 : index
    %c0_86 = arith.constant 0 : index
    %140 = vector.load %arg20[%c0_84, %c0_85, %c0_86] : memref<18x18x8xf32, #tpu.memory_space<vmem>>, vector<18x18x8xf32>
    %cst_87 = arith.constant 0.000000e+00 : f32
    %141 = vector.broadcast %cst_87 : f32 to vector<256x8xf32>
    %142 = vector.extract_strided_slice %140 {offsets = [0, 0, 0], sizes = [16, 16, 8], strides = [1, 1, 1]} : vector<18x18x8xf32> to vector<16x16x8xf32>
    %143 = vector.shape_cast %142 : vector<16x16x8xf32> to vector<256x8xf32>
    %144 = arith.truncf %143 : vector<256x8xf32> to vector<256x8xbf16>
    %c0_88 = arith.constant 0 : index
    %c0_89 = arith.constant 0 : index
    %c0_90 = arith.constant 0 : index
    %145 = vector.load %arg9[%c0_88, %c0_89, %c0_90] : memref<9x8x8xbf16, #tpu.memory_space<vmem>>, vector<1x8x8xbf16>
    %146 = vector.shape_cast %145 : vector<1x8x8xbf16> to vector<8x8xbf16>
    %cst_91 = arith.constant dense<0.000000e+00> : vector<256x8xf32>
    %147 = tpu.matmul %144, %146, %cst_91 {dimension_numbers = #tpu.dot_dimension_numbers<[1], [0], [0], [1], [0, 0, 1, 1], [], []>} : vector<256x8xbf16>, vector<8x8xbf16>, vector<256x8xf32> -> vector<256x8xf32>
    %148 = arith.addf %141, %147 : vector<256x8xf32>
    %149 = vector.extract_strided_slice %140 {offsets = [0, 1, 0], sizes = [16, 16, 8], strides = [1, 1, 1]} : vector<18x18x8xf32> to vector<16x16x8xf32>
    %150 = vector.shape_cast %149 : vector<16x16x8xf32> to vector<256x8xf32>
    %151 = arith.truncf %150 : vector<256x8xf32> to vector<256x8xbf16>
    %c1_92 = arith.constant 1 : index
    %c0_93 = arith.constant 0 : index
    %c0_94 = arith.constant 0 : index
    %152 = vector.load %arg9[%c1_92, %c0_93, %c0_94] : memref<9x8x8xbf16, #tpu.memory_space<vmem>>, vector<1x8x8xbf16>
    %153 = vector.shape_cast %152 : vector<1x8x8xbf16> to vector<8x8xbf16>
    %cst_95 = arith.constant dense<0.000000e+00> : vector<256x8xf32>
    %154 = tpu.matmul %151, %153, %cst_95 {dimension_numbers = #tpu.dot_dimension_numbers<[1], [0], [0], [1], [0, 0, 1, 1], [], []>} : vector<256x8xbf16>, vector<8x8xbf16>, vector<256x8xf32> -> vector<256x8xf32>
    %155 = arith.addf %148, %154 : vector<256x8xf32>
    %156 = vector.extract_strided_slice %140 {offsets = [0, 2, 0], sizes = [16, 16, 8], strides = [1, 1, 1]} : vector<18x18x8xf32> to vector<16x16x8xf32>
    %157 = vector.shape_cast %156 : vector<16x16x8xf32> to vector<256x8xf32>
    %158 = arith.truncf %157 : vector<256x8xf32> to vector<256x8xbf16>
    %c2_96 = arith.constant 2 : index
    %c0_97 = arith.constant 0 : index
    %c0_98 = arith.constant 0 : index
    %159 = vector.load %arg9[%c2_96, %c0_97, %c0_98] : memref<9x8x8xbf16, #tpu.memory_space<vmem>>, vector<1x8x8xbf16>
    %160 = vector.shape_cast %159 : vector<1x8x8xbf16> to vector<8x8xbf16>
    %cst_99 = arith.constant dense<0.000000e+00> : vector<256x8xf32>
    %161 = tpu.matmul %158, %160, %cst_99 {dimension_numbers = #tpu.dot_dimension_numbers<[1], [0], [0], [1], [0, 0, 1, 1], [], []>} : vector<256x8xbf16>, vector<8x8xbf16>, vector<256x8xf32> -> vector<256x8xf32>
    %162 = arith.addf %155, %161 : vector<256x8xf32>
    %163 = vector.extract_strided_slice %140 {offsets = [1, 0, 0], sizes = [16, 16, 8], strides = [1, 1, 1]} : vector<18x18x8xf32> to vector<16x16x8xf32>
    %164 = vector.shape_cast %163 : vector<16x16x8xf32> to vector<256x8xf32>
    %165 = arith.truncf %164 : vector<256x8xf32> to vector<256x8xbf16>
    %c3_100 = arith.constant 3 : index
    %c0_101 = arith.constant 0 : index
    %c0_102 = arith.constant 0 : index
    %166 = vector.load %arg9[%c3_100, %c0_101, %c0_102] : memref<9x8x8xbf16, #tpu.memory_space<vmem>>, vector<1x8x8xbf16>
    %167 = vector.shape_cast %166 : vector<1x8x8xbf16> to vector<8x8xbf16>
    %cst_103 = arith.constant dense<0.000000e+00> : vector<256x8xf32>
    %168 = tpu.matmul %165, %167, %cst_103 {dimension_numbers = #tpu.dot_dimension_numbers<[1], [0], [0], [1], [0, 0, 1, 1], [], []>} : vector<256x8xbf16>, vector<8x8xbf16>, vector<256x8xf32> -> vector<256x8xf32>
    %169 = arith.addf %162, %168 : vector<256x8xf32>
    %170 = vector.extract_strided_slice %140 {offsets = [1, 1, 0], sizes = [16, 16, 8], strides = [1, 1, 1]} : vector<18x18x8xf32> to vector<16x16x8xf32>
    %171 = vector.shape_cast %170 : vector<16x16x8xf32> to vector<256x8xf32>
    %172 = arith.truncf %171 : vector<256x8xf32> to vector<256x8xbf16>
    %c4_104 = arith.constant 4 : index
    %c0_105 = arith.constant 0 : index
    %c0_106 = arith.constant 0 : index
    %173 = vector.load %arg9[%c4_104, %c0_105, %c0_106] : memref<9x8x8xbf16, #tpu.memory_space<vmem>>, vector<1x8x8xbf16>
    %174 = vector.shape_cast %173 : vector<1x8x8xbf16> to vector<8x8xbf16>
    %cst_107 = arith.constant dense<0.000000e+00> : vector<256x8xf32>
    %175 = tpu.matmul %172, %174, %cst_107 {dimension_numbers = #tpu.dot_dimension_numbers<[1], [0], [0], [1], [0, 0, 1, 1], [], []>} : vector<256x8xbf16>, vector<8x8xbf16>, vector<256x8xf32> -> vector<256x8xf32>
    %176 = arith.addf %169, %175 : vector<256x8xf32>
    %177 = vector.extract_strided_slice %140 {offsets = [1, 2, 0], sizes = [16, 16, 8], strides = [1, 1, 1]} : vector<18x18x8xf32> to vector<16x16x8xf32>
    %178 = vector.shape_cast %177 : vector<16x16x8xf32> to vector<256x8xf32>
    %179 = arith.truncf %178 : vector<256x8xf32> to vector<256x8xbf16>
    %c5_108 = arith.constant 5 : index
    %c0_109 = arith.constant 0 : index
    %c0_110 = arith.constant 0 : index
    %180 = vector.load %arg9[%c5_108, %c0_109, %c0_110] : memref<9x8x8xbf16, #tpu.memory_space<vmem>>, vector<1x8x8xbf16>
    %181 = vector.shape_cast %180 : vector<1x8x8xbf16> to vector<8x8xbf16>
    %cst_111 = arith.constant dense<0.000000e+00> : vector<256x8xf32>
    %182 = tpu.matmul %179, %181, %cst_111 {dimension_numbers = #tpu.dot_dimension_numbers<[1], [0], [0], [1], [0, 0, 1, 1], [], []>} : vector<256x8xbf16>, vector<8x8xbf16>, vector<256x8xf32> -> vector<256x8xf32>
    %183 = arith.addf %176, %182 : vector<256x8xf32>
    %184 = vector.extract_strided_slice %140 {offsets = [2, 0, 0], sizes = [16, 16, 8], strides = [1, 1, 1]} : vector<18x18x8xf32> to vector<16x16x8xf32>
    %185 = vector.shape_cast %184 : vector<16x16x8xf32> to vector<256x8xf32>
    %186 = arith.truncf %185 : vector<256x8xf32> to vector<256x8xbf16>
    %c6_112 = arith.constant 6 : index
    %c0_113 = arith.constant 0 : index
    %c0_114 = arith.constant 0 : index
    %187 = vector.load %arg9[%c6_112, %c0_113, %c0_114] : memref<9x8x8xbf16, #tpu.memory_space<vmem>>, vector<1x8x8xbf16>
    %188 = vector.shape_cast %187 : vector<1x8x8xbf16> to vector<8x8xbf16>
    %cst_115 = arith.constant dense<0.000000e+00> : vector<256x8xf32>
    %189 = tpu.matmul %186, %188, %cst_115 {dimension_numbers = #tpu.dot_dimension_numbers<[1], [0], [0], [1], [0, 0, 1, 1], [], []>} : vector<256x8xbf16>, vector<8x8xbf16>, vector<256x8xf32> -> vector<256x8xf32>
    %190 = arith.addf %183, %189 : vector<256x8xf32>
    %191 = vector.extract_strided_slice %140 {offsets = [2, 1, 0], sizes = [16, 16, 8], strides = [1, 1, 1]} : vector<18x18x8xf32> to vector<16x16x8xf32>
    %192 = vector.shape_cast %191 : vector<16x16x8xf32> to vector<256x8xf32>
    %193 = arith.truncf %192 : vector<256x8xf32> to vector<256x8xbf16>
    %c7_116 = arith.constant 7 : index
    %c0_117 = arith.constant 0 : index
    %c0_118 = arith.constant 0 : index
    %194 = vector.load %arg9[%c7_116, %c0_117, %c0_118] : memref<9x8x8xbf16, #tpu.memory_space<vmem>>, vector<1x8x8xbf16>
    %195 = vector.shape_cast %194 : vector<1x8x8xbf16> to vector<8x8xbf16>
    %cst_119 = arith.constant dense<0.000000e+00> : vector<256x8xf32>
    %196 = tpu.matmul %193, %195, %cst_119 {dimension_numbers = #tpu.dot_dimension_numbers<[1], [0], [0], [1], [0, 0, 1, 1], [], []>} : vector<256x8xbf16>, vector<8x8xbf16>, vector<256x8xf32> -> vector<256x8xf32>
    %197 = arith.addf %190, %196 : vector<256x8xf32>
    %198 = vector.extract_strided_slice %140 {offsets = [2, 2, 0], sizes = [16, 16, 8], strides = [1, 1, 1]} : vector<18x18x8xf32> to vector<16x16x8xf32>
    %199 = vector.shape_cast %198 : vector<16x16x8xf32> to vector<256x8xf32>
    %200 = arith.truncf %199 : vector<256x8xf32> to vector<256x8xbf16>
    %c8_120 = arith.constant 8 : index
    %c0_121 = arith.constant 0 : index
    %c0_122 = arith.constant 0 : index
    %201 = vector.load %arg9[%c8_120, %c0_121, %c0_122] : memref<9x8x8xbf16, #tpu.memory_space<vmem>>, vector<1x8x8xbf16>
    %202 = vector.shape_cast %201 : vector<1x8x8xbf16> to vector<8x8xbf16>
    %cst_123 = arith.constant dense<0.000000e+00> : vector<256x8xf32>
    %203 = tpu.matmul %200, %202, %cst_123 {dimension_numbers = #tpu.dot_dimension_numbers<[1], [0], [0], [1], [0, 0, 1, 1], [], []>} : vector<256x8xbf16>, vector<8x8xbf16>, vector<256x8xf32> -> vector<256x8xf32>
    %204 = arith.addf %197, %203 : vector<256x8xf32>
    %c0_124 = arith.constant 0 : index
    %c0_125 = arith.constant 0 : index
    %205 = vector.load %arg10[%c0_124, %c0_125] : memref<1x8xf32, #tpu.memory_space<vmem>>, vector<1x8xf32>
    %206 = vector.broadcast %205 : vector<1x8xf32> to vector<256x8xf32>
    %207 = arith.addf %204, %206 : vector<256x8xf32>
    %cst_126 = arith.constant dense<0.000000e+00> : vector<8xf32>
    %208 = vector.multi_reduction <add>, %207, %cst_126 [0] : vector<256x8xf32> to vector<8xf32>
    %209 = vector.shape_cast %208 : vector<8xf32> to vector<1x8xf32>
    %210 = arith.mulf %207, %207 : vector<256x8xf32>
    %cst_127 = arith.constant dense<0.000000e+00> : vector<8xf32>
    %211 = vector.multi_reduction <add>, %210, %cst_127 [0] : vector<256x8xf32> to vector<8xf32>
    %212 = vector.shape_cast %211 : vector<8xf32> to vector<1x8xf32>
    %c0_128 = arith.constant 0 : index
    %c0_129 = arith.constant 0 : index
    %213 = vector.load %arg13[%c0_128, %c0_129] : memref<8x4xf32, #tpu.memory_space<vmem>>, vector<8x4xf32>
    %cst_130 = arith.constant dense<0.000000e+00> : vector<1x4xf32>
    %214 = tpu.matmul %209, %213, %cst_130 {dimension_numbers = #tpu.dot_dimension_numbers<[1], [0], [0], [1], [0, 0, 1, 1], [], []>} : vector<1x8xf32>, vector<8x4xf32>, vector<1x4xf32> -> vector<1x4xf32>
    %cst_131 = arith.constant 5.120000e+02 : f32
    %215 = vector.broadcast %cst_131 : f32 to vector<1x4xf32>
    %216 = arith.divf %214, %215 : vector<1x4xf32>
    %c0_132 = arith.constant 0 : index
    %c0_133 = arith.constant 0 : index
    %217 = vector.load %arg13[%c0_132, %c0_133] : memref<8x4xf32, #tpu.memory_space<vmem>>, vector<8x4xf32>
    %cst_134 = arith.constant dense<0.000000e+00> : vector<1x4xf32>
    %218 = tpu.matmul %212, %217, %cst_134 {dimension_numbers = #tpu.dot_dimension_numbers<[1], [0], [0], [1], [0, 0, 1, 1], [], []>} : vector<1x8xf32>, vector<8x4xf32>, vector<1x4xf32> -> vector<1x4xf32>
    %cst_135 = arith.constant 5.120000e+02 : f32
    %219 = vector.broadcast %cst_135 : f32 to vector<1x4xf32>
    %220 = arith.divf %218, %219 : vector<1x4xf32>
    %c0_136 = arith.constant 0 : index
    %c0_137 = arith.constant 0 : index
    %221 = vector.load %arg14[%c0_136, %c0_137] : memref<4x8xf32, #tpu.memory_space<vmem>>, vector<4x8xf32>
    %cst_138 = arith.constant dense<0.000000e+00> : vector<1x8xf32>
    %222 = tpu.matmul %216, %221, %cst_138 {dimension_numbers = #tpu.dot_dimension_numbers<[1], [0], [0], [1], [0, 0, 1, 1], [], []>} : vector<1x4xf32>, vector<4x8xf32>, vector<1x8xf32> -> vector<1x8xf32>
    %c0_139 = arith.constant 0 : index
    %c0_140 = arith.constant 0 : index
    %223 = vector.load %arg14[%c0_139, %c0_140] : memref<4x8xf32, #tpu.memory_space<vmem>>, vector<4x8xf32>
    %cst_141 = arith.constant dense<0.000000e+00> : vector<1x8xf32>
    %224 = tpu.matmul %220, %223, %cst_141 {dimension_numbers = #tpu.dot_dimension_numbers<[1], [0], [0], [1], [0, 0, 1, 1], [], []>} : vector<1x4xf32>, vector<4x8xf32>, vector<1x8xf32> -> vector<1x8xf32>
    %225 = arith.mulf %222, %222 : vector<1x8xf32>
    %226 = arith.subf %224, %225 : vector<1x8xf32>
    %cst_142 = arith.constant 0.000000e+00 : f32
    %227 = vector.broadcast %cst_142 : f32 to vector<1x8xf32>
    %228 = arith.maximumf %226, %227 : vector<1x8xf32>
    %229 = vector.broadcast %222 : vector<1x8xf32> to vector<256x8xf32>
    %230 = arith.subf %207, %229 : vector<256x8xf32>
    %cst_143 = arith.constant 9.99999974E-6 : f32
    %231 = vector.broadcast %cst_143 : f32 to vector<1x8xf32>
    %232 = arith.addf %228, %231 : vector<1x8xf32>
    %233 = math.rsqrt %232 : vector<1x8xf32>
    %234 = vector.broadcast %233 : vector<1x8xf32> to vector<256x8xf32>
    %235 = arith.mulf %230, %234 : vector<256x8xf32>
    %c0_144 = arith.constant 0 : index
    %c0_145 = arith.constant 0 : index
    %236 = vector.load %arg11[%c0_144, %c0_145] : memref<1x8xf32, #tpu.memory_space<vmem>>, vector<1x8xf32>
    %237 = vector.broadcast %236 : vector<1x8xf32> to vector<256x8xf32>
    %238 = arith.mulf %235, %237 : vector<256x8xf32>
    %c0_146 = arith.constant 0 : index
    %c0_147 = arith.constant 0 : index
    %239 = vector.load %arg12[%c0_146, %c0_147] : memref<1x8xf32, #tpu.memory_space<vmem>>, vector<1x8xf32>
    %240 = vector.broadcast %239 : vector<1x8xf32> to vector<256x8xf32>
    %241 = arith.addf %238, %240 : vector<256x8xf32>
    %242 = arith.negf %241 : vector<256x8xf32>
    %243 = math.exp %242 : vector<256x8xf32>
    %cst_148 = arith.constant 1.000000e+00 : f32
    %244 = vector.broadcast %cst_148 : f32 to vector<256x8xf32>
    %245 = arith.addf %244, %243 : vector<256x8xf32>
    %246 = arith.divf %244, %245 : vector<256x8xf32>
    %247 = arith.mulf %241, %246 : vector<256x8xf32>
    %248 = vector.extract_strided_slice %16 {offsets = [1, 1, 0], sizes = [16, 16, 4], strides = [1, 1, 1]} : vector<18x18x4xf32> to vector<16x16x4xf32>
    %249 = vector.shape_cast %248 : vector<16x16x4xf32> to vector<256x4xf32>
    %250 = arith.truncf %249 : vector<256x4xf32> to vector<256x4xbf16>
    %c0_149 = arith.constant 0 : index
    %c0_150 = arith.constant 0 : index
    %251 = vector.load %arg17[%c0_149, %c0_150] : memref<4x8xbf16, #tpu.memory_space<vmem>>, vector<4x8xbf16>
    %cst_151 = arith.constant dense<0.000000e+00> : vector<256x8xf32>
    %252 = tpu.matmul %250, %251, %cst_151 {dimension_numbers = #tpu.dot_dimension_numbers<[1], [0], [0], [1], [0, 0, 1, 1], [], []>} : vector<256x4xbf16>, vector<4x8xbf16>, vector<256x8xf32> -> vector<256x8xf32>
    %c0_152 = arith.constant 0 : index
    %c0_153 = arith.constant 0 : index
    %253 = vector.load %arg18[%c0_152, %c0_153] : memref<1x8xf32, #tpu.memory_space<vmem>>, vector<1x8xf32>
    %254 = vector.broadcast %253 : vector<1x8xf32> to vector<256x8xf32>
    %255 = arith.addf %252, %254 : vector<256x8xf32>
    %256 = arith.addf %247, %255 : vector<256x8xf32>
    %257 = vector.shape_cast %256 : vector<256x8xf32> to vector<1x16x16x8xf32>
    %c0_154 = arith.constant 0 : index
    %c0_155 = arith.constant 0 : index
    %c0_156 = arith.constant 0 : index
    %c0_157 = arith.constant 0 : index
    %258 = vector.load %arg19[%c0_154, %c0_155, %c0_156, %c0_157] : memref<1x16x16x8xf32, #tpu.memory_space<vmem>>, vector<1x16x16x8xf32>
    tpu.vector_store %arg19[%c0_154, %c0_155, %c0_156, %c0_157], %257 {strides = array<i32>} : memref<1x16x16x8xf32, #tpu.memory_space<vmem>>, vector<1x16x16x8xf32>,
    return
  }
  func.func @transform_0(%arg0: i32) -> (i32, i32, i32, i32) {
    %c0_i32 = arith.constant 0 : i32
    %c0_i32_0 = arith.constant 0 : i32
    %c0_i32_1 = arith.constant 0 : i32
    %c0_i32_2 = arith.constant 0 : i32
    return %arg0, %c0_i32, %c0_i32_0, %c0_i32_1 : i32, i32, i32, i32
  }
  func.func @transform_1(%arg0: i32) -> (i32, i32, i32) {
    %c0_i32 = arith.constant 0 : i32
    %c0_i32_0 = arith.constant 0 : i32
    %c0_i32_1 = arith.constant 0 : i32
    return %arg0, %c0_i32, %c0_i32_0 : i32, i32, i32
  }
  func.func @transform_2(%arg0: i32) -> (i32, i32, i32) {
    %c0_i32 = arith.constant 0 : i32
    %c0_i32_0 = arith.constant 0 : i32
    %c0_i32_1 = arith.constant 0 : i32
    %c0_i32_2 = arith.constant 0 : i32
    return %c0_i32, %c0_i32_0, %c0_i32_1 : i32, i32, i32
  }
  func.func @transform_3(%arg0: i32) -> (i32, i32) {
    %c0_i32 = arith.constant 0 : i32
    %c0_i32_0 = arith.constant 0 : i32
    %c0_i32_1 = arith.constant 0 : i32
    return %c0_i32, %c0_i32_0 : i32, i32
  }
  func.func @transform_4(%arg0: i32) -> (i32, i32) {
    %c0_i32 = arith.constant 0 : i32
    %c0_i32_0 = arith.constant 0 : i32
    %c0_i32_1 = arith.constant 0 : i32
    return %c0_i32, %c0_i32_0 : i32, i32
  }
  func.func @transform_5(%arg0: i32) -> (i32, i32) {
    %c0_i32 = arith.constant 0 : i32
    %c0_i32_0 = arith.constant 0 : i32
    %c0_i32_1 = arith.constant 0 : i32
    return %c0_i32, %c0_i32_0 : i32, i32
  }
  func.func @transform_6(%arg0: i32) -> (i32, i32) {
    %c0_i32 = arith.constant 0 : i32
    %c0_i32_0 = arith.constant 0 : i32
    %c0_i32_1 = arith.constant 0 : i32
    return %c0_i32, %c0_i32_0 : i32, i32
  }
  func.func @transform_7(%arg0: i32) -> (i32, i32) {
    %c0_i32 = arith.constant 0 : i32
    %c0_i32_0 = arith.constant 0 : i32
    %c0_i32_1 = arith.constant 0 : i32
    return %c0_i32, %c0_i32_0 : i32, i32
  }
  func.func @transform_8(%arg0: i32) -> (i32, i32, i32) {
    %c0_i32 = arith.constant 0 : i32
    %c0_i32_0 = arith.constant 0 : i32
    %c0_i32_1 = arith.constant 0 : i32
    %c0_i32_2 = arith.constant 0 : i32
    return %c0_i32, %c0_i32_0, %c0_i32_1 : i32, i32, i32
  }
  func.func @transform_9(%arg0: i32) -> (i32, i32) {
    %c0_i32 = arith.constant 0 : i32
    %c0_i32_0 = arith.constant 0 : i32
    %c0_i32_1 = arith.constant 0 : i32
    return %c0_i32, %c0_i32_0 : i32, i32
  }
  func.func @transform_10(%arg0: i32) -> (i32, i32) {
    %c0_i32 = arith.constant 0 : i32
    %c0_i32_0 = arith.constant 0 : i32
    %c0_i32_1 = arith.constant 0 : i32
    return %c0_i32, %c0_i32_0 : i32, i32
  }
  func.func @transform_11(%arg0: i32) -> (i32, i32) {
    %c0_i32 = arith.constant 0 : i32
    %c0_i32_0 = arith.constant 0 : i32
    %c0_i32_1 = arith.constant 0 : i32
    return %c0_i32, %c0_i32_0 : i32, i32
  }
  func.func @transform_12(%arg0: i32) -> (i32, i32) {
    %c0_i32 = arith.constant 0 : i32
    %c0_i32_0 = arith.constant 0 : i32
    %c0_i32_1 = arith.constant 0 : i32
    return %c0_i32, %c0_i32_0 : i32, i32
  }
  func.func @transform_13(%arg0: i32) -> (i32, i32) {
    %c0_i32 = arith.constant 0 : i32
    %c0_i32_0 = arith.constant 0 : i32
    %c0_i32_1 = arith.constant 0 : i32
    return %c0_i32, %c0_i32_0 : i32, i32
  }
  func.func @transform_14(%arg0: i32) -> (i32, i32) {
    %c0_i32 = arith.constant 0 : i32
    %c0_i32_0 = arith.constant 0 : i32
    %c0_i32_1 = arith.constant 0 : i32
    return %c0_i32, %c0_i32_0 : i32, i32
  }
  func.func @transform_15(%arg0: i32) -> (i32, i32) {
    %c0_i32 = arith.constant 0 : i32
    %c0_i32_0 = arith.constant 0 : i32
    %c0_i32_1 = arith.constant 0 : i32
    return %c0_i32, %c0_i32_0 : i32, i32
  }
  func.func @transform_16(%arg0: i32) -> (i32, i32) {
    %c0_i32 = arith.constant 0 : i32
    %c0_i32_0 = arith.constant 0 : i32
    %c0_i32_1 = arith.constant 0 : i32
    return %c0_i32, %c0_i32_0 : i32, i32
  }
  func.func @transform_17(%arg0: i32) -> (i32, i32) {
    %c0_i32 = arith.constant 0 : i32
    %c0_i32_0 = arith.constant 0 : i32
    %c0_i32_1 = arith.constant 0 : i32
    return %c0_i32, %c0_i32_0 : i32, i32
  }
  func.func @transform_18(%arg0: i32) -> (i32, i32, i32, i32) {
    %c0_i32 = arith.constant 0 : i32
    %c0_i32_0 = arith.constant 0 : i32
    %c0_i32_1 = arith.constant 0 : i32
    %c0_i32_2 = arith.constant 0 : i32
    return %arg0, %c0_i32, %c0_i32_0, %c0_i32_1 : i32, i32, i32, i32
  }
}

</mosaic_0001>

<bundles_post_ra>
// kernel: tpu_custom_call.1
= control target key start
LH: loop header
LB: loop body
LE: loop exit
PB: predicated region body
PF: predicated region fallthrough
CT: control target
= control target key end

     0   :  { %s9462_s27 = smov 0   ;;  %s13959_s0 = inlined_call_operand.vmem [shape: bf16[2,18,18,4], index: 0, kind: input, shape index: {}]   ;;  %s13960_s1 = inlined_call_operand.vmem [shape: f32[2,1,16], index: 1, kind: input, shape index: {}]   ;;  %s13961_s2 = inlined_call_operand.vmem [shape: bf16[9,4,8], index: 2, kind: input, shape index: {}]   ;;  %s13962_s3 = inlined_call_operand.vmem [shape: f32[1,8], index: 3, kind: input, shape index: {}]   ;;  %s13963_s4 = inlined_call_operand.vmem [shape: f32[1,8], index: 4, kind: input, shape index: {}]   ;;  %s13964_s5 = inlined_call_operand.vmem [shape: f32[1,8], index: 5, kind: input, shape index: {}]   ;;  %s13965_s6 = inlined_call_operand.vmem [shape: f32[8,4], index: 6, kind: input, shape index: {}]   ;;  %s13966_s7 = inlined_call_operand.vmem [shape: f32[4,8], index: 7, kind: input, shape index: {}]   ;;  %s13967_s8 = inlined_call_operand.vmem [shape: bf16[9,8,8], index: 8, kind: input, shape index: {}]   ;;  %s13968_s9 = inlined_call_operand.vmem [shape: f32[1,8], index: 9, kind: input, shape index: {}]   ;;  %s13969_s10 = inlined_call_operand.vmem [shape: f32[1,8], index: 10, kind: input, shape index: {}]   ;;  %s13970_s11 = inlined_call_operand.vmem [shape: f32[1,8], index: 11, kind: input, shape index: {}]   ;;  %s13971_s12 = inlined_call_operand.vmem [shape: f32[8,4], index: 12, kind: input, shape index: {}]   ;;  %s13972_s13 = inlined_call_operand.vmem [shape: f32[4,8], index: 13, kind: input, shape index: {}]   ;;  %s13973_s14 = inlined_call_operand.vmem [shape: f32[16,16], index: 14, kind: input, shape index: {}]   ;;  %s13974_s15 = inlined_call_operand.vmem [shape: f32[1,16], index: 15, kind: input, shape index: {}]   ;;  %s13975_s16 = inlined_call_operand.vmem [shape: bf16[4,8], index: 16, kind: input, shape index: {}]   ;;  %s13976_s17 = inlined_call_operand.vmem [shape: f32[1,8], index: 17, kind: input, shape index: {}]   ;;  %s13977_s18 = inlined_call_operand.vmem [shape: f32[2,16,16,8], index: 18, kind: output, shape index: {}]  }
   0x1   :  { %14119 = sst [smem:[#allocation63_spill]] %s13959_s0 }
   0x2   :  { %14120 = sst [smem:[#allocation64_spill]] %s13960_s1 }
   0x3   :  { %14121 = sst [smem:[#allocation65_spill]] %s13961_s2 }
   0x4 LB: > { %s7552_s28 = sadd.s32 4294967295, %s9362_s27   ;;  %p7556_p0 = scmp.ge.s32.totalorder %s9362_s27, 1  ;;  %s9362_s27 = sphi %s9462_s27, %s28_s27  }
   0x5   : > { %p520_p1 = scmp.lt.s32.totalorder %s9362_s27, 3 }
   0x7   : > { %p521_p2 = pnand %p7556_p0, %p520_p1 }
   0x9   : > { %524 = sbr.rel (%p521_p2) target bundleno = 2143 (0x85f), region = 92 }
   0xe   : > { %s14122_s0 = sld [smem:[#allocation65_spill]]  ;;  %vm1029_vm0 = vcmask 1041408   ;;  %p577_p3 = scmp.lt.s32.totalorder %s7552_s28, 1  ;;  %v600_v3 = vld [vmem:[%s13973_s14 + $0x8] sm:$0xff]  ;;  %v13979_v4 = vmov 0.0   ;;  %v599_v5 = vld [vmem:[%s13973_s14] sm:$0xff] }
   0xf   : > { %8328 = vmatprep.subr.mxu0 %v13979_v4  ;;  %vm9365_vm1 = vmmov 0   ;;  %s14123_s26 = sld [smem:[#allocation64_spill]]  ;;  %vm849_vm2 = vcmask 1046528   ;;  %vm980_vm3 = vcmask 31744   ;;  %vm1406_vm4 = vcmask 1045504   ;;  %s9366_s25 = smov 120  }
  0x10   : > { %s14509_s28 = smov (!%p577_p3, %s7552_s28), 1  ;;  %8329 = vmatpush3.msra.mxu0 %v600_v3  ;;  %8332 = vmatprep.mubr.msk.f32.mxu0 %vm9365_vm1, %v13979_v4  ;;  %s14124_s1 = sld [smem:[#allocation63_spill]]  ;;  %vm602_vm5 = vcmask 130048   ;;  %vm3066_vm6 = vcmask 64512   ;;  %vm3391_vm7 = vcmask 1043456   ;;  %vm3996_vm8 = vcmask 58368  }
  0x11   : > { %s9043_s23 = smul.u32 216, %s14509_s28  ;;  %8330 = vmatprep.subr.mxu0 %v13979_v4  ;;  %vm4002_vm9 = vcmask 57344   ;;  %s7985_s2 = sshll.u32 %s14509_s28, 8 }
  0x12   : > { %8331 = vmatpush3.msra.mxu0 %v599_v5  ;;  %s13733_s24 = scalar_lea.vmem %s13977_s18, %s7985_s2 }
  0x14   : > { %v7578_v0 = vld [vmem:[%s14122_s0 + $0x2] sm:$0x3]  ;;  %v7611_v2 = vld [vmem:[%s14122_s0 + $0x4] sm:$0x3]  ;;  %v9591_v52 = vld [vmem:[%s14122_s0 + $0x8] sm:$0x3] }
  0x15   : > { %9024 = vmatprep.subr.msk.bf16.mxu1 %vm1029_vm0, %v7578_v0  ;;  %v9475_v1 = vsel %vm1029_vm0, %v7578_v0, 0  ;;  %s584_s29 = scalar_lea.vmem %s14123_s26, %s14509_s28  ;;  %v1586_v7 = vsel %vm1029_vm0, %v7611_v2, 0  ;;  %9023 = vmatprep.subr.msk.bf16.mxu0 %vm1029_vm0, %v7578_v0 }
  0x16   : > { %9022 = vmatpush3.bf16.msra.mxu1 %v9475_v1  ;;  %v9499_v6 = vld [vmem:[%s584_s29] sm:$0x1]  ;;  %s9504_s20 = scalar_lea.vmem %s14124_s1, %s9043_s23 }
  0x17   : > { %9026 = vmatprep.subr.msk.bf16.mxu1 %vm1029_vm0, %v7611_v2  ;;  %v9509_v8 = vld [vmem:[%s9504_s20 + $0x48] sm:$0xff]   ;;  %v9512_v9 = vld [vmem:[%s9504_s20 + $0x50] sm:$0x1]  ;;  %v9515_v10 = vld [vmem:[%s9504_s20 + $0x54] sm:$0xff]   ;;  %v7560_v11 = vmul.f32 -1.442695, %v9499_v6 }
  0x18   : > { %v14002_v12 = vunpack.c.l.bf16 %v9509_v8  ;;  %v14001_v13 = vunpack.c.h.bf16 %v9509_v8  ;;  %v13990_v14 = vunpack.c.l.bf16 %v9512_v9  ;;  %v9522_v15 = vld [vmem:[%s9504_s20 + $0x5c] sm:$0x1]  ;;  %v14004_v16 = vunpack.c.l.bf16 %v9515_v10  ;;  %v9526_v17 = vld [vmem:[%s9504_s20 + $0x60] sm:$0xff]   ;;  %v9529_v18 = vld [vmem:[%s9504_s20 + $0x68] sm:$0x1] }
  0x19   : > { %v14003_v19 = vunpack.c.h.bf16 %v9515_v10  ;;  %v14000_v20 = vunpack.c.l.bf16 %v9522_v15  ;;  %v13999_v21 = vunpack.c.l.bf16 %v9526_v17  ;;  %v13998_v22 = vunpack.c.h.bf16 %v9526_v17  ;;  %v9536_v23 = vld [vmem:[%s9504_s20 + $0x6c] sm:$0xff]   ;;  %v9554_v32 = vld [vmem:[%s9504_s20 + $0x74] sm:$0x1]  ;;  %v9562_v37 = vld [vmem:[%s9504_s20 + $0x78] sm:$0xff]  }
  0x1a   : > { %v880_v24 = vrot.slane %v14002_v12, 1  ;;  %v881_v25 = vrot.slane %v14001_v13, 1  ;;  %v883_v26 = vrot.slane %v13990_v14, 1  ;;  %v885_v27 = vrot.slane %v14004_v16, 1  ;;  %v9571_v42 = vld [vmem:[%s9504_s20 + $0x80] sm:$0x1] }
  0x1b   : > { %v886_v28 = vrot.slane %v14003_v19, 1  ;;  %v888_v29 = vrot.slane %v14000_v20, 1  ;;  %v13996_v30 = vunpack.c.l.bf16 %v9529_v18  ;;  %v890_v31 = vrot.slane %v13999_v21, 1  ;;  %v9579_v47 = vld [vmem:[%s9504_s20 + $0x84] sm:$0xff]   ;;  %v9603_v57 = vld [vmem:[%s9504_s20 + $0x8c] sm:$0x1] }
  0x1c   : > { %v882_v33 = vsel %vm849_vm2, %v880_v24, %v881_v25  ;;  %v884_v34 = vsel %vm849_vm2, %v881_v25, %v883_v26  ;;  %v891_v35 = vrot.slane %v13998_v22, 1  ;;  %v13993_v36 = vunpack.c.l.bf16 %v9536_v23  ;;  %v9618_v2 = vld [vmem:[%s9504_s20] sm:$0xff]   ;;  %v9729_v22 = vld [vmem:[%s9504_s20 + $0xb0] sm:$0x1]  ;;  %v9732_v21 = vld [vmem:[%s9504_s20 + $0xb4] sm:$0xff]  }
  0x1d   : > { %v9564_v38 = vpack.c.bf16 %v884_v34, %v882_v33  ;;  %v887_v39 = vsel %vm849_vm2, %v885_v27, %v886_v28  ;;  %v889_v40 = vsel %vm849_vm2, %v886_v28, %v888_v29  ;;  %v893_v41 = vrot.slane %v13996_v30, 1  ;;  %v9643_v33 = vld [vmem:[%s14122_s0] sm:$0x3]  ;;  %v9646_v34 = vld [vmem:[%s9504_s20 + $0xc] sm:$0xff]   ;;  %14133 = vst [vmem:[#allocation11_spill] sm:$0xff] %v9729_v22 }
  0x1e   : > { %v9573_v43 = vpack.c.bf16 %v889_v40, %v887_v39  ;;  %v892_v44 = vsel %vm849_vm2, %v890_v31, %v891_v35  ;;  %v13991_v45 = vunpack.c.h.bf16 %v9536_v23  ;;  %v13987_v46 = vunpack.c.l.bf16 %v9554_v32  ;;  %v9650_v39 = vld [vmem:[%s9504_s20 + $0x90] sm:$0xff]   ;;  %v9718_v30 = vld [vmem:[%s9504_s20 + $0xa8] sm:$0xff]  }
  0x1f   : > { %14125 = vst [vmem:[#allocation3_spill] sm:$0xff] %v9564_v38  ;;  %8349 = vmatprep.mubr.msk.bf16.mxu1 %vm980_vm3, %v9564_v38  ;;  %v894_v48 = vsel %vm849_vm2, %v891_v35, %v893_v41  ;;  %v895_v49 = vrot.slane %v13993_v36, 1  ;;  %v13986_v50 = vunpack.c.l.bf16 %v9562_v37  ;;  %v13985_v51 = vunpack.c.h.bf16 %v9562_v37  ;;  %v681_v40 = vld [vmem:[%s9504_s20 + $0x14] sm:$0x1]  ;;  %14131 = vst [vmem:[#allocation9_spill] sm:$0xff] %v9718_v30 }
  0x20   : > { %14126 = vst [vmem:[#allocation4_spill] sm:$0xff] %v9573_v43  ;;  %8350 = vmatmul.mubr.msk.bf16.vlgmr.msra.gmra.mxu1 %vm980_vm3, %v9573_v43  ;;  %v9595_v53 = vpack.c.bf16 %v894_v48, %v892_v44  ;;  %v896_v54 = vrot.slane %v13991_v45, 1  ;;  %v898_v55 = vrot.slane %v13987_v46, 1  ;;  %v13984_v56 = vunpack.c.l.bf16 %v9571_v42  ;;  %v9661_v48 = vld [vmem:[%s9504_s20 + $0x98] sm:$0x1] }
  0x21   : > { %8404 = vmatpush3.bf16.msra.mxu1 %v1586_v7  ;;  %v900_v58 = vrot.slane %v13986_v50, 1  ;;  %v901_v59 = vrot.slane %v13985_v51, 1  ;;  %9091 = vpow2.f32 %v7560_v11  ;;  %v13983_v60 = vunpack.c.l.bf16 %v9579_v47  ;;  %v9625_v7 = vld [vmem:[%s9504_s20 + $0x8] sm:$0x1] }
  0x22   : > { %14127 = vst [vmem:[#allocation5_spill] sm:$0xff] %v9595_v53  ;;  %8353 = vmatprep.mubr.msk.bf16.mxu1 %vm980_vm3, %v9595_v53  ;;  %v897_v61 = vsel %vm849_vm2, %v895_v49, %v896_v54  ;;  %v899_v62 = vsel %vm849_vm2, %v896_v54, %v898_v55  ;;  %v903_v63 = vrot.slane %v13984_v56, 1  ;;  %v13982_v0 = vunpack.c.h.bf16 %v9579_v47  ;;  %9028 = vmatprep.subr.msk.bf16.mxu1 %vm1029_vm0, %v9591_v52  ;;  %v9664_v49 = vld [vmem:[%s9504_s20 + $0x9c] sm:$0xff]  }
  0x23   : > { %v902_v3 = vsel %vm849_vm2, %v900_v58, %v901_v59  ;;  %v13981_v5 = vunpack.c.l.bf16 %v9603_v57  ;;  %v9627_v11 = vpack.c.bf16 %v899_v62, %v897_v61  ;;  %v905_v25 = vrot.slane %v13983_v60, 1  ;;  %v9675_v61 = vld [vmem:[%s9504_s20 + $0xa4] sm:$0x1] }
  0x24   : > { %v904_v24 = vsel %vm849_vm2, %v901_v59, %v903_v63  ;;  %v906_v26 = vrot.slane %v13982_v0, 1  ;;  %v14012_v29 = vunpack.c.l.bf16 %v9618_v2  ;;  %v14010_v31 = vunpack.c.h.bf16 %v9618_v2 }
  0x25   : > { %14128 = vst [vmem:[#allocation6_spill] sm:$0xff] %v9627_v11  ;;  %v9634_v27 = vpack.c.bf16 %v904_v24, %v902_v3  ;;  %v908_v28 = vrot.slane %v13981_v5, 1  ;;  %v14009_v35 = vunpack.c.l.bf16 %v9625_v7  ;;  %v733_v41 = vunpack.c.l.bf16 %v9646_v34  ;;  %v9686_v5 = vld [vmem:[%s9504_s20 + $0x18] sm:$0xff]  }
  0x26   : > { %v9658_v44 = vsel %vm1029_vm0, %v9643_v33, 0  ;;  %v907_v54 = vsel %vm849_vm2, %v905_v25, %v906_v26  ;;  %v850_v58 = vrot.slane %v14012_v29, 1  ;;  %v851_v59 = vrot.slane %v14010_v31, 1  ;;  %v9775_v31 = vld [vmem:[%s9504_s20 + $0x30] sm:$0xff]  }
  0x27   : > { %14129 = vst [vmem:[#allocation7_spill] sm:$0xff] %v9634_v27  ;;  %v909_v55 = vsel %vm849_vm2, %v906_v26, %v908_v28  ;;  %v853_v62 = vrot.slane %v14009_v35, 1  ;;  %v734_v63 = vunpack.c.h.bf16 %v9646_v34  ;;  %v13988_v3 = vunpack.c.l.bf16 %v9650_v39  ;;  %14136 = vst [vmem:[#allocation14_spill] sm:$0xff] %v9775_v31 }
  0x28   : > { %8354 = vmatmul.mubr.msk.bf16.gmra.mxu1 %vm980_vm3, %v9627_v11  ;;  %v13989_v24 = vunpack.c.h.bf16 %v9650_v39  ;;  %v735_v25 = vunpack.c.l.bf16 %v681_v40  ;;  %v13992_v26 = vunpack.c.l.bf16 %v9661_v48  ;;  %v13994_v28 = vunpack.c.l.bf16 %v9664_v49  ;;  %v9696_v40 = vld [vmem:[%s9504_s20 + $0x20] sm:$0x1]  ;;  %v9795_v11 = vld [vmem:[%s9504_s20 + $0x44] sm:$0x1] }
  0x29   : > { %8357 = vmatprep.mubr.msk.bf16.mxu1 %vm980_vm3, %v9634_v27  ;;  %v13995_v4 = vunpack.c.h.bf16 %v9664_v49  ;;  %v9688_v0 = vpack.c.bf16 %v909_v55, %v907_v54  ;;  %v910_v60 = vrot.slane %v13988_v3, 1  ;;  %v13997_v51 = vunpack.c.l.bf16 %v9675_v61 }
  0x2a   : > { %v911_v56 = vrot.slane %v13989_v24, 1  ;;  %v9699_v50 = vsel %vm849_vm2, %v850_v58, %v851_v59  ;;  %v913_v46 = vrot.slane %v13992_v26, 1  ;;  %v915_v54 = vrot.slane %v13994_v28, 1 }
  0x2b   : > { %14130 = vst [vmem:[#allocation8_spill] sm:$0xff] %v9688_v0  ;;  %v916_v55 = vrot.slane %v13995_v4, 1  ;;  %v9708_v24 = vsel %vm849_vm2, %v851_v59, %v853_v62  ;;  %v918_v45 = vrot.slane %v13997_v51, 1  ;;  %v14007_v58 = vunpack.c.l.bf16 %v9686_v5 }
  0x2c   : > { %v912_v14 = vsel %vm849_vm2, %v910_v60, %v911_v56  ;;  %v914_v36 = vsel %vm849_vm2, %v911_v56, %v913_v46  ;;  %v14005_v28 = vunpack.c.h.bf16 %v9686_v5  ;;  %v14006_v4 = vunpack.c.l.bf16 %v9696_v40 }
  0x2d   : > { %v855_v60 = vrot.slane %v733_v41, 1  ;;  %v856_v59 = vrot.slane %v734_v63, 1  ;;  %v9722_v62 = vrot.slane %v733_v41, 2  ;;  %v9724_v51 = vpack.c.bf16 %v914_v36, %v912_v14  ;;  %v9744_v36 = vld [vmem:[%s9504_s20 + $0xbc] sm:$0x1] }
  0x2e   : > { %v9092_v3 = vpop.eup %9091  ;;  %v917_v46 = vsel %vm849_vm2, %v915_v54, %v916_v55  ;;  %v919_v56 = vsel %vm849_vm2, %v916_v55, %v918_v45  ;;  %v9736_v13 = vrot.slane %v734_v63, 2  ;;  %v9738_v41 = vrot.slane %v735_v25, 2  ;;  %v9753_v54 = vld [vmem:[%s9504_s20 + $0x24] sm:$0xff]  }
  0x2f   : > { %v595_v26 = vadd.f32 1.0, %v9092_v3  ;;  %14132 = vst [vmem:[#allocation10_spill] sm:$0xff] %v9724_v51  ;;  %v858_v3 = vrot.slane %v735_v25, 1  ;;  %v14008_v14 = vunpack.c.l.bf16 %v9718_v30  ;;  %v860_v45 = vrot.slane %v14007_v58, 1  ;;  %14134 = vst [vmem:[#allocation12_spill] sm:$0xff] %v9753_v54 }
  0x30   : > { %8358 = vmatmul.mubr.msk.bf16.gmra.mxu1 %vm980_vm3, %v9688_v0  ;;  %v863_v63 = vrot.slane %v14006_v4, 1  ;;  %v14011_v25 = vunpack.c.h.bf16 %v9718_v30  ;;  %v9756_v55 = vpack.c.bf16 %v919_v56, %v917_v46  ;;  %v14017_v12 = vunpack.c.l.bf16 %v9729_v22  ;;  %v9787_v0 = vld [vmem:[%s9504_s20 + $0x3c] sm:$0xff]  }
  0x31   : > { %9093 = vrcp.f32 %v595_v26  ;;  %8361 = vmatprep.mubr.msk.bf16.mxu1 %vm980_vm3, %v9724_v51  ;;  %v861_v26 = vrot.slane %v14005_v28, 1  ;;  %v920_v19 = vrot.slane %v14008_v14, 1  ;;  %v14018_v16 = vunpack.c.l.bf16 %v9732_v21  ;;  %v687_v28 = vld [vmem:[%s9504_s20 + $0x2c] sm:$0x1]  ;;  %v9784_v51 = vld [vmem:[%s9504_s20 + $0x38] sm:$0x1] }
  0x32   : > { %14135 = vst [vmem:[#allocation13_spill] sm:$0xff] %v9756_v55  ;;  %v857_v20 = vsel %vm849_vm2, %v855_v60, %v856_v59  ;;  %v921_v4 = vrot.slane %v14011_v25, 1  ;;  %v14023_v58 = vunpack.c.h.bf16 %v9732_v21  ;;  %v859_v56 = vsel %vm849_vm2, %v856_v59, %v858_v3  ;;  %14138 = vst [vmem:[#allocation15_spill] sm:$0xff] %v9787_v0 }
  0x33   : > { %v739_v14 = vunpack.c.l.bf16 %v9753_v54  ;;  %v923_v35 = vrot.slane %v14017_v12, 1  ;;  %v925_v60 = vrot.slane %v14018_v16, 1  ;;  %v740_v25 = vunpack.c.h.bf16 %v9753_v54 }
  0x34   : > { %v922_v29 = vsel %vm849_vm2, %v920_v19, %v921_v4  ;;  %v926_v46 = vrot.slane %v14023_v58, 1  ;;  %v14137_v59 = vunpack.c.l.bf16 %v9744_v36  ;;  %v862_v12 = vsel %vm849_vm2, %v860_v45, %v861_v26 }
  0x35   : > { %v864_v16 = vsel %vm849_vm2, %v861_v26, %v863_v63  ;;  %v741_v27 = vunpack.c.l.bf16 %v687_v28  ;;  %v924_v19 = vsel %vm849_vm2, %v921_v4, %v923_v35  ;;  %v742_v43 = vunpack.c.l.bf16 %v9775_v31 }
  0x36   : > { %v928_v3 = vrot.slane %v14137_v59, 1  ;;  %v9797_v58 = vpack.c.bf16 %v924_v19, %v922_v29  ;;  %v927_v59 = vsel %vm849_vm2, %v925_v60, %v926_v46  ;;  %v9802_v38 = vpack.c.bf16 %v859_v56, %v857_v20 }
  0x37   : > { %v744_v45 = vunpack.c.l.bf16 %v9784_v51  ;;  %v745_v28 = vunpack.c.l.bf16 %v9787_v0  ;;  %v746_v4 = vunpack.c.h.bf16 %v9787_v0  ;;  %v14141_v35 = vunpack.c.l.bf16 %v9618_v2 }
  0x38   : > { %8362 = vmatmul.mubr.msk.bf16.gmra.mxu1 %vm980_vm3, %v9756_v55  ;;  %14139 = vst [vmem:[#allocation16_spill] sm:$0xff] %v9797_v58  ;;  %v929_v53 = vsel %vm849_vm2, %v926_v46, %v928_v3  ;;  %14140 = vst [vmem:[#allocation17_spill] sm:$0xff] %v9802_v38  ;;  %v743_v55 = vunpack.c.h.bf16 %v9775_v31  ;;  %v14142_v63 = vunpack.c.h.bf16 %v9618_v2  ;;  %v9815_v46 = vpack.c.bf16 %v864_v16, %v862_v12 }
  0x39   : > { %8365 = vmatprep.mubr.msk.bf16.mxu1 %vm980_vm3, %v9797_v58  ;;  %v1407_v26 = vrot.slane %v14141_v35, 2  ;;  %v865_v56 = vrot.slane %v739_v14, 1  ;;  %v9817_v60 = vpack.c.bf16 %v929_v53, %v927_v59  ;;  %v14145_v51 = vunpack.c.l.bf16 %v9625_v7 }
  0x3a   : > { %v1408_v20 = vrot.slane %v14142_v63, 2  ;;  %14143 = vst [vmem:[#allocation18_spill] sm:$0xff] %v9815_v46  ;;  %v866_v19 = vrot.slane %v740_v25, 1  ;;  %v868_v58 = vrot.slane %v741_v27, 1  ;;  %v870_v22 = vrot.slane %v742_v43, 1 }
  0x3b   : > { %14144 = vst [vmem:[#allocation19_spill] sm:$0xff] %v9817_v60  ;;  %v1410_v3 = vrot.slane %v14145_v51, 2  ;;  %v871_v0 = vrot.slane %v743_v55, 1  ;;  %v873_v31 = vrot.slane %v744_v45, 1  ;;  %v875_v35 = vrot.slane %v745_v28, 1 }
  0x3c   : > { %v1409_v30 = vsel %vm1406_vm4, %v1407_v26, %v1408_v20  ;;  %v876_v16 = vrot.slane %v746_v4, 1  ;;  %v14146_v53 = vunpack.c.l.bf16 %v9795_v11  ;;  %v1414_v7 = vsel %vm1406_vm4, %v9722_v62, %v9736_v13 }
  0x3d   : > { %v1411_v54 = vsel %vm1406_vm4, %v1408_v20, %v1410_v3  ;;  %v1416_v26 = vsel %vm1406_vm4, %v9736_v13, %v9738_v41  ;;  %v14147_v20 = vunpack.c.l.bf16 %v9686_v5  ;;  %v1422_v3 = vrot.slane %v739_v14, 2 }
  0x3e   : > { %v9094_v29 = vpop.eup %9093  ;;  %v878_v59 = vrot.slane %v14146_v53, 1  ;;  %v1519_v63 = vpack.c.bf16 %v1411_v54, %v1409_v30  ;;  %v14149_v30 = vunpack.c.l.bf16 %v9696_v40  ;;  %v1423_v53 = vrot.slane %v740_v25, 2 }
  0x3f   : > { %v598_v12 = vmul.f32 %v9094_v29, %v9499_v6  ;;  %v1417_v51 = vrot.slane %v14147_v20, 2  ;;  %v14148_v6 = vunpack.c.h.bf16 %v9686_v5  ;;  %v1425_v62 = vrot.slane %v741_v27, 2 }
  0x40   : > { %8366 = vmatmul.mubr.msk.bf16.gmra.mxu1 %vm980_vm3, %v9817_v60  ;;  %v1420_v54 = vrot.slane %v14149_v30, 2  ;;  %v14150_v13 = vpack.c.bf16 %v9708_v24, %v9699_v50  ;;  %v867_v41 = vsel %vm849_vm2, %v865_v56, %v866_v19  ;;  %v869_v20 = vsel %vm849_vm2, %v866_v19, %v868_v58 }
  0x41   : > { %v1418_v29 = vrot.slane %v14148_v6, 2  ;;  %8333 = vmatmul.mubr.msk.f32.vlgmr.msra.gmra.mxu0 %vm602_vm5, %v598_v12  ;;  %8405 = vmatprep.mubr.msk.bf16.mxu1 %vm980_vm3, %v1519_v63  ;;  %v1427_v63 = vrot.slane %v742_v43, 2  ;;  %v872_v40 = vsel %vm849_vm2, %v870_v22, %v871_v0  ;;  %v874_v27 = vsel %vm849_vm2, %v871_v0, %v873_v31  ;;  %v9862_v43 = vld [vmem:[%s14122_s0 + $0x6] sm:$0x3] }
  0x42   : > { %8336 = vmatpush3.bf16.msra.mxu0 %v9475_v1  ;;  %8337 = vmatprep.mubr.msk.bf16.mxu0 %vm980_vm3, %v14150_v13  ;;  %v1428_v14 = vrot.slane %v743_v55, 2  ;;  %v877_v50 = vsel %vm849_vm2, %v875_v35, %v876_v16  ;;  %v879_v24 = vsel %vm849_vm2, %v876_v16, %v878_v59  ;;  %v9857_v25 = vpack.c.bf16 %v1416_v26, %v1414_v7 }
  0x43   : > { %v1419_v12 = vsel %vm1406_vm4, %v1417_v51, %v1418_v29  ;;  %9025 = vmatprep.subr.msk.bf16.mxu0 %vm1029_vm0, %v9643_v33  ;;  %v1421_v1 = vsel %vm1406_vm4, %v1418_v29, %v1420_v54  ;;  %v1430_v58 = vrot.slane %v744_v45, 2  ;;  %v2000_v22 = vsel %vm1029_vm0, %v9591_v52, 0 }
  0x44   : > { %v9868_v0 = vpack.c.bf16 %v1421_v1, %v1419_v12  ;;  %v1424_v31 = vsel %vm1406_vm4, %v1422_v3, %v1423_v53  ;;  %v1426_v33 = vsel %vm1406_vm4, %v1423_v53, %v1425_v62  ;;  %v1429_v55 = vsel %vm1406_vm4, %v1427_v63, %v1428_v14 }
  0x45   : > { %8338 = vmatmul.mubr.msk.bf16.vlgmr.msra.gmra.mxu0 %vm980_vm3, %v9802_v38  ;;  %v1431_v45 = vsel %vm1406_vm4, %v1428_v14, %v1430_v58  ;;  %v1432_v56 = vrot.slane %v745_v28, 2  ;;  %v1433_v19 = vrot.slane %v746_v4, 2  ;;  %v9877_v35 = vpack.c.bf16 %v869_v20, %v867_v41 }
  0x46   : > { %8370 = vmatpush3.bf16.msra.mxu0 %v9658_v44  ;;  %8341 = vmatprep.mubr.msk.bf16.mxu0 %vm980_vm3, %v9815_v46  ;;  %v9879_v52 = vpack.c.bf16 %v874_v27, %v872_v40  ;;  %v9881_v16 = vpack.c.bf16 %v879_v24, %v877_v50  ;;  %v9888_v44 = vld [vmem:[%s14122_s0 + $0xc] sm:$0x3]  ;;  %v9892_v59 = vpack.c.bf16 %v1426_v33, %v1424_v31  ;;  %v14154_v28 = vunpack.c.l.bf16 %v9795_v11 }
  0x47   : > { %14151 = vst [vmem:[#allocation20_spill] sm:$0xff] %v9877_v35  ;;  %9027 = vmatprep.subr.msk.bf16.mxu0 %vm1029_vm0, %v9862_v43  ;;  %v14155_v7 = vunpack.c.l.bf16 %v9515_v10  ;;  %v14156_v51 = vunpack.c.h.bf16 %v9515_v10  ;;  %v9902_v29 = vpack.c.bf16 %v1431_v45, %v1429_v55  ;;  %v14157_v30 = vunpack.c.l.bf16 %v9509_v8 }
  0x48   : > { %14152 = vst [vmem:[#allocation21_spill] sm:$0xff] %v9879_v52  ;;  %14153 = vst [vmem:[#allocation22_spill] sm:$0xff] %v9881_v16  ;;  %8406 = vmatmul.mubr.msk.bf16.vlgmr.msra.gmra.mxu1 %vm980_vm3, %v9857_v25  ;;  %v1435_v4 = vrot.slane %v14154_v28, 2  ;;  %v14158_v3 = vunpack.c.h.bf16 %v9509_v8  ;;  %v14159_v11 = vunpack.c.l.bf16 %v9522_v15  ;;  %v1434_v13 = vsel %vm1406_vm4, %v1432_v56, %v1433_v19 }
  0x49   : > { %v1442_v26 = vrot.slane %v14155_v7, 2  ;;  %v1443_v6 = vrot.slane %v14156_v51, 2  ;;  %8472 = vmatpush3.bf16.msra.mxu1 %v2000_v22  ;;  %8409 = vmatprep.mubr.msk.bf16.mxu1 %vm980_vm3, %v9868_v0  ;;  %v1437_v54 = vrot.slane %v14157_v30, 2  ;;  %v14160_v20 = vunpack.c.l.bf16 %v9526_v17 }
  0x4a   : > { %v1438_v53 = vrot.slane %v14158_v3, 2  ;;  %v1445_v62 = vrot.slane %v14159_v11, 2  ;;  %v14161_v63 = vunpack.c.h.bf16 %v9526_v17  ;;  %9030 = vmatprep.subr.msk.bf16.mxu1 %vm1029_vm0, %v9888_v44  ;;  %v14162_v1 = vunpack.c.l.bf16 %v9529_v18 }
  0x4b   : > { %v1444_v41 = vsel %vm1406_vm4, %v1442_v26, %v1443_v6  ;;  %v1447_v12 = vrot.slane %v14160_v20, 2  ;;  %v14163_v15 = vunpack.c.l.bf16 %v9536_v23  ;;  %v14164_v24 = vunpack.c.h.bf16 %v9536_v23 }
  0x4c   : > { %v1448_v40 = vrot.slane %v14161_v63, 2  ;;  %v1446_v27 = vsel %vm1406_vm4, %v1443_v6, %v1445_v62  ;;  %v1450_v14 = vrot.slane %v14162_v1, 2  ;;  %v14165_v22 = vunpack.c.l.bf16 %v9512_v9 }
  0x4d   : > { %v1452_v50 = vrot.slane %v14163_v15, 2  ;;  %v1453_v58 = vrot.slane %v14164_v24, 2  ;;  %v9927_v33 = vpack.c.bf16 %v1446_v27, %v1444_v41  ;;  %v14166_v45 = vunpack.c.l.bf16 %v9554_v32  ;;  %8342 = vmatmul.mubr.msk.bf16.gmra.mxu0 %vm980_vm3, %v9877_v35 }
  0x4e   : > { %v1440_v31 = vrot.slane %v14165_v22, 2  ;;  %v1449_v55 = vsel %vm1406_vm4, %v1447_v12, %v1448_v40  ;;  %v1436_v18 = vsel %vm1406_vm4, %v1433_v19, %v1435_v4  ;;  %v1451_v28 = vsel %vm1406_vm4, %v1448_v40, %v1450_v14  ;;  %8345 = vmatprep.mubr.msk.bf16.mxu0 %vm980_vm3, %v9879_v52 }
  0x4f   : > { %v1455_v56 = vrot.slane %v14166_v45, 2  ;;  %v1454_v7 = vsel %vm1406_vm4, %v1452_v50, %v1453_v58  ;;  %v14167_v26 = vunpack.c.l.bf16 %v9562_v37  ;;  %v9941_v51 = vpack.c.bf16 %v1451_v28, %v1449_v55 }
  0x50   : > { %v14168_v6 = vunpack.c.h.bf16 %v9562_v37  ;;  %v14169_v3 = vunpack.c.l.bf16 %v9571_v42  ;;  %v14170_v11 = vunpack.c.l.bf16 %v9579_v47  ;;  %v14171_v41 = vunpack.c.h.bf16 %v9579_v47  ;;  %8410 = vmatmul.mubr.msk.bf16.gmra.mxu1 %vm980_vm3, %v9892_v59 }
  0x51   : > { %v1457_v9 = vrot.slane %v14167_v26, 2  ;;  %v1456_v32 = vsel %vm1406_vm4, %v1453_v58, %v1455_v56  ;;  %v14172_v12 = vunpack.c.l.bf16 %v9603_v57  ;;  %v1439_v40 = vsel %vm1406_vm4, %v1437_v54, %v1438_v53  ;;  %8413 = vmatprep.mubr.msk.bf16.mxu1 %vm980_vm3, %v9902_v29 }
  0x52   : > { %v1458_v30 = vrot.slane %v14168_v6, 2  ;;  %v1460_v19 = vrot.slane %v14169_v3, 2  ;;  %v9948_v4 = vpack.c.bf16 %v1456_v32, %v1454_v7  ;;  %v1462_v62 = vrot.slane %v14170_v11, 2 }
  0x53   : > { %v1463_v20 = vrot.slane %v14171_v41, 2  ;;  %v1465_v63 = vrot.slane %v14172_v12, 2  ;;  %v1441_v27 = vsel %vm1406_vm4, %v1438_v53, %v1440_v31  ;;  %v14173_v50 = vunpack.c.l.bf16 %v9650_v39 }
  0x54   : > { %v1459_v42 = vsel %vm1406_vm4, %v1457_v9, %v1458_v30  ;;  %v1461_v1 = vsel %vm1406_vm4, %v1458_v30, %v1460_v19  ;;  %v14174_v54 = vunpack.c.h.bf16 %v9650_v39  ;;  %v14175_v22 = vunpack.c.l.bf16 %v9661_v48 }
  0x55   : > { %v9964_v14 = vpack.c.bf16 %v1461_v1, %v1459_v42  ;;  %v1464_v15 = vsel %vm1406_vm4, %v1462_v62, %v1463_v20  ;;  %v1466_v57 = vsel %vm1406_vm4, %v1463_v20, %v1465_v63  ;;  %v1467_v24 = vrot.slane %v14173_v50, 2  ;;  %8346 = vmatmul.mubr.msk.bf16.gmra.mxu0 %vm980_vm3, %v9881_v16  ;;  %v14184_v42 = vld [vmem:[#allocation15_spill] sm:$0xff]  ;;  %v14185_v1 = vld [vmem:[#allocation9_spill] sm:$0xff] }
  0x56   : > { %v9970_v58 = vpack.c.bf16 %v1466_v57, %v1464_v15  ;;  %v1468_v53 = vrot.slane %v14174_v54, 2  ;;  %v1470_v31 = vrot.slane %v14175_v22, 2  ;;  %v14176_v55 = vunpack.c.l.bf16 %v9664_v49  ;;  %8371 = vmatprep.mubr.msk.bf16.mxu0 %vm980_vm3, %v9618_v2  ;;  %v14188_v54 = vld [vmem:[#allocation11_spill] sm:$0xff] }
  0x57   : > { %v14177_v56 = vunpack.c.h.bf16 %v9664_v49  ;;  %v14178_v7 = vunpack.c.l.bf16 %v9675_v61  ;;  %v9982_v9 = vpack.c.bf16 %v1436_v18, %v1434_v13  ;;  %v9988_v48 = vpack.c.bf16 %v1441_v27, %v1439_v40  ;;  %v14183_v27 = vld [vmem:[#allocation14_spill] sm:$0xff] }
  0x58   : > { %v1472_v45 = vrot.slane %v14176_v55, 2  ;;  %v1469_v32 = vsel %vm1406_vm4, %v1467_v24, %v1468_v53  ;;  %v1471_v6 = vsel %vm1406_vm4, %v1468_v53, %v1470_v31  ;;  %v14179_v13 = vunpack.c.l.bf16 %v9732_v21 }
  0x59   : > { %v1473_v28 = vrot.slane %v14177_v56, 2  ;;  %v1475_v26 = vrot.slane %v14178_v7, 2  ;;  %v9990_v30 = vpack.c.bf16 %v1471_v6, %v1469_v32  ;;  %v14180_v11 = vunpack.c.h.bf16 %v9732_v21  ;;  %8414 = vmatmul.mubr.msk.bf16.gmra.mxu1 %vm980_vm3, %v9982_v9  ;;  %v10083_v7 = vld [vmem:[%s9504_s20 + $0xc0] sm:$0xff]  }
  0x5a   : > { %v1482_v18 = vrot.slane %v14179_v13, 2  ;;  %v14181_v41 = vunpack.c.l.bf16 %v9744_v36  ;;  %8417 = vmatprep.mubr.msk.bf16.mxu1 %vm980_vm3, %v9988_v48  ;;  %v1788_v40 = vsel %vm1029_vm0, %v9862_v43, 0  ;;  %v7663_v36 = vld [vmem:[%s14122_s0 + $0xa] sm:$0x3]  ;;  %v14182_v43 = vld [vmem:[#allocation12_spill] sm:$0xff]  ;;  %v14186_v15 = vunpack.c.l.bf16 %v14185_v1 }
  0x5b   : > { %v1474_v3 = vsel %vm1406_vm4, %v1472_v45, %v1473_v28  ;;  %v1476_v19 = vsel %vm1406_vm4, %v1473_v28, %v1475_v26  ;;  %v1483_v62 = vrot.slane %v14180_v11, 2  ;;  %v14187_v50 = vunpack.c.h.bf16 %v14185_v1  ;;  %v7715_v28 = vld [vmem:[%s14122_s0 + $0x10] sm:$0x3]  ;;  %v726_v26 = vld [vmem:[%s9504_s20 + $0xc8] sm:$0x1] }
  0x5c   : > { %v9996_v61 = vpack.c.bf16 %v1476_v19, %v1474_v3  ;;  %v1485_v20 = vrot.slane %v14181_v41, 2  ;;  %v1477_v57 = vrot.slane %v14186_v15, 2  ;;  %v14189_v53 = vunpack.c.l.bf16 %v14188_v54  ;;  %v14190_v41 = vld [vmem:[#allocation3_spill] sm:$0xff]  ;;  %v14195_v15 = vld [vmem:[#allocation8_spill] sm:$0xff] }
  0x5d   : > { %v1484_v12 = vsel %vm1406_vm4, %v1482_v18, %v1483_v62  ;;  %8372 = vmatmul.mubr.msk.bf16.vlgmr.msra.gmra.mxu0 %vm980_vm3, %v9646_v34  ;;  %v1478_v24 = vrot.slane %v14187_v50, 2  ;;  %v2411_v56 = vsel %vm1029_vm0, %v9888_v44, 0  ;;  %v778_v44 = vunpack.c.l.bf16 %v10083_v7  ;;  %v14197_v50 = vld [vmem:[#allocation13_spill] sm:$0xff] }
  0x5e   : > { %v1486_v2 = vsel %vm1406_vm4, %v1483_v62, %v1485_v20  ;;  %8438 = vmatpush3.bf16.msra.mxu0 %v1788_v40  ;;  %8375 = vmatprep.mubr.msk.bf16.mxu0 %vm980_vm3, %v9686_v5  ;;  %v1480_v22 = vrot.slane %v14189_v53, 2  ;;  %v779_v32 = vunpack.c.h.bf16 %v10083_v7  ;;  %v780_v6 = vunpack.c.l.bf16 %v726_v26  ;;  %v14191_v20 = vld [vmem:[#allocation4_spill] sm:$0xff]  ;;  %v14193_v40 = vld [vmem:[#allocation6_spill] sm:$0xff] }
  0x5f   : > { %v10010_v63 = vpack.c.bf16 %v1486_v2, %v1484_v12  ;;  %9029 = vmatprep.subr.msk.bf16.mxu0 %vm1029_vm0, %v7663_v36  ;;  %v1479_v31 = vsel %vm1406_vm4, %v1477_v57, %v1478_v24  ;;  %v2195_v3 = vrot.slane %v778_v44, 2  ;;  %v2209_v12 = vsel %vm1029_vm0, %v7663_v36, 0  ;;  %v7698_v2 = vld [vmem:[%s14122_s0 + $0xe] sm:$0x3]  ;;  %v14194_v36 = vld [vmem:[#allocation7_spill] sm:$0xff] }
  0x60   : > { %v1481_v55 = vsel %vm1406_vm4, %v1478_v24, %v1480_v22  ;;  %v2196_v19 = vrot.slane %v779_v32, 2  ;;  %v2198_v13 = vrot.slane %v780_v6, 2  ;;  %v14196_v57 = vld [vmem:[#allocation10_spill] sm:$0xff]  ;;  %v1986_v24 = vrot.slane %v778_v44, 1  ;;  %v14198_v22 = vld [vmem:[#allocation16_spill] sm:$0xff] }
  0x61   : > { %8418 = vmatmul.mubr.msk.bf16.gmra.mxu1 %vm980_vm3, %v9927_v33  ;;  %v10052_v45 = vpack.c.bf16 %v1481_v55, %v1479_v31  ;;  %v1987_v54 = vrot.slane %v779_v32, 1  ;;  %v1989_v53 = vrot.slane %v780_v6, 1  ;;  %v2832_v26 = vsel %vm1029_vm0, %v7715_v28, 0 }
  0x62   : > { %8421 = vmatprep.mubr.msk.bf16.mxu1 %vm980_vm3, %v9941_v51  ;;  %v2197_v18 = vsel %vm1406_vm4, %v2195_v3, %v2196_v19  ;;  %v2199_v11 = vsel %vm1406_vm4, %v2196_v19, %v2198_v13  ;;  %v3541_v32 = vlaneseq }
  0x63   : > { %v10098_v62 = vpack.c.bf16 %v2199_v11, %v2197_v18  ;;  %v1988_v31 = vsel %vm849_vm2, %v1986_v24, %v1987_v54  ;;  %v1990_v55 = vsel %vm849_vm2, %v1987_v54, %v1989_v53 }
  0x64   : > { %v3542_v3 = vshrl.u32 %v3541_v32, 7 }
  0x65   : > { %8376 = vmatmul.mubr.msk.bf16.gmra.mxu0 %vm980_vm3, %v14182_v43 }
  0x66   : > { %8379 = vmatprep.mubr.msk.bf16.mxu0 %vm980_vm3, %v14183_v27 }
  0x69   : > { %8422 = vmatmul.mubr.msk.bf16.gmra.mxu1 %vm980_vm3, %v9948_v4 }
  0x6a   : > { %8425 = vmatprep.mubr.msk.bf16.mxu1 %vm980_vm3, %v9964_v14 }
  0x6d   : > { %8380 = vmatmul.mubr.msk.bf16.gmra.mxu0 %vm980_vm3, %v14184_v42 }
  0x6e   : > { %8383 = vmatprep.mubr.msk.bf16.mxu0 %vm980_vm3, %v9509_v8 }
  0x71   : > { %8426 = vmatmul.mubr.msk.bf16.gmra.mxu1 %vm980_vm3, %v9970_v58 }
  0x72   : > { %8429 = vmatprep.mubr.msk.bf16.mxu1 %vm980_vm3, %v9990_v30 }
  0x75   : > { %8384 = vmatmul.mubr.msk.bf16.gmra.mxu0 %vm980_vm3, %v9515_v10 }
  0x76   : > { %8387 = vmatprep.mubr.msk.bf16.mxu0 %vm980_vm3, %v9526_v17 }
  0x79   : > { %8430 = vmatmul.mubr.msk.bf16.gmra.mxu1 %vm980_vm3, %v9996_v61 }
  0x7a   : > { %8433 = vmatprep.mubr.msk.bf16.mxu1 %vm980_vm3, %v10052_v45 }
  0x7d   : > { %8388 = vmatmul.mubr.msk.bf16.gmra.mxu0 %vm980_vm3, %v9536_v23 }
  0x7e   : > { %8391 = vmatprep.mubr.msk.bf16.mxu0 %vm980_vm3, %v9562_v37 }
  0x81   : > { %8434 = vmatmul.mubr.msk.bf16.gmra.mxu1 %vm980_vm3, %v10010_v63 }
  0x82   : > { %8473 = vmatprep.mubr.msk.bf16.mxu1 %vm980_vm3, %v9802_v38 }
  0x85   : > { %8392 = vmatmul.mubr.msk.bf16.gmra.mxu0 %vm980_vm3, %v9579_v47 }
  0x86   : > { %8395 = vmatprep.mubr.msk.bf16.mxu0 %vm980_vm3, %v9650_v39 }
  0x89   : > { %8474 = vmatmul.mubr.msk.bf16.vlgmr.msra.gmra.mxu1 %vm980_vm3, %v9815_v46 }
  0x8a   : > { %8540 = vmatpush3.bf16.msra.mxu1 %v2411_v56  ;;  %8477 = vmatprep.mubr.msk.bf16.mxu1 %vm980_vm3, %v9877_v35  ;;  %v10147_v56 = vpack.c.bf16 %v1990_v55, %v1988_v31 }
  0x8b   : > { %9032 = vmatprep.subr.msk.bf16.mxu1 %vm1029_vm0, %v7715_v28 }
  0x8c   : > { %14199 = vst [vmem:[#allocation12_spill] sm:$0xff] %v10147_v56 }
  0x8d   : > { %8396 = vmatmul.mubr.msk.bf16.gmra.mxu0 %vm980_vm3, %v9664_v49 }
  0x8e   : > { %8399 = vmatprep.mubr.msk.bf16.mxu0 %vm980_vm3, %v14185_v1 }
  0x91   : > { %8478 = vmatmul.mubr.msk.bf16.gmra.mxu1 %vm980_vm3, %v9879_v52 }
  0x92   : > { %8481 = vmatprep.mubr.msk.bf16.mxu1 %vm980_vm3, %v9881_v16 }
  0x95   : > { %8400 = vmatmul.mubr.msk.bf16.gmra.mxu0 %vm980_vm3, %v9732_v21 }
  0x96   : > { %8439 = vmatprep.mubr.msk.bf16.mxu0 %vm980_vm3, %v9646_v34  ;;  %v14192_v34 = vld [vmem:[#allocation5_spill] sm:$0xff] }
  0x99   : > { %8482 = vmatmul.mubr.msk.bf16.gmra.mxu1 %vm980_vm3, %v14190_v41 }
  0x9a   : > { %8485 = vmatprep.mubr.msk.bf16.mxu1 %vm980_vm3, %v14191_v20 }
  0x9d   : > { %8440 = vmatmul.mubr.msk.bf16.vlgmr.msra.gmra.mxu0 %vm980_vm3, %v9686_v5 }
  0x9e   : > { %8506 = vmatpush3.bf16.msra.mxu0 %v2209_v12  ;;  %8443 = vmatprep.mubr.msk.bf16.mxu0 %vm980_vm3, %v14182_v43 }
  0x9f   : > { %9031 = vmatprep.subr.msk.bf16.mxu0 %vm1029_vm0, %v7698_v2 }
  0xa1   : > { %8486 = vmatmul.mubr.msk.bf16.gmra.mxu1 %vm980_vm3, %v14192_v34 }
  0xa2   : > { %8489 = vmatprep.mubr.msk.bf16.mxu1 %vm980_vm3, %v14193_v40 }
  0xa5   : > { %8444 = vmatmul.mubr.msk.bf16.gmra.mxu0 %vm980_vm3, %v14183_v27 }
  0xa6   : > { %8447 = vmatprep.mubr.msk.bf16.mxu0 %vm980_vm3, %v14184_v42 }
  0xa9   : > { %8490 = vmatmul.mubr.msk.bf16.gmra.mxu1 %vm980_vm3, %v14194_v36 }
  0xaa   : > { %8493 = vmatprep.mubr.msk.bf16.mxu1 %vm980_vm3, %v14195_v15 }
  0xad   : > { %8448 = vmatmul.mubr.msk.bf16.gmra.mxu0 %vm980_vm3, %v9509_v8 }
  0xae   : > { %8451 = vmatprep.mubr.msk.bf16.mxu0 %vm980_vm3, %v9515_v10 }
  0xb1   : > { %8494 = vmatmul.mubr.msk.bf16.gmra.mxu1 %vm980_vm3, %v14196_v57 }
  0xb2   : > { %8497 = vmatprep.mubr.msk.bf16.mxu1 %vm980_vm3, %v14197_v50 }
  0xb5   : > { %8452 = vmatmul.mubr.msk.bf16.gmra.mxu0 %vm980_vm3, %v9526_v17 }
  0xb6   : > { %8455 = vmatprep.mubr.msk.bf16.mxu0 %vm980_vm3, %v9536_v23 }
  0xb9   : > { %8498 = vmatmul.mubr.msk.bf16.gmra.mxu1 %vm980_vm3, %v14198_v22 }
  0xba   : > { %8501 = vmatprep.mubr.msk.bf16.mxu1 %vm980_vm3, %v9817_v60 }
  0xbd   : > { %8456 = vmatmul.mubr.msk.bf16.gmra.mxu0 %vm980_vm3, %v9562_v37 }
  0xbe   : > { %8459 = vmatprep.mubr.msk.bf16.mxu0 %vm980_vm3, %v9579_v47 }
  0xc1   : > { %8502 = vmatmul.mubr.msk.bf16.gmra.mxu1 %vm980_vm3, %v10147_v56 }
  0xc2   : > { %8541 = vmatprep.mubr.msk.bf16.mxu1 %vm980_vm3, %v9686_v5  ;;  %v2623_v5 = vsel %vm1029_vm0, %v7698_v2, 0 }
  0xc5   : > { %8460 = vmatmul.mubr.msk.bf16.gmra.mxu0 %vm980_vm3, %v9650_v39 }
  0xc6   : > { %8463 = vmatprep.mubr.msk.bf16.mxu0 %vm980_vm3, %v9664_v49 }
  0xc9   : > { %8542 = vmatmul.mubr.msk.bf16.vlgmr.msra.gmra.mxu1 %vm980_vm3, %v14182_v43 }
  0xca   : > { %8608 = vmatpush3.bf16.msra.mxu1 %v2832_v26  ;;  %8545 = vmatprep.mubr.msk.bf16.mxu1 %vm980_vm3, %v14183_v27 }
  0xcd   : > { %8464 = vmatmul.mubr.msk.bf16.gmra.mxu0 %vm980_vm3, %v14185_v1 }
  0xce   : > { %8467 = vmatprep.mubr.msk.bf16.mxu0 %vm980_vm3, %v9732_v21 }
  0xd1   : > { %8546 = vmatmul.mubr.msk.bf16.gmra.mxu1 %vm980_vm3, %v14184_v42 }
  0xd2   : > { %8549 = vmatprep.mubr.msk.bf16.mxu1 %vm980_vm3, %v9509_v8  ;;  %v14200_v8 = vmov 0.0  }
  0xd5   : > { %8468 = vmatmul.mubr.msk.bf16.gmra.mxu0 %vm980_vm3, %v10083_v7 }
  0xd6   : > { %8507 = vmatprep.mubr.msk.bf16.mxu0 %vm980_vm3, %v9857_v25 }
  0xd9   : > { %8550 = vmatmul.mubr.msk.bf16.gmra.mxu1 %vm980_vm3, %v9515_v10 }
  0xda   : > { %8553 = vmatprep.mubr.msk.bf16.mxu1 %vm980_vm3, %v9526_v17 }
  0xdd   : > { %8508 = vmatmul.mubr.msk.bf16.vlgmr.msra.gmra.mxu0 %vm980_vm3, %v9868_v0 }
  0xde   : > { %8574 = vmatpush3.bf16.msra.mxu0 %v2623_v5  ;;  %8511 = vmatprep.mubr.msk.bf16.mxu0 %vm980_vm3, %v9892_v59 }
  0xdf   : > { %8641 = vmatprep.subr.mxu0 %v14200_v8 }
  0xe0   : > { %v10188_v43 = vpop.f32.mrf.mxu1 }
  0xe1   : > { %8554 = vmatmul.mubr.msk.bf16.gmra.mxu1 %vm980_vm3, %v9536_v23 }
  0xe2   : > { %8557 = vmatprep.mubr.msk.bf16.mxu1 %vm980_vm3, %v9562_v37  ;;  %v10194_v10 = vpop.f32.mrf.mxu1 }
  0xe4   : > { %v10196_v17 = vpop.f32.mrf.mxu1 }
  0xe5   : > { %8512 = vmatmul.mubr.msk.bf16.gmra.mxu0 %vm980_vm3, %v9902_v29 }
  0xe6   : > { %8515 = vmatprep.mubr.msk.bf16.mxu0 %vm980_vm3, %v9982_v9  ;;  %v10202_v25 = vpop.f32.mrf.mxu1 }
  0xe8   : > { %v10204_v27 = vpop.f32.mrf.mxu1 }
  0xe9   : > { %8558 = vmatmul.mubr.msk.bf16.gmra.mxu1 %vm980_vm3, %v9579_v47 }
  0xea   : > { %8561 = vmatprep.mubr.msk.bf16.mxu1 %vm980_vm3, %v9650_v39  ;;  %v10210_v23 = vpop.f32.mrf.mxu1 }
  0xeb   : > { %14201 = vst [vmem:[#allocation14_spill] sm:$0xff] %v10210_v23 }
  0xec   : > { %v10212_v37 = vpop.f32.mrf.mxu1 }
  0xed   : > { %8516 = vmatmul.mubr.msk.bf16.gmra.mxu0 %vm980_vm3, %v9988_v48 }
  0xee   : > { %8519 = vmatprep.mubr.msk.bf16.mxu0 %vm980_vm3, %v9927_v33  ;;  %v10218_v42 = vpop.f32.mrf.mxu1 }
  0xef   : > { %14202 = vst [vmem:[#allocation15_spill] sm:$0xff] %v10218_v42 }
  0xf0   : > { %v10220_v28 = vpop.f32.mrf.mxu1 }
  0xf1   : > { %8562 = vmatmul.mubr.msk.bf16.gmra.mxu1 %vm980_vm3, %v9664_v49  ;;  %v10243_v49 = vld [vmem:[%s9504_s20 + $0xcc] sm:$0xff]  }
  0xf2   : > { %8565 = vmatprep.mubr.msk.bf16.mxu1 %vm980_vm3, %v14185_v1  ;;  %v10226_v47 = vpop.f32.mrf.mxu1 }
  0xf3   : > { %14203 = vst [vmem:[#allocation9_spill] sm:$0xff] %v10226_v47 }
  0xf4   : > { %v10228_v39 = vpop.f32.mrf.mxu1 }
  0xf5   : > { %8520 = vmatmul.mubr.msk.bf16.gmra.mxu0 %vm980_vm3, %v9941_v51 }
  0xf6   : > { %8523 = vmatprep.mubr.msk.bf16.mxu0 %vm980_vm3, %v9948_v4  ;;  %v10234_v44 = vpop.f32.mrf.mxu1 }
  0xf7   : > { %14204 = vst [vmem:[#allocation11_spill] sm:$0xff] %v10234_v44 }
  0xf8   : > { %v10236_v6 = vpop.f32.mrf.mxu1 }
  0xf9   : > { %8566 = vmatmul.mubr.msk.bf16.gmra.mxu1 %vm980_vm3, %v9732_v21  ;;  %v601_v21 = vld [vmem:[%s13974_s15] sm:$0x1] }
  0xfa   : > { %8569 = vmatprep.mubr.msk.bf16.mxu1 %vm980_vm3, %v10083_v7  ;;  %v10245_v1 = vpop.f32.mrf.mxu1  ;;  %v10258_v7 = vsub.s32 0, %v3542_v3 }
  0xfb   : > { %14205 = vst [vmem:[#allocation23_spill] sm:$0xff] %v10245_v1 }
  0xfc   : > { %v10247_v19 = vpop.f32.mrf.mxu1  ;;  %14208 = vst [vmem:[#allocation26_spill] sm:$0xff] %v10258_v7 }
  0xfd   : > { %14206 = vst [vmem:[#allocation24_spill] sm:$0xff] %v10247_v19  ;;  %8524 = vmatmul.mubr.msk.bf16.gmra.mxu0 %vm980_vm3, %v9964_v14 }
  0xfe   : > { %8527 = vmatprep.mubr.msk.bf16.mxu0 %vm980_vm3, %v9970_v58  ;;  %v10253_v13 = vpop.f32.mrf.mxu1 }
  0xff   : > { %14207 = vst [vmem:[#allocation25_spill] sm:$0xff] %v10253_v13 }
 0x100   : > { %v10260_v18 = vpop.f32.mrf.mxu1 }
 0x101   : > { %14209 = vst [vmem:[#allocation27_spill] sm:$0xff] %v10260_v18  ;;  %8570 = vmatmul.mubr.msk.bf16.gmra.mxu1 %vm980_vm3, %v10243_v49  ;;  %v672_v11 = vpop.f32.mrf.mxu0 }
 0x102   : > { %8609 = vmatprep.mubr.msk.bf16.mxu1 %vm980_vm3, %v9868_v0  ;;  %v10266_v12 = vadd.f32 %v672_v11, %v601_v21  ;;  %v10268_v2 = vpop.f32.mrf.mxu1 }
 0x103   : > { %14211 = vst [vmem:[#allocation29_spill] sm:$0xff] %v10268_v2  ;;  %v8334_v24 = vpop.f32.mrf.mxu0 }
 0x104   : > { %14210 = vst [vmem:[#allocation28_spill] sm:$0xff] %v10266_v12  ;;  %v3733_v54 = vrot.slane %v10266_v12, %v10258_v7  ;;  %v10272_v53 = vpop.f32.mrf.mxu1 }
 0x105   : > { %14212 = vst [vmem:[#allocation30_spill] sm:$0xff] %v10272_v53  ;;  %v8339_v31 = vpop.f32.mrf.mxu0  ;;  %8528 = vmatmul.mubr.msk.bf16.gmra.mxu0 %vm980_vm3, %v9990_v30 }
 0x106   : > { %3735 = vrot.lane.b32.xlu0 %v3733_v54, %s9366_s25  ;;  %8531 = vmatprep.mubr.msk.bf16.mxu0 %vm980_vm3, %v9996_v61  ;;  %v10278_v0 = vpop.f32.mrf.mxu1 }
 0x107   : > { %14213 = vst [vmem:[#allocation31_spill] sm:$0xff] %v10278_v0  ;;  %v1067_v55 = vpop.f32.mrf.mxu0 }
 0x108   : > { %v8407_v26 = vpop.f32.mrf.mxu1 }
 0x109   : > { %8610 = vmatmul.mubr.msk.bf16.vlgmr.msra.gmra.mxu1 %vm980_vm3, %v9892_v59  ;;  %v8340_v5 = vpop.f32.mrf.mxu0 }
 0x10a   : > { %8613 = vmatprep.mubr.msk.bf16.mxu1 %vm980_vm3, %v9902_v29  ;;  %v1622_v32 = vpop.f32.mrf.mxu1 }
 0x10b   : > { %v1070_v3 = vpop.f32.mrf.mxu0 }
 0x10c   : > { %v8408_v21 = vpop.f32.mrf.mxu1 }
 0x10d   : > { %v8343_v11 = vpop.f32.mrf.mxu0  ;;  %8532 = vmatmul.mubr.msk.bf16.gmra.mxu0 %vm980_vm3, %v10052_v45 }
 0x10e   : > { %8535 = vmatprep.mubr.msk.bf16.mxu0 %vm980_vm3, %v10010_v63  ;;  %v1625_v24 = vpop.f32.mrf.mxu1 }
 0x10f   : > { %v1083_v54 = vpop.f32.mrf.mxu0 }
 0x110   : > { %v8411_v38 = vpop.f32.mrf.mxu1 }
 0x111   : > { %8614 = vmatmul.mubr.msk.bf16.gmra.mxu1 %vm980_vm3, %v9982_v9  ;;  %v8344_v59 = vpop.f32.mrf.mxu0 }
 0x112   : > { %8617 = vmatprep.mubr.msk.bf16.mxu1 %vm980_vm3, %v9988_v48  ;;  %v1638_v29 = vpop.f32.mrf.mxu1 }
 0x113   : > { %v1086_v7 = vpop.f32.mrf.mxu0 }
 0x114   : > { %v8412_v12 = vpop.f32.mrf.mxu1 }
 0x115   : > { %v8347_v0 = vpop.f32.mrf.mxu0  ;;  %8536 = vmatmul.mubr.msk.bf16.gmra.mxu0 %vm980_vm3, %v10098_v62 }
 0x116   : > { %8575 = vmatprep.mubr.msk.bf16.mxu0 %vm980_vm3, %v9815_v46  ;;  %v1641_v13 = vpop.f32.mrf.mxu1 }
 0x117   : > { %v1099_v44 = vpop.f32.mrf.mxu0 }
 0x119   : > { %v8415_v42 = vpop.f32.mrf.mxu1  ;;  %8618 = vmatmul.mubr.msk.bf16.gmra.mxu1 %vm980_vm3, %v9927_v33  ;;  %v8348_v9 = vpop.f32.mrf.mxu0 }
 0x11a   : > { %8621 = vmatprep.mubr.msk.bf16.mxu1 %vm980_vm3, %v9941_v51 }
 0x11b   : > { %v1654_v48 = vpop.f32.mrf.mxu1  ;;  %v1102_v47 = vpop.f32.mrf.mxu0 }
 0x11d   : > { %v10300_v23 = vpop.f32.mrf.mxu1  ;;  %v8373_v53 = vpop.f32.mrf.mxu0  ;;  %8576 = vmatmul.mubr.msk.bf16.vlgmr.msra.gmra.mxu0 %vm980_vm3, %v9877_v35 }
 0x11e   : > { %v1288_v2 = vadd.f32 %v8373_v53, %v8339_v31  ;;  %8579 = vmatprep.mubr.msk.bf16.mxu0 %vm980_vm3, %v9879_v52 }
 0x11f   : > { %v10306_v46 = vpop.f32.mrf.mxu1  ;;  %v1279_v8 = vpop.f32.mrf.mxu0 }
 0x120   : > { %v1280_v33 = vadd.f32 %v1279_v8, %v1067_v55  ;;  %v10312_v51 = vadd.f32 %v8407_v26, %v1288_v2 }
 0x121   : > { %v10308_v18 = vpop.f32.mrf.mxu1  ;;  %8622 = vmatmul.mubr.msk.bf16.gmra.mxu1 %vm980_vm3, %v9948_v4  ;;  %v8374_v19 = vpop.f32.mrf.mxu0 }
 0x122   : > { %8625 = vmatprep.mubr.msk.bf16.mxu1 %vm980_vm3, %v9964_v14  ;;  %v1291_v35 = vadd.f32 %v8374_v19, %v8340_v5  ;;  %v10318_v31 = vadd.f32 %v1622_v32, %v1280_v33 }
 0x123   : > { %v10316_v53 = vpop.f32.mrf.mxu1  ;;  %v1282_v52 = vpop.f32.mrf.mxu0 }
 0x124   : > { %v1283_v1 = vadd.f32 %v1282_v52, %v1070_v3  ;;  %v10322_v8 = vadd.f32 %v8408_v21, %v1291_v35 }
 0x125   : > { %v10320_v56 = vpop.f32.mrf.mxu1  ;;  %v8377_v55 = vpop.f32.mrf.mxu0  ;;  %8580 = vmatmul.mubr.msk.bf16.gmra.mxu0 %vm980_vm3, %v9881_v16 }
 0x126   : > { %v1304_v4 = vadd.f32 %v8377_v55, %v8343_v11  ;;  %8583 = vmatprep.mubr.msk.bf16.mxu0 %vm980_vm3, %v14190_v41  ;;  %v10330_v19 = vadd.f32 %v1625_v24, %v1283_v1 }
 0x127   : > { %v10328_v14 = vpop.f32.mrf.mxu1  ;;  %v1295_v2 = vpop.f32.mrf.mxu0 }
 0x128   : > { %v1296_v26 = vadd.f32 %v1295_v2, %v1083_v54  ;;  %v10336_v35 = vadd.f32 %v8411_v38, %v1304_v4  ;;  %v782_v4 = vunpack.c.h.bf16 %v10243_v49 }
 0x129   : > { %v10332_v5 = vpop.f32.mrf.mxu1  ;;  %8626 = vmatmul.mubr.msk.bf16.gmra.mxu1 %vm980_vm3, %v9970_v58  ;;  %v8378_v52 = vpop.f32.mrf.mxu0 }
 0x12a   : > { %8629 = vmatprep.mubr.msk.bf16.mxu1 %vm980_vm3, %v9990_v30  ;;  %v1307_v32 = vadd.f32 %v8378_v52, %v8344_v59  ;;  %v10342_v21 = vadd.f32 %v1638_v29, %v1296_v26  ;;  %v10355_v30 = vld [vmem:[%s9504_s20 + $0xd4] sm:$0x1] }
 0x12b   : > { %v10340_v3 = vpop.f32.mrf.mxu1  ;;  %v1298_v1 = vpop.f32.mrf.mxu0 }
 0x12c   : > { %v1299_v11 = vadd.f32 %v1298_v1, %v1086_v7  ;;  %v10346_v54 = vadd.f32 %v8412_v12, %v1307_v32 }
 0x12d   : > { %v10344_v24 = vpop.f32.mrf.mxu1  ;;  %v8381_v33 = vpop.f32.mrf.mxu0  ;;  %8584 = vmatmul.mubr.msk.bf16.gmra.mxu0 %vm980_vm3, %v14191_v20 }
 0x12e   : > { %v1320_v38 = vadd.f32 %v8381_v33, %v8347_v0  ;;  %8587 = vmatprep.mubr.msk.bf16.mxu0 %vm980_vm3, %v14192_v34  ;;  %v10357_v59 = vadd.f32 %v1641_v13, %v1299_v11  ;;  %v781_v0 = vunpack.c.l.bf16 %v10243_v49  ;;  %v783_v13 = vunpack.c.l.bf16 %v10355_v30 }
 0x12f   : > { %v10352_v58 = vpop.f32.mrf.mxu1  ;;  %v1311_v29 = vpop.f32.mrf.mxu0  ;;  %v2819_v33 = vrot.slane %v782_v4, 2 }
 0x130   : > { %v1312_v7 = vadd.f32 %v1311_v29, %v1099_v44  ;;  %v10363_v12 = vadd.f32 %v8415_v42, %v1320_v38  ;;  %v2818_v11 = vrot.slane %v781_v0, 2 }
 0x131   : > { %v10359_v55 = vpop.f32.mrf.mxu1  ;;  %8630 = vmatmul.mubr.msk.bf16.gmra.mxu1 %vm980_vm3, %v9996_v61  ;;  %v8382_v2 = vpop.f32.mrf.mxu0 }
 0x132   : > { %8633 = vmatprep.mubr.msk.bf16.mxu1 %vm980_vm3, %v10052_v45  ;;  %v1323_v26 = vadd.f32 %v8382_v2, %v8348_v9  ;;  %v10372_v44 = vadd.f32 %v1654_v48, %v1312_v7  ;;  %v2821_v45 = vrot.slane %v783_v13, 2 }
 0x133   : > { %v10370_v52 = vpop.f32.mrf.mxu1  ;;  %v1314_v32 = vpop.f32.mrf.mxu0 }
 0x134   : > { %v1315_v1 = vadd.f32 %v1314_v32, %v1102_v47  ;;  %v10375_v42 = vadd.f32 %v10300_v23, %v1323_v26  ;;  %v2822_v2 = vsel %vm1406_vm4, %v2819_v33, %v2821_v45 }
 0x135   : > { %v8428_v61 = vpop.f32.mrf.mxu1  ;;  %v8385_v49 = vpop.f32.mrf.mxu0  ;;  %8588 = vmatmul.mubr.msk.bf16.gmra.mxu0 %vm980_vm3, %v14193_v40 }
 0x136   : > { %v1336_v38 = vadd.f32 %v8385_v49, %v10188_v43  ;;  %8591 = vmatprep.mubr.msk.bf16.mxu0 %vm980_vm3, %v14194_v36  ;;  %v10385_v47 = vadd.f32 %v10306_v46, %v1315_v1  ;;  %v2820_v43 = vsel %vm1406_vm4, %v2818_v11, %v2819_v33 }
 0x137   : > { %v10382_v9 = vpop.f32.mrf.mxu1  ;;  %v1327_v48 = vpop.f32.mrf.mxu0 }
 0x138   : > { %v1328_v23 = vadd.f32 %v1327_v48, %v10194_v10  ;;  %v10391_v29 = vadd.f32 %v10308_v18, %v1336_v38  ;;  %v2825_v18 = vpack.c.bf16 %v2822_v2, %v2820_v43 }
 0x139   : > { %v8431_v30 = vpop.f32.mrf.mxu1  ;;  %8634 = vmatmul.mubr.msk.bf16.gmra.mxu1 %vm980_vm3, %v10010_v63  ;;  %v8386_v7 = vpop.f32.mrf.mxu0 }
 0x13a   : > { %8637 = vmatprep.mubr.msk.bf16.mxu1 %vm980_vm3, %v10098_v62  ;;  %v1339_v46 = vadd.f32 %v8386_v7, %v10196_v17  ;;  %v10399_v10 = vadd.f32 %v10316_v53, %v1328_v23 }
 0x13b   : > { %v1718_v26 = vpop.f32.mrf.mxu1  ;;  %v1330_v32 = vpop.f32.mrf.mxu0 }
 0x13c   : > { %v1331_v63 = vadd.f32 %v1330_v32, %v10202_v25  ;;  %v10403_v49 = vadd.f32 %v10320_v56, %v1339_v46 }
 0x13d   : > { %v8432_v1 = vpop.f32.mrf.mxu1  ;;  %v8389_v38 = vpop.f32.mrf.mxu0  ;;  %8592 = vmatmul.mubr.msk.bf16.gmra.mxu0 %vm980_vm3, %v14195_v15 }
 0x13e   : > { %v1352_v62 = vadd.f32 %v8389_v38, %v10204_v27  ;;  %8595 = vmatprep.mubr.msk.bf16.mxu0 %vm980_vm3, %v14196_v57  ;;  %v10413_v53 = vadd.f32 %v10328_v14, %v1331_v63  ;;  %v2610_v63 = vrot.slane %v782_v4, 1  ;;  %v2612_v38 = vrot.slane %v783_v13, 1 }
 0x13f   : > { %v10410_v17 = vpop.f32.mrf.mxu1  ;;  %v10415_v25 = vpop.f32.mrf.mxu0 }
 0x140   : > { %v10419_v56 = vadd.f32 %v10332_v5, %v1352_v62 }
 0x141   : > { %v8435_v11 = vpop.f32.mrf.mxu1  ;;  %8638 = vmatmul.mubr.msk.bf16.gmra.mxu1 %vm980_vm3, %v2825_v18  ;;  %v8390_v33 = vpop.f32.mrf.mxu0 }
 0x142   : > { %v1355_v45 = vadd.f32 %v8390_v33, %v10212_v37 }
 0x143   : > { %v1734_v27 = vpop.f32.mrf.mxu1  ;;  %v10422_v48 = vpop.f32.mrf.mxu0 }
 0x144   : > { %v10425_v7 = vadd.f32 %v10344_v24, %v1355_v45  ;;  %v2609_v24 = vrot.slane %v781_v0, 1 }
 0x145   : > { %v8436_v23 = vpop.f32.mrf.mxu1  ;;  %v8393_v14 = vpop.f32.mrf.mxu0  ;;  %8596 = vmatmul.mubr.msk.bf16.gmra.mxu0 %vm980_vm3, %v14197_v50 }
 0x146   : > { %v1368_v43 = vadd.f32 %v8393_v14, %v10220_v28  ;;  %8599 = vmatprep.mubr.msk.bf16.mxu0 %vm980_vm3, %v14198_v22  ;;  %v2611_v0 = vsel %vm849_vm2, %v2609_v24, %v2610_v63 }
 0x147   : > { %v10432_v5 = vpop.f32.mrf.mxu1  ;;  %v10434_v2 = vpop.f32.mrf.mxu0 }
 0x148   : > { %v10437_v46 = vadd.f32 %v10359_v55, %v1368_v43  ;;  %v14214_v55 = vld [vmem:[#allocation12_spill] sm:$0xff]  ;;  %v14216_v43 = vld [vmem:[#allocation23_spill] sm:$0xff] }
 0x149   : > { %v8475_v37 = vpop.f32.mrf.mxu1  ;;  %v8394_v32 = vpop.f32.mrf.mxu0 }
 0x14a   : > { %v1371_v18 = vadd.f32 %v8394_v32, %v10228_v39  ;;  %v2613_v39 = vsel %vm849_vm2, %v2610_v63, %v2612_v38  ;;  %v14218_v38 = vld [vmem:[#allocation27_spill] sm:$0xff] }
 0x14b   : > { %v2036_v62 = vpop.f32.mrf.mxu1  ;;  %v10440_v33 = vpop.f32.mrf.mxu0  ;;  %v2616_v57 = vpack.c.bf16 %v2613_v39, %v2611_v0 }
 0x14c   : > { %v10442_v45 = vadd.f32 %v8428_v61, %v1371_v18 }
 0x14d   : > { %v8476_v28 = vpop.f32.mrf.mxu1  ;;  %v8397_v14 = vpop.f32.mrf.mxu0  ;;  %8600 = vmatmul.mubr.msk.bf16.gmra.mxu0 %vm980_vm3, %v9817_v60  ;;  %v14217_v60 = vld [vmem:[#allocation24_spill] sm:$0xff] }
 0x14e   : > { %v1384_v22 = vadd.f32 %v8397_v14, %v10236_v6  ;;  %8603 = vmatprep.mubr.msk.bf16.mxu0 %vm980_vm3, %v14214_v55 }
 0x14f   : > { %v10451_v4 = vpop.f32.mrf.mxu1  ;;  %v1375_v13 = vpop.f32.mrf.mxu0 }
 0x150   : > { %14215 = vst [vmem:[#allocation32_spill] sm:$0xff] %v10451_v4  ;;  %v1376_v32 = vadd.f32 %v1375_v13, %v14216_v43  ;;  %v10454_v18 = vadd.f32 %v8431_v30, %v1384_v22  ;;  %v14220_v22 = vmov 0.0  }
 0x151   : > { %v8479_v61 = vpop.f32.mrf.mxu1  ;;  %v8398_v50 = vpop.f32.mrf.mxu0  ;;  %3994 = vst.msk [vmem:[#allocation2] sm:$0xff] %vm3066_vm6, %v14220_v22  ;;  %3995 = vst.msk [vmem:[#allocation2 + $0x8] sm:$0xff] %vm3066_vm6, %v14220_v22 }
 0x152   : > { %v1387_v15 = vadd.f32 %v8398_v50, %v14217_v60  ;;  %v10457_v14 = vadd.f32 %v1718_v26, %v1376_v32  ;;  %v14221_v60 = vld [vmem:[#allocation29_spill] sm:$0xff]  ;;  %v14222_v32 = vld [vmem:[#allocation30_spill] sm:$0xff]  ;;  %3999 = vst.msk [vmem:[#allocation2 + $0x198] sm:$0xff] %vm3066_vm6, %v14220_v22  ;;  %4000 = vst.msk [vmem:[#allocation2 + $0x1a0] sm:$0xff] %vm3066_vm6, %v14220_v22 }
 0x153   : > { %v2052_v6 = vpop.f32.mrf.mxu1  ;;  %v10459_v55 = vpop.f32.mrf.mxu0 }
 0x154   : > { %v10461_v36 = vadd.f32 %v8432_v1, %v1387_v15 }
 0x155   : > { %v8480_v24 = vpop.f32.mrf.mxu1  ;;  %v8401_v63 = vpop.f32.mrf.mxu0  ;;  %8604 = vmatmul.mubr.msk.bf16.gmra.mxu0 %vm980_vm3, %v2616_v57 }
 0x156   : > { %v1400_v13 = vadd.f32 %v8401_v63, %v14218_v38  ;;  %8643 = vmatprep.mubr.msk.f32.mxu0 %vm9365_vm1, %v14220_v22 }
 0x157   : > { %v10465_v43 = vpop.f32.mrf.mxu1  ;;  %v1391_v30 = vpop.f32.mrf.mxu0 }
 0x158   : > { %14219 = vst [vmem:[#allocation23_spill] sm:$0xff] %v10465_v43  ;;  %v1392_v50 = vadd.f32 %v1391_v30, %v14221_v60  ;;  %v10470_v0 = vadd.f32 %v8435_v11, %v1400_v13 }
 0x159   : > { %v8483_v26 = vpop.f32.mrf.mxu1  ;;  %v8402_v39 = vpop.f32.mrf.mxu0 }
 0x15a   : > { %v1403_v15 = vadd.f32 %v8402_v39, %v14222_v32  ;;  %v10473_v40 = vadd.f32 %v1734_v27, %v1392_v50 }
 0x15b   : > { %v2068_v1 = vpop.f32.mrf.mxu1  ;;  %v10475_v57 = vpop.f32.mrf.mxu0 }
 0x15c   : > { %v10477_v38 = vadd.f32 %v8436_v23, %v1403_v15 }
 0x15d   : > { %v8484_v63 = vpop.f32.mrf.mxu1  ;;  %v8441_v34 = vpop.f32.mrf.mxu0 }
 0x15e   : > { %v1953_v20 = vadd.f32 %v8441_v34, %v10312_v51 }
 0x15f   : > { %v10480_v41 = vpop.f32.mrf.mxu1  ;;  %v1824_v30 = vpop.f32.mrf.mxu0 }
 0x160   : > { %14223 = vst [vmem:[#allocation24_spill] sm:$0xff] %v10480_v41  ;;  %v1951_v11 = vadd.f32 %v1824_v30, %v10318_v31  ;;  %v10483_v60 = vadd.f32 %v8475_v37, %v1953_v20 }
 0x161   : > { %v8487_v13 = vpop.f32.mrf.mxu1  ;;  %v8442_v39 = vpop.f32.mrf.mxu0 }
 0x162   : > { %v1954_v27 = vadd.f32 %v8442_v39, %v10322_v8  ;;  %v10486_v32 = vadd.f32 %v2036_v62, %v1951_v11 }
 0x163   : > { %v2084_v50 = vpop.f32.mrf.mxu1  ;;  %v10488_v23 = vpop.f32.mrf.mxu0 }
 0x164   : > { %v10498_v34 = vadd.f32 %v8476_v28, %v1954_v27 }
 0x165   : > { %v8488_v20 = vpop.f32.mrf.mxu1  ;;  %v8445_v51 = vpop.f32.mrf.mxu0 }
 0x166   : > { %v1957_v31 = vadd.f32 %v8445_v51, %v10336_v35 }
 0x167   : > { %v10501_v8 = vpop.f32.mrf.mxu1  ;;  %v1840_v37 = vpop.f32.mrf.mxu0 }
 0x168   : > { %14224 = vst [vmem:[#allocation27_spill] sm:$0xff] %v10501_v8  ;;  %v1955_v62 = vadd.f32 %v1840_v37, %v10342_v21  ;;  %v10504_v30 = vadd.f32 %v8479_v61, %v1957_v31 }
 0x169   : > { %v8491_v15 = vpop.f32.mrf.mxu1  ;;  %v8446_v11 = vpop.f32.mrf.mxu0 }
 0x16a   : > { %v1958_v39 = vadd.f32 %v8446_v11, %v10346_v54  ;;  %v10507_v41 = vadd.f32 %v2052_v6, %v1955_v62 }
 0x16b   : > { %v2100_v16 = vpop.f32.mrf.mxu1  ;;  %v10509_v43 = vpop.f32.mrf.mxu0 }
 0x16c   : > { %14225 = vst [vmem:[#allocation29_spill] sm:$0xff] %v10507_v41  ;;  %v10511_v27 = vadd.f32 %v8480_v24, %v1958_v39 }
 0x16d   : > { %v8492_v28 = vpop.f32.mrf.mxu1  ;;  %v8449_v35 = vpop.f32.mrf.mxu0 }
 0x16e   : > { %v1961_v51 = vadd.f32 %v8449_v35, %v10363_v12 }
 0x16f   : > { %v10514_v8 = vpop.f32.mrf.mxu1  ;;  %v1856_v21 = vpop.f32.mrf.mxu0 }
 0x170   : > { %14226 = vst [vmem:[#allocation30_spill] sm:$0xff] %v10514_v8  ;;  %v1959_v61 = vadd.f32 %v1856_v21, %v10372_v44  ;;  %v10517_v37 = vadd.f32 %v8483_v26, %v1961_v51 }
 0x171   : > { %v8495_v31 = vpop.f32.mrf.mxu1  ;;  %v8450_v54 = vpop.f32.mrf.mxu0 }
 0x172   : > { %v1962_v6 = vadd.f32 %v8450_v54, %v10375_v42  ;;  %v10520_v11 = vadd.f32 %v2068_v1, %v1959_v61  ;;  %v14229_v54 = vld [vmem:[#allocation14_spill] sm:$0xff] }
 0x173   : > { %v2116_v62 = vpop.f32.mrf.mxu1  ;;  %v10522_v41 = vpop.f32.mrf.mxu0  ;;  %v1344_v1 = vadd.f32 %v10415_v25, %v14229_v54 }
 0x174   : > { %14227 = vst [vmem:[#allocation33_spill] sm:$0xff] %v10520_v11  ;;  %v10524_v39 = vadd.f32 %v8484_v63, %v1962_v6 }
 0x175   : > { %v8496_v24 = vpop.f32.mrf.mxu1  ;;  %v8453_v12 = vpop.f32.mrf.mxu0 }
 0x176   : > { %v1965_v35 = vadd.f32 %v8453_v12, %v10391_v29 }
 0x177   : > { %v10527_v8 = vpop.f32.mrf.mxu1  ;;  %v1872_v44 = vpop.f32.mrf.mxu0 }
 0x178   : > { %14228 = vst [vmem:[#allocation34_spill] sm:$0xff] %v10527_v8  ;;  %v1963_v26 = vadd.f32 %v1872_v44, %v10399_v10  ;;  %v10530_v21 = vadd.f32 %v8487_v13, %v1965_v35  ;;  %v1765_v13 = vadd.f32 %v10340_v3, %v1344_v1 }
 0x179   : > { %v8499_v51 = vpop.f32.mrf.mxu1  ;;  %v8454_v42 = vpop.f32.mrf.mxu0 }
 0x17a   : > { %v1966_v61 = vadd.f32 %v8454_v42, %v10403_v49  ;;  %v10535_v63 = vadd.f32 %v2084_v50, %v1963_v26  ;;  %v3237_v49 = vld [vmem:[%s13965_s6] sm:$0xff] }
 0x17b   : > { %v2132_v11 = vpop.f32.mrf.mxu1  ;;  %v10537_v6 = vpop.f32.mrf.mxu0  ;;  %8642 = vmatpush3.msra.mxu0 %v3237_v49 }
 0x17c   : > { %v10539_v12 = vadd.f32 %v8488_v20, %v1966_v61  ;;  %v14230_v20 = vld [vmem:[#allocation9_spill] sm:$0xff]  ;;  %8646 = vmatprep.subr.mxu0 %v14220_v22 }
 0x17d   : > { %v8500_v29 = vpop.f32.mrf.mxu1  ;;  %v8457_v8 = vpop.f32.mrf.mxu0  ;;  %v1360_v26 = vadd.f32 %v10434_v2, %v14230_v20 }
 0x17e   : > { %v1969_v10 = vadd.f32 %v8457_v8, %v10419_v56 }
 0x17f   : > { %v10543_v35 = vpop.f32.mrf.mxu1  ;;  %v1888_v44 = vpop.f32.mrf.mxu0 }
 0x180   : > { %v1967_v4 = vadd.f32 %v1888_v44, %v1765_v13  ;;  %v10545_v54 = vadd.f32 %v8491_v15, %v1969_v10  ;;  %v1769_v13 = vadd.f32 %v10370_v52, %v1360_v26 }
 0x181   : > { %v8503_v25 = vpop.f32.mrf.mxu1  ;;  %v8458_v50 = vpop.f32.mrf.mxu0 }
 0x182   : > { %v1970_v56 = vadd.f32 %v8458_v50, %v10425_v7  ;;  %v10553_v3 = vadd.f32 %v2100_v16, %v1967_v4 }
 0x183   : > { %v2148_v8 = vpop.f32.mrf.mxu1  ;;  %v10556_v42 = vpop.f32.mrf.mxu0 }
 0x184   : > { %14231 = vst [vmem:[#allocation14_spill] sm:$0xff] %v10553_v3  ;;  %v10558_v1 = vadd.f32 %v8492_v28, %v1970_v56 }
 0x185   : > { %v8504_v15 = vpop.f32.mrf.mxu1  ;;  %v8461_v61 = vpop.f32.mrf.mxu0 }
 0x186   : > { %v1973_v10 = vadd.f32 %v8461_v61, %v10437_v46 }
 0x187   : > { %v10562_v44 = vpop.f32.mrf.mxu1  ;;  %v1904_v2 = vpop.f32.mrf.mxu0 }
 0x188   : > { %v1971_v49 = vadd.f32 %v1904_v2, %v1769_v13  ;;  %v10564_v50 = vadd.f32 %v8495_v31, %v1973_v10 }
 0x189   : > { %v8543_v7 = vpop.f32.mrf.mxu1  ;;  %v8462_v16 = vpop.f32.mrf.mxu0 }
 0x18a   : > { %v1974_v4 = vadd.f32 %v8462_v16, %v10442_v45  ;;  %v10567_v22 = vadd.f32 %v2116_v62, %v1971_v49 }
 0x18b   : > { %v2447_v20 = vpop.f32.mrf.mxu1  ;;  %v10569_v28 = vpop.f32.mrf.mxu0 }
 0x18c   : > { %14232 = vst [vmem:[#allocation9_spill] sm:$0xff] %v10567_v22  ;;  %v10571_v3 = vadd.f32 %v8496_v24, %v1974_v4 }
 0x18d   : > { %v8544_v56 = vpop.f32.mrf.mxu1  ;;  %v8465_v46 = vpop.f32.mrf.mxu0 }
 0x18e   : > { %v1977_v52 = vadd.f32 %v8465_v46, %v10454_v18 }
 0x18f   : > { %v10574_v26 = vpop.f32.mrf.mxu1  ;;  %v1920_v61 = vpop.f32.mrf.mxu0 }
 0x190   : > { %v1975_v31 = vadd.f32 %v1920_v61, %v10457_v14  ;;  %v10577_v13 = vadd.f32 %v8499_v51, %v1977_v52 }
 0x191   : > { %v8547_v10 = vpop.f32.mrf.mxu1  ;;  %v8466_v45 = vpop.f32.mrf.mxu0 }
 0x192   : > { %v1978_v62 = vadd.f32 %v8466_v45, %v10461_v36  ;;  %v10582_v49 = vadd.f32 %v2132_v11, %v1975_v31 }
 0x193   : > { %v10580_v2 = vpop.f32.mrf.mxu1  ;;  %v10584_v24 = vpop.f32.mrf.mxu0 }
 0x194   : > { %14233 = vst [vmem:[#allocation35_spill] sm:$0xff] %v10582_v49  ;;  %v10586_v4 = vadd.f32 %v8500_v29, %v1978_v62 }
 0x195   : > { %v8548_v16 = vpop.f32.mrf.mxu1  ;;  %v8469_v18 = vpop.f32.mrf.mxu0 }
 0x196   : > { %v1981_v46 = vadd.f32 %v8469_v18, %v10470_v0 }
 0x197   : > { %v10589_v22 = vpop.f32.mrf.mxu1  ;;  %v1936_v14 = vpop.f32.mrf.mxu0 }
 0x198   : > { %14234 = vst [vmem:[#allocation36_spill] sm:$0xff] %v10589_v22  ;;  %v1979_v51 = vadd.f32 %v1936_v14, %v10473_v40  ;;  %v10592_v61 = vadd.f32 %v8503_v25, %v1981_v46 }
 0x199   : > { %v8551_v52 = vpop.f32.mrf.mxu1  ;;  %v8470_v36 = vpop.f32.mrf.mxu0 }
 0x19a   : > { %v1982_v11 = vadd.f32 %v8470_v36, %v10477_v38  ;;  %v10597_v45 = vadd.f32 %v2148_v8, %v1979_v51 }
 0x19b   : > { %v10595_v31 = vpop.f32.mrf.mxu1  ;;  %v10599_v29 = vpop.f32.mrf.mxu0 }
 0x19c   : > { %14235 = vst [vmem:[#allocation37_spill] sm:$0xff] %v10597_v45  ;;  %v10601_v49 = vadd.f32 %v8504_v15, %v1982_v11 }
 0x19d   : > { %v8552_v62 = vpop.f32.mrf.mxu1  ;;  %v8509_v0 = vpop.f32.mrf.mxu0 }
 0x19e   : > { %v2374_v18 = vadd.f32 %v8509_v0, %v10483_v60 }
 0x19f   : > { %v10604_v22 = vpop.f32.mrf.mxu1  ;;  %v2245_v40 = vpop.f32.mrf.mxu0 }
 0x1a0   : > { %14236 = vst [vmem:[#allocation38_spill] sm:$0xff] %v10604_v22  ;;  %v2372_v25 = vadd.f32 %v2245_v40, %v10486_v32  ;;  %v10607_v14 = vadd.f32 %v8543_v7, %v2374_v18 }
 0x1a1   : > { %v8555_v46 = vpop.f32.mrf.mxu1  ;;  %v8510_v38 = vpop.f32.mrf.mxu0 }
 0x1a2   : > { %v2375_v8 = vadd.f32 %v8510_v38, %v10498_v34  ;;  %v10612_v36 = vadd.f32 %v2447_v20, %v2372_v25 }
 0x1a3   : > { %v10610_v51 = vpop.f32.mrf.mxu1  ;;  %v10614_v15 = vpop.f32.mrf.mxu0 }
 0x1a4   : > { %14237 = vst [vmem:[#allocation39_spill] sm:$0xff] %v10610_v51  ;;  %v10616_v45 = vadd.f32 %v8544_v56, %v2375_v8 }
 0x1a5   : > { %v8556_v11 = vpop.f32.mrf.mxu1  ;;  %v8513_v60 = vpop.f32.mrf.mxu0 }
 0x1a6   : > { %v2378_v0 = vadd.f32 %v8513_v60, %v10504_v30 }
 0x1a7   : > { %v10619_v22 = vpop.f32.mrf.mxu1  ;;  %v10621_v32 = vpop.f32.mrf.mxu0 }
 0x1a8   : > { %14238 = vst [vmem:[#allocation40_spill] sm:$0xff] %v10619_v22  ;;  %v10623_v18 = vadd.f32 %v8547_v10, %v2378_v0 }
 0x1a9   : > { %v8559_v7 = vpop.f32.mrf.mxu1  ;;  %v8514_v34 = vpop.f32.mrf.mxu0 }
 0x1aa   : > { %14239 = vst [vmem:[#allocation41_spill] sm:$0xff] %v10623_v18  ;;  %v2379_v40 = vadd.f32 %v8514_v34, %v10511_v27 }
 0x1ab   : > { %v10626_v20 = vpop.f32.mrf.mxu1  ;;  %v10628_v25 = vpop.f32.mrf.mxu0 }
 0x1ac   : > { %14240 = vst [vmem:[#allocation42_spill] sm:$0xff] %v10626_v20  ;;  %v10630_v56 = vadd.f32 %v8548_v16, %v2379_v40 }
 0x1ad   : > { %v8560_v38 = vpop.f32.mrf.mxu1  ;;  %v8517_v8 = vpop.f32.mrf.mxu0 }
 0x1ae   : > { %14241 = vst [vmem:[#allocation43_spill] sm:$0xff] %v10630_v56  ;;  %v2382_v30 = vadd.f32 %v8517_v8, %v10517_v37 }
 0x1af   : > { %v10633_v60 = vpop.f32.mrf.mxu1  ;;  %v10635_v22 = vpop.f32.mrf.mxu0 }
 0x1b0   : > { %14242 = vst [vmem:[#allocation44_spill] sm:$0xff] %v10633_v60  ;;  %v10637_v10 = vadd.f32 %v8551_v52, %v2382_v30 }
 0x1b1   : > { %v8563_v51 = vpop.f32.mrf.mxu1  ;;  %v8518_v0 = vpop.f32.mrf.mxu0 }
 0x1b2   : > { %14243 = vst [vmem:[#allocation45_spill] sm:$0xff] %v10637_v10  ;;  %v2383_v27 = vadd.f32 %v8518_v0, %v10524_v39 }
 0x1b3   : > { %v10640_v34 = vpop.f32.mrf.mxu1  ;;  %v10642_v18 = vpop.f32.mrf.mxu0 }
 0x1b4   : > { %14244 = vst [vmem:[#allocation46_spill] sm:$0xff] %v10640_v34  ;;  %v10644_v16 = vadd.f32 %v8552_v62, %v2383_v27 }
 0x1b5   : > { %v8564_v20 = vpop.f32.mrf.mxu1  ;;  %v8521_v40 = vpop.f32.mrf.mxu0 }
 0x1b6   : > { %14245 = vst [vmem:[#allocation47_spill] sm:$0xff] %v10644_v16  ;;  %v2386_v37 = vadd.f32 %v8521_v40, %v10530_v21 }
 0x1b7   : > { %v10647_v8 = vpop.f32.mrf.mxu1  ;;  %v10649_v56 = vpop.f32.mrf.mxu0 }
 0x1b8   : > { %14246 = vst [vmem:[#allocation48_spill] sm:$0xff] %v10647_v8  ;;  %v10651_v52 = vadd.f32 %v8555_v46, %v2386_v37 }
 0x1b9   : > { %v8567_v60 = vpop.f32.mrf.mxu1  ;;  %v8522_v30 = vpop.f32.mrf.mxu0 }
 0x1ba   : > { %14247 = vst [vmem:[#allocation49_spill] sm:$0xff] %v10651_v52  ;;  %v2387_v39 = vadd.f32 %v8522_v30, %v10539_v12 }
 0x1bb   : > { %v10654_v0 = vpop.f32.mrf.mxu1  ;;  %v10656_v10 = vpop.f32.mrf.mxu0 }
 0x1bc   : > { %14248 = vst [vmem:[#allocation50_spill] sm:$0xff] %v10654_v0  ;;  %v10658_v62 = vadd.f32 %v8556_v11, %v2387_v39 }
 0x1bd   : > { %v8568_v34 = vpop.f32.mrf.mxu1  ;;  %v8525_v27 = vpop.f32.mrf.mxu0 }
 0x1be   : > { %14249 = vst [vmem:[#allocation51_spill] sm:$0xff] %v10658_v62  ;;  %v2390_v21 = vadd.f32 %v8525_v27, %v10545_v54 }
 0x1bf   : > { %v10661_v40 = vpop.f32.mrf.mxu1  ;;  %v10663_v16 = vpop.f32.mrf.mxu0 }
 0x1c0   : > { %14250 = vst [vmem:[#allocation52_spill] sm:$0xff] %v10661_v40  ;;  %v10665_v46 = vadd.f32 %v8559_v7, %v2390_v21 }
 0x1c1   : > { %v8571_v8 = vpop.f32.mrf.mxu1  ;;  %v8526_v37 = vpop.f32.mrf.mxu0 }
 0x1c2   : > { %14251 = vst [vmem:[#allocation53_spill] sm:$0xff] %v10665_v46  ;;  %v2391_v12 = vadd.f32 %v8526_v37, %v10558_v1 }
 0x1c3   : > { %v10668_v30 = vpop.f32.mrf.mxu1  ;;  %v10670_v52 = vpop.f32.mrf.mxu0 }
 0x1c4   : > { %14252 = vst [vmem:[#allocation54_spill] sm:$0xff] %v10668_v30  ;;  %v10672_v11 = vadd.f32 %v8560_v38, %v2391_v12 }
 0x1c5   : > { %v8572_v0 = vpop.f32.mrf.mxu1  ;;  %v8529_v39 = vpop.f32.mrf.mxu0 }
 0x1c6   : > { %14253 = vst [vmem:[#allocation55_spill] sm:$0xff] %v10672_v11  ;;  %v2394_v54 = vadd.f32 %v8529_v39, %v10564_v50 }
 0x1c7   : > { %v10675_v27 = vpop.f32.mrf.mxu1  ;;  %v10677_v62 = vpop.f32.mrf.mxu0 }
 0x1c8   : > { %14254 = vst [vmem:[#allocation56_spill] sm:$0xff] %v10675_v27  ;;  %v10681_v7 = vadd.f32 %v8563_v51, %v2394_v54 }
 0x1c9   : > { %v10679_v40 = vpop.f32.mrf.mxu1  ;;  %v8530_v21 = vpop.f32.mrf.mxu0 }
 0x1ca   : > { %14255 = vst [vmem:[#allocation57_spill] sm:$0xff] %v10681_v7  ;;  %v2395_v1 = vadd.f32 %v8530_v21, %v10571_v3 }
 0x1cb   : > { %v10684_v37 = vpop.f32.mrf.mxu1  ;;  %v10686_v46 = vpop.f32.mrf.mxu0 }
 0x1cc   : > { %v10690_v12 = vadd.f32 %v8564_v20, %v2395_v1  ;;  %v14261_v20 = vld [vmem:[#allocation15_spill] sm:$0xff] }
 0x1cd   : > { %v10688_v38 = vpop.f32.mrf.mxu1  ;;  %v8533_v50 = vpop.f32.mrf.mxu0  ;;  %v1347_v1 = vadd.f32 %v10422_v48, %v14261_v20 }
 0x1ce   : > { %14256 = vst [vmem:[#allocation58_spill] sm:$0xff] %v10690_v12  ;;  %v2398_v39 = vadd.f32 %v8533_v50, %v10577_v13  ;;  %v14262_v12 = vld [vmem:[#allocation11_spill] sm:$0xff] }
 0x1cf   : > { %v10693_v27 = vpop.f32.mrf.mxu1  ;;  %v10695_v11 = vpop.f32.mrf.mxu0  ;;  %v1363_v13 = vadd.f32 %v10440_v33, %v14262_v12  ;;  %v1766_v33 = vadd.f32 %v10352_v58, %v1347_v1  ;;  %v1964_v58 = vadd.f32 %v10537_v6, %v10413_v53  ;;  %v14266_v6 = vld [vmem:[#allocation29_spill] sm:$0xff] }
 0x1d0   : > { %14257 = vst [vmem:[#allocation59_spill] sm:$0xff] %v10693_v27  ;;  %v10699_v54 = vadd.f32 %v8567_v60, %v2398_v39  ;;  %v14264_v39 = vld [vmem:[#allocation31_spill] sm:$0xff] }
 0x1d1   : > { %v10697_v51 = vpop.f32.mrf.mxu1  ;;  %v8534_v3 = vpop.f32.mrf.mxu0 }
 0x1d2   : > { %14258 = vst [vmem:[#allocation60_spill] sm:$0xff] %v10697_v51  ;;  %14259 = vst [vmem:[#allocation61_spill] sm:$0xff] %v10699_v54  ;;  %v2399_v21 = vadd.f32 %v8534_v3, %v10586_v4  ;;  %v14263_v51 = vld [vmem:[#allocation25_spill] sm:$0xff]  ;;  %v1395_v4 = vadd.f32 %v10475_v57, %v14264_v39  ;;  %v1952_v54 = vadd.f32 %v10488_v23, %v10330_v19  ;;  %v14269_v39 = vld [vmem:[#allocation27_spill] sm:$0xff] }
 0x1d3   : > { %v10702_v7 = vpop.f32.mrf.mxu1  ;;  %v10704_v30 = vpop.f32.mrf.mxu0  ;;  %v1379_v60 = vadd.f32 %v10459_v55, %v14263_v51  ;;  %v1956_v55 = vadd.f32 %v10509_v43, %v10357_v59  ;;  %v1960_v57 = vadd.f32 %v10522_v41, %v10385_v47  ;;  %v14265_v51 = vld [vmem:[#allocation32_spill] sm:$0xff] }
 0x1d4   : > { %14260 = vst [vmem:[#allocation62_spill] sm:$0xff] %v10702_v7  ;;  %v10712_v27 = vadd.f32 %v8568_v34, %v2399_v21  ;;  %v1770_v34 = vadd.f32 %v10382_v9, %v1363_v13  ;;  %v1778_v23 = vadd.f32 %v10432_v5, %v1395_v4  ;;  %v1968_v9 = vadd.f32 %v10556_v42, %v1766_v33  ;;  %v14268_v13 = vld [vmem:[#allocation24_spill] sm:$0xff] }
 0x1d5   : > { %v10710_v50 = vpop.f32.mrf.mxu1  ;;  %v8537_v3 = vpop.f32.mrf.mxu0  ;;  %v1774_v19 = vadd.f32 %v10410_v17, %v1379_v60  ;;  %v2164_v1 = vadd.f32 %v14265_v51, %v1952_v54  ;;  %v2376_v42 = vadd.f32 %v10621_v32, %v14266_v6  ;;  %v2172_v60 = vadd.f32 %v14268_v13, %v1960_v57  ;;  %v14273_v51 = vld [vmem:[#allocation14_spill] sm:$0xff] }
 0x1d6   : > { %v2402_v7 = vadd.f32 %v8537_v3, %v10592_v61  ;;  %v1972_v59 = vadd.f32 %v10569_v28, %v1770_v34  ;;  %v1980_v47 = vadd.f32 %v10599_v29, %v1778_v23  ;;  %v2176_v4 = vadd.f32 %v14269_v39, %v1964_v58  ;;  %v14270_v3 = vld [vmem:[#allocation30_spill] sm:$0xff] }
 0x1d7   : > { %v10721_v48 = vpop.f32.mrf.mxu1  ;;  %v2357_v20 = vpop.f32.mrf.mxu0  ;;  %v1976_v41 = vadd.f32 %v10584_v24, %v1774_v19  ;;  %v2373_v17 = vadd.f32 %v10614_v15, %v2164_v1  ;;  %v2180_v24 = vadd.f32 %v14270_v3, %v1968_v9  ;;  %v2381_v32 = vadd.f32 %v10642_v18, %v2172_v60  ;;  %v14272_v19 = vld [vmem:[#allocation34_spill] sm:$0xff] }
 0x1d8   : > { %v10727_v21 = vadd.f32 %v8571_v8, %v2402_v7  ;;  %v2388_v18 = vadd.f32 %v10663_v16, %v14273_v51 }
 0x1d9   : > { %v10725_v12 = vpop.f32.mrf.mxu1  ;;  %v8538_v61 = vpop.f32.mrf.mxu0  ;;  %v2188_v57 = vadd.f32 %v10543_v35, %v1976_v41  ;;  %v2389_v35 = vadd.f32 %v10670_v52, %v2180_v24  ;;  %v14274_v41 = vld [vmem:[#allocation9_spill] sm:$0xff] }
 0x1da   : > { %v2403_v8 = vadd.f32 %v8538_v61, %v10601_v49  ;;  %v14267_v49 = vld [vmem:[#allocation23_spill] sm:$0xff]  ;;  %v2192_v61 = vadd.f32 %v10562_v44, %v1980_v47 }
 0x1db   : > { %v10740_v7 = vpop.f32.mrf.mxu1  ;;  %v10743_v43 = vpop.f32.mrf.mxu0  ;;  %v2168_v54 = vadd.f32 %v14267_v49, %v1956_v55  ;;  %v2184_v55 = vadd.f32 %v14272_v19, %v1972_v59  ;;  %v14277_v47 = vld [vmem:[#allocation35_spill] sm:$0xff]  ;;  %v14278_v49 = vld [vmem:[#allocation37_spill] sm:$0xff] }
 0x1dc   : > { %v10750_v53 = vadd.f32 %v8572_v0, %v2403_v8  ;;  %v14271_v0 = vld [vmem:[#allocation33_spill] sm:$0xff]  ;;  %v2578_v8 = vadd.f32 %v10580_v2, %v2376_v42  ;;  %v14275_v2 = vld [vmem:[#allocation36_spill] sm:$0xff] }
 0x1dd   : > { %v10748_v5 = vpop.f32.mrf.mxu1  ;;  %v8577_v28 = vpop.f32.mrf.mxu0  ;;  %v2377_v15 = vadd.f32 %v10628_v25, %v2168_v54  ;;  %v2380_v34 = vadd.f32 %v10635_v22, %v14271_v0  ;;  %v2384_v25 = vadd.f32 %v10649_v56, %v10535_v63  ;;  %v2385_v22 = vadd.f32 %v10656_v10, %v2176_v4  ;;  %v10789_v56 = vld [vmem:[%s13962_s3] ss:$0 sm:$0xff] }
 0x1de   : > { %v2788_v29 = vadd.f32 %v8577_v28, %v10607_v14  ;;  %v2575_v14 = vadd.f32 %v10574_v26, %v2373_v17  ;;  %v2392_v63 = vadd.f32 %v10677_v62, %v14274_v41  ;;  %v2396_v17 = vadd.f32 %v10695_v11, %v14277_v47  ;;  %v14279_v28 = vld [vmem:[#allocation39_spill] sm:$0xff]  ;;  %v14290_v41 = vld [vmem:[#allocation54_spill] sm:$0xff] }
 0x1df   : > { %v10759_v33 = vpop.f32.mrf.mxu1  ;;  %v2659_v23 = vpop.f32.mrf.mxu0  ;;  %v2579_v16 = vadd.f32 %v14275_v2, %v2377_v15  ;;  %v10793_v52 = vadd.f32 %v10595_v31, %v2380_v34  ;;  %v2397_v62 = vadd.f32 %v10704_v30, %v2188_v57  ;;  %v2400_v54 = vadd.f32 %v2357_v20, %v14278_v49  ;;  %v14280_v30 = vld [vmem:[#allocation40_spill] sm:$0xff]  ;;  %v14283_v15 = vld [vmem:[#allocation59_spill] sm:$0xff]  ;;  %v14284_v34 = vld [vmem:[#allocation41_spill] sm:$0xff] }
 0x1e0   : > { %v2786_v58 = vadd.f32 %v2659_v23, %v10612_v36  ;;  %v2997_v44 = vadd.f32 %v10679_v40, %v2788_v29  ;;  %v14276_v40 = vld [vmem:[#allocation38_spill] sm:$0xff]  ;;  %v10810_v39 = vadd.f32 %v14279_v28, %v2384_v25  ;;  %v10818_v4 = vadd.f32 %v14280_v30, %v2385_v22  ;;  %v14282_v20 = vld [vmem:[#allocation44_spill] sm:$0xff]  ;;  %v14292_v47 = vld [vmem:[#allocation43_spill] sm:$0xff] }
 0x1e1   : > { %v10770_v9 = vpop.f32.mrf.mxu1  ;;  %v8578_v1 = vpop.f32.mrf.mxu0  ;;  %v10824_v24 = vadd.f32 %v14282_v20, %v2389_v35  ;;  %v14287_v22 = vld [vmem:[#allocation50_spill] sm:$0xff] }
 0x1e2   : > { %v2995_v36 = vadd.f32 %v10684_v37, %v2786_v58  ;;  %v2789_v26 = vadd.f32 %v8578_v1, %v10616_v45  ;;  %v10796_v37 = vadd.f32 %v14276_v40, %v2381_v32  ;;  %v2393_v45 = vadd.f32 %v10686_v46, %v2184_v55  ;;  %v14285_v55 = vld [vmem:[#allocation46_spill] sm:$0xff] }
 0x1e3   : > { %v10782_v59 = vpop.f32.mrf.mxu1  ;;  %v2662_v10 = vpop.f32.mrf.mxu0  ;;  %v10813_v46 = vadd.f32 %v10789_v56, %v2997_v44  ;;  %v10832_v23 = vadd.f32 %v14285_v55, %v2392_v63  ;;  %v10840_v51 = vadd.f32 %v14287_v22, %v2396_v17  ;;  %v10852_v63 = vadd.f32 %v14290_v41, %v2400_v54  ;;  %v14291_v40 = vld [vmem:[#allocation62_spill] sm:$0xff] }
 0x1e4   : > { %v2998_v6 = vadd.f32 %v10688_v38, %v2789_v26  ;;  %v10807_v13 = vadd.f32 %v10789_v56, %v2995_v36  ;;  %v2787_v31 = vadd.f32 %v2662_v10, %v2575_v14  ;;  %v14281_v38 = vld [vmem:[#allocation42_spill] sm:$0xff]  ;;  %v14286_v14 = vld [vmem:[#allocation48_spill] sm:$0xff]  ;;  %v10855_v10 = vadd.f32 %v10743_v43, %v2192_v61 }
 0x1e5   : > { %v10803_v42 = vpop.f32.mrf.mxu1  ;;  %v8581_v60 = vpop.f32.mrf.mxu0  ;;  %v10821_v3 = vadd.f32 %v14281_v38, %v2388_v18  ;;  %v10837_v25 = vadd.f32 %v14286_v14, %v2393_v45  ;;  %v14288_v18 = vld [vmem:[#allocation52_spill] sm:$0xff]  ;;  %v3138_v2 = vmul.f32 %v10813_v46, %v10813_v46  ;;  %v3070_v20 = vsel %vm3066_vm6, %v10813_v46, 0.0 }
 0x1e6   : > { %v10827_v29 = vadd.f32 %v10789_v56, %v2998_v6  ;;  %v2996_v0 = vadd.f32 %v14283_v15, %v2787_v31  ;;  %v2792_v32 = vadd.f32 %v8581_v60, %v14284_v34  ;;  %v10843_v1 = vadd.f32 %v14288_v18, %v2397_v62  ;;  %v14289_v36 = vld [vmem:[#allocation60_spill] sm:$0xff] }
 0x1e7   : > { %v10815_v11 = vpop.f32.mrf.mxu1  ;;  %v2675_v19 = vpop.f32.mrf.mxu0  ;;  %v3136_v35 = vmul.f32 %v10807_v13, %v10807_v13  ;;  %v3067_v6 = vsel %vm3066_vm6, %v10807_v13, 0.0 }
 0x1e8   : > { %v2790_v57 = vadd.f32 %v2675_v19, %v2578_v8  ;;  %v10848_v44 = vadd.f32 %v10789_v56, %v2996_v0  ;;  %v3001_v26 = vadd.f32 %v14289_v36, %v2792_v32  ;;  %v3139_v49 = vmul.f32 %v10827_v29, %v10827_v29 }
 0x1e9   : > { %v10834_v58 = vpop.f32.mrf.mxu1  ;;  %v8582_v8 = vpop.f32.mrf.mxu0  ;;  %v3168_v15 = vsel %vm3066_vm6, %v3136_v35, 0.0  ;;  %v3171_v19 = vsel %vm3066_vm6, %v3138_v2, 0.0  ;;  %v3072_v55 = vsel %vm3066_vm6, %v10827_v29, 0.0  ;;  %v14293_v35 = vld [vmem:[#allocation45_spill] sm:$0xff] }
 0x1ea   : > { %v2999_v45 = vadd.f32 %v14291_v40, %v2790_v57  ;;  %v2793_v17 = vadd.f32 %v8582_v8, %v14292_v47  ;;  %v3068_v54 = vsel %vm3066_vm6, %v10848_v44, 0.0  ;;  %v3137_v43 = vmul.f32 %v10848_v44, %v10848_v44 }
 0x1eb   : > { %v10861_v62 = vpop.f32.mrf.mxu1  ;;  %v2678_v61 = vpop.f32.mrf.mxu0  ;;  %v3069_v31 = vadd.f32 %v3068_v54, %v3067_v6  ;;  %v10882_v34 = vadd.f32 %v10789_v56, %v3001_v26  ;;  %v3173_v8 = vsel %vm3066_vm6, %v3139_v49, 0.0 }
 0x1ec   : > { %v10872_v60 = vadd.f32 %v10789_v56, %v2999_v45  ;;  %v3002_v28 = vadd.f32 %v10710_v50, %v2793_v17  ;;  %v2791_v30 = vadd.f32 %v2678_v61, %v2579_v16  ;;  %v3169_v0 = vsel %vm3066_vm6, %v3137_v43, 0.0  ;;  %v14294_v61 = vld [vmem:[#allocation47_spill] sm:$0xff] }
 0x1ed   : > { %v10875_v38 = vpop.f32.mrf.mxu1  ;;  %v8585_v32 = vpop.f32.mrf.mxu0  ;;  %v3071_v50 = vadd.f32 %v3070_v20, %v3069_v31  ;;  %v3170_v16 = vadd.f32 %v3169_v0, %v3168_v15  ;;  %v3142_v45 = vmul.f32 %v10882_v34, %v10882_v34 }
 0x1ee   : > { %v3140_v14 = vmul.f32 %v10872_v60, %v10872_v60  ;;  %v10892_v22 = vadd.f32 %v10789_v56, %v3002_v28  ;;  %v3000_v18 = vadd.f32 %v10721_v48, %v2791_v30  ;;  %v2796_v36 = vadd.f32 %v8585_v32, %v14293_v35 }
 0x1ef   : > { %v10887_v57 = vpop.f32.mrf.mxu1  ;;  %v2691_v26 = vpop.f32.mrf.mxu0  ;;  %v3172_v41 = vadd.f32 %v3171_v19, %v3170_v16  ;;  %v3073_v2 = vadd.f32 %v3072_v55, %v3071_v50  ;;  %v3074_v47 = vsel %vm3066_vm6, %v10872_v60, 0.0  ;;  %v3078_v55 = vsel %vm3066_vm6, %v10882_v34, 0.0 }
 0x1f0   : > { %v2794_v40 = vadd.f32 %v2691_v26, %v10793_v52  ;;  %v10903_v17 = vadd.f32 %v10789_v56, %v3000_v18  ;;  %v3005_v48 = vadd.f32 %v10725_v12, %v2796_v36  ;;  %v3175_v52 = vsel %vm3066_vm6, %v3140_v14, 0.0 }
 0x1f1   : > { %v8586_v6 = vpop.f32.mrf.mxu0  ;;  %v3075_v54 = vadd.f32 %v3074_v47, %v3073_v2  ;;  %v3174_v43 = vadd.f32 %v3173_v8, %v3172_v41  ;;  %v10908_v28 = vpop.f32.mrf.mxu1  ;;  %v3143_v30 = vmul.f32 %v10892_v22, %v10892_v22  ;;  %v3179_v35 = vsel %vm3066_vm6, %v3142_v45, 0.0  ;;  %v14295_v47 = vld [vmem:[#allocation49_spill] sm:$0xff] }
 0x1f2   : > { %v3003_v49 = vadd.f32 %v10740_v7, %v2794_v40  ;;  %v2797_v31 = vadd.f32 %v8586_v6, %v14294_v61  ;;  %v3076_v20 = vsel %vm3066_vm6, %v10903_v17, 0.0  ;;  %v3141_v12 = vmul.f32 %v10903_v17, %v10903_v17 }
 0x1f3   : > { %v2694_v15 = vpop.f32.mrf.mxu0  ;;  %v3176_v0 = vadd.f32 %v3175_v52, %v3174_v43  ;;  %v3077_v32 = vadd.f32 %v3076_v20, %v3075_v54  ;;  %v10925_v16 = vadd.f32 %v10789_v56, %v3005_v48  ;;  %v3080_v36 = vsel %vm3066_vm6, %v10892_v22, 0.0  ;;  %v10931_v41 = vpop.f32.mrf.mxu1 }
 0x1f4   : > { %v10918_v7 = vadd.f32 %v10789_v56, %v3003_v49  ;;  %v3006_v19 = vadd.f32 %v10748_v5, %v2797_v31  ;;  %v3177_v50 = vsel %vm3066_vm6, %v3141_v12, 0.0  ;;  %v2795_v14 = vadd.f32 %v2694_v15, %v10796_v37  ;;  %v14296_v15 = vld [vmem:[#allocation51_spill] sm:$0xff] }
 0x1f5   : > { %v8589_v18 = vpop.f32.mrf.mxu0  ;;  %v3079_v26 = vadd.f32 %v3078_v55, %v3077_v32  ;;  %v3178_v8 = vadd.f32 %v3177_v50, %v3176_v0  ;;  %v3181_v45 = vsel %vm3066_vm6, %v3143_v30, 0.0  ;;  %v3146_v49 = vmul.f32 %v10925_v16, %v10925_v16  ;;  %v10952_v32 = vpop.f32.mrf.mxu1 }
 0x1f6   : > { %v3144_v5 = vmul.f32 %v10918_v7, %v10918_v7  ;;  %v10936_v2 = vadd.f32 %v10789_v56, %v3006_v19  ;;  %v3004_v40 = vadd.f32 %v10759_v33, %v2795_v14  ;;  %v2800_v37 = vadd.f32 %v8589_v18, %v14295_v47 }
 0x1f7   : > { %v2707_v48 = vpop.f32.mrf.mxu0  ;;  %v3180_v6 = vadd.f32 %v3179_v35, %v3178_v8  ;;  %v3081_v54 = vadd.f32 %v3080_v36, %v3079_v26  ;;  %v3082_v61 = vsel %vm3066_vm6, %v10918_v7, 0.0  ;;  %v3086_v36 = vsel %vm3066_vm6, %v10925_v16, 0.0 }
 0x1f8   : > { %v2798_v43 = vadd.f32 %v2707_v48, %v10810_v39  ;;  %v10947_v31 = vadd.f32 %v10789_v56, %v3004_v40  ;;  %v3009_v33 = vadd.f32 %v10770_v9, %v2800_v37  ;;  %v3183_v39 = vsel %vm3066_vm6, %v3144_v5, 0.0 }
 0x1f9   : > { %v8590_v52 = vpop.f32.mrf.mxu0  ;;  %v3083_v20 = vadd.f32 %v3082_v61, %v3081_v54  ;;  %v3182_v12 = vadd.f32 %v3181_v45, %v3180_v6  ;;  %v3147_v19 = vmul.f32 %v10936_v2, %v10936_v2  ;;  %v3187_v47 = vsel %vm3066_vm6, %v3146_v49, 0.0  ;;  %v10975_v6 = vpop.f32.mrf.mxu1  ;;  %v14297_v61 = vld [vmem:[#allocation53_spill] sm:$0xff] }
 0x1fa   : > { %v3007_v30 = vadd.f32 %v10782_v59, %v2798_v43  ;;  %v2801_v0 = vadd.f32 %v8590_v52, %v14296_v15  ;;  %v3084_v55 = vsel %vm3066_vm6, %v10947_v31, 0.0  ;;  %v3145_v9 = vmul.f32 %v10947_v31, %v10947_v31 }
 0x1fb   : > { %v2710_v50 = vpop.f32.mrf.mxu0  ;;  %v3184_v14 = vadd.f32 %v3183_v39, %v3182_v12  ;;  %v3085_v18 = vadd.f32 %v3084_v55, %v3083_v20  ;;  %v10969_v8 = vadd.f32 %v10789_v56, %v3009_v33  ;;  %v3088_v37 = vsel %vm3066_vm6, %v10936_v2, 0.0 }
 0x1fc   : > { %v10962_v59 = vadd.f32 %v10789_v56, %v3007_v30  ;;  %v3010_v35 = vadd.f32 %v10803_v42, %v2801_v0  ;;  %v3185_v26 = vsel %vm3066_vm6, %v3145_v9, 0.0  ;;  %v2799_v5 = vadd.f32 %v2710_v50, %v10818_v4  ;;  %v14298_v50 = vld [vmem:[#allocation55_spill] sm:$0xff] }
 0x1fd   : > { %v8593_v40 = vpop.f32.mrf.mxu0  ;;  %v3087_v48 = vadd.f32 %v3086_v36, %v3085_v18  ;;  %v3186_v45 = vadd.f32 %v3185_v26, %v3184_v14  ;;  %v3189_v49 = vsel %vm3066_vm6, %v3147_v19, 0.0  ;;  %v3150_v30 = vmul.f32 %v10969_v8, %v10969_v8  ;;  %v10996_v18 = vpop.f32.mrf.mxu1 }
 0x1fe   : > { %v3148_v42 = vmul.f32 %v10962_v59, %v10962_v59  ;;  %v10980_v54 = vadd.f32 %v10789_v56, %v3010_v35  ;;  %v3008_v43 = vadd.f32 %v10815_v11, %v2799_v5  ;;  %v2804_v4 = vadd.f32 %v8593_v40, %v14297_v61 }
 0x1ff   : > { %v2723_v33 = vpop.f32.mrf.mxu0  ;;  %v3188_v52 = vadd.f32 %v3187_v47, %v3186_v45  ;;  %v3089_v20 = vadd.f32 %v3088_v37, %v3087_v48  ;;  %v3090_v15 = vsel %vm3066_vm6, %v10962_v59, 0.0  ;;  %v3094_v37 = vsel %vm3066_vm6, %v10969_v8, 0.0 }
 0x200   : > { %v2802_v12 = vadd.f32 %v2723_v33, %v10821_v3  ;;  %v10991_v0 = vadd.f32 %v10789_v56, %v3008_v43  ;;  %v3013_v11 = vadd.f32 %v10834_v58, %v2804_v4  ;;  %v3191_v3 = vsel %vm3066_vm6, %v3148_v42, 0.0 }
 0x201   : > { %v8594_v39 = vpop.f32.mrf.mxu0  ;;  %v3091_v55 = vadd.f32 %v3090_v15, %v3089_v20  ;;  %v3190_v9 = vadd.f32 %v3189_v49, %v3188_v52  ;;  %v3151_v35 = vmul.f32 %v10980_v54, %v10980_v54  ;;  %v3195_v61 = vsel %vm3066_vm6, %v3150_v30, 0.0  ;;  %v2964_v52 = vpop.f32.mrf.mxu1  ;;  %v14299_v15 = vld [vmem:[#allocation57_spill] sm:$0xff] }
 0x202   : > { %v3011_v19 = vadd.f32 %v10861_v62, %v2802_v12  ;;  %v2805_v14 = vadd.f32 %v8594_v39, %v14298_v50  ;;  %v3092_v36 = vsel %vm3066_vm6, %v10991_v0, 0.0  ;;  %v3149_v58 = vmul.f32 %v10991_v0, %v10991_v0 }
 0x203   : > { %v2726_v26 = vpop.f32.mrf.mxu0  ;;  %v3192_v5 = vadd.f32 %v3191_v3, %v3190_v9  ;;  %v3093_v40 = vadd.f32 %v3092_v36, %v3091_v55  ;;  %v11013_v45 = vadd.f32 %v10789_v56, %v3013_v11  ;;  %v3096_v4 = vsel %vm3066_vm6, %v10980_v54, 0.0 }
 0x204   : > { %v11006_v62 = vadd.f32 %v10789_v56, %v3011_v19  ;;  %v3014_v47 = vadd.f32 %v10875_v38, %v2805_v14  ;;  %v3193_v48 = vsel %vm3066_vm6, %v3149_v58, 0.0  ;;  %v2803_v42 = vadd.f32 %v2726_v26, %v10824_v24  ;;  %v14300_v26 = vld [vmem:[#allocation58_spill] sm:$0xff] }
 0x205   : > { %v8597_v43 = vpop.f32.mrf.mxu0  ;;  %v3095_v33 = vadd.f32 %v3094_v37, %v3093_v40  ;;  %v3194_v49 = vadd.f32 %v3193_v48, %v3192_v5  ;;  %v3197_v39 = vsel %vm3066_vm6, %v3151_v35, 0.0  ;;  %v3154_v19 = vmul.f32 %v11013_v45, %v11013_v45  ;;  %v8636_v40 = vpop.f32.mrf.mxu1 }
 0x206   : > { %v3152_v38 = vmul.f32 %v11006_v62, %v11006_v62  ;;  %v11022_v20 = vadd.f32 %v10789_v56, %v3014_v47  ;;  %v3012_v12 = vadd.f32 %v10887_v57, %v2803_v42  ;;  %v2808_v11 = vadd.f32 %v8597_v43, %v14299_v15 }
 0x207   : > { %v2739_v24 = vpop.f32.mrf.mxu0  ;;  %v3196_v30 = vadd.f32 %v3195_v61, %v3194_v49  ;;  %v3097_v55 = vadd.f32 %v3096_v4, %v3095_v33  ;;  %v3098_v50 = vsel %vm3066_vm6, %v11006_v62, 0.0  ;;  %v3102_v4 = vsel %vm3066_vm6, %v11013_v45, 0.0 }
 0x208   : > { %v2806_v9 = vadd.f32 %v2739_v24, %v10832_v23  ;;  %v11033_v14 = vadd.f32 %v10789_v56, %v3012_v12  ;;  %v3017_v57 = vadd.f32 %v10908_v28, %v2808_v11  ;;  %v3199_v23 = vsel %vm3066_vm6, %v3152_v38, 0.0 }
 0x209   : > { %v8598_v3 = vpop.f32.mrf.mxu0  ;;  %v3099_v36 = vadd.f32 %v3098_v50, %v3097_v55  ;;  %v3198_v58 = vadd.f32 %v3197_v39, %v3196_v30  ;;  %v3155_v47 = vmul.f32 %v11022_v20, %v11022_v20  ;;  %v3203_v15 = vsel %vm3066_vm6, %v3154_v19, 0.0  ;;  %v2967_v30 = vpop.f32.mrf.mxu1  ;;  %v14301_v50 = vld [vmem:[#allocation61_spill] sm:$0xff] }
 0x20a   : > { %v3015_v35 = vadd.f32 %v10931_v41, %v2806_v9  ;;  %v2809_v5 = vadd.f32 %v8598_v3, %v14300_v26  ;;  %v3100_v37 = vsel %vm3066_vm6, %v11033_v14, 0.0  ;;  %v3153_v48 = vmul.f32 %v11033_v14, %v11033_v14 }
 0x20b   : > { %v2742_v28 = vpop.f32.mrf.mxu0  ;;  %v3200_v42 = vadd.f32 %v3199_v23, %v3198_v58  ;;  %v3101_v43 = vadd.f32 %v3100_v37, %v3099_v36  ;;  %v11053_v49 = vadd.f32 %v10789_v56, %v3017_v57  ;;  %v3104_v11 = vsel %vm3066_vm6, %v11022_v20, 0.0 }
 0x20c   : > { %v11046_v61 = vadd.f32 %v10789_v56, %v3015_v35  ;;  %v3018_v41 = vadd.f32 %v10952_v32, %v2809_v5  ;;  %v3201_v33 = vsel %vm3066_vm6, %v3153_v48, 0.0  ;;  %v2807_v38 = vadd.f32 %v2742_v28, %v10837_v25 }
 0x20d   : > { %v8601_v12 = vpop.f32.mrf.mxu0  ;;  %v3103_v24 = vadd.f32 %v3102_v4, %v3101_v43  ;;  %v3202_v39 = vadd.f32 %v3201_v33, %v3200_v42  ;;  %v3205_v32 = vsel %vm3066_vm6, %v3155_v47, 0.0  ;;  %v3158_v35 = vmul.f32 %v11053_v49, %v11053_v49  ;;  %v8639_v42 = vpop.f32.mrf.mxu1 }
 0x20e   : > { %v3156_v55 = vmul.f32 %v11046_v61, %v11046_v61  ;;  %v3016_v9 = vadd.f32 %v10975_v6, %v2807_v38  ;;  %v2812_v57 = vadd.f32 %v8601_v12, %v14301_v50  ;;  %v11065_v19 = vadd.f32 %v10789_v56, %v3018_v41 }
 0x20f   : > { %v2755_v3 = vpop.f32.mrf.mxu0  ;;  %v3204_v25 = vadd.f32 %v3203_v15, %v3202_v39  ;;  %v3105_v36 = vadd.f32 %v3104_v11, %v3103_v24  ;;  %v3106_v26 = vsel %vm3066_vm6, %v11046_v61, 0.0  ;;  %v2980_v50 = vpop.f32.mrf.mxu1 }
 0x210   : > { %v2810_v58 = vadd.f32 %v2755_v3, %v10840_v51  ;;  %v11073_v5 = vadd.f32 %v10789_v56, %v3016_v9  ;;  %v3021_v6 = vadd.f32 %v10996_v18, %v2812_v57  ;;  %v3110_v51 = vsel %vm3066_vm6, %v11053_v49, 0.0  ;;  %v14302_v57 = vld [vmem:[#allocation56_spill] sm:$0xff] }
 0x211   : > { %v8602_v23 = vpop.f32.mrf.mxu0  ;;  %v3107_v47 = vadd.f32 %v3106_v26, %v3105_v36  ;;  %v3206_v37 = vadd.f32 %v3205_v32, %v3204_v25  ;;  %v3207_v43 = vsel %vm3066_vm6, %v3156_v55, 0.0  ;;  %v3159_v38 = vmul.f32 %v11065_v19, %v11065_v19 }
 0x212   : > { %v3019_v48 = vadd.f32 %v2964_v52, %v2810_v58  ;;  %v2813_v28 = vadd.f32 %v8602_v23, %v10712_v27  ;;  %v3108_v41 = vsel %vm3066_vm6, %v11073_v5, 0.0  ;;  %v3157_v4 = vmul.f32 %v11073_v5, %v11073_v5 }
 0x213   : > { %v2758_v33 = vpop.f32.mrf.mxu0  ;;  %v3208_v18 = vadd.f32 %v3207_v43, %v3206_v37  ;;  %v3109_v52 = vadd.f32 %v3108_v41, %v3107_v47  ;;  %v11091_v15 = vadd.f32 %v10789_v56, %v3021_v6  ;;  %v3211_v32 = vsel %vm3066_vm6, %v3158_v35, 0.0 }
 0x214   : > { %v11087_v27 = vadd.f32 %v10789_v56, %v3019_v48  ;;  %v3209_v12 = vsel %vm3066_vm6, %v3157_v4, 0.0  ;;  %v3022_v11 = vadd.f32 %v8636_v40, %v2813_v28  ;;  %v2811_v24 = vadd.f32 %v2758_v33, %v10843_v1 }
 0x215   : > { %v8605_v39 = vpop.f32.mrf.mxu0  ;;  %v3111_v55 = vadd.f32 %v3110_v51, %v3109_v52  ;;  %v3210_v9 = vadd.f32 %v3209_v12, %v3208_v18  ;;  %v2603_v3 = vadd.f32 %v14302_v57, %v10855_v10  ;;  %v3112_v25 = vsel %vm3066_vm6, %v11065_v19, 0.0  ;;  %v8640_v51 = vpop.f32.mrf.mxu1 }
 0x216   : > { %v3160_v36 = vmul.f32 %v11087_v27, %v11087_v27  ;;  %v3020_v58 = vadd.f32 %v2967_v30, %v2811_v24  ;;  %v2816_v40 = vadd.f32 %v8605_v39, %v10727_v21  ;;  %v3213_v1 = vsel %vm3066_vm6, %v3159_v38, 0.0 }
 0x217   : > { %v2771_v26 = vpop.f32.mrf.mxu0  ;;  %v3212_v6 = vadd.f32 %v3211_v32, %v3210_v9  ;;  %v3113_v35 = vadd.f32 %v3112_v25, %v3111_v55  ;;  %v3162_v47 = vmul.f32 %v11091_v15, %v11091_v15  ;;  %v3114_v10 = vsel %vm3066_vm6, %v11087_v27, 0.0  ;;  %v2983_v57 = vpop.f32.mrf.mxu1 }
 0x218   : > { %v2814_v23 = vadd.f32 %v2771_v26, %v10852_v63  ;;  %v11109_v37 = vadd.f32 %v10789_v56, %v3022_v11  ;;  %v11112_v30 = vadd.f32 %v10789_v56, %v3020_v58  ;;  %v3215_v63 = vsel %vm3066_vm6, %v3160_v36, 0.0 }
 0x219   : > { %v8606_v21 = vpop.f32.mrf.mxu0  ;;  %v3115_v48 = vadd.f32 %v3114_v10, %v3113_v35  ;;  %v3214_v28 = vadd.f32 %v3213_v1, %v3212_v6  ;;  %v3025_v18 = vadd.f32 %v8639_v42, %v2816_v40  ;;  %v3118_v52 = vsel %vm3066_vm6, %v11091_v15, 0.0 }
 0x21a   : > { %v3023_v43 = vadd.f32 %v2980_v50, %v2814_v23  ;;  %v2817_v41 = vadd.f32 %v8606_v21, %v10750_v53  ;;  %v3116_v4 = vsel %vm3066_vm6, %v11112_v30, 0.0  ;;  %v3161_v33 = vmul.f32 %v11112_v30, %v11112_v30 }
 0x21b   : > { %v2774_v38 = vpop.f32.mrf.mxu0  ;;  %v3216_v12 = vadd.f32 %v3215_v63, %v3214_v28  ;;  %v3117_v11 = vadd.f32 %v3116_v4, %v3115_v48  ;;  %v3163_v53 = vmul.f32 %v11109_v37, %v11109_v37  ;;  %v3219_v9 = vsel %vm3066_vm6, %v3162_v47, 0.0 }
 0x21c   : > { %v11123_v24 = vadd.f32 %v10789_v56, %v3023_v43  ;;  %v3217_v39 = vsel %vm3066_vm6, %v3161_v33, 0.0  ;;  %v3026_v32 = vadd.f32 %v8640_v51, %v2817_v41  ;;  %v2815_v55 = vadd.f32 %v2774_v38, %v2603_v3 }
 0x21d   : > { %v3119_v50 = vadd.f32 %v3118_v52, %v3117_v11  ;;  %v3218_v42 = vadd.f32 %v3217_v39, %v3216_v12  ;;  %v3120_v25 = vsel %vm3066_vm6, %v11109_v37, 0.0  ;;  %v11132_v36 = vadd.f32 %v10789_v56, %v3025_v18 }
 0x21e   : > { %v3164_v58 = vmul.f32 %v11123_v24, %v11123_v24  ;;  %v3024_v40 = vadd.f32 %v2983_v57, %v2815_v55  ;;  %v3221_v6 = vsel %vm3066_vm6, %v3163_v53, 0.0  ;;  %v3122_v3 = vsel %vm3066_vm6, %v11123_v24, 0.0 }
 0x21f   : > { %v3220_v26 = vadd.f32 %v3219_v9, %v3218_v42  ;;  %v3121_v1 = vadd.f32 %v3120_v25, %v3119_v50  ;;  %v11140_v35 = vadd.f32 %v10789_v56, %v3026_v32  ;;  %v3166_v21 = vmul.f32 %v11132_v36, %v11132_v36 }
 0x220   : > { %v11143_v23 = vadd.f32 %v10789_v56, %v3024_v40  ;;  %v3223_v48 = vsel %vm3066_vm6, %v3164_v58, 0.0  ;;  %v3126_v63 = vsel %vm3066_vm6, %v11132_v36, 0.0 }
 0x221   : > { %v3123_v47 = vadd.f32 %v3122_v3, %v3121_v1  ;;  %v3222_v10 = vadd.f32 %v3221_v6, %v3220_v26  ;;  %v3167_v56 = vmul.f32 %v11140_v35, %v11140_v35  ;;  %v3227_v38 = vsel %vm3066_vm6, %v3166_v21, 0.0  ;;  %v9355_v6 = vld [vmem:[%s13965_s6] sm:$0xff] }
 0x222   : > { %v3124_v28 = vsel %vm3066_vm6, %v11143_v23, 0.0  ;;  %v3165_v51 = vmul.f32 %v11143_v23, %v11143_v23  ;;  %v3128_v52 = vsel %vm3066_vm6, %v11140_v35, 0.0  ;;  %v14303_v3 = vmov 0.0  }
 0x223   : > { %v3224_v43 = vadd.f32 %v3223_v48, %v3222_v10  ;;  %v3125_v41 = vadd.f32 %v3124_v28, %v3123_v47  ;;  %v3229_v53 = vsel %vm3066_vm6, %v3167_v56, 0.0  ;;  %v3387_v10 = vld [vmem:[%s13966_s7] sm:$0xf]  ;;  %3997 = vst.msk [vmem:[#allocation2 + $0x10] sm:$0x3] %vm3996_vm8, %v14303_v3 }
 0x224   : > { %v3225_v4 = vsel %vm3066_vm6, %v3165_v51, 0.0  ;;  %4001 = vst.msk [vmem:[#allocation2 + $0x1a8] sm:$0x3] %vm3996_vm8, %v14303_v3 }
 0x225   : > { %v3127_v33 = vadd.f32 %v3126_v63, %v3125_v41  ;;  %v3226_v18 = vadd.f32 %v3225_v4, %v3224_v43  ;;  %v4142_v63 = vld [vmem:[%s13967_s8] sm:$0xf]  ;;  %4003 = vst.msk [vmem:[#allocation2] sm:$0x1] %vm4002_vm9, %v14303_v3  ;;  %4004 = vst.msk [vmem:[#allocation2 + $0x18] sm:$0x1] %vm4002_vm9, %v14303_v3 }
 0x226   : > { %9034 = vmatprep.subr.msk.bf16.mxu1 %vm3391_vm7, %v4142_v63  ;;  %v4582_v56 = vsel %vm3391_vm7, %v4142_v63, 0  ;;  %4005 = vst.msk [vmem:[#allocation2 + $0x30] sm:$0x1] %vm4002_vm9, %v14303_v3  ;;  %4006 = vst.msk [vmem:[#allocation2 + $0x48] sm:$0x1] %vm4002_vm9, %v14303_v3 }
 0x227   : > { %v3129_v12 = vadd.f32 %v3128_v52, %v3127_v33  ;;  %v3228_v11 = vadd.f32 %v3227_v38, %v3226_v18  ;;  %8696 = vmatpush3.bf16.msra.mxu1 %v4582_v56  ;;  %4007 = vst.msk [vmem:[#allocation2 + $0x60] sm:$0x1] %vm4002_vm9, %v14303_v3  ;;  %4008 = vst.msk [vmem:[#allocation2 + $0x78] sm:$0x1] %vm4002_vm9, %v14303_v3 }
 0x228   : > { %4009 = vst.msk [vmem:[#allocation2 + $0x90] sm:$0x1] %vm4002_vm9, %v14303_v3  ;;  %4010 = vst.msk [vmem:[#allocation2 + $0xa8] sm:$0x1] %vm4002_vm9, %v14303_v3 }
 0x229   : > { %v3130_v39 = vrot.slane %v3129_v12, 4  ;;  %v3230_v32 = vadd.f32 %v3229_v53, %v3228_v11  ;;  %4011 = vst.msk [vmem:[#allocation2 + $0xc0] sm:$0x1] %vm4002_vm9, %v14303_v3  ;;  %4012 = vst.msk [vmem:[#allocation2 + $0xd8] sm:$0x1] %vm4002_vm9, %v14303_v3 }
 0x22a   : > { %4013 = vst.msk [vmem:[#allocation2 + $0xf0] sm:$0x1] %vm4002_vm9, %v14303_v3  ;;  %4014 = vst.msk [vmem:[#allocation2 + $0x108] sm:$0x1] %vm4002_vm9, %v14303_v3 }
 0x22b   : > { %v3131_v55 = vadd.f32 %v3130_v39, %v3129_v12  ;;  %v3231_v9 = vrot.slane %v3230_v32, 4  ;;  %v14304_v39 = vld [vmem:[#allocation28_spill] sm:$0xff]  ;;  %4015 = vst.msk [vmem:[#allocation2 + $0x120] sm:$0x1] %vm4002_vm9, %v14303_v3  ;;  %4016 = vst.msk [vmem:[#allocation2 + $0x138] sm:$0x1] %vm4002_vm9, %v14303_v3 }
 0x22c   : > { %4017 = vst.msk [vmem:[#allocation2 + $0x150] sm:$0x1] %vm4002_vm9, %v14303_v3  ;;  %4018 = vst.msk [vmem:[#allocation2 + $0x168] sm:$0x1] %vm4002_vm9, %v14303_v3 }
 0x22d   : > { %v3132_v50 = vrot.slane %v3131_v55, 2  ;;  %v3232_v42 = vadd.f32 %v3231_v9, %v3230_v32  ;;  %v3693_v32 = vadd.f32 1.0, %v14304_v39  ;;  %4019 = vst.msk [vmem:[#allocation2 + $0x180] sm:$0x1] %vm4002_vm9, %v14303_v3  ;;  %4020 = vst.msk [vmem:[#allocation2 + $0x198] sm:$0x1] %vm4002_vm9, %v14303_v3 }
 0x22e   : > { %4022 = vst.msk [vmem:[#allocation2 + $0x29] sm:$0x1] %vm4002_vm9, %v14303_v3  ;;  %4023 = vst.msk [vmem:[#allocation2 + $0x41] sm:$0x1] %vm4002_vm9, %v14303_v3 }
 0x22f   : > { %v3133_v57 = vadd.f32 %v3132_v50, %v3131_v55  ;;  %v3233_v25 = vrot.slane %v3232_v42, 2  ;;  %v14305_v55 = vld [vmem:[#allocation26_spill] sm:$0xff]  ;;  %4024 = vst.msk [vmem:[#allocation2 + $0x59] sm:$0x1] %vm4002_vm9, %v14303_v3  ;;  %4025 = vst.msk [vmem:[#allocation2 + $0x71] sm:$0x1] %vm4002_vm9, %v14303_v3 }
 0x230   : > { %v11191_v50 = vrot.slane %v3693_v32, %v14305_v55  ;;  %4026 = vst.msk [vmem:[#allocation2 + $0x89] sm:$0x1] %vm4002_vm9, %v14303_v3  ;;  %4027 = vst.msk [vmem:[#allocation2 + $0xa1] sm:$0x1] %vm4002_vm9, %v14303_v3 }
 0x231   : > { %v3134_v58 = vrot.slane %v3133_v57, 1  ;;  %v3234_v40 = vadd.f32 %v3233_v25, %v3232_v42  ;;  %4028 = vst.msk [vmem:[#allocation2 + $0xb9] sm:$0x1] %vm4002_vm9, %v14303_v3  ;;  %4029 = vst.msk [vmem:[#allocation2 + $0xd1] sm:$0x1] %vm4002_vm9, %v14303_v3 }
 0x232   : > { %4030 = vst.msk [vmem:[#allocation2 + $0xe9] sm:$0x1] %vm4002_vm9, %v14303_v3  ;;  %4031 = vst.msk [vmem:[#allocation2 + $0x101] sm:$0x1] %vm4002_vm9, %v14303_v3 }
 0x233   : > { %v3135_v26 = vadd.f32 %v3134_v58, %v3133_v57  ;;  %v3235_v1 = vrot.slane %v3234_v40, 1  ;;  %4032 = vst.msk [vmem:[#allocation2 + $0x119] sm:$0x1] %vm4002_vm9, %v14303_v3  ;;  %4033 = vst.msk [vmem:[#allocation2 + $0x131] sm:$0x1] %vm4002_vm9, %v14303_v3 }
 0x234   : > { %4034 = vst.msk [vmem:[#allocation2 + $0x149] sm:$0x1] %vm4002_vm9, %v14303_v3  ;;  %4035 = vst.msk [vmem:[#allocation2 + $0x161] sm:$0x1] %vm4002_vm9, %v14303_v3 }
 0x235   : > { %8644 = vmatmul.mubr.msk.f32.vlgmr.msra.gmra.mxu0 %vm3066_vm6, %v3135_v26  ;;  %v3236_v47 = vadd.f32 %v3235_v1, %v3234_v40  ;;  %4036 = vst.msk [vmem:[#allocation2 + $0x179] sm:$0x1] %vm4002_vm9, %v14303_v3  ;;  %4037 = vst.msk [vmem:[#allocation2 + $0x191] sm:$0x1] %vm4002_vm9, %v14303_v3 }
 0x236   : > { %8647 = vmatpush3.msra.mxu0 %v9355_v6  ;;  %8648 = vmatprep.mubr.msk.f32.mxu0 %vm9365_vm1, %v14303_v3  ;;  %4021 = vst.msk [vmem:[#allocation2 + $0x11] sm:$0x1] %vm4002_vm9, %v14303_v3  ;;  %4038 = vst.msk [vmem:[#allocation2 + $0x1a9] sm:$0x1] %vm4002_vm9, %v14303_v3 }
 0x237   : > { %8651 = vmatprep.subr.mxu0 %v14303_v3 }
 0x239   : > { %8649 = vmatmul.mubr.msk.f32.vlgmr.msra.gmra.mxu0 %vm3066_vm6, %v3236_v47 }
 0x23a   : > { %8652 = vmatpush3.msk.msra.mxu0 %vm3391_vm7, %v3387_v10  ;;  %8653 = vmatprep.mubr.msk.f32.mxu0 %vm9365_vm1, %v14303_v3 }
 0x23b   : > { %8656 = vmatprep.subr.mxu0 %v14303_v3 }
 0x2f5   : > { %v3307_v21 = vpop.f32.mrf.mxu0 }
 0x2f6   : > { %v3312_v48 = vmul.f32 0.001953125, %v3307_v21  ;;  %v7773_v21 = vld [vmem:[%s13967_s8 + $0x4] sm:$0xf] }
 0x2f7   : > { %v8645_v28 = vpop.f32.mrf.mxu0 }
 0x2f8   : > { %8654 = vmatmul.mubr.msk.f32.vlgmr.msra.gmra.mxu0 %vm980_vm3, %v3312_v48  ;;  %v11293_v48 = vld [vmem:[%s13967_s8 + $0x8] sm:$0xf] }
 0x2f9   : > { %8657 = vmatpush3.msk.msra.mxu0 %vm3391_vm7, %v3387_v10  ;;  %v3382_v51 = vpop.f32.mrf.mxu0  ;;  %8658 = vmatprep.mubr.msk.f32.mxu0 %vm9365_vm1, %v14303_v3 }
 0x2fa   : > { %v3386_v43 = vmul.f32 0.001953125, %v3382_v51  ;;  %9033 = vmatprep.subr.msk.bf16.mxu0 %vm3391_vm7, %v7773_v21 }
 0x2fb   : > { %v8650_v41 = vpop.f32.mrf.mxu0 }
 0x2fc   : > { %8659 = vmatmul.mubr.msk.f32.vlgmr.msra.gmra.mxu0 %vm980_vm3, %v3386_v43 }
 0x3b8   : > { %v3461_v4 = vpop.f32.mrf.mxu0 }
 0x3b9   : > { %v3538_v52 = vmul.f32 %v3461_v4, %v3461_v4  ;;  %v11188_v9 = vrot.slane %v3461_v4, %v14305_v55 }
 0x3ba   : > { %v8655_v33 = vpop.f32.mrf.mxu0 }
 0x3bb   : > { %v3545_v42 = vsub.f32 %v10807_v13, %v11188_v9  ;;  %v3546_v57 = vsub.f32 %v10848_v44, %v11188_v9  ;;  %v3547_v25 = vsub.f32 %v10813_v46, %v11188_v9  ;;  %v3548_v58 = vsub.f32 %v10827_v29, %v11188_v9 }
 0x3bc   : > { %v3534_v18 = vpop.f32.mrf.mxu0  ;;  %v3549_v40 = vsub.f32 %v10872_v60, %v11188_v9  ;;  %v3550_v26 = vsub.f32 %v10903_v17, %v11188_v9  ;;  %v3551_v1 = vsub.f32 %v10882_v34, %v11188_v9  ;;  %v3552_v6 = vsub.f32 %v10892_v22, %v11188_v9  ;;  %v7739_v60 = vld [vmem:[%s13963_s4] ss:$0 sm:$0xff] }
 0x3bd   : > { %v3539_v12 = vsub.f32 %v3534_v18, %v3538_v52  ;;  %v3553_v47 = vsub.f32 %v10918_v7, %v11188_v9  ;;  %v3554_v10 = vsub.f32 %v10947_v31, %v11188_v9  ;;  %v3555_v34 = vsub.f32 %v10925_v16, %v11188_v9 }
 0x3be   : > { %v8660_v38 = vpop.f32.mrf.mxu0  ;;  %v3556_v22 = vsub.f32 %v10936_v2, %v11188_v9  ;;  %v3557_v7 = vsub.f32 %v10962_v59, %v11188_v9  ;;  %v4370_v31 = vsel %vm3391_vm7, %v7773_v21, 0  ;;  %v3558_v28 = vsub.f32 %v10991_v0, %v11188_v9 }
 0x3bf   : > { %v3540_v11 = vmax.f32 %v3539_v12, 0.0  ;;  %v3559_v51 = vsub.f32 %v10969_v8, %v11188_v9  ;;  %v3560_v43 = vsub.f32 %v10980_v54, %v11188_v9  ;;  %v3561_v16 = vsub.f32 %v11006_v62, %v11188_v9  ;;  %8662 = vmatpush3.bf16.msra.mxu0 %v4370_v31 }
 0x3c0   : > { %v3562_v2 = vsub.f32 %v11033_v14, %v11188_v9  ;;  %v3563_v59 = vsub.f32 %v11013_v45, %v11188_v9  ;;  %v3564_v41 = vsub.f32 %v11022_v20, %v11188_v9  ;;  %v3565_v0 = vsub.f32 %v11046_v61, %v11188_v9  ;;  %9035 = vmatprep.subr.msk.bf16.mxu0 %vm3391_vm7, %v11293_v48 }
 0x3c1   : > { %v3577_v53 = vadd.f32 1e-05, %v3540_v11  ;;  %v3566_v54 = vsub.f32 %v11073_v5, %v11188_v9  ;;  %v3567_v62 = vsub.f32 %v11053_v49, %v11188_v9  ;;  %v3568_v14 = vsub.f32 %v11065_v19, %v11188_v9 }
 0x3c2   : > { %v3569_v45 = vsub.f32 %v11087_v27, %v11188_v9  ;;  %v3570_v20 = vsub.f32 %v11112_v30, %v11188_v9  ;;  %v3571_v61 = vsub.f32 %v11091_v15, %v11188_v9  ;;  %v3572_v63 = vsub.f32 %v11109_v37, %v11188_v9 }
 0x3c3   : > { %9095 = vrsqrt.f32 %v3577_v53  ;;  %v3573_v49 = vsub.f32 %v11123_v24, %v11188_v9  ;;  %v3574_v19 = vsub.f32 %v11143_v23, %v11188_v9  ;;  %v3575_v27 = vsub.f32 %v11132_v36, %v11188_v9 }
 0x3c4   : > { %v3576_v30 = vsub.f32 %v11140_v35, %v11188_v9 }
 0x3d0   : > { %v9096_v8 = vpop.eup %9095 }
 0x3d1   : > { %v3582_v5 = vrot.slane %v9096_v8, %v14305_v55 }
 0x3d3   : > { %v3583_v15 = vmul.f32 %v3582_v5, %v3545_v42  ;;  %v3584_v37 = vmul.f32 %v3582_v5, %v3546_v57  ;;  %v3585_v24 = vmul.f32 %v3582_v5, %v3547_v25  ;;  %v3586_v23 = vmul.f32 %v3582_v5, %v3548_v58 }
 0x3d4   : > { %v3587_v36 = vmul.f32 %v3582_v5, %v3549_v40  ;;  %v3588_v13 = vmul.f32 %v3582_v5, %v3550_v26  ;;  %v3589_v35 = vmul.f32 %v3582_v5, %v3551_v1  ;;  %v3590_v56 = vmul.f32 %v3582_v5, %v3552_v6 }
 0x3d5   : > { %v3591_v44 = vmul.f32 %v3582_v5, %v3553_v47  ;;  %v3592_v4 = vmul.f32 %v3582_v5, %v3554_v10  ;;  %v3593_v33 = vmul.f32 %v3582_v5, %v3555_v34  ;;  %v3594_v18 = vmul.f32 %v3582_v5, %v3556_v22 }
 0x3d6   : > { %v3595_v46 = vmul.f32 %v3582_v5, %v3557_v7  ;;  %v3596_v38 = vmul.f32 %v3582_v5, %v3558_v28  ;;  %v3597_v52 = vmul.f32 %v3582_v5, %v3559_v51  ;;  %v3598_v12 = vmul.f32 %v3582_v5, %v3560_v43 }
 0x3d7   : > { %v3599_v29 = vmul.f32 %v3582_v5, %v3561_v16  ;;  %v3600_v11 = vmul.f32 %v3582_v5, %v3562_v2  ;;  %v3601_v53 = vmul.f32 %v3582_v5, %v3563_v59  ;;  %v3602_v39 = vmul.f32 %v3582_v5, %v3564_v41 }
 0x3d8   : > { %v3603_v17 = vmul.f32 %v3582_v5, %v3565_v0  ;;  %v3604_v32 = vmul.f32 %v3582_v5, %v3566_v54  ;;  %v3605_v9 = vmul.f32 %v3582_v5, %v3567_v62  ;;  %v3606_v42 = vmul.f32 %v3582_v5, %v3568_v14 }
 0x3d9   : > { %v3607_v57 = vmul.f32 %v3582_v5, %v3569_v45  ;;  %v3608_v25 = vmul.f32 %v3582_v5, %v3570_v20  ;;  %v3609_v58 = vmul.f32 %v3582_v5, %v3571_v61  ;;  %v3610_v40 = vmul.f32 %v3582_v5, %v3572_v63  ;;  %v7740_v61 = vld [vmem:[%s13964_s5] ss:$0 sm:$0xff] }
 0x3da   : > { %v3611_v26 = vmul.f32 %v3582_v5, %v3573_v49  ;;  %v3612_v1 = vmul.f32 %v3582_v5, %v3574_v19  ;;  %v3613_v6 = vmul.f32 %v3582_v5, %v3575_v27  ;;  %v3614_v47 = vmul.f32 %v3582_v5, %v3576_v30 }
 0x3db   : > { %v3622_v10 = vmul.f32 %v7739_v60, %v3583_v15  ;;  %v3623_v21 = vmul.f32 %v7739_v60, %v3584_v37  ;;  %v3624_v34 = vmul.f32 %v7739_v60, %v3585_v24  ;;  %v3625_v22 = vmul.f32 %v7739_v60, %v3586_v23 }
 0x3dc   : > { %v3626_v7 = vmul.f32 %v7739_v60, %v3587_v36  ;;  %v3627_v31 = vmul.f32 %v7739_v60, %v3588_v13  ;;  %v3628_v28 = vmul.f32 %v7739_v60, %v3589_v35  ;;  %v3629_v51 = vmul.f32 %v7739_v60, %v3590_v56 }
 0x3dd   : > { %v3630_v43 = vmul.f32 %v7739_v60, %v3591_v44  ;;  %v3631_v16 = vmul.f32 %v7739_v60, %v3592_v4  ;;  %v3632_v2 = vmul.f32 %v7739_v60, %v3593_v33  ;;  %v3633_v59 = vmul.f32 %v7739_v60, %v3594_v18 }
 0x3de   : > { %v3634_v41 = vmul.f32 %v7739_v60, %v3595_v46  ;;  %v3635_v0 = vmul.f32 %v7739_v60, %v3596_v38  ;;  %v3636_v8 = vmul.f32 %v7739_v60, %v3597_v52  ;;  %v3637_v54 = vmul.f32 %v7739_v60, %v3598_v12 }
 0x3df   : > { %v3638_v62 = vmul.f32 %v7739_v60, %v3599_v29  ;;  %v3639_v14 = vmul.f32 %v7739_v60, %v3600_v11  ;;  %v3640_v45 = vmul.f32 %v7739_v60, %v3601_v53  ;;  %v3641_v20 = vmul.f32 %v7739_v60, %v3602_v39 }
 0x3e0   : > { %v3642_v63 = vmul.f32 %v7739_v60, %v3603_v17  ;;  %v3643_v5 = vmul.f32 %v7739_v60, %v3604_v32  ;;  %v3644_v49 = vmul.f32 %v7739_v60, %v3605_v9  ;;  %v3645_v19 = vmul.f32 %v7739_v60, %v3606_v42 }
 0x3e1   : > { %v3646_v27 = vmul.f32 %v7739_v60, %v3607_v57  ;;  %v3647_v30 = vmul.f32 %v7739_v60, %v3608_v25  ;;  %v3648_v15 = vmul.f32 %v7739_v60, %v3609_v58  ;;  %v3649_v37 = vmul.f32 %v7739_v60, %v3610_v40 }
 0x3e2   : > { %v3650_v24 = vmul.f32 %v7739_v60, %v3611_v26  ;;  %v3651_v23 = vmul.f32 %v7739_v60, %v3612_v1  ;;  %v3652_v36 = vmul.f32 %v7739_v60, %v3613_v6  ;;  %v3653_v13 = vmul.f32 %v7739_v60, %v3614_v47 }
 0x3e3   : > { %v3661_v35 = vadd.f32 %v7740_v61, %v3622_v10  ;;  %v3662_v56 = vadd.f32 %v7740_v61, %v3623_v21  ;;  %v3663_v44 = vadd.f32 %v7740_v61, %v3624_v34  ;;  %v3664_v4 = vadd.f32 %v7740_v61, %v3625_v22 }
 0x3e4   : > { %v3665_v33 = vadd.f32 %v7740_v61, %v3626_v7  ;;  %v3666_v18 = vadd.f32 %v7740_v61, %v3627_v31  ;;  %v3667_v46 = vadd.f32 %v7740_v61, %v3628_v28  ;;  %v3668_v38 = vadd.f32 %v7740_v61, %v3629_v51 }
 0x3e5   : > { %v3669_v52 = vadd.f32 %v7740_v61, %v3630_v43  ;;  %v3670_v12 = vadd.f32 %v7740_v61, %v3631_v16  ;;  %v3671_v29 = vadd.f32 %v7740_v61, %v3632_v2  ;;  %v3672_v11 = vadd.f32 %v7740_v61, %v3633_v59 }
 0x3e6   : > { %v3673_v53 = vadd.f32 %v7740_v61, %v3634_v41  ;;  %v3674_v39 = vadd.f32 %v7740_v61, %v3635_v0  ;;  %v3675_v17 = vadd.f32 %v7740_v61, %v3636_v8  ;;  %v3676_v32 = vadd.f32 %v7740_v61, %v3637_v54 }
 0x3e7   : > { %v3677_v9 = vadd.f32 %v7740_v61, %v3638_v62  ;;  %v3678_v42 = vadd.f32 %v7740_v61, %v3639_v14  ;;  %v3679_v57 = vadd.f32 %v7740_v61, %v3640_v45  ;;  %v3680_v60 = vadd.f32 %v7740_v61, %v3641_v20 }
 0x3e8   : > { %v3681_v25 = vadd.f32 %v7740_v61, %v3642_v63  ;;  %v3682_v58 = vadd.f32 %v7740_v61, %v3643_v5  ;;  %v3683_v40 = vadd.f32 %v7740_v61, %v3644_v49  ;;  %v3684_v26 = vadd.f32 %v7740_v61, %v3645_v19 }
 0x3e9   : > { %v3685_v1 = vadd.f32 %v7740_v61, %v3646_v27  ;;  %v3686_v6 = vadd.f32 %v7740_v61, %v3647_v30  ;;  %v3687_v47 = vadd.f32 %v7740_v61, %v3648_v15  ;;  %v3688_v10 = vadd.f32 %v7740_v61, %v3649_v37 }
 0x3ea   : > { %v3689_v21 = vadd.f32 %v7740_v61, %v3650_v24  ;;  %v3690_v34 = vadd.f32 %v7740_v61, %v3651_v23  ;;  %v3691_v22 = vadd.f32 %v7740_v61, %v3652_v36  ;;  %v3692_v7 = vadd.f32 %v7740_v61, %v3653_v13 }
 0x3eb   : > { %v3698_v31 = vmul.f32 %v11191_v50, %v3661_v35  ;;  %v3699_v28 = vmul.f32 %v11191_v50, %v3662_v56  ;;  %v3700_v51 = vmul.f32 %v11191_v50, %v3663_v44  ;;  %v3701_v43 = vmul.f32 %v11191_v50, %v3664_v4 }
 0x3ec   : > { %v3702_v16 = vmul.f32 %v11191_v50, %v3665_v33  ;;  %v3703_v2 = vmul.f32 %v11191_v50, %v3666_v18  ;;  %v3704_v59 = vmul.f32 %v11191_v50, %v3667_v46  ;;  %v3705_v41 = vmul.f32 %v11191_v50, %v3668_v38  ;;  %v11422_v33 = vpop.permute.xlu0 %3735 }
 0x3ed   : > { %v3706_v0 = vmul.f32 %v11191_v50, %v3669_v52  ;;  %v3707_v8 = vmul.f32 %v11191_v50, %v3670_v12  ;;  %v3708_v54 = vmul.f32 %v11191_v50, %v3671_v29  ;;  %v3709_v62 = vmul.f32 %v11191_v50, %v3672_v11  ;;  %v11436_v52 = vld [vmem:[%s13967_s8 + $0xc] sm:$0xf] }
 0x3ee   : > { %v3710_v14 = vmul.f32 %v11191_v50, %v3673_v53  ;;  %v3711_v45 = vmul.f32 %v11191_v50, %v3674_v39  ;;  %v3712_v20 = vmul.f32 %v11191_v50, %v3675_v17  ;;  %v3713_v61 = vmul.f32 %v11191_v50, %v3676_v32  ;;  %v11441_v29 = vld [vmem:[#allocation2 + $0x8] sm:$0xff]  ;;  %9036 = vmatprep.subr.msk.bf16.mxu1 %vm3391_vm7, %v11436_v52 }
 0x3ef   : > { %v3714_v63 = vmul.f32 %v11191_v50, %v3677_v9  ;;  %v3715_v5 = vmul.f32 %v11191_v50, %v3678_v42  ;;  %v3716_v49 = vmul.f32 %v11191_v50, %v3679_v57  ;;  %v3717_v19 = vmul.f32 %v11191_v50, %v3680_v60 }
 0x3f0   : > { %v3718_v27 = vmul.f32 %v11191_v50, %v3681_v25  ;;  %v11390_v30 = vmul.f32 %v11191_v50, %v3682_v58  ;;  %v11393_v15 = vmul.f32 %v11191_v50, %v3683_v40  ;;  %v11396_v37 = vmul.f32 %v11191_v50, %v3684_v26 }
 0x3f1   : > { %v11399_v24 = vmul.f32 %v11191_v50, %v3685_v1  ;;  %v11402_v23 = vmul.f32 %v11191_v50, %v3686_v6  ;;  %v11405_v36 = vmul.f32 %v11191_v50, %v3687_v47  ;;  %v11408_v13 = vmul.f32 %v11191_v50, %v3688_v10 }
 0x3f2   : > { %v11411_v35 = vmul.f32 %v11191_v50, %v3689_v21  ;;  %v11414_v56 = vmul.f32 %v11191_v50, %v3690_v34  ;;  %v11417_v44 = vmul.f32 %v11191_v50, %v3691_v22  ;;  %v11420_v4 = vmul.f32 %v11191_v50, %v3692_v7  ;;  %v4072_v50 = vld [vmem:[#allocation2] sm:$0xff] }
 0x3f3   : > { %v11425_v18 = vadd.f32 %v11422_v33, %v3698_v31  ;;  %v11428_v46 = vadd.f32 %v11422_v33, %v3699_v28  ;;  %v11431_v38 = vadd.f32 %v11422_v33, %v3700_v51  ;;  %v11439_v12 = vadd.f32 %v11422_v33, %v3701_v43 }
 0x3f4   : > { %v11446_v11 = vadd.f32 %v11422_v33, %v3702_v16  ;;  %v11449_v53 = vadd.f32 %v11422_v33, %v3703_v2  ;;  %v11452_v39 = vadd.f32 %v11422_v33, %v3704_v59  ;;  %v4126_v42 = vpack.c.bf16 %v11441_v29, %v4072_v50 }
 0x3f5   : > { %v7741_v17 = vmul.f32 -1.442695, %v11425_v18  ;;  %v7742_v32 = vmul.f32 -1.442695, %v11428_v46  ;;  %v7743_v9 = vmul.f32 -1.442695, %v11431_v38  ;;  %v11459_v57 = vadd.f32 %v11422_v33, %v3705_v41 }
 0x3f6   : > { %v7744_v60 = vmul.f32 -1.442695, %v11439_v12  ;;  %v11463_v25 = vadd.f32 %v11422_v33, %v3706_v0  ;;  %v7745_v58 = vmul.f32 -1.442695, %v11446_v11  ;;  %8697 = vmatprep.mubr.msk.bf16.mxu1 %vm3066_vm6, %v4126_v42  ;;  %v11468_v40 = vadd.f32 %v11422_v33, %v3707_v8  ;;  %v4074_v41 = vld [vmem:[#allocation2 + $0x10] sm:$0x3] }
 0x3f7   : > { %9097 = vpow2.f32 %v7741_v17  ;;  %v7746_v26 = vmul.f32 -1.442695, %v11449_v53  ;;  %v11472_v1 = vadd.f32 %v11422_v33, %v3708_v54  ;;  %v7747_v6 = vmul.f32 -1.442695, %v11452_v39 }
 0x3f8   : > { %9099 = vpow2.f32 %v7742_v32  ;;  %v4192_v47 = vrot.slane %v11441_v29, 1  ;;  %v11477_v10 = vadd.f32 %v11422_v33, %v3709_v62  ;;  %v7748_v21 = vmul.f32 -1.442695, %v11459_v57 }
 0x3f9   : > { %9101 = vpow2.f32 %v7743_v9  ;;  %v4746_v34 = vrot.slane %v11441_v29, 2  ;;  %v11482_v22 = vadd.f32 %v11422_v33, %v3710_v14  ;;  %v11485_v7 = vadd.f32 %v11422_v33, %v3711_v45 }
 0x3fa   : > { %9103 = vpow2.f32 %v7744_v60  ;;  %v7749_v31 = vmul.f32 -1.442695, %v11463_v25  ;;  %v11489_v28 = vadd.f32 %v11422_v33, %v3712_v20  ;;  %v11492_v51 = vadd.f32 %v11422_v33, %v3713_v61 }
 0x3fb   : > { %9105 = vpow2.f32 %v7745_v58  ;;  %v7750_v43 = vmul.f32 -1.442695, %v11468_v40  ;;  %v11496_v16 = vadd.f32 %v11422_v33, %v3714_v63  ;;  %v11499_v2 = vadd.f32 %v11422_v33, %v3715_v5 }
 0x3fc   : > { %9107 = vpow2.f32 %v7746_v26  ;;  %v7751_v59 = vmul.f32 -1.442695, %v11472_v1  ;;  %v11503_v0 = vadd.f32 %v11422_v33, %v3716_v49  ;;  %v11506_v8 = vadd.f32 %v11422_v33, %v3717_v19 }
 0x3fd   : > { %9109 = vpow2.f32 %v7747_v6  ;;  %v7752_v54 = vmul.f32 -1.442695, %v11477_v10  ;;  %v11510_v62 = vadd.f32 %v11422_v33, %v3718_v27  ;;  %v7753_v14 = vmul.f32 -1.442695, %v11482_v22 }
 0x3fe   : > { %9111 = vpow2.f32 %v7748_v21  ;;  %v4191_v45 = vrot.slane %v4072_v50, 1  ;;  %v7754_v20 = vmul.f32 -1.442695, %v11485_v7  ;;  %v4745_v61 = vrot.slane %v4072_v50, 2 }
 0x3ff   : > { %9113 = vpow2.f32 %v7749_v31  ;;  %v4194_v63 = vrot.slane %v4074_v41, 1  ;;  %v7755_v5 = vmul.f32 -1.442695, %v11489_v28  ;;  %v4748_v19 = vrot.slane %v4074_v41, 2 }
 0x400   : > { %9115 = vpow2.f32 %v7750_v43  ;;  %v4193_v49 = vsel %vm849_vm2, %v4191_v45, %v4192_v47  ;;  %v7756_v29 = vmul.f32 -1.442695, %v11492_v51  ;;  %v11519_v17 = vsel %vm1406_vm4, %v4745_v61, %v4746_v34 }
 0x401   : > { %9117 = vpow2.f32 %v7751_v59  ;;  %v4195_v27 = vsel %vm849_vm2, %v4192_v47, %v4194_v63  ;;  %14306 = vst [vmem:[#allocation15_spill] sm:$0xff] %v11519_v17  ;;  %v7757_v32 = vmul.f32 -1.442695, %v11496_v16  ;;  %v11523_v50 = vsel %vm1406_vm4, %v4746_v34, %v4748_v19 }
 0x402   : > { %9119 = vpow2.f32 %v7752_v54  ;;  %v4303_v9 = vpack.c.bf16 %v4195_v27, %v4193_v49  ;;  %14307 = vst [vmem:[#allocation11_spill] sm:$0xff] %v11523_v50  ;;  %v11527_v60 = vadd.f32 %v11422_v33, %v11390_v30  ;;  %v7758_v58 = vmul.f32 -1.442695, %v11499_v2 }
 0x403   : > { %9121 = vpow2.f32 %v7753_v14  ;;  %v11534_v47 = vadd.f32 %v11422_v33, %v11393_v15  ;;  %v7759_v21 = vmul.f32 -1.442695, %v11503_v0  ;;  %v11540_v30 = vadd.f32 %v11422_v33, %v11396_v37 }
 0x404   : > { %v9098_v42 = vpop.eup %9097  ;;  %9123 = vpow2.f32 %v7754_v20  ;;  %8663 = vmatprep.mubr.msk.bf16.mxu0 %vm3066_vm6, %v4303_v9  ;;  %v7760_v31 = vmul.f32 -1.442695, %v11506_v8  ;;  %v11545_v59 = vadd.f32 %v11422_v33, %v11399_v24  ;;  %v7761_v15 = vmul.f32 -1.442695, %v11510_v62 }
 0x405   : > { %v9100_v6 = vpop.eup %9099  ;;  %9125 = vpow2.f32 %v7755_v5  ;;  %v11550_v54 = vadd.f32 %v11422_v33, %v11402_v23  ;;  %v7762_v37 = vmul.f32 -1.442695, %v11527_v60  ;;  %v11555_v45 = vadd.f32 %v11422_v33, %v11405_v36 }
 0x406   : > { %v9102_v34 = vpop.eup %9101  ;;  %9127 = vpow2.f32 %v7756_v29  ;;  %v7763_v24 = vmul.f32 -1.442695, %v11534_v47  ;;  %v11560_v61 = vadd.f32 %v11422_v33, %v11408_v13  ;;  %v7764_v23 = vmul.f32 -1.442695, %v11540_v30 }
 0x407   : > { %v9104_v43 = vpop.eup %9103  ;;  %9129 = vpow2.f32 %v7757_v32  ;;  %v11565_v5 = vadd.f32 %v11422_v33, %v11411_v35  ;;  %v7765_v36 = vmul.f32 -1.442695, %v11545_v59  ;;  %v11570_v19 = vadd.f32 %v11422_v33, %v11414_v56 }
 0x408   : > { %v9106_v41 = vpop.eup %9105  ;;  %9131 = vpow2.f32 %v7758_v58  ;;  %v7766_v13 = vmul.f32 -1.442695, %v11550_v54  ;;  %v11575_v27 = vadd.f32 %v11422_v33, %v11417_v44  ;;  %v7767_v35 = vmul.f32 -1.442695, %v11555_v45 }
 0x409   : > { %v9108_v14 = vpop.eup %9107  ;;  %9133 = vpow2.f32 %v7759_v21  ;;  %14308 = vst [vmem:[#allocation25_spill] sm:$0xff] %v11570_v19  ;;  %v11580_v9 = vadd.f32 %v11422_v33, %v11420_v4  ;;  %v7768_v56 = vmul.f32 -1.442695, %v11560_v61  ;;  %v7769_v21 = vmul.f32 -1.442695, %v11565_v5 }
 0x40a   : > { %v9110_v20 = vpop.eup %9109  ;;  %9135 = vpow2.f32 %v7760_v31  ;;  %14309 = vst [vmem:[#allocation31_spill] sm:$0xff] %v11575_v27  ;;  %v7770_v44 = vmul.f32 -1.442695, %v11570_v19  ;;  %v3868_v3 = vadd.f32 1.0, %v9102_v34  ;;  %v3869_v17 = vadd.f32 1.0, %v9104_v43 }
 0x40b   : > { %v9112_v63 = vpop.eup %9111  ;;  %9137 = vpow2.f32 %v7761_v15  ;;  %14310 = vst [vmem:[#allocation32_spill] sm:$0xff] %v11580_v9  ;;  %v7772_v4 = vmul.f32 -1.442695, %v11580_v9  ;;  %v3871_v19 = vadd.f32 1.0, %v9108_v14  ;;  %v3872_v9 = vadd.f32 1.0, %v9110_v20 }
 0x40c   : > { %v9114_v49 = vpop.eup %9113  ;;  %9139 = vpow2.f32 %v7762_v37  ;;  %v7771_v37 = vmul.f32 -1.442695, %v11575_v27 }
 0x40d   : > { %v9116_v29 = vpop.eup %9115  ;;  %9141 = vpow2.f32 %v7763_v24 }
 0x40e   : > { %v9118_v32 = vpop.eup %9117  ;;  %9143 = vpow2.f32 %v7764_v23  ;;  %v3866_v23 = vadd.f32 1.0, %v9098_v42  ;;  %v3873_v42 = vadd.f32 1.0, %v9112_v63  ;;  %v3875_v34 = vadd.f32 1.0, %v9116_v29 }
 0x40f   : > { %v9120_v58 = vpop.eup %9119  ;;  %9145 = vpow2.f32 %v7765_v36  ;;  %v3867_v36 = vadd.f32 1.0, %v9100_v6  ;;  %v3874_v6 = vadd.f32 1.0, %v9114_v49  ;;  %v3876_v43 = vadd.f32 1.0, %v9118_v32 }
 0x410   : > { %v9122_v31 = vpop.eup %9121  ;;  %9147 = vpow2.f32 %v7766_v13 }
 0x411   : > { %v9124_v15 = vpop.eup %9123  ;;  %9149 = vpow2.f32 %v7767_v35  ;;  %v3870_v35 = vadd.f32 1.0, %v9106_v41 }
 0x412   : > { %v9126_v24 = vpop.eup %9125  ;;  %9151 = vpow2.f32 %v7768_v56 }
 0x413   : > { %v9128_v33 = vpop.eup %9127  ;;  %9153 = vpow2.f32 %v7769_v21 }
 0x414   : > { %v9130_v26 = vpop.eup %9129  ;;  %9155 = vpow2.f32 %v7770_v44 }
 0x415   : > { %v9132_v55 = vpop.eup %9131  ;;  %9157 = vpow2.f32 %v7771_v37  ;;  %v3882_v29 = vadd.f32 1.0, %v9130_v26 }
 0x416   : > { %v9134_v13 = vpop.eup %9133  ;;  %9159 = vpow2.f32 %v7772_v4 }
 0x417   : > { %v9136_v50 = vpop.eup %9135  ;;  %9161 = vrcp.f32 %v3866_v23  ;;  %v3877_v23 = vadd.f32 1.0, %v9120_v58 }
 0x418   : > { %v9138_v27 = vpop.eup %9137  ;;  %9163 = vrcp.f32 %v3867_v36  ;;  %v3878_v36 = vadd.f32 1.0, %v9122_v31  ;;  %v3884_v31 = vadd.f32 1.0, %v9134_v13 }
 0x419   : > { %v9140_v56 = vpop.eup %9139  ;;  %9165 = vrcp.f32 %v3868_v3  ;;  %v3879_v3 = vadd.f32 1.0, %v9124_v15 }
 0x41a   : > { %v9142_v21 = vpop.eup %9141  ;;  %9167 = vrcp.f32 %v3869_v17  ;;  %v3880_v17 = vadd.f32 1.0, %v9126_v24 }
 0x41b   : > { %v9144_v44 = vpop.eup %9143  ;;  %9169 = vrcp.f32 %v3870_v35  ;;  %v3881_v35 = vadd.f32 1.0, %v9128_v33  ;;  %v3886_v33 = vadd.f32 1.0, %v9138_v27 }
 0x41c   : > { %v9146_v37 = vpop.eup %9145  ;;  %9171 = vrcp.f32 %v3871_v19  ;;  %v3889_v27 = vadd.f32 1.0, %v9144_v44 }
 0x41d   : > { %v9148_v4 = vpop.eup %9147  ;;  %9173 = vrcp.f32 %v3872_v9  ;;  %v3883_v9 = vadd.f32 1.0, %v9132_v55  ;;  %v3887_v55 = vadd.f32 1.0, %v9140_v56 }
 0x41e   : > { %v9150_v41 = vpop.eup %9149  ;;  %9175 = vrcp.f32 %v3873_v42 }
 0x41f   : > { %v9152_v14 = vpop.eup %9151  ;;  %9177 = vrcp.f32 %v3874_v6  ;;  %v3885_v6 = vadd.f32 1.0, %v9136_v50 }
 0x420   : > { %v9154_v20 = vpop.eup %9153  ;;  %9179 = vrcp.f32 %v3875_v34 }
 0x421   : > { %v11587_v63 = vpop.eup %9155  ;;  %9181 = vrcp.f32 %v3876_v43 }
 0x422   : > { %v9158_v49 = vpop.eup %9157  ;;  %9183 = vrcp.f32 %v3877_v23  ;;  %v3888_v23 = vadd.f32 1.0, %v9142_v21 }
 0x423   : > { %v11589_v19 = vpop.eup %9159  ;;  %9185 = vrcp.f32 %v3878_v36  ;;  %v3890_v36 = vadd.f32 1.0, %v9146_v37  ;;  %v5126_v37 = vsel %vm3391_vm7, %v11436_v52, 0 }
 0x424   : > { %v9162_v32 = vpop.eup %9161  ;;  %9187 = vrcp.f32 %v3879_v3  ;;  %v3891_v3 = vadd.f32 1.0, %v9148_v4 }
 0x425   : > { %v9164_v58 = vpop.eup %9163  ;;  %9189 = vrcp.f32 %v3880_v17  ;;  %v3962_v15 = vmul.f32 %v9162_v32, %v11425_v18  ;;  %v3892_v17 = vadd.f32 1.0, %v9150_v41  ;;  %v3895_v41 = vadd.f32 1.0, %v11587_v63 }
 0x426   : > { %v9166_v42 = vpop.eup %9165  ;;  %9191 = vrcp.f32 %v3881_v35  ;;  %v3963_v24 = vmul.f32 %v9164_v58, %v11428_v46  ;;  %v3893_v35 = vadd.f32 1.0, %v9152_v14 }
 0x427   : > { %v9168_v34 = vpop.eup %9167  ;;  %9193 = vrcp.f32 %v3882_v29  ;;  %v3964_v43 = vmul.f32 %v9166_v42, %v11431_v38  ;;  %4040 = vst.msk [vmem:[#allocation2 + $0x19] sm:$0xff] %vm3066_vm6, %v3962_v15  ;;  %v3894_v29 = vadd.f32 1.0, %v9154_v20  ;;  %v3897_v20 = vadd.f32 1.0, %v11589_v19 }
 0x428   : > { %v9170_v26 = vpop.eup %9169  ;;  %9195 = vrcp.f32 %v3883_v9  ;;  %v3965_v13 = vmul.f32 %v9168_v34, %v11439_v12  ;;  %4041 = vst.msk [vmem:[#allocation2 + $0x21] sm:$0xff] %vm3066_vm6, %v3963_v24  ;;  %v3896_v9 = vadd.f32 1.0, %v9158_v49  ;;  %v11647_v34 = vld [vmem:[%s13967_s8 + $0x14] sm:$0xf] }
 0x429   : > { %v9172_v18 = vpop.eup %9171  ;;  %9197 = vrcp.f32 %v3884_v31  ;;  %v3966_v50 = vmul.f32 %v9170_v26, %v11446_v11  ;;  %4042 = vst.msk [vmem:[#allocation2 + $0x31] sm:$0xff] %vm3066_vm6, %v3964_v43  ;;  %14313 = vst [vmem:[#allocation24_spill] sm:$0xff] %v11647_v34 }
 0x42a   : > { %v9174_v46 = vpop.eup %9173  ;;  %9199 = vrcp.f32 %v3885_v6  ;;  %v3967_v38 = vmul.f32 %v9172_v18, %v11449_v53  ;;  %4043 = vst.msk [vmem:[#allocation2 + $0x39] sm:$0xff] %vm3066_vm6, %v3965_v13 }
 0x42b   : > { %v9176_v56 = vpop.eup %9175  ;;  %9201 = vrcp.f32 %v3886_v33  ;;  %v3968_v12 = vmul.f32 %v9174_v46, %v11452_v39  ;;  %4044 = vst.msk [vmem:[#allocation2 + $0x49] sm:$0xff] %vm3066_vm6, %v3966_v50 }
 0x42c   : > { %v9178_v21 = vpop.eup %9177  ;;  %9203 = vrcp.f32 %v3887_v55  ;;  %v3969_v11 = vmul.f32 %v9176_v56, %v11459_v57  ;;  %4045 = vst.msk [vmem:[#allocation2 + $0x51] sm:$0xff] %vm3066_vm6, %v3967_v38 }
 0x42d   : > { %v9180_v44 = vpop.eup %9179  ;;  %9205 = vrcp.f32 %v3888_v23  ;;  %v3970_v53 = vmul.f32 %v9178_v21, %v11463_v25  ;;  %4046 = vst.msk [vmem:[#allocation2 + $0x61] sm:$0xff] %vm3066_vm6, %v3968_v12 }
 0x42e   : > { %v9182_v39 = vpop.eup %9181  ;;  %9207 = vrcp.f32 %v3889_v27  ;;  %v3971_v4 = vmul.f32 %v9180_v44, %v11468_v40  ;;  %4047 = vst.msk [vmem:[#allocation2 + $0x69] sm:$0xff] %vm3066_vm6, %v3969_v11  ;;  %v11611_v57 = vld [vmem:[#allocation2 + $0x18] sm:$0xff] }
 0x42f   : > { %v9184_v32 = vpop.eup %9183  ;;  %9209 = vrcp.f32 %v3890_v36  ;;  %v3972_v25 = vmul.f32 %v9182_v39, %v11472_v1  ;;  %4048 = vst.msk [vmem:[#allocation2 + $0x79] sm:$0xff] %vm3066_vm6, %v3970_v53  ;;  %v11616_v52 = vld [vmem:[#allocation2 + $0x20] sm:$0xff]  ;;  %v11632_v15 = vld [vmem:[#allocation2 + $0x28] sm:$0x3] }
 0x430   : > { %v9186_v14 = vpop.eup %9185  ;;  %9211 = vrcp.f32 %v3891_v3  ;;  %v3973_v40 = vmul.f32 %v9184_v32, %v11477_v10  ;;  %4049 = vst.msk [vmem:[#allocation2 + $0x81] sm:$0xff] %vm3066_vm6, %v3971_v4  ;;  %v11623_v58 = vpack.c.bf16 %v11616_v52, %v11611_v57  ;;  %v11625_v63 = vld [vmem:[#allocation2 + $0x30] sm:$0xff]  ;;  %v4196_v10 = vrot.slane %v11611_v57, 1 }
 0x431   : > { %v9188_v49 = vpop.eup %9187  ;;  %9213 = vrcp.f32 %v3892_v17  ;;  %v3974_v1 = vmul.f32 %v9186_v14, %v11482_v22  ;;  %4050 = vst.msk [vmem:[#allocation2 + $0x91] sm:$0xff] %vm3066_vm6, %v3972_v25  ;;  %v11629_v31 = vld [vmem:[#allocation2 + $0x38] sm:$0xff]  ;;  %v4201_v19 = vrot.slane %v11625_v63, 1  ;;  %v4197_v43 = vrot.slane %v11616_v52, 1  ;;  %v11652_v26 = vld [vmem:[#allocation2 + $0x40] sm:$0x3] }
 0x432   : > { %14311 = vst [vmem:[#allocation29_spill] sm:$0xff] %v11623_v58  ;;  %v9190_v42 = vpop.eup %9189  ;;  %9215 = vrcp.f32 %v3893_v35  ;;  %v3975_v6 = vmul.f32 %v9188_v49, %v11485_v7  ;;  %4051 = vst.msk [vmem:[#allocation2 + $0x99] sm:$0xff] %vm3066_vm6, %v3973_v40  ;;  %8698 = vmatmul.mubr.msk.bf16.vlgmr.msra.gmra.mxu1 %vm3066_vm6, %v11623_v58  ;;  %v11641_v22 = vpack.c.bf16 %v11629_v31, %v11625_v63  ;;  %v4202_v24 = vrot.slane %v11629_v31, 1  ;;  %v11659_v23 = vld [vmem:[#allocation2 + $0x48] sm:$0xff] }
 0x433   : > { %v9192_v33 = vpop.eup %9191  ;;  %9217 = vrcp.f32 %v3894_v29  ;;  %v3976_v7 = vmul.f32 %v9190_v42, %v11489_v28  ;;  %4052 = vst.msk [vmem:[#allocation2 + $0xa9] sm:$0xff] %vm3066_vm6, %v3974_v1  ;;  %8764 = vmatpush3.bf16.msra.mxu1 %v5126_v37  ;;  %v4199_v18 = vrot.slane %v11632_v15, 1  ;;  %v11661_v28 = vld [vmem:[#allocation2 + $0x50] sm:$0xff]  ;;  %v4204_v12 = vrot.slane %v11652_v26, 1  ;;  %v11692_v29 = vld [vmem:[#allocation2 + $0x58] sm:$0x3] }
 0x434   : > { %14312 = vst [vmem:[#allocation23_spill] sm:$0xff] %v11641_v22  ;;  %v9194_v55 = vpop.eup %9193  ;;  %9219 = vrcp.f32 %v3895_v41  ;;  %v3977_v13 = vmul.f32 %v9192_v33, %v11492_v51  ;;  %4053 = vst.msk [vmem:[#allocation2 + $0xb1] sm:$0xff] %vm3066_vm6, %v3975_v6  ;;  %8701 = vmatprep.mubr.msk.bf16.mxu1 %vm3066_vm6, %v11641_v22  ;;  %9038 = vmatprep.subr.msk.bf16.mxu1 %vm3391_vm7, %v11647_v34  ;;  %v4198_v51 = vsel %vm849_vm2, %v4196_v10, %v4197_v43  ;;  %v11673_v21 = vld [vmem:[#allocation2 + $0x60] sm:$0xff] }
 0x435   : > { %v9196_v50 = vpop.eup %9195  ;;  %9221 = vrcp.f32 %v3896_v9  ;;  %v3978_v46 = vmul.f32 %v9194_v55, %v11496_v16  ;;  %4054 = vst.msk [vmem:[#allocation2 + $0xc1] sm:$0xff] %vm3066_vm6, %v3976_v7  ;;  %v4203_v27 = vsel %vm849_vm2, %v4201_v19, %v4202_v24  ;;  %v4200_v36 = vsel %vm849_vm2, %v4197_v43, %v4199_v18  ;;  %v11675_v3 = vld [vmem:[#allocation2 + $0x68] sm:$0xff]  ;;  %v11704_v41 = vld [vmem:[#allocation2 + $0x70] sm:$0x3] }
 0x436   : > { %v9198_v38 = vpop.eup %9197  ;;  %9223 = vrcp.f32 %v3897_v20  ;;  %v3979_v56 = vmul.f32 %v9196_v50, %v11499_v2  ;;  %4055 = vst.msk [vmem:[#allocation2 + $0xc9] sm:$0xff] %vm3066_vm6, %v3977_v13  ;;  %v11679_v44 = vpack.c.bf16 %v4200_v36, %v4198_v51  ;;  %v4924_v2 = vsel %vm3391_vm7, %v11293_v48, 0  ;;  %v11709_v9 = vld [vmem:[%s13967_s8 + $0x10] sm:$0xf] }
 0x437   : > { %v9200_v16 = vpop.eup %9199  ;;  %v3980_v11 = vmul.f32 %v9198_v38, %v11503_v0  ;;  %4056 = vst.msk [vmem:[#allocation2 + $0xd9] sm:$0xff] %vm3066_vm6, %v3978_v46  ;;  %v11685_v17 = vpack.c.bf16 %v11661_v28, %v11659_v23  ;;  %v4205_v39 = vsel %vm849_vm2, %v4202_v24, %v4204_v12  ;;  %v4206_v0 = vrot.slane %v11659_v23, 1  ;;  %14318 = vst [vmem:[#allocation14_spill] sm:$0xff] %v11709_v9  ;;  %v11730_v24 = vld [vmem:[#allocation2 + $0x78] sm:$0xff]  ;;  %v11732_v33 = vld [vmem:[#allocation2 + $0x80] sm:$0xff] }
 0x438   : > { %14314 = vst [vmem:[#allocation27_spill] sm:$0xff] %v11679_v44  ;;  %v9202_v53 = vpop.eup %9201  ;;  %v3981_v37 = vmul.f32 %v9200_v16, %v11506_v8  ;;  %4057 = vst.msk [vmem:[#allocation2 + $0xe1] sm:$0xff] %vm3066_vm6, %v3979_v56  ;;  %v4207_v35 = vrot.slane %v11661_v28, 1  ;;  %8664 = vmatmul.mubr.msk.bf16.vlgmr.msra.gmra.mxu0 %vm3066_vm6, %v11679_v44  ;;  %v11698_v32 = vpack.c.bf16 %v4205_v39, %v4203_v27  ;;  %v4211_v14 = vrot.slane %v11673_v21, 1  ;;  %v11741_v18 = vld [vmem:[#allocation2 + $0x90] sm:$0xff] }
 0x439   : > { %14315 = vst [vmem:[#allocation30_spill] sm:$0xff] %v11685_v17  ;;  %v9204_v4 = vpop.eup %9203  ;;  %v3982_v48 = vmul.f32 %v9202_v53, %v11510_v62  ;;  %4058 = vst.msk [vmem:[#allocation2 + $0xf1] sm:$0xff] %vm3066_vm6, %v3980_v11  ;;  %v11702_v8 = vpack.c.bf16 %v11675_v3, %v11673_v21  ;;  %8730 = vmatpush3.bf16.msra.mxu0 %v4924_v2  ;;  %v4212_v20 = vrot.slane %v11675_v3, 1  ;;  %v4214_v6 = vrot.slane %v11704_v41, 1  ;;  %v11743_v50 = vld [vmem:[#allocation2 + $0x98] sm:$0xff] }
 0x43a   : > { %14316 = vst [vmem:[#allocation33_spill] sm:$0xff] %v11698_v32  ;;  %v9206_v25 = vpop.eup %9205  ;;  %v3983_v62 = vmul.f32 %v9204_v4, %v11527_v60  ;;  %4059 = vst.msk [vmem:[#allocation2 + $0xf9] sm:$0xff] %vm3066_vm6, %v3981_v37  ;;  %8702 = vmatmul.mubr.msk.bf16.gmra.mxu1 %vm3066_vm6, %v11685_v17  ;;  %8667 = vmatprep.mubr.msk.bf16.mxu0 %vm3066_vm6, %v11698_v32  ;;  %v4209_v60 = vrot.slane %v11692_v29, 1  ;;  %v11750_v56 = vld [vmem:[#allocation2 + $0x88] sm:$0x3]  ;;  %v4216_v11 = vrot.slane %v11730_v24, 1 }
 0x43b   : > { %14317 = vst [vmem:[#allocation34_spill] sm:$0xff] %v11702_v8  ;;  %v9208_v40 = vpop.eup %9207  ;;  %v3984_v49 = vmul.f32 %v9206_v25, %v11534_v47  ;;  %4060 = vst.msk [vmem:[#allocation2 + $0x109] sm:$0xff] %vm3066_vm6, %v3982_v48  ;;  %8705 = vmatprep.mubr.msk.bf16.mxu1 %vm3066_vm6, %v11702_v8  ;;  %v4208_v47 = vsel %vm849_vm2, %v4206_v0, %v4207_v35  ;;  %9037 = vmatprep.subr.msk.bf16.mxu0 %vm3391_vm7, %v11709_v9  ;;  %v11761_v2 = vld [vmem:[#allocation2 + $0xa0] sm:$0x3]  ;;  %v4222_v48 = vrot.slane %v11743_v50, 1 }
 0x43c   : > { %v9210_v19 = vpop.eup %9209  ;;  %v3985_v10 = vmul.f32 %v9208_v40, %v11540_v30  ;;  %4061 = vst.msk [vmem:[#allocation2 + $0x111] sm:$0xff] %vm3066_vm6, %v3983_v62  ;;  %v4210_v55 = vsel %vm849_vm2, %v4207_v35, %v4209_v60  ;;  %v4213_v13 = vsel %vm849_vm2, %v4211_v14, %v4212_v20  ;;  %v4215_v38 = vsel %vm849_vm2, %v4212_v20, %v4214_v6  ;;  %v14323_v14 = vld [vmem:[#allocation25_spill] sm:$0xff]  ;;  %v11788_v60 = vld [vmem:[#allocation2 + $0xa8] sm:$0xff] }
 0x43d   : > { %v9212_v7 = vpop.eup %9211  ;;  %v3986_v43 = vmul.f32 %v9210_v19, %v11545_v59  ;;  %4062 = vst.msk [vmem:[#allocation2 + $0x121] sm:$0xff] %vm3066_vm6, %v3984_v49  ;;  %v11754_v16 = vpack.c.bf16 %v4210_v55, %v4208_v47  ;;  %v11765_v39 = vpack.c.bf16 %v4215_v38, %v4213_v13  ;;  %v11770_v0 = vpack.c.bf16 %v11743_v50, %v11741_v18  ;;  %v11790_v19 = vld [vmem:[#allocation2 + $0xb0] sm:$0xff]  ;;  %v11799_v13 = vld [vmem:[#allocation2 + $0xc0] sm:$0xff] }
 0x43e   : > { %v9214_v46 = vpop.eup %9213  ;;  %v3987_v51 = vmul.f32 %v9212_v7, %v11550_v54  ;;  %4063 = vst.msk [vmem:[#allocation2 + $0x129] sm:$0xff] %vm3066_vm6, %v3985_v10  ;;  %v11758_v54 = vpack.c.bf16 %v11732_v33, %v11730_v24  ;;  %v4219_v25 = vrot.slane %v11750_v56, 1  ;;  %v4224_v49 = vrot.slane %v11761_v2, 1  ;;  %v14324_v47 = vld [vmem:[#allocation31_spill] sm:$0xff] }
 0x43f   : > { %v9216_v36 = vpop.eup %9215  ;;  %v3988_v12 = vmul.f32 %v9214_v46, %v11555_v45  ;;  %4064 = vst.msk [vmem:[#allocation2 + $0x139] sm:$0xff] %vm3066_vm6, %v3986_v43  ;;  %14319 = vst [vmem:[#allocation9_spill] sm:$0xff] %v11754_v16  ;;  %v4217_v45 = vrot.slane %v11732_v33, 1  ;;  %v11801_v46 = vld [vmem:[#allocation2 + $0xc8] sm:$0xff]  ;;  %v14338_v34 = vrot.slane %v11611_v57, 2 }
 0x440   : > { %14320 = vst [vmem:[#allocation36_spill] sm:$0xff] %v11758_v54  ;;  %v9218_v53 = vpop.eup %9217  ;;  %v3989_v37 = vmul.f32 %v9216_v36, %v11560_v61  ;;  %4065 = vst.msk [vmem:[#allocation2 + $0x141] sm:$0xff] %vm3066_vm6, %v3987_v51  ;;  %8668 = vmatmul.mubr.msk.bf16.gmra.mxu0 %vm3066_vm6, %v11754_v16  ;;  %v4221_v61 = vrot.slane %v11741_v18, 1  ;;  %v14325_v51 = vld [vmem:[#allocation32_spill] sm:$0xff] }
 0x441   : > { %14321 = vst [vmem:[#allocation38_spill] sm:$0xff] %v11765_v39  ;;  %14322 = vst [vmem:[#allocation35_spill] sm:$0xff] %v11770_v0  ;;  %v9220_v35 = vpop.eup %9219  ;;  %v3990_v4 = vmul.f32 %v9218_v53, %v11565_v5  ;;  %8671 = vmatprep.mubr.msk.bf16.mxu0 %vm3066_vm6, %v11765_v39  ;;  %v4220_v53 = vsel %vm849_vm2, %v4217_v45, %v4219_v25  ;;  %v4231_v25 = vrot.slane %v11799_v13, 1  ;;  %v11848_v7 = vld [vmem:[#allocation2 + $0x100] sm:$0x3] }
 0x442   : > { %4066 = vst.msk [vmem:[#allocation2 + $0x151] sm:$0xff] %vm3066_vm6, %v3988_v12  ;;  %v9222_v62 = vpop.eup %9221  ;;  %v3991_v20 = vmul.f32 %v9220_v35, %v14323_v14  ;;  %4067 = vst.msk [vmem:[#allocation2 + $0x159] sm:$0xff] %vm3066_vm6, %v3989_v37  ;;  %8706 = vmatmul.mubr.msk.bf16.gmra.mxu1 %vm3066_vm6, %v11758_v54  ;;  %v4218_v12 = vsel %vm849_vm2, %v4216_v11, %v4217_v45  ;;  %v11808_v37 = vld [vmem:[#allocation2 + $0xb8] sm:$0x3]  ;;  %v11810_v35 = vld [vmem:[#allocation2 + $0xd0] sm:$0x3] }
 0x443   : > { %v9224_v10 = vpop.eup %9223  ;;  %v3992_v6 = vmul.f32 %v9222_v62, %v14324_v47  ;;  %4068 = vst.msk [vmem:[#allocation2 + $0x169] sm:$0xff] %vm3066_vm6, %v3990_v4  ;;  %8709 = vmatprep.mubr.msk.bf16.mxu1 %vm3066_vm6, %v11770_v0  ;;  %v4223_v4 = vsel %vm849_vm2, %v4221_v61, %v4222_v48  ;;  %v4225_v62 = vsel %vm849_vm2, %v4222_v48, %v4224_v49  ;;  %v4226_v14 = vrot.slane %v11788_v60, 1  ;;  %v11826_v61 = vld [vmem:[#allocation2 + $0xf0] sm:$0xff]  ;;  %v11836_v11 = vld [vmem:[#allocation2 + $0xf8] sm:$0xff]  ;;  %v11870_v42 = vld [vmem:[#allocation2 + $0x108] sm:$0xff] }
 0x444   : > { %v3993_v38 = vmul.f32 %v9224_v10, %v14325_v51  ;;  %4069 = vst.msk [vmem:[#allocation2 + $0x171] sm:$0xff] %vm3066_vm6, %v3991_v20  ;;  %v4227_v20 = vrot.slane %v11790_v19, 1  ;;  %v11817_v10 = vld [vmem:[#allocation2 + $0xd8] sm:$0xff]  ;;  %v4232_v47 = vrot.slane %v11801_v46, 1  ;;  %v11828_v48 = vpack.c.bf16 %v4220_v53, %v4218_v12  ;;  %v11846_v53 = vld [vmem:[#allocation2 + $0xe8] sm:$0x3] }
 0x445   : > { %4070 = vst.msk [vmem:[#allocation2 + $0x181] sm:$0xff] %vm3066_vm6, %v3992_v6  ;;  %v11824_v6 = vld [vmem:[#allocation2 + $0xe0] sm:$0xff]  ;;  %v11832_v49 = vpack.c.bf16 %v11790_v19, %v11788_v60  ;;  %v4229_v51 = vrot.slane %v11808_v37, 1  ;;  %v11838_v45 = vpack.c.bf16 %v4225_v62, %v4223_v4  ;;  %v11844_v12 = vpack.c.bf16 %v11801_v46, %v11799_v13  ;;  %v11886_v27 = vld [vmem:[#allocation2 + $0x128] sm:$0xff]  ;;  %v11894_v32 = vld [vmem:[#allocation2 + $0x118] sm:$0x3] }
 0x446   : > { %4071 = vst.msk [vmem:[#allocation2 + $0x189] sm:$0xff] %vm3066_vm6, %v3993_v38  ;;  %14326 = vst [vmem:[#allocation37_spill] sm:$0xff] %v11828_v48  ;;  %v4234_v38 = vrot.slane %v11810_v35, 1  ;;  %v4228_v43 = vsel %vm849_vm2, %v4226_v14, %v4227_v20  ;;  %v4236_v4 = vrot.slane %v11817_v10, 1  ;;  %v4237_v62 = vrot.slane %v11824_v6, 1  ;;  %v11884_v30 = vld [vmem:[#allocation2 + $0x120] sm:$0xff] }
 0x447   : > { %14327 = vst [vmem:[#allocation39_spill] sm:$0xff] %v11832_v49  ;;  %14328 = vst [vmem:[#allocation40_spill] sm:$0xff] %v11838_v45  ;;  %v4241_v55 = vrot.slane %v11826_v61, 1  ;;  %v4230_v36 = vsel %vm849_vm2, %v4227_v20, %v4229_v51  ;;  %v4233_v40 = vsel %vm849_vm2, %v4231_v25, %v4232_v47  ;;  %v4242_v14 = vrot.slane %v11836_v11, 1  ;;  %v11872_v20 = vld [vmem:[#allocation2 + $0x110] sm:$0xff] }
 0x448   : > { %14329 = vst [vmem:[#allocation42_spill] sm:$0xff] %v11844_v12  ;;  %8672 = vmatmul.mubr.msk.bf16.gmra.mxu0 %vm3066_vm6, %v11828_v48  ;;  %v4235_v5 = vsel %vm849_vm2, %v4232_v47, %v4234_v38  ;;  %v4239_v59 = vrot.slane %v11846_v53, 1  ;;  %v4244_v1 = vrot.slane %v11848_v7, 1  ;;  %v11876_v25 = vpack.c.bf16 %v11824_v6, %v11817_v10  ;;  %v11896_v47 = vld [vmem:[#allocation2 + $0x130] sm:$0x3] }
 0x449   : > { %8675 = vmatprep.mubr.msk.bf16.mxu0 %vm3066_vm6, %v11838_v45  ;;  %v11882_v38 = vpack.c.bf16 %v11836_v11, %v11826_v61  ;;  %v11888_v45 = vpack.c.bf16 %v4230_v36, %v4228_v43  ;;  %v11890_v48 = vpack.c.bf16 %v4235_v5, %v4233_v40  ;;  %v4238_v39 = vsel %vm849_vm2, %v4236_v4, %v4237_v62  ;;  %v11906_v36 = vld [vmem:[#allocation2 + $0x138] sm:$0xff]  ;;  %v11908_v4 = vld [vmem:[#allocation2 + $0x140] sm:$0xff]  ;;  %v11917_v43 = vld [vmem:[#allocation2 + $0x150] sm:$0xff] }
 0x44a   : > { %8710 = vmatmul.mubr.msk.bf16.gmra.mxu1 %vm3066_vm6, %v11832_v49  ;;  %14330 = vst [vmem:[#allocation44_spill] sm:$0xff] %v11876_v25  ;;  %v4243_v16 = vsel %vm849_vm2, %v4241_v55, %v4242_v14  ;;  %v4240_v51 = vsel %vm849_vm2, %v4237_v62, %v4239_v59  ;;  %v4245_v44 = vsel %vm849_vm2, %v4242_v14, %v4244_v1  ;;  %v4247_v49 = vrot.slane %v11872_v20, 1  ;;  %v11919_v40 = vld [vmem:[#allocation2 + $0x158] sm:$0xff]  ;;  %v11932_v9 = vld [vmem:[#allocation2 + $0x148] sm:$0x3] }
 0x44b   : > { %8713 = vmatprep.mubr.msk.bf16.mxu1 %vm3066_vm6, %v11844_v12  ;;  %14331 = vst [vmem:[#allocation59_spill] sm:$0xff] %v11882_v38  ;;  %14332 = vst [vmem:[#allocation41_spill] sm:$0xff] %v11888_v45  ;;  %v4246_v12 = vrot.slane %v11870_v42, 1  ;;  %v4251_v5 = vrot.slane %v11884_v30, 1  ;;  %v4252_v55 = vrot.slane %v11886_v27, 1  ;;  %v11912_v59 = vpack.c.bf16 %v11872_v20, %v11870_v42  ;;  %v11957_v22 = vld [vmem:[#allocation2 + $0x168] sm:$0xff] }
 0x44c   : > { %14333 = vst [vmem:[#allocation46_spill] sm:$0xff] %v11890_v48  ;;  %v4249_v62 = vrot.slane %v11894_v32, 1  ;;  %v4254_v14 = vrot.slane %v11896_v47, 1  ;;  %v11923_v0 = vpack.c.bf16 %v4240_v51, %v4238_v39  ;;  %v11925_v54 = vpack.c.bf16 %v4245_v44, %v4243_v16  ;;  %14334 = vst [vmem:[#allocation48_spill] sm:$0xff] %v11932_v9 }
 0x44d   : > { %v11930_v1 = vpack.c.bf16 %v11886_v27, %v11884_v30  ;;  %v4256_v44 = vrot.slane %v11906_v36, 1  ;;  %v4257_v16 = vrot.slane %v11908_v4, 1  ;;  %v4253_v51 = vsel %vm849_vm2, %v4251_v5, %v4252_v55  ;;  %v11959_v5 = vld [vmem:[#allocation2 + $0x170] sm:$0xff] }
 0x44e   : > { %v4250_v39 = vsel %vm849_vm2, %v4247_v49, %v4249_v62  ;;  %v4255_v8 = vsel %vm849_vm2, %v4252_v55, %v4254_v14  ;;  %v11954_v62 = vpack.c.bf16 %v11908_v4, %v11906_v36  ;;  %v4820_v57 = vrot.slane %v11957_v22, 2 }
 0x450   : > { %8676 = vmatmul.mubr.msk.bf16.gmra.mxu0 %vm3066_vm6, %v11888_v45  ;;  %v4248_v45 = vsel %vm849_vm2, %v4246_v12, %v4247_v49  ;;  %v11967_v12 = vpack.c.bf16 %v11919_v40, %v11917_v43  ;;  %v11969_v49 = vpack.c.bf16 %v4255_v8, %v4253_v51  ;;  %v11987_v8 = vpack.c.bf16 %v11959_v5, %v11957_v22 }
 0x451   : > { %8679 = vmatprep.mubr.msk.bf16.mxu0 %vm3066_vm6, %v11890_v48  ;;  %v4261_v48 = vrot.slane %v11917_v43, 1  ;;  %v11961_v55 = vpack.c.bf16 %v4250_v39, %v4248_v45  ;;  %v14335_v39 = vrot.slane %v11919_v40, 1  ;;  %v14337_v51 = vrot.slane %v11616_v52, 2 }
 0x452   : > { %8714 = vmatmul.mubr.msk.bf16.gmra.mxu1 %vm3066_vm6, %v11876_v25  ;;  %v11948_v25 = vld [vmem:[#allocation2 + $0x160] sm:$0x3]  ;;  %14336 = vst [vmem:[#allocation50_spill] sm:$0xff] %v11987_v8  ;;  %v4758_v8 = vrot.slane %v11652_v26, 2  ;;  %v14344_v52 = vrot.slane %v11659_v23, 2  ;;  %v14347_v23 = vrot.slane %v11673_v21, 2 }
 0x453   : > { %8717 = vmatprep.mubr.msk.bf16.mxu1 %vm3066_vm6, %v11882_v38  ;;  %v4259_v38 = vrot.slane %v11932_v9, 1  ;;  %v11974_v9 = vsel %vm849_vm2, %v4256_v44, %v4257_v16  ;;  %v11982_v14 = vsel %vm849_vm2, %v4261_v48, %v14335_v39  ;;  %v4752_v44 = vsel %vm1406_vm4, %v14338_v34, %v14337_v51 }
 0x454   : > { %v14341_v48 = vrot.slane %v11629_v31, 2  ;;  %v14342_v39 = vrot.slane %v11625_v63, 2  ;;  %v4821_v63 = vrot.slane %v11959_v5, 2  ;;  %v14349_v31 = vrot.slane %v11732_v33, 2 }
 0x455   : > { %v11977_v45 = vsel %vm849_vm2, %v4257_v16, %v4259_v38  ;;  %v14339_v38 = vrot.slane %v11632_v15, 2  ;;  %v14340_v16 = vmov %v14337_v51  ;;  %v14343_v15 = vrot.slane %v11661_v28, 2 }
 0x456   : > { %v4757_v17 = vsel %vm1406_vm4, %v14342_v39, %v14341_v48  ;;  %v14345_v26 = vmov %v14341_v48  ;;  %v4773_v21 = vrot.slane %v11750_v56, 2  ;;  %v14353_v28 = vrot.slane %v11741_v18, 2 }
 0x457   : > { %v4754_v58 = vsel %vm1406_vm4, %v14340_v16, %v14339_v38  ;;  %v4762_v51 = vsel %vm1406_vm4, %v14344_v52, %v14343_v15  ;;  %v4763_v38 = vrot.slane %v11692_v29, 2  ;;  %v4768_v29 = vrot.slane %v11704_v41, 2 }
 0x458   : > { %8680 = vmatmul.mubr.msk.bf16.gmra.mxu0 %vm3066_vm6, %v11923_v0  ;;  %v12008_v34 = vpack.c.bf16 %v4754_v58, %v4752_v44  ;;  %v4759_v58 = vsel %vm1406_vm4, %v14345_v26, %v4758_v8  ;;  %v14346_v44 = vrot.slane %v11675_v3, 2  ;;  %v14348_v39 = vmov %v14343_v15 }
 0x459   : > { %8683 = vmatprep.mubr.msk.bf16.mxu0 %vm3066_vm6, %v11925_v54  ;;  %v12032_v48 = vpack.c.bf16 %v4759_v58, %v4757_v17  ;;  %v4764_v15 = vsel %vm1406_vm4, %v14348_v39, %v4763_v38  ;;  %v14350_v8 = vrot.slane %v11730_v24, 2  ;;  %v14352_v17 = vrot.slane %v11743_v50, 2 }
 0x45a   : > { %8718 = vmatmul.mubr.msk.bf16.gmra.mxu1 %vm3066_vm6, %v11912_v59  ;;  %v4767_v16 = vsel %vm1406_vm4, %v14347_v23, %v14346_v44  ;;  %v12043_v26 = vpack.c.bf16 %v4764_v15, %v4762_v51  ;;  %v14351_v41 = vmov %v14346_v44  ;;  %v4778_v58 = vrot.slane %v11761_v2, 2 }
 0x45b   : > { %8721 = vmatprep.mubr.msk.bf16.mxu1 %vm3066_vm6, %v11930_v1  ;;  %v4772_v52 = vsel %vm1406_vm4, %v14350_v8, %v14349_v31  ;;  %v4769_v44 = vsel %vm1406_vm4, %v14351_v41, %v4768_v29  ;;  %v4777_v38 = vsel %vm1406_vm4, %v14353_v28, %v14352_v17  ;;  %v14354_v24 = vmov %v14349_v31 }
 0x45c   : > { %v12054_v23 = vpack.c.bf16 %v4769_v44, %v4767_v16  ;;  %v4774_v56 = vsel %vm1406_vm4, %v14354_v24, %v4773_v21  ;;  %v14355_v51 = vrot.slane %v11790_v19, 2  ;;  %v14356_v3 = vrot.slane %v11788_v60, 2 }
 0x45d   : > { %v4783_v39 = vrot.slane %v11808_v37, 2  ;;  %v12065_v15 = vpack.c.bf16 %v4774_v56, %v4772_v52  ;;  %v14357_v18 = vmov %v14352_v17  ;;  %v14358_v16 = vrot.slane %v11801_v46, 2 }
 0x45e   : > { %v4782_v29 = vsel %vm1406_vm4, %v14356_v3, %v14355_v51  ;;  %v4779_v2 = vsel %vm1406_vm4, %v14357_v18, %v4778_v58  ;;  %v14359_v33 = vrot.slane %v11799_v13, 2  ;;  %v4788_v8 = vrot.slane %v11810_v35, 2  ;;  %v12126_v18 = vld [vmem:[#allocation2 + $0x180] sm:$0xff] }
 0x45f   : > { %v12076_v21 = vpack.c.bf16 %v4779_v2, %v4777_v38  ;;  %v14360_v60 = vmov %v14355_v51  ;;  %v14361_v52 = vrot.slane %v11824_v6, 2  ;;  %v14362_v50 = vrot.slane %v11817_v10, 2 }
 0x460   : > { %v4787_v31 = vsel %vm1406_vm4, %v14359_v33, %v14358_v16  ;;  %v4784_v37 = vsel %vm1406_vm4, %v14360_v60, %v4783_v39  ;;  %v4793_v44 = vrot.slane %v11846_v53, 2  ;;  %v14363_v13 = vmov %v14358_v16  ;;  %8684 = vmatmul.mubr.msk.bf16.gmra.mxu0 %vm3066_vm6, %v11961_v55 }
 0x461   : > { %v4792_v41 = vsel %vm1406_vm4, %v14362_v50, %v14361_v52  ;;  %v12087_v17 = vpack.c.bf16 %v4784_v37, %v4782_v29  ;;  %v4789_v35 = vsel %vm1406_vm4, %v14363_v13, %v4788_v8  ;;  %v14364_v28 = vrot.slane %v11836_v11, 2  ;;  %8687 = vmatprep.mubr.msk.bf16.mxu0 %vm3066_vm6, %v11969_v49  ;;  %v14375_v8 = vld [vmem:[#allocation48_spill] sm:$0xff] }
 0x462   : > { %v14365_v19 = vrot.slane %v11826_v61, 2  ;;  %v4798_v58 = vrot.slane %v11848_v7, 2  ;;  %v12100_v10 = vpack.c.bf16 %v4789_v35, %v4787_v31  ;;  %v14366_v53 = vmov %v14361_v52  ;;  %8722 = vmatmul.mubr.msk.bf16.gmra.mxu1 %vm3066_vm6, %v11954_v62  ;;  %v4119_v37 = vld [vmem:[#allocation2 + $0x178] sm:$0x3] }
 0x463   : > { %v4794_v24 = vsel %vm1406_vm4, %v14366_v53, %v4793_v44  ;;  %v14367_v46 = vrot.slane %v11872_v20, 2  ;;  %v14368_v56 = vrot.slane %v11870_v42, 2  ;;  %v4803_v61 = vrot.slane %v11894_v32, 2  ;;  %8725 = vmatprep.mubr.msk.bf16.mxu1 %vm3066_vm6, %v11967_v12 }
 0x464   : > { %v4797_v38 = vsel %vm1406_vm4, %v14365_v19, %v14364_v28  ;;  %v12115_v7 = vpack.c.bf16 %v4794_v24, %v4792_v41  ;;  %v14369_v6 = vmov %v14364_v28  ;;  %v14370_v29 = vrot.slane %v11886_v27, 2 }
 0x465   : > { %v4802_v51 = vsel %vm1406_vm4, %v14368_v56, %v14367_v46  ;;  %v4799_v3 = vsel %vm1406_vm4, %v14369_v6, %v4798_v58  ;;  %v14371_v42 = vrot.slane %v11884_v30, 2  ;;  %v4808_v32 = vrot.slane %v11896_v47, 2  ;;  %v12141_v47 = vld [vmem:[#allocation2 + $0x188] sm:$0xff] }
 0x466   : > { %v12130_v2 = vpack.c.bf16 %v4799_v3, %v4797_v38  ;;  %v14372_v16 = vmov %v14367_v46  ;;  %v14373_v33 = vrot.slane %v11908_v4, 2  ;;  %v14374_v31 = vrot.slane %v11906_v36, 2 }
 0x467   : > { %v4807_v39 = vsel %vm1406_vm4, %v14371_v42, %v14370_v29  ;;  %v4804_v11 = vsel %vm1406_vm4, %v14372_v16, %v4803_v61  ;;  %v4813_v60 = vrot.slane %v14375_v8, 2  ;;  %v14376_v50 = vmov %v14370_v29  ;;  %v14387_v8 = vld [vmem:[#allocation11_spill] sm:$0xff] }
 0x468   : > { %v4812_v30 = vsel %vm1406_vm4, %v14374_v31, %v14373_v33  ;;  %v12143_v52 = vpack.c.bf16 %v4804_v11, %v4802_v51  ;;  %v4809_v41 = vsel %vm1406_vm4, %v14376_v50, %v4808_v32  ;;  %v14377_v20 = vrot.slane %v11919_v40, 2  ;;  %v12172_v51 = vld [vmem:[#allocation2 + $0x190] sm:$0x3]  ;;  %v7891_v50 = vld [vmem:[%s13967_s8 + $0x1c] sm:$0xf] }
 0x469   : > { %v14378_v44 = vrot.slane %v11917_v43, 2  ;;  %v4818_v36 = vrot.slane %v11948_v25, 2  ;;  %v14379_v35 = vrot.slane %v11948_v25, 1  ;;  %v14380_v28 = vrot.slane %v11919_v40, 1 }
 0x46a   : > { %v12159_v38 = vpack.c.bf16 %v4809_v41, %v4807_v39  ;;  %v14381_v27 = vmov %v14373_v33  ;;  %v5324_v53 = vrot.slane %v12126_v18, 1  ;;  %v4266_v43 = vrot.slane %v11957_v22, 1  ;;  %v14385_v33 = vld [vmem:[#allocation24_spill] sm:$0xff]  ;;  %v14390_v41 = vld [vmem:[#allocation30_spill] sm:$0xff] }
 0x46b   : > { %v4817_v13 = vsel %vm1406_vm4, %v14378_v44, %v14377_v20  ;;  %v4265_v19 = vsel %vm849_vm2, %v14380_v28, %v14379_v35  ;;  %v4814_v58 = vsel %vm1406_vm4, %v14381_v27, %v4813_v60  ;;  %v14382_v46 = vmov %v14377_v20  ;;  %v14388_v60 = vld [vmem:[#allocation15_spill] sm:$0xff]  ;;  %v14391_v20 = vld [vmem:[#allocation14_spill] sm:$0xff]  ;;  %v14393_v35 = vld [vmem:[#allocation36_spill] sm:$0xff] }
 0x46c   : > { %v12166_v24 = vpack.c.bf16 %v4814_v58, %v4812_v30  ;;  %v4819_v25 = vsel %vm1406_vm4, %v14382_v46, %v4818_v36  ;;  %v5325_v56 = vrot.slane %v12141_v47, 1  ;;  %v12176_v61 = vpack.c.bf16 %v11977_v45, %v11974_v9  ;;  %v14383_v45 = vld [vmem:[#allocation50_spill] sm:$0xff]  ;;  %v14386_v30 = vld [vmem:[#allocation23_spill] sm:$0xff]  ;;  %v14397_v58 = vld [vmem:[#allocation44_spill] sm:$0xff] }
 0x46d   : > { %v12178_v4 = vpack.c.bf16 %v4819_v25, %v4817_v13  ;;  %v4822_v6 = vsel %vm1406_vm4, %v4820_v57, %v4821_v63  ;;  %v4823_v3 = vrot.slane %v4119_v37, 2  ;;  %v12186_v40 = vpack.c.bf16 %v4265_v19, %v11982_v14  ;;  %8726 = vmatmul.mubr.msk.bf16.gmra.mxu1 %vm3066_vm6, %v14383_v45  ;;  %v14384_v57 = vld [vmem:[#allocation29_spill] sm:$0xff]  ;;  %v7874_v13 = vld [vmem:[%s13967_s8 + $0x18] sm:$0xf]  ;;  %v14392_v36 = vld [vmem:[#allocation34_spill] sm:$0xff] }
 0x46e   : > { %v4267_v29 = vrot.slane %v11959_v5, 1  ;;  %v4269_v42 = vrot.slane %v4119_v37, 1  ;;  %v5326_v39 = vsel %vm849_vm2, %v5324_v53, %v5325_v56  ;;  %8688 = vmatmul.mubr.msk.bf16.gmra.mxu0 %vm3066_vm6, %v12176_v61  ;;  %v5327_v22 = vrot.slane %v12172_v51, 1  ;;  %8765 = vmatprep.mubr.msk.bf16.mxu1 %vm3066_vm6, %v14384_v57  ;;  %v14394_v28 = vld [vmem:[#allocation35_spill] sm:$0xff]  ;;  %v14396_v27 = vld [vmem:[#allocation42_spill] sm:$0xff] }
 0x46f   : > { %v4824_v9 = vsel %vm1406_vm4, %v4821_v63, %v4823_v3  ;;  %8691 = vmatprep.mubr.msk.bf16.mxu0 %vm3066_vm6, %v12186_v40  ;;  %v5547_v31 = vsel %vm3391_vm7, %v14385_v33, 0  ;;  %v14389_v37 = vpack.c.bf16 %v14387_v8, %v14388_v60  ;;  %v5338_v44 = vsel %vm3391_vm7, %v14391_v20, 0  ;;  %v14395_v19 = vld [vmem:[#allocation39_spill] sm:$0xff]  ;;  %v14401_v3 = vld [vmem:[#allocation33_spill] sm:$0xff]  ;;  %v14407_v57 = vld [vmem:[#allocation46_spill] sm:$0xff] }
 0x470   : > { %v12200_v14 = vpack.c.bf16 %v4824_v9, %v4822_v6  ;;  %v5328_v32 = vsel %vm849_vm2, %v5325_v56, %v5327_v22  ;;  %v4268_v16 = vsel %vm849_vm2, %v4266_v43, %v4267_v29  ;;  %v4270_v5 = vsel %vm849_vm2, %v4267_v29, %v4269_v42  ;;  %v14398_v53 = vld [vmem:[#allocation59_spill] sm:$0xff]  ;;  %v14402_v29 = vld [vmem:[#allocation9_spill] sm:$0xff]  ;;  %v14403_v42 = vld [vmem:[#allocation38_spill] sm:$0xff] }
 0x471   : > { %v12207_v63 = vpack.c.bf16 %v5328_v32, %v5326_v39  ;;  %v12209_v11 = vpack.c.bf16 %v4270_v5, %v4268_v16  ;;  %v12285_v43 = vpack.c.bf16 %v12141_v47, %v12126_v18  ;;  %v5961_v46 = vsel %vm3391_vm7, %v7891_v50, 0  ;;  %v14399_v25 = vld [vmem:[#allocation27_spill] sm:$0xff]  ;;  %v14404_v39 = vld [vmem:[#allocation37_spill] sm:$0xff]  ;;  %v14405_v9 = vld [vmem:[#allocation40_spill] sm:$0xff] }
 0x472   : > { %v14400_v56 = vmov 0.0   ;;  %v5749_v6 = vsel %vm3391_vm7, %v7874_v13, 0  ;;  %v14406_v22 = vld [vmem:[#allocation41_spill] sm:$0xff]  ;;  %v5533_v32 = vrot.slane %v12126_v18, 2  ;;  %v5534_v16 = vrot.slane %v12141_v47, 2  ;;  %v12371_v47 = vld [vmem:[#allocation2 + $0x198] sm:$0xff] }
 0x473   : > { %v5536_v5 = vrot.slane %v12172_v51, 2  ;;  %v12373_v51 = vld [vmem:[#allocation2 + $0x1a0] sm:$0xff]  ;;  %v6156_v8 = vrot.slane %v12371_v47, 2 }
 0x474   : > { %v5535_v33 = vsel %vm1406_vm4, %v5533_v32, %v5534_v16  ;;  %v6157_v60 = vrot.slane %v12373_v51, 2 }
 0x475   : > { %8766 = vmatmul.mubr.msk.bf16.vlgmr.msra.gmra.mxu1 %vm3066_vm6, %v14386_v30 }
 0x476   : > { %8692 = vmatmul.mubr.msk.bf16.gmra.mxu0 %vm3066_vm6, %v12209_v11  ;;  %8769 = vmatprep.mubr.msk.bf16.mxu1 %vm3066_vm6, %v14390_v41  ;;  %v12384_v20 = vsel %vm1406_vm4, %v6156_v8, %v6157_v60 }
 0x477   : > { %8731 = vmatprep.mubr.msk.bf16.mxu0 %vm3066_vm6, %v14389_v37  ;;  %8832 = vmatpush3.bf16.msra.mxu1 %v5547_v31  ;;  %v5537_v31 = vsel %vm1406_vm4, %v5534_v16, %v5536_v5  ;;  %v12379_v37 = vld [vmem:[#allocation2 + $0x1a8] sm:$0x3] }
 0x478   : > { %9040 = vmatprep.subr.msk.bf16.mxu1 %vm3391_vm7, %v7891_v50  ;;  %v12363_v18 = vpack.c.bf16 %v5537_v31, %v5535_v33 }
 0x47d   : > { %8770 = vmatmul.mubr.msk.bf16.gmra.mxu1 %vm3066_vm6, %v14392_v36 }
 0x47e   : > { %8732 = vmatmul.mubr.msk.bf16.vlgmr.msra.gmra.mxu0 %vm3066_vm6, %v12008_v34  ;;  %8773 = vmatprep.mubr.msk.bf16.mxu1 %vm3066_vm6, %v14393_v35 }
 0x47f   : > { %8798 = vmatpush3.bf16.msra.mxu0 %v5338_v44  ;;  %8735 = vmatprep.mubr.msk.bf16.mxu0 %vm3066_vm6, %v12032_v48  ;;  %v6159_v44 = vrot.slane %v12379_v37, 2 }
 0x480   : > { %9039 = vmatprep.subr.msk.bf16.mxu0 %vm3391_vm7, %v7874_v13 }
 0x485   : > { %8774 = vmatmul.mubr.msk.bf16.gmra.mxu1 %vm3066_vm6, %v14394_v28 }
 0x486   : > { %8736 = vmatmul.mubr.msk.bf16.gmra.mxu0 %vm3066_vm6, %v12043_v26  ;;  %8777 = vmatprep.mubr.msk.bf16.mxu1 %vm3066_vm6, %v14395_v19 }
 0x487   : > { %8739 = vmatprep.mubr.msk.bf16.mxu0 %vm3066_vm6, %v12054_v23 }
 0x48d   : > { %8778 = vmatmul.mubr.msk.bf16.gmra.mxu1 %vm3066_vm6, %v14396_v27 }
 0x48e   : > { %8740 = vmatmul.mubr.msk.bf16.gmra.mxu0 %vm3066_vm6, %v12065_v15  ;;  %8781 = vmatprep.mubr.msk.bf16.mxu1 %vm3066_vm6, %v14397_v58 }
 0x48f   : > { %8743 = vmatprep.mubr.msk.bf16.mxu0 %vm3066_vm6, %v12076_v21 }
 0x495   : > { %8782 = vmatmul.mubr.msk.bf16.gmra.mxu1 %vm3066_vm6, %v14398_v53 }
 0x496   : > { %8744 = vmatmul.mubr.msk.bf16.gmra.mxu0 %vm3066_vm6, %v12087_v17  ;;  %8785 = vmatprep.mubr.msk.bf16.mxu1 %vm3066_vm6, %v11912_v59 }
 0x497   : > { %8747 = vmatprep.mubr.msk.bf16.mxu0 %vm3066_vm6, %v12100_v10 }
 0x49d   : > { %8786 = vmatmul.mubr.msk.bf16.gmra.mxu1 %vm3066_vm6, %v11930_v1 }
 0x49e   : > { %8748 = vmatmul.mubr.msk.bf16.gmra.mxu0 %vm3066_vm6, %v12115_v7  ;;  %8789 = vmatprep.mubr.msk.bf16.mxu1 %vm3066_vm6, %v11954_v62 }
 0x49f   : > { %8751 = vmatprep.mubr.msk.bf16.mxu0 %vm3066_vm6, %v12130_v2 }
 0x4a5   : > { %8790 = vmatmul.mubr.msk.bf16.gmra.mxu1 %vm3066_vm6, %v11967_v12 }
 0x4a6   : > { %8752 = vmatmul.mubr.msk.bf16.gmra.mxu0 %vm3066_vm6, %v12143_v52  ;;  %8793 = vmatprep.mubr.msk.bf16.mxu1 %vm3066_vm6, %v14383_v45 }
 0x4a7   : > { %8755 = vmatprep.mubr.msk.bf16.mxu0 %vm3066_vm6, %v12159_v38 }
 0x4ad   : > { %8794 = vmatmul.mubr.msk.bf16.gmra.mxu1 %vm3066_vm6, %v12285_v43 }
 0x4ae   : > { %8756 = vmatmul.mubr.msk.bf16.gmra.mxu0 %vm3066_vm6, %v12166_v24  ;;  %8833 = vmatprep.mubr.msk.bf16.mxu1 %vm3066_vm6, %v12008_v34  ;;  %v7908_v34 = vld [vmem:[%s13967_s8 + $0x20] sm:$0xf] }
 0x4af   : > { %8759 = vmatprep.mubr.msk.bf16.mxu0 %vm3066_vm6, %v12178_v4 }
 0x4b5   : > { %8834 = vmatmul.mubr.msk.bf16.vlgmr.msra.gmra.mxu1 %vm3066_vm6, %v12032_v48 }
 0x4b6   : > { %8760 = vmatmul.mubr.msk.bf16.gmra.mxu0 %vm3066_vm6, %v12200_v14  ;;  %8837 = vmatprep.mubr.msk.bf16.mxu1 %vm3066_vm6, %v12043_v26 }
 0x4b7   : > { %8799 = vmatprep.mubr.msk.bf16.mxu0 %vm3066_vm6, %v14399_v25  ;;  %8900 = vmatpush3.bf16.msra.mxu1 %v5961_v46  ;;  %v12392_v46 = vsel %vm1406_vm4, %v6157_v60, %v6159_v44 }
 0x4b8   : > { %8972 = vmatprep.subr.mxu1 %v14400_v56 }
 0x4bd   : > { %8838 = vmatmul.mubr.msk.bf16.gmra.mxu1 %vm3066_vm6, %v12054_v23 }
 0x4be   : > { %8800 = vmatmul.mubr.msk.bf16.vlgmr.msra.gmra.mxu0 %vm3066_vm6, %v14401_v3  ;;  %8841 = vmatprep.mubr.msk.bf16.mxu1 %vm3066_vm6, %v12065_v15 }
 0x4bf   : > { %8866 = vmatpush3.bf16.msra.mxu0 %v5749_v6  ;;  %8803 = vmatprep.mubr.msk.bf16.mxu0 %vm3066_vm6, %v14402_v29  ;;  %v6170_v6 = vsel %vm3391_vm7, %v7908_v34, 0 }
 0x4c0   : > { %9041 = vmatprep.subr.msk.bf16.mxu0 %vm3391_vm7, %v7908_v34 }
 0x4c5   : > { %8842 = vmatmul.mubr.msk.bf16.gmra.mxu1 %vm3066_vm6, %v12076_v21 }
 0x4c6   : > { %8804 = vmatmul.mubr.msk.bf16.gmra.mxu0 %vm3066_vm6, %v14403_v42  ;;  %8845 = vmatprep.mubr.msk.bf16.mxu1 %vm3066_vm6, %v12087_v17 }
 0x4c7   : > { %8807 = vmatprep.mubr.msk.bf16.mxu0 %vm3066_vm6, %v14404_v39 }
 0x4cd   : > { %8846 = vmatmul.mubr.msk.bf16.gmra.mxu1 %vm3066_vm6, %v12100_v10 }
 0x4ce   : > { %8808 = vmatmul.mubr.msk.bf16.gmra.mxu0 %vm3066_vm6, %v14405_v9  ;;  %8849 = vmatprep.mubr.msk.bf16.mxu1 %vm3066_vm6, %v12115_v7 }
 0x4cf   : > { %8811 = vmatprep.mubr.msk.bf16.mxu0 %vm3066_vm6, %v14406_v22 }
 0x4d5   : > { %8850 = vmatmul.mubr.msk.bf16.gmra.mxu1 %vm3066_vm6, %v12130_v2 }
 0x4d6   : > { %8812 = vmatmul.mubr.msk.bf16.gmra.mxu0 %vm3066_vm6, %v14407_v57  ;;  %8853 = vmatprep.mubr.msk.bf16.mxu1 %vm3066_vm6, %v12143_v52 }
 0x4d7   : > { %8815 = vmatprep.mubr.msk.bf16.mxu0 %vm3066_vm6, %v11923_v0 }
 0x4dd   : > { %8854 = vmatmul.mubr.msk.bf16.gmra.mxu1 %vm3066_vm6, %v12159_v38 }
 0x4de   : > { %8816 = vmatmul.mubr.msk.bf16.gmra.mxu0 %vm3066_vm6, %v11925_v54  ;;  %8857 = vmatprep.mubr.msk.bf16.mxu1 %vm3066_vm6, %v12166_v24 }
 0x4df   : > { %8819 = vmatprep.mubr.msk.bf16.mxu0 %vm3066_vm6, %v11961_v55 }
 0x4e5   : > { %8858 = vmatmul.mubr.msk.bf16.gmra.mxu1 %vm3066_vm6, %v12178_v4 }
 0x4e6   : > { %8820 = vmatmul.mubr.msk.bf16.gmra.mxu0 %vm3066_vm6, %v11969_v49  ;;  %8861 = vmatprep.mubr.msk.bf16.mxu1 %vm3066_vm6, %v12200_v14 }
 0x4e7   : > { %8823 = vmatprep.mubr.msk.bf16.mxu0 %vm3066_vm6, %v12176_v61 }
 0x4ed   : > { %8862 = vmatmul.mubr.msk.bf16.gmra.mxu1 %vm3066_vm6, %v12363_v18 }
 0x4ee   : > { %8824 = vmatmul.mubr.msk.bf16.gmra.mxu0 %vm3066_vm6, %v12186_v40  ;;  %8901 = vmatprep.mubr.msk.bf16.mxu1 %vm3066_vm6, %v14401_v3 }
 0x4ef   : > { %8827 = vmatprep.mubr.msk.bf16.mxu0 %vm3066_vm6, %v12209_v11 }
 0x4f2   : > { %v8699_v50 = vpop.f32.mrf.mxu1 }
 0x4f4   : > { %v4618_v13 = vpop.f32.mrf.mxu1 }
 0x4f5   : > { %8902 = vmatmul.mubr.msk.bf16.vlgmr.msra.gmra.mxu1 %vm3066_vm6, %v14402_v29 }
 0x4f6   : > { %8828 = vmatmul.mubr.msk.bf16.gmra.mxu0 %vm3066_vm6, %v12207_v63  ;;  %8905 = vmatprep.mubr.msk.bf16.mxu1 %vm3066_vm6, %v14403_v42 }
 0x4f7   : > { %8867 = vmatprep.mubr.msk.bf16.mxu0 %vm3066_vm6, %v14386_v30  ;;  %v8700_v30 = vpop.f32.mrf.mxu1 }
 0x4f8   : > { %v8665_v32 = vpop.f32.mrf.mxu0 }
 0x4f9   : > { %v4621_v3 = vpop.f32.mrf.mxu1  ;;  %v12399_v16 = vadd.f32 %v8699_v50, %v8665_v32 }
 0x4fa   : > { %v4406_v42 = vpop.f32.mrf.mxu0 }
 0x4fb   : > { %v8703_v29 = vpop.f32.mrf.mxu1  ;;  %v12406_v5 = vadd.f32 %v4618_v13, %v4406_v42 }
 0x4fd   : > { %8906 = vmatmul.mubr.msk.bf16.gmra.mxu1 %vm3066_vm6, %v14404_v39  ;;  %v4634_v34 = vpop.f32.mrf.mxu1 }
 0x4fe   : > { %8868 = vmatmul.mubr.msk.bf16.vlgmr.msra.gmra.mxu0 %vm3066_vm6, %v14390_v41  ;;  %8909 = vmatprep.mubr.msk.bf16.mxu1 %vm3066_vm6, %v14405_v9  ;;  %v8666_v41 = vpop.f32.mrf.mxu0 }
 0x4ff   : > { %8934 = vmatpush3.bf16.msra.mxu0 %v6170_v6  ;;  %8871 = vmatprep.mubr.msk.bf16.mxu0 %vm3066_vm6, %v14392_v36  ;;  %v12410_v33 = vadd.f32 %v8700_v30, %v8666_v41  ;;  %v8704_v31 = vpop.f32.mrf.mxu1 }
 0x500   : > { %8967 = vmatprep.subr.mxu0 %v14400_v56  ;;  %v4409_v8 = vpop.f32.mrf.mxu0 }
 0x501   : > { %v12412_v60 = vadd.f32 %v4621_v3, %v4409_v8  ;;  %v4637_v36 = vpop.f32.mrf.mxu1 }
 0x502   : > { %v8669_v50 = vpop.f32.mrf.mxu0 }
 0x503   : > { %v12416_v39 = vadd.f32 %v8703_v29, %v8669_v50  ;;  %v8707_v44 = vpop.f32.mrf.mxu1 }
 0x504   : > { %v4422_v9 = vpop.f32.mrf.mxu0 }
 0x505   : > { %8910 = vmatmul.mubr.msk.bf16.gmra.mxu1 %vm3066_vm6, %v14406_v22  ;;  %v12422_v13 = vadd.f32 %v4634_v34, %v4422_v9  ;;  %v4650_v30 = vpop.f32.mrf.mxu1 }
 0x506   : > { %8872 = vmatmul.mubr.msk.bf16.gmra.mxu0 %vm3066_vm6, %v14393_v35  ;;  %8913 = vmatprep.mubr.msk.bf16.mxu1 %vm3066_vm6, %v14407_v57  ;;  %v8670_v6 = vpop.f32.mrf.mxu0 }
 0x507   : > { %8875 = vmatprep.mubr.msk.bf16.mxu0 %vm3066_vm6, %v14394_v28  ;;  %v12426_v3 = vadd.f32 %v8704_v31, %v8670_v6  ;;  %v8708_v35 = vpop.f32.mrf.mxu1 }
 0x508   : > { %v4425_v32 = vpop.f32.mrf.mxu0 }
 0x509   : > { %v12428_v29 = vadd.f32 %v4637_v36, %v4425_v32  ;;  %v4653_v42 = vpop.f32.mrf.mxu1 }
 0x50a   : > { %v8673_v28 = vpop.f32.mrf.mxu0 }
 0x50b   : > { %v12432_v41 = vadd.f32 %v8707_v44, %v8673_v28  ;;  %v8711_v22 = vpop.f32.mrf.mxu1 }
 0x50c   : > { %v4438_v57 = vpop.f32.mrf.mxu0 }
 0x50d   : > { %8914 = vmatmul.mubr.msk.bf16.gmra.mxu1 %vm3066_vm6, %v11923_v0  ;;  %v12438_v34 = vadd.f32 %v4650_v30, %v4438_v57  ;;  %v4666_v31 = vpop.f32.mrf.mxu1 }
 0x50e   : > { %8876 = vmatmul.mubr.msk.bf16.gmra.mxu0 %vm3066_vm6, %v14395_v19  ;;  %8917 = vmatprep.mubr.msk.bf16.mxu1 %vm3066_vm6, %v11925_v54  ;;  %v8674_v8 = vpop.f32.mrf.mxu0 }
 0x50f   : > { %8879 = vmatprep.mubr.msk.bf16.mxu0 %vm3066_vm6, %v14396_v27  ;;  %v12442_v36 = vadd.f32 %v8708_v35, %v8674_v8  ;;  %v8712_v19 = vpop.f32.mrf.mxu1 }
 0x510   : > { %v4441_v50 = vpop.f32.mrf.mxu0 }
 0x511   : > { %v12444_v44 = vadd.f32 %v4653_v42, %v4441_v50  ;;  %v4669_v9 = vpop.f32.mrf.mxu1 }
 0x512   : > { %v8677_v27 = vpop.f32.mrf.mxu0 }
 0x513   : > { %v12448_v6 = vadd.f32 %v8711_v22, %v8677_v27  ;;  %v8715_v0 = vpop.f32.mrf.mxu1 }
 0x514   : > { %v4454_v54 = vpop.f32.mrf.mxu0 }
 0x515   : > { %8918 = vmatmul.mubr.msk.bf16.gmra.mxu1 %vm3066_vm6, %v11961_v55  ;;  %v12454_v30 = vadd.f32 %v4666_v31, %v4454_v54  ;;  %v12458_v35 = vpop.f32.mrf.mxu1  ;;  %v5950_v54 = vrot.slane %v12379_v37, 1 }
 0x516   : > { %8880 = vmatmul.mubr.msk.bf16.gmra.mxu0 %vm3066_vm6, %v14397_v58  ;;  %8921 = vmatprep.mubr.msk.bf16.mxu1 %vm3066_vm6, %v11969_v49  ;;  %14408 = vst [vmem:[#allocation52_spill] sm:$0xff] %v12458_v35  ;;  %v8678_v32 = vpop.f32.mrf.mxu0 }
 0x517   : > { %8883 = vmatprep.mubr.msk.bf16.mxu0 %vm3066_vm6, %v14398_v53  ;;  %v12460_v42 = vadd.f32 %v8712_v19, %v8678_v32  ;;  %v8716_v58 = vpop.f32.mrf.mxu1 }
 0x518   : > { %v4457_v28 = vpop.f32.mrf.mxu0 }
 0x519   : > { %v12462_v22 = vadd.f32 %v4669_v9, %v4457_v28  ;;  %v12464_v53 = vpop.f32.mrf.mxu1 }
 0x51a   : > { %v8681_v57 = vpop.f32.mrf.mxu0 }
 0x51b   : > { %v12468_v55 = vadd.f32 %v8715_v0, %v8681_v57  ;;  %v8719_v49 = vpop.f32.mrf.mxu1  ;;  %v5948_v0 = vrot.slane %v12373_v51, 1 }
 0x51c   : > { %v12472_v31 = vpop.f32.mrf.mxu0 }
 0x51d   : > { %14409 = vst [vmem:[#allocation60_spill] sm:$0xff] %v12472_v31  ;;  %8922 = vmatmul.mubr.msk.bf16.gmra.mxu1 %vm3066_vm6, %v12176_v61  ;;  %v12478_v8 = vpop.f32.mrf.mxu1 }
 0x51e   : > { %8884 = vmatmul.mubr.msk.bf16.gmra.mxu0 %vm3066_vm6, %v11912_v59  ;;  %8925 = vmatprep.mubr.msk.bf16.mxu1 %vm3066_vm6, %v12186_v40  ;;  %v8682_v19 = vpop.f32.mrf.mxu0 }
 0x51f   : > { %8887 = vmatprep.mubr.msk.bf16.mxu0 %vm3066_vm6, %v11930_v1  ;;  %v12480_v50 = vadd.f32 %v8716_v58, %v8682_v19  ;;  %v8720_v59 = vpop.f32.mrf.mxu1  ;;  %v5947_v1 = vrot.slane %v12371_v47, 1 }
 0x520   : > { %v12482_v9 = vpop.f32.mrf.mxu0 }
 0x521   : > { %v4701_v27 = vpop.f32.mrf.mxu1  ;;  %v5949_v37 = vsel %vm849_vm2, %v5947_v1, %v5948_v0 }
 0x522   : > { %v8685_v32 = vpop.f32.mrf.mxu0 }
 0x523   : > { %v12489_v61 = vadd.f32 %v8719_v49, %v8685_v32  ;;  %v8723_v40 = vpop.f32.mrf.mxu1 }
 0x524   : > { %v12493_v58 = vpop.f32.mrf.mxu0 }
 0x525   : > { %8926 = vmatmul.mubr.msk.bf16.gmra.mxu1 %vm3066_vm6, %v12209_v11  ;;  %v12499_v28 = vpop.f32.mrf.mxu1 }
 0x526   : > { %8888 = vmatmul.mubr.msk.bf16.gmra.mxu0 %vm3066_vm6, %v11954_v62  ;;  %8929 = vmatprep.mubr.msk.bf16.mxu1 %vm3066_vm6, %v12207_v63  ;;  %v5951_v62 = vsel %vm849_vm2, %v5948_v0, %v5950_v54  ;;  %v8686_v57 = vpop.f32.mrf.mxu0  ;;  %v5742_v0 = vpack.c.bf16 %v12373_v51, %v12371_v47 }
 0x527   : > { %8891 = vmatprep.mubr.msk.bf16.mxu0 %vm3066_vm6, %v11967_v12  ;;  %v12503_v49 = vadd.f32 %v8720_v59, %v8686_v57  ;;  %v8724_v19 = vpop.f32.mrf.mxu1  ;;  %v5954_v32 = vpack.c.bf16 %v5951_v62, %v5949_v37 }
 0x528   : > { %v4489_v12 = vpop.f32.mrf.mxu0 }
 0x529   : > { %v12505_v25 = vadd.f32 %v4701_v27, %v4489_v12  ;;  %v4717_v35 = vpop.f32.mrf.mxu1 }
 0x52d   : > { %v8727_v11 = vpop.f32.mrf.mxu1  ;;  %8930 = vmatmul.mubr.msk.bf16.gmra.mxu1 %vm3066_vm6, %v5954_v32 }
 0x52e   : > { %v8689_v31 = vpop.f32.mrf.mxu0  ;;  %8892 = vmatmul.mubr.msk.bf16.gmra.mxu0 %vm3066_vm6, %v14383_v45  ;;  %8974 = vmatprep.mubr.msk.f32.mxu1 %vm9365_vm1, %v14400_v56 }
 0x52f   : > { %v12509_v63 = vadd.f32 %v8723_v40, %v8689_v31  ;;  %8895 = vmatprep.mubr.msk.bf16.mxu0 %vm3066_vm6, %v12285_v43  ;;  %v12516_v59 = vpop.f32.mrf.mxu1 }
 0x530   : > { %v12513_v1 = vpop.f32.mrf.mxu0 }
 0x531   : > { %v8728_v31 = vpop.f32.mrf.mxu1 }
 0x532   : > { %v8690_v27 = vpop.f32.mrf.mxu0 }
 0x533   : > { %v12522_v45 = vadd.f32 %v8724_v19, %v8690_v27  ;;  %v4733_v43 = vpop.f32.mrf.mxu1 }
 0x534   : > { %v4505_v54 = vpop.f32.mrf.mxu0 }
 0x535   : > { %v12524_v40 = vadd.f32 %v4717_v35, %v4505_v54  ;;  %v8767_v57 = vpop.f32.mrf.mxu1 }
 0x536   : > { %v8693_v37 = vpop.f32.mrf.mxu0  ;;  %8896 = vmatmul.mubr.msk.bf16.gmra.mxu0 %vm3066_vm6, %v5742_v0 }
 0x537   : > { %v12527_v62 = vadd.f32 %v8727_v11, %v8693_v37  ;;  %8935 = vmatprep.mubr.msk.bf16.mxu0 %vm3066_vm6, %v12032_v48  ;;  %v12533_v32 = vpop.f32.mrf.mxu1 }
 0x538   : > { %v12531_v12 = vpop.f32.mrf.mxu0  ;;  %14410 = vst [vmem:[#allocation54_spill] sm:$0xff] %v12533_v32 }
 0x539   : > { %v8768_v19 = vpop.f32.mrf.mxu1 }
 0x53a   : > { %v8694_v47 = vpop.f32.mrf.mxu0 }
 0x53b   : > { %v12535_v51 = vadd.f32 %v8728_v31, %v8694_v47  ;;  %v5165_v54 = vpop.f32.mrf.mxu1 }
 0x53c   : > { %v4521_v35 = vpop.f32.mrf.mxu0 }
 0x53d   : > { %v12537_v27 = vadd.f32 %v4733_v43, %v4521_v35  ;;  %v8771_v0 = vpop.f32.mrf.mxu1 }
 0x53e   : > { %v8733_v56 = vpop.f32.mrf.mxu0  ;;  %8936 = vmatmul.mubr.msk.bf16.vlgmr.msra.gmra.mxu0 %vm3066_vm6, %v12043_v26 }
 0x53f   : > { %14411 = vst [vmem:[#allocation62_spill] sm:$0xff] %v12537_v27  ;;  %v5089_v11 = vadd.f32 %v8733_v56, %v12399_v16  ;;  %8939 = vmatprep.mubr.msk.bf16.mxu0 %vm3066_vm6, %v12054_v23  ;;  %v12549_v43 = vpop.f32.mrf.mxu1 }
 0x540   : > { %v4960_v48 = vpop.f32.mrf.mxu0 }
 0x541   : > { %v12545_v37 = vadd.f32 %v4960_v48, %v12406_v5  ;;  %v12547_v31 = vadd.f32 %v8767_v57, %v5089_v11  ;;  %v8772_v27 = vpop.f32.mrf.mxu1 }
 0x542   : > { %v8734_v47 = vpop.f32.mrf.mxu0 }
 0x543   : > { %v5090_v35 = vadd.f32 %v8734_v47, %v12410_v33  ;;  %v5181_v23 = vpop.f32.mrf.mxu1 }
 0x544   : > { %v4963_v32 = vpop.f32.mrf.mxu0 }
 0x545   : > { %v5088_v26 = vadd.f32 %v4963_v32, %v12412_v60  ;;  %v12553_v56 = vadd.f32 %v8768_v19, %v5090_v35  ;;  %v8775_v33 = vpop.f32.mrf.mxu1 }
 0x546   : > { %v8737_v16 = vpop.f32.mrf.mxu0  ;;  %8940 = vmatmul.mubr.msk.bf16.gmra.mxu0 %vm3066_vm6, %v12065_v15 }
 0x547   : > { %v5093_v5 = vadd.f32 %v8737_v16, %v12416_v39  ;;  %8943 = vmatprep.mubr.msk.bf16.mxu0 %vm3066_vm6, %v12076_v21  ;;  %v12560_v57 = vadd.f32 %v5165_v54, %v5088_v26  ;;  %v12567_v19 = vpop.f32.mrf.mxu1 }
 0x548   : > { %v4976_v11 = vpop.f32.mrf.mxu0 }
 0x549   : > { %v12563_v48 = vadd.f32 %v4976_v11, %v12422_v13  ;;  %v12565_v60 = vadd.f32 %v8771_v0, %v5093_v5  ;;  %v8776_v35 = vpop.f32.mrf.mxu1 }
 0x54a   : > { %v8738_v32 = vpop.f32.mrf.mxu0 }
 0x54b   : > { %v5094_v15 = vadd.f32 %v8738_v32, %v12426_v3  ;;  %v5197_v54 = vpop.f32.mrf.mxu1 }
 0x54c   : > { %v4979_v47 = vpop.f32.mrf.mxu0 }
 0x54d   : > { %v5092_v39 = vadd.f32 %v4979_v47, %v12428_v29  ;;  %v12571_v16 = vadd.f32 %v8772_v27, %v5094_v15  ;;  %v8779_v3 = vpop.f32.mrf.mxu1 }
 0x54e   : > { %v8741_v21 = vpop.f32.mrf.mxu0  ;;  %8944 = vmatmul.mubr.msk.bf16.gmra.mxu0 %vm3066_vm6, %v12087_v17 }
 0x54f   : > { %v5097_v13 = vadd.f32 %v8741_v21, %v12432_v41  ;;  %8947 = vmatprep.mubr.msk.bf16.mxu0 %vm3066_vm6, %v12100_v10  ;;  %v12578_v0 = vadd.f32 %v5181_v23, %v5092_v39  ;;  %v12585_v11 = vpop.f32.mrf.mxu1 }
 0x550   : > { %v4992_v26 = vpop.f32.mrf.mxu0 }
 0x551   : > { %v12581_v5 = vadd.f32 %v4992_v26, %v12438_v34  ;;  %v12583_v29 = vadd.f32 %v8775_v33, %v5097_v13  ;;  %v8780_v15 = vpop.f32.mrf.mxu1 }
 0x552   : > { %v8742_v27 = vpop.f32.mrf.mxu0 }
 0x553   : > { %v5098_v17 = vadd.f32 %v8742_v27, %v12442_v36  ;;  %v5213_v23 = vpop.f32.mrf.mxu1 }
 0x554   : > { %v4995_v32 = vpop.f32.mrf.mxu0 }
 0x555   : > { %v5096_v41 = vadd.f32 %v4995_v32, %v12444_v44  ;;  %v12589_v47 = vadd.f32 %v8776_v35, %v5098_v17  ;;  %v8783_v36 = vpop.f32.mrf.mxu1 }
 0x556   : > { %v8745_v10 = vpop.f32.mrf.mxu0  ;;  %8948 = vmatmul.mubr.msk.bf16.gmra.mxu0 %vm3066_vm6, %v12115_v7 }
 0x557   : > { %v5101_v34 = vadd.f32 %v8745_v10, %v12448_v6  ;;  %8951 = vmatprep.mubr.msk.bf16.mxu0 %vm3066_vm6, %v12130_v2  ;;  %v12596_v33 = vadd.f32 %v5197_v54, %v5096_v41  ;;  %v12603_v13 = vpop.f32.mrf.mxu1  ;;  %v4686_v10 = vadd.f32 %v12464_v53, %v12482_v9 }
 0x558   : > { %v5008_v39 = vpop.f32.mrf.mxu0 }
 0x559   : > { %v12599_v21 = vadd.f32 %v5008_v39, %v12454_v30  ;;  %v12601_v44 = vadd.f32 %v8779_v3, %v5101_v34  ;;  %v8784_v27 = vpop.f32.mrf.mxu1 }
 0x55a   : > { %v8746_v35 = vpop.f32.mrf.mxu0 }
 0x55b   : > { %v5102_v7 = vadd.f32 %v8746_v35, %v12460_v42  ;;  %v5229_v54 = vpop.f32.mrf.mxu1 }
 0x55c   : > { %v5011_v26 = vpop.f32.mrf.mxu0 }
 0x55d   : > { %v5100_v6 = vadd.f32 %v5011_v26, %v12462_v22  ;;  %v12607_v17 = vadd.f32 %v8780_v15, %v5102_v7  ;;  %v8787_v42 = vpop.f32.mrf.mxu1 }
 0x55e   : > { %v8749_v2 = vpop.f32.mrf.mxu0  ;;  %8952 = vmatmul.mubr.msk.bf16.gmra.mxu0 %vm3066_vm6, %v12143_v52 }
 0x55f   : > { %v5105_v30 = vadd.f32 %v8749_v2, %v12468_v55  ;;  %8955 = vmatprep.mubr.msk.bf16.mxu0 %vm3066_vm6, %v12159_v38  ;;  %v12614_v3 = vadd.f32 %v5213_v23, %v5100_v6  ;;  %v12620_v15 = vpop.f32.mrf.mxu1 }
 0x560   : > { %v12616_v32 = vpop.f32.mrf.mxu0 }
 0x561   : > { %v12618_v41 = vadd.f32 %v8783_v36, %v5105_v30  ;;  %v8788_v55 = vpop.f32.mrf.mxu1  ;;  %v4699_v36 = vadd.f32 %v12478_v8, %v12493_v58 }
 0x562   : > { %v8750_v22 = vpop.f32.mrf.mxu0 }
 0x563   : > { %v5106_v52 = vadd.f32 %v8750_v22, %v12480_v50  ;;  %v5245_v23 = vpop.f32.mrf.mxu1 }
 0x564   : > { %v5027_v34 = vpop.f32.mrf.mxu0 }
 0x565   : > { %v5104_v39 = vadd.f32 %v5027_v34, %v4686_v10  ;;  %v12625_v35 = vadd.f32 %v8784_v27, %v5106_v52  ;;  %v8791_v9 = vpop.f32.mrf.mxu1 }
 0x566   : > { %v8753_v38 = vpop.f32.mrf.mxu0  ;;  %8956 = vmatmul.mubr.msk.bf16.gmra.mxu0 %vm3066_vm6, %v12166_v24 }
 0x567   : > { %v5109_v7 = vadd.f32 %v8753_v38, %v12489_v61  ;;  %8959 = vmatprep.mubr.msk.bf16.mxu0 %vm3066_vm6, %v12178_v4  ;;  %v12634_v53 = vadd.f32 %v5229_v54, %v5104_v39  ;;  %v5258_v2 = vpop.f32.mrf.mxu1  ;;  %v4715_v54 = vadd.f32 %v12499_v28, %v12513_v1 }
 0x568   : > { %v5040_v50 = vpop.f32.mrf.mxu0 }
 0x569   : > { %v12636_v26 = vadd.f32 %v5040_v50, %v4699_v36  ;;  %v12638_v27 = vadd.f32 %v8787_v42, %v5109_v7  ;;  %v8792_v22 = vpop.f32.mrf.mxu1  ;;  %v4731_v50 = vadd.f32 %v12516_v59, %v12531_v12  ;;  %v14414_v12 = vld [vmem:[#allocation62_spill] sm:$0xff] }
 0x56a   : > { %v8754_v6 = vpop.f32.mrf.mxu0 }
 0x56b   : > { %v5110_v24 = vadd.f32 %v8754_v6, %v12503_v49  ;;  %v5261_v4 = vpop.f32.mrf.mxu1  ;;  %v14413_v6 = vmov 0.0  }
 0x56c   : > { %v5043_v30 = vpop.f32.mrf.mxu0 }
 0x56d   : > { %v5108_v8 = vadd.f32 %v5043_v30, %v12505_v25  ;;  %v12642_v61 = vadd.f32 %v8788_v55, %v5110_v24  ;;  %v8795_v52 = vpop.f32.mrf.mxu1 }
 0x56e   : > { %v8757_v58 = vpop.f32.mrf.mxu0  ;;  %8960 = vmatmul.mubr.msk.bf16.gmra.mxu0 %vm3066_vm6, %v12200_v14 }
 0x56f   : > { %v5113_v42 = vadd.f32 %v8757_v58, %v12509_v63  ;;  %8963 = vmatprep.mubr.msk.bf16.mxu0 %vm3066_vm6, %v12363_v18  ;;  %v12651_v49 = vadd.f32 %v5245_v23, %v5108_v8  ;;  %v5274_v39 = vpop.f32.mrf.mxu1  ;;  %v14412_v23 = vpack.c.bf16 %v12392_v46, %v12384_v20 }
 0x570   : > { %v5056_v10 = vpop.f32.mrf.mxu0 }
 0x571   : > { %v5111_v25 = vadd.f32 %v5056_v10, %v4715_v54  ;;  %v12653_v34 = vadd.f32 %v8791_v9, %v5113_v42  ;;  %v8796_v28 = vpop.f32.mrf.mxu1 }
 0x572   : > { %v8758_v55 = vpop.f32.mrf.mxu0 }
 0x573   : > { %v5114_v14 = vadd.f32 %v8758_v55, %v12522_v45  ;;  %v12656_v38 = vadd.f32 %v5258_v2, %v5111_v25  ;;  %v5277_v7 = vpop.f32.mrf.mxu1 }
 0x574   : > { %v5059_v36 = vpop.f32.mrf.mxu0 }
 0x575   : > { %v5112_v63 = vadd.f32 %v5059_v36, %v12524_v40  ;;  %v12659_v1 = vadd.f32 %v8792_v22, %v5114_v14  ;;  %v8835_v2 = vpop.f32.mrf.mxu1 }
 0x576   : > { %v8761_v18 = vpop.f32.mrf.mxu0  ;;  %8964 = vmatmul.mubr.msk.bf16.gmra.mxu0 %vm3066_vm6, %v14412_v23 }
 0x577   : > { %v5117_v45 = vadd.f32 %v8761_v18, %v12527_v62  ;;  %v12668_v9 = vadd.f32 %v5261_v4, %v5112_v63  ;;  %8969 = vmatprep.mubr.msk.f32.mxu0 %vm9365_vm1, %v14413_v6  ;;  %v5583_v20 = vpop.f32.mrf.mxu1 }
 0x578   : > { %v5072_v40 = vpop.f32.mrf.mxu0 }
 0x579   : > { %v5115_v24 = vadd.f32 %v5072_v40, %v4731_v50  ;;  %v12672_v30 = vadd.f32 %v8795_v52, %v5117_v45  ;;  %v8836_v59 = vpop.f32.mrf.mxu1  ;;  %v14415_v52 = vld [vmem:[#allocation54_spill] sm:$0xff] }
 0x57a   : > { %v8762_v22 = vpop.f32.mrf.mxu0  ;;  %v5289_v25 = vadd.f32 %v14415_v52, %v12545_v37  ;;  %v5297_v52 = vadd.f32 %v12567_v19, %v12581_v5 }
 0x57b   : > { %v5118_v46 = vadd.f32 %v8762_v22, %v12535_v51  ;;  %v12675_v8 = vadd.f32 %v5274_v39, %v5115_v24  ;;  %v12680_v42 = vpop.f32.mrf.mxu1  ;;  %v5293_v24 = vadd.f32 %v12549_v43, %v12563_v48 }
 0x57c   : > { %v5075_v58 = vpop.f32.mrf.mxu0 }
 0x57d   : > { %v5116_v62 = vadd.f32 %v5075_v58, %v14414_v12  ;;  %v12678_v4 = vadd.f32 %v8796_v28, %v5118_v46  ;;  %v8839_v51 = vpop.f32.mrf.mxu1 }
 0x57e   : > { %v8801_v54 = vpop.f32.mrf.mxu0 }
 0x57f   : > { %v5503_v10 = vadd.f32 %v8801_v54, %v12547_v31  ;;  %v12685_v55 = vadd.f32 %v5277_v7, %v5116_v62  ;;  %v12689_v18 = vpop.f32.mrf.mxu1 }
 0x580   : > { %v5374_v14 = vpop.f32.mrf.mxu0 }
 0x581   : > { %v5501_v39 = vadd.f32 %v5374_v14, %v5289_v25  ;;  %v12687_v36 = vadd.f32 %v8835_v2, %v5503_v10  ;;  %v8840_v45 = vpop.f32.mrf.mxu1 }
 0x582   : > { %v8802_v63 = vpop.f32.mrf.mxu0 }
 0x583   : > { %v5504_v28 = vadd.f32 %v8802_v63, %v12553_v56  ;;  %v12692_v23 = vadd.f32 %v5583_v20, %v5501_v39  ;;  %v12699_v40 = vpop.f32.mrf.mxu1 }
 0x584   : > { %v5377_v50 = vpop.f32.mrf.mxu0 }
 0x585   : > { %v12695_v31 = vadd.f32 %v5377_v50, %v12560_v57  ;;  %v12697_v37 = vadd.f32 %v8836_v59, %v5504_v28  ;;  %v8843_v46 = vpop.f32.mrf.mxu1 }
 0x586   : > { %v8805_v7 = vpop.f32.mrf.mxu0 }
 0x587   : > { %v5507_v2 = vadd.f32 %v8805_v7, %v12565_v60  ;;  %v12708_v12 = vpop.f32.mrf.mxu1 }
 0x588   : > { %v5390_v22 = vpop.f32.mrf.mxu0 }
 0x589   : > { %v12704_v56 = vadd.f32 %v5390_v22, %v5293_v24  ;;  %v12706_v20 = vadd.f32 %v8839_v51, %v5507_v2  ;;  %v8844_v62 = vpop.f32.mrf.mxu1  ;;  %v5301_v2 = vadd.f32 %v12585_v11, %v12599_v21 }
 0x58a   : > { %v8806_v58 = vpop.f32.mrf.mxu0 }
 0x58b   : > { %v5508_v57 = vadd.f32 %v8806_v58, %v12571_v16  ;;  %v12716_v43 = vpop.f32.mrf.mxu1  ;;  %v14417_v58 = vld [vmem:[#allocation52_spill] sm:$0xff] }
 0x58c   : > { %v5393_v59 = vpop.f32.mrf.mxu0 }
 0x58d   : > { %v12712_v54 = vadd.f32 %v5393_v59, %v12578_v0  ;;  %v12714_v60 = vadd.f32 %v8840_v45, %v5508_v57  ;;  %v8847_v14 = vpop.f32.mrf.mxu1 }
 0x58e   : > { %v8809_v10 = vpop.f32.mrf.mxu0 }
 0x58f   : > { %v5511_v48 = vadd.f32 %v8809_v10, %v12583_v29  ;;  %v12725_v63 = vpop.f32.mrf.mxu1 }
 0x590   : > { %v5406_v25 = vpop.f32.mrf.mxu0 }
 0x591   : > { %v12721_v51 = vadd.f32 %v5406_v25, %v5297_v52  ;;  %v12723_v16 = vadd.f32 %v8843_v46, %v5511_v48  ;;  %v8848_v50 = vpop.f32.mrf.mxu1  ;;  %v14416_v46 = vld [vmem:[#allocation60_spill] sm:$0xff] }
 0x592   : > { %v8810_v39 = vpop.f32.mrf.mxu0 }
 0x593   : > { %v5512_v0 = vadd.f32 %v8810_v39, %v12589_v47  ;;  %v12733_v19 = vpop.f32.mrf.mxu1  ;;  %v4683_v47 = vadd.f32 %v14417_v58, %v14416_v46 }
 0x594   : > { %v5409_v28 = vpop.f32.mrf.mxu0 }
 0x595   : > { %v12729_v45 = vadd.f32 %v5409_v28, %v12596_v33  ;;  %v12731_v29 = vadd.f32 %v8844_v62, %v5512_v0  ;;  %v8851_v22 = vpop.f32.mrf.mxu1  ;;  %v5103_v10 = vadd.f32 %v12616_v32, %v4683_v47  ;;  %v6574_v32 = vld [vmem:[%s13971_s12] sm:$0xff] }
 0x596   : > { %v8813_v7 = vpop.f32.mrf.mxu0  ;;  %8968 = vmatpush3.msra.mxu0 %v6574_v32  ;;  %8973 = vmatpush3.msra.mxu1 %v6574_v32 }
 0x597   : > { %v5515_v5 = vadd.f32 %v8813_v7, %v12601_v44  ;;  %v12744_v62 = vpop.f32.mrf.mxu1  ;;  %v5305_v0 = vadd.f32 %v12603_v13, %v5103_v10  ;;  %8977 = vmatprep.subr.mxu1 %v14413_v6 }
 0x598   : > { %v5422_v24 = vpop.f32.mrf.mxu0 }
 0x599   : > { %v12740_v57 = vadd.f32 %v5422_v24, %v5301_v2  ;;  %v12742_v59 = vadd.f32 %v8847_v14, %v5515_v5  ;;  %v8852_v52 = vpop.f32.mrf.mxu1 }
 0x59a   : > { %v8814_v33 = vpop.f32.mrf.mxu0 }
 0x59b   : > { %v5516_v48 = vadd.f32 %v8814_v33, %v12607_v17  ;;  %v12753_v39 = vpop.f32.mrf.mxu1  ;;  %v5309_v33 = vadd.f32 %v12620_v15, %v12636_v26 }
 0x59c   : > { %v5425_v44 = vpop.f32.mrf.mxu0 }
 0x59d   : > { %v12749_v11 = vadd.f32 %v5425_v44, %v12614_v3  ;;  %v12751_v21 = vadd.f32 %v8848_v50, %v5516_v48  ;;  %v8855_v17 = vpop.f32.mrf.mxu1 }
 0x59e   : > { %v8817_v25 = vpop.f32.mrf.mxu0 }
 0x59f   : > { %v5519_v14 = vadd.f32 %v8817_v25, %v12618_v41  ;;  %v12765_v5 = vpop.f32.mrf.mxu1 }
 0x5a0   : > { %v5438_v28 = vpop.f32.mrf.mxu0 }
 0x5a1   : > { %v12760_v7 = vadd.f32 %v5438_v28, %v5305_v0  ;;  %v12762_v3 = vadd.f32 %v8851_v22, %v5519_v14  ;;  %v8856_v2 = vpop.f32.mrf.mxu1 }
 0x5a2   : > { %v8818_v50 = vpop.f32.mrf.mxu0 }
 0x5a3   : > { %v5520_v41 = vadd.f32 %v8818_v50, %v12625_v35  ;;  %v12773_v47 = vpop.f32.mrf.mxu1 }
 0x5a4   : > { %v5441_v13 = vpop.f32.mrf.mxu0 }
 0x5a5   : > { %v12769_v24 = vadd.f32 %v5441_v13, %v12634_v53  ;;  %v12771_v46 = vadd.f32 %v8852_v52, %v5520_v41  ;;  %v8859_v48 = vpop.f32.mrf.mxu1 }
 0x5a6   : > { %v8821_v58 = vpop.f32.mrf.mxu0 }
 0x5a7   : > { %v5523_v22 = vadd.f32 %v8821_v58, %v12638_v27  ;;  %v12782_v14 = vpop.f32.mrf.mxu1 }
 0x5a8   : > { %v5454_v10 = vpop.f32.mrf.mxu0 }
 0x5a9   : > { %v12778_v44 = vadd.f32 %v5454_v10, %v5309_v33  ;;  %v12780_v35 = vadd.f32 %v8855_v17, %v5523_v22  ;;  %v8860_v0 = vpop.f32.mrf.mxu1 }
 0x5aa   : > { %v8822_v25 = vpop.f32.mrf.mxu0 }
 0x5ab   : > { %v5524_v53 = vadd.f32 %v8822_v25, %v12642_v61  ;;  %v12790_v15 = vpop.f32.mrf.mxu1 }
 0x5ac   : > { %v5457_v52 = vpop.f32.mrf.mxu0 }
 0x5ad   : > { %v12786_v32 = vadd.f32 %v5457_v52, %v12651_v49  ;;  %v12788_v27 = vadd.f32 %v8856_v2, %v5524_v53  ;;  %v8863_v17 = vpop.f32.mrf.mxu1 }
 0x5ae   : > { %v8825_v28 = vpop.f32.mrf.mxu0 }
 0x5af   : > { %v5527_v26 = vadd.f32 %v8825_v28, %v12653_v34  ;;  %v12798_v58 = vpop.f32.mrf.mxu1 }
 0x5b0   : > { %v5470_v50 = vpop.f32.mrf.mxu0 }
 0x5b1   : > { %v12794_v41 = vadd.f32 %v5470_v50, %v12656_v38  ;;  %v12796_v13 = vadd.f32 %v8859_v48, %v5527_v26  ;;  %v8864_v34 = vpop.f32.mrf.mxu1 }
 0x5b2   : > { %v8826_v61 = vpop.f32.mrf.mxu0 }
 0x5b3   : > { %v5528_v49 = vadd.f32 %v8826_v61, %v12659_v1  ;;  %v12812_v52 = vpop.f32.mrf.mxu1 }
 0x5b4   : > { %v5473_v22 = vpop.f32.mrf.mxu0 }
 0x5b5   : > { %v12802_v2 = vadd.f32 %v5473_v22, %v12668_v9  ;;  %v12804_v33 = vadd.f32 %v8860_v0, %v5528_v49  ;;  %v12820_v50 = vpop.f32.mrf.mxu1 }
 0x5b6   : > { %v8829_v10 = vpop.f32.mrf.mxu0 }
 0x5b7   : > { %v5531_v25 = vadd.f32 %v8829_v10, %v12672_v30  ;;  %v12828_v49 = vpop.f32.mrf.mxu1 }
 0x5b8   : > { %v5486_v53 = vpop.f32.mrf.mxu0 }
 0x5b9   : > { %v12808_v38 = vadd.f32 %v5486_v53, %v12675_v8  ;;  %v12810_v48 = vadd.f32 %v8863_v17, %v5531_v25  ;;  %v12835_v10 = vpop.f32.mrf.mxu1 }
 0x5ba   : > { %v8830_v28 = vpop.f32.mrf.mxu0 }
 0x5bb   : > { %v5532_v1 = vadd.f32 %v8830_v28, %v12678_v4  ;;  %v12842_v53 = vpop.f32.mrf.mxu1 }
 0x5bc   : > { %v5489_v26 = vpop.f32.mrf.mxu0 }
 0x5bd   : > { %v12816_v9 = vadd.f32 %v5489_v26, %v12685_v55  ;;  %v12818_v0 = vadd.f32 %v8864_v34, %v5532_v1 }
 0x5be   : > { %v8869_v30 = vpop.f32.mrf.mxu0 }
 0x5bf   : > { %v12823_v61 = vadd.f32 %v8869_v30, %v12687_v36 }
 0x5c0   : > { %v5785_v8 = vpop.f32.mrf.mxu0 }
 0x5c1   : > { %v12826_v17 = vadd.f32 %v5785_v8, %v12692_v23 }
 0x5c2   : > { %v8870_v22 = vpop.f32.mrf.mxu0 }
 0x5c3   : > { %v12831_v4 = vadd.f32 %v8870_v22, %v12697_v37  ;;  %v12849_v37 = vpop.f32.mrf.mxu1 }
 0x5c4   : > { %v12833_v55 = vpop.f32.mrf.mxu0  ;;  %14419 = vst [vmem:[#allocation45_spill] sm:$0xff] %v12849_v37 }
 0x5c6   : > { %v8873_v34 = vpop.f32.mrf.mxu0 }
 0x5c7   : > { %v12838_v25 = vadd.f32 %v8873_v34, %v12706_v20  ;;  %v12856_v20 = vpop.f32.mrf.mxu1 }
 0x5c8   : > { %v12840_v36 = vpop.f32.mrf.mxu0  ;;  %14421 = vst [vmem:[#allocation49_spill] sm:$0xff] %v12856_v20 }
 0x5ca   : > { %v8874_v23 = vpop.f32.mrf.mxu0 }
 0x5cb   : > { %v12845_v28 = vadd.f32 %v8874_v23, %v12714_v60  ;;  %v12863_v60 = vpop.f32.mrf.mxu1 }
 0x5cc   : > { %v12847_v1 = vpop.f32.mrf.mxu0  ;;  %14423 = vst [vmem:[#allocation53_spill] sm:$0xff] %v12863_v60 }
 0x5cd   : > { %14418 = vst [vmem:[#allocation43_spill] sm:$0xff] %v12845_v28 }
 0x5ce   : > { %v8877_v26 = vpop.f32.mrf.mxu0 }
 0x5cf   : > { %v12852_v30 = vadd.f32 %v8877_v26, %v12723_v16  ;;  %v12870_v16 = vpop.f32.mrf.mxu1 }
 0x5d0   : > { %v12854_v8 = vpop.f32.mrf.mxu0  ;;  %14425 = vst [vmem:[#allocation57_spill] sm:$0xff] %v12870_v16 }
 0x5d1   : > { %14420 = vst [vmem:[#allocation47_spill] sm:$0xff] %v12852_v30 }
 0x5d2   : > { %v8878_v22 = vpop.f32.mrf.mxu0 }
 0x5d3   : > { %v12859_v34 = vadd.f32 %v8878_v22, %v12731_v29  ;;  %v12877_v29 = vpop.f32.mrf.mxu1 }
 0x5d4   : > { %v12861_v6 = vpop.f32.mrf.mxu0 }
 0x5d5   : > { %14422 = vst [vmem:[#allocation51_spill] sm:$0xff] %v12859_v34 }
 0x5d6   : > { %v8881_v23 = vpop.f32.mrf.mxu0 }
 0x5d7   : > { %v12866_v28 = vadd.f32 %v8881_v23, %v12742_v59  ;;  %v12884_v59 = vpop.f32.mrf.mxu1 }
 0x5d8   : > { %v12868_v37 = vpop.f32.mrf.mxu0 }
 0x5d9   : > { %14424 = vst [vmem:[#allocation55_spill] sm:$0xff] %v12866_v28 }
 0x5da   : > { %v8882_v26 = vpop.f32.mrf.mxu0 }
 0x5db   : > { %v12873_v30 = vadd.f32 %v8882_v26, %v12751_v21  ;;  %v12891_v21 = vpop.f32.mrf.mxu1 }
 0x5dc   : > { %v12875_v20 = vpop.f32.mrf.mxu0 }
 0x5dd   : > { %14426 = vst [vmem:[#allocation58_spill] sm:$0xff] %v12873_v30  ;;  %14427 = vst [vmem:[#allocation61_spill] sm:$0xff] %v12875_v20 }
 0x5de   : > { %v8885_v22 = vpop.f32.mrf.mxu0 }
 0x5df   : > { %v12880_v34 = vadd.f32 %v8885_v22, %v12762_v3  ;;  %v12898_v3 = vpop.f32.mrf.mxu1 }
 0x5e0   : > { %v12882_v60 = vpop.f32.mrf.mxu0 }
 0x5e1   : > { %14428 = vst [vmem:[#allocation56_spill] sm:$0xff] %v12880_v34  ;;  %14429 = vst [vmem:[#allocation28_spill] sm:$0xff] %v12882_v60 }
 0x5e2   : > { %v8886_v23 = vpop.f32.mrf.mxu0 }
 0x5e3   : > { %v12887_v28 = vadd.f32 %v8886_v23, %v12771_v46  ;;  %v12905_v46 = vpop.f32.mrf.mxu1 }
 0x5e4   : > { %v12889_v16 = vpop.f32.mrf.mxu0 }
 0x5e5   : > { %14430 = vst [vmem:[#allocation25_spill] sm:$0xff] %v12887_v28  ;;  %14431 = vst [vmem:[#allocation31_spill] sm:$0xff] %v12889_v16 }
 0x5e6   : > { %v8889_v26 = vpop.f32.mrf.mxu0 }
 0x5e7   : > { %v12894_v30 = vadd.f32 %v8889_v26, %v12780_v35  ;;  %v12912_v35 = vpop.f32.mrf.mxu1 }
 0x5e8   : > { %v12896_v20 = vpop.f32.mrf.mxu0 }
 0x5e9   : > { %14432 = vst [vmem:[#allocation32_spill] sm:$0xff] %v12894_v30  ;;  %14433 = vst [vmem:[#allocation48_spill] sm:$0xff] %v12896_v20 }
 0x5ea   : > { %v8890_v22 = vpop.f32.mrf.mxu0 }
 0x5eb   : > { %v12901_v34 = vadd.f32 %v8890_v22, %v12788_v27  ;;  %v12919_v27 = vpop.f32.mrf.mxu1 }
 0x5ec   : > { %v12903_v60 = vpop.f32.mrf.mxu0 }
 0x5ed   : > { %14434 = vst [vmem:[#allocation50_spill] sm:$0xff] %v12901_v34  ;;  %14435 = vst [vmem:[#allocation29_spill] sm:$0xff] %v12903_v60 }
 0x5ee   : > { %v8893_v23 = vpop.f32.mrf.mxu0 }
 0x5ef   : > { %v12908_v28 = vadd.f32 %v8893_v23, %v12796_v13  ;;  %v12926_v13 = vpop.f32.mrf.mxu1 }
 0x5f0   : > { %v12910_v16 = vpop.f32.mrf.mxu0 }
 0x5f1   : > { %14436 = vst [vmem:[#allocation24_spill] sm:$0xff] %v12908_v28  ;;  %14437 = vst [vmem:[#allocation23_spill] sm:$0xff] %v12910_v16 }
 0x5f2   : > { %v8894_v26 = vpop.f32.mrf.mxu0 }
 0x5f3   : > { %v12915_v30 = vadd.f32 %v8894_v26, %v12804_v33  ;;  %v5711_v33 = vadd.f32 %v12680_v42, %v12695_v31  ;;  %v5714_v26 = vadd.f32 %v12689_v18, %v12704_v56  ;;  %v5723_v42 = vadd.f32 %v12733_v19, %v12749_v11 }
 0x5f4   : > { %v12917_v20 = vpop.f32.mrf.mxu0  ;;  %v6124_v18 = vadd.f32 %v12828_v49, %v12826_v17  ;;  %v12956_v56 = vadd.f32 %v12753_v39, %v12769_v24  ;;  %v6127_v39 = vadd.f32 %v12835_v10, %v12831_v4  ;;  %v14442_v49 = vld [vmem:[#allocation43_spill] sm:$0xff]  ;;  %v14443_v4 = vld [vmem:[#allocation53_spill] sm:$0xff] }
 0x5f5   : > { %v5913_v31 = vadd.f32 %v12833_v55, %v5711_v33  ;;  %v6131_v55 = vadd.f32 %v14443_v4, %v14442_v49 }
 0x5f6   : > { %v8897_v22 = vpop.f32.mrf.mxu0 }
 0x5f7   : > { %v12922_v34 = vadd.f32 %v8897_v22, %v12810_v48  ;;  %v5715_v48 = vadd.f32 %v12699_v40, %v12712_v54  ;;  %v5718_v22 = vadd.f32 %v12708_v12, %v12721_v51  ;;  %v5726_v40 = vadd.f32 %v12744_v62, %v12760_v7 }
 0x5f8   : > { %v12924_v60 = vpop.f32.mrf.mxu0  ;;  %v6126_v12 = vadd.f32 %v12820_v50, %v12823_v61  ;;  %v12963_v51 = vadd.f32 %v12765_v5, %v12778_v44  ;;  %v12974_v62 = vadd.f32 %v12782_v14, %v12794_v41  ;;  %v12986_v44 = vadd.f32 %v12798_v58, %v12808_v38  ;;  %v12991_v14 = vld [vmem:[%s13968_s9] ss:$0 sm:$0xff] }
 0x5f9   : > { %14438 = vst [vmem:[#allocation11_spill] sm:$0xff] %v12922_v34  ;;  %14439 = vst [vmem:[#allocation15_spill] sm:$0xff] %v12924_v60  ;;  %v12941_v34 = vpop.f32.mrf.mxu1  ;;  %v5917_v19 = vadd.f32 %v12847_v1, %v5715_v48  ;;  %v5920_v5 = vadd.f32 %v12854_v8, %v5718_v22  ;;  %v14440_v58 = vld [vmem:[#allocation45_spill] sm:$0xff]  ;;  %v14447_v48 = vld [vmem:[#allocation55_spill] sm:$0xff] }
 0x5fa   : > { %v8898_v23 = vpop.f32.mrf.mxu0  ;;  %v14441_v38 = vld [vmem:[#allocation49_spill] sm:$0xff]  ;;  %v13025_v22 = vadd.f32 %v12905_v46, %v14447_v48  ;;  %v14451_v48 = vld [vmem:[#allocation56_spill] sm:$0xff] }
 0x5fb   : > { %v12929_v28 = vadd.f32 %v8898_v23, %v12818_v0  ;;  %v5719_v0 = vadd.f32 %v12716_v43, %v12729_v45  ;;  %v5722_v23 = vadd.f32 %v12725_v63, %v12740_v57  ;;  %v5916_v43 = vadd.f32 %v12840_v36, %v5714_v26  ;;  %v12970_v57 = vpop.f32.mrf.mxu1 }
 0x5fc   : > { %v12931_v16 = vpop.f32.mrf.mxu0  ;;  %v12967_v63 = vadd.f32 %v12773_v47, %v12786_v32  ;;  %v12982_v47 = vadd.f32 %v12790_v15, %v12802_v2  ;;  %v13000_v15 = vadd.f32 %v12812_v52, %v12816_v9  ;;  %v6130_v2 = vadd.f32 %v14440_v58, %v12838_v25  ;;  %v14446_v25 = vld [vmem:[#allocation51_spill] sm:$0xff] }
 0x5fd   : > { %v5921_v24 = vadd.f32 %v12861_v6, %v5719_v0  ;;  %v5924_v32 = vadd.f32 %v12868_v37, %v5722_v23  ;;  %v6125_v6 = vadd.f32 %v12842_v53, %v5913_v31  ;;  %v6128_v17 = vadd.f32 %v14441_v38, %v5916_v43  ;;  %v13007_v10 = vpop.f32.mrf.mxu1  ;;  %v14444_v37 = vld [vmem:[#allocation57_spill] sm:$0xff] }
 0x5fe   : > { %v8937_v60 = vpop.f32.mrf.mxu0  ;;  %v6129_v8 = vadd.f32 %v14444_v37, %v5917_v19  ;;  %v6132_v9 = vadd.f32 %v12884_v59, %v5920_v5  ;;  %v13018_v33 = vadd.f32 %v12891_v21, %v14446_v25 }
 0x5ff   : > { %v6335_v11 = vadd.f32 %v8937_v60, %v6126_v12  ;;  %v14445_v60 = vld [vmem:[#allocation47_spill] sm:$0xff]  ;;  %v13021_v26 = vadd.f32 %v12898_v3, %v5921_v24  ;;  %v13036_v21 = vadd.f32 %v12912_v35, %v5924_v32  ;;  %v13043_v43 = vpop.f32.mrf.mxu1 }
 0x600   : > { %v6206_v54 = vpop.f32.mrf.mxu0  ;;  %v6134_v52 = vadd.f32 %v12877_v29, %v14445_v60 }
 0x601   : > { %v6333_v45 = vadd.f32 %v6206_v54, %v6124_v18  ;;  %v13010_v36 = vadd.f32 %v12991_v14, %v6335_v11  ;;  %v14448_v18 = vld [vmem:[#allocation61_spill] sm:$0xff]  ;;  %v14449_v54 = vld [vmem:[#allocation58_spill] sm:$0xff]  ;;  %v13069_v49 = vpop.f32.mrf.mxu1 }
 0x602   : > { %v8938_v7 = vpop.f32.mrf.mxu0  ;;  %v5925_v3 = vadd.f32 %v14448_v18, %v5723_v42  ;;  %v13041_v46 = vadd.f32 %v12919_v27, %v14449_v54 }
 0x603   : > { %v12995_v41 = vadd.f32 %v12991_v14, %v6333_v45  ;;  %v6336_v50 = vadd.f32 %v8938_v7, %v6127_v39  ;;  %v6475_v45 = vmul.f32 %v13010_v36, %v13010_v36  ;;  %v14450_v39 = vld [vmem:[#allocation28_spill] sm:$0xff]  ;;  %v6407_v27 = vsel %vm3066_vm6, %v13010_v36, 0.0 }
 0x604   : > { %v6209_v61 = vpop.f32.mrf.mxu0  ;;  %v5928_v7 = vadd.f32 %v14450_v39, %v5726_v40 }
 0x605   : > { %v6334_v1 = vadd.f32 %v6209_v61, %v6125_v6  ;;  %v6473_v0 = vmul.f32 %v12995_v41, %v12995_v41  ;;  %v13030_v23 = vadd.f32 %v12991_v14, %v6336_v50  ;;  %v6404_v19 = vsel %vm3066_vm6, %v12995_v41, 0.0 }
 0x606   : > { %v8941_v53 = vpop.f32.mrf.mxu0  ;;  %v6508_v4 = vsel %vm3066_vm6, %v6475_v45, 0.0 }
 0x607   : > { %v13033_v29 = vadd.f32 %v12991_v14, %v6334_v1  ;;  %v6339_v31 = vadd.f32 %v8941_v53, %v6130_v2  ;;  %v6505_v32 = vsel %vm3066_vm6, %v6473_v0, 0.0  ;;  %v6476_v50 = vmul.f32 %v13030_v23, %v13030_v23 }
 0x608   : > { %v6222_v59 = vpop.f32.mrf.mxu0  ;;  %v6409_v1 = vsel %vm3066_vm6, %v13030_v23, 0.0  ;;  %v13078_v0 = vadd.f32 %v12941_v34, %v14451_v48 }
 0x609   : > { %v6337_v12 = vadd.f32 %v6222_v59, %v6128_v17  ;;  %v6405_v35 = vsel %vm3066_vm6, %v13033_v29, 0.0  ;;  %v6474_v42 = vmul.f32 %v13033_v29, %v13033_v29  ;;  %v13064_v40 = vadd.f32 %v12991_v14, %v6339_v31 }
 0x60a   : > { %v8942_v11 = vpop.f32.mrf.mxu0  ;;  %v6406_v5 = vadd.f32 %v6405_v35, %v6404_v19  ;;  %v13067_v17 = vadd.f32 %v12926_v13, %v5925_v3  ;;  %v13081_v13 = vadd.f32 %v12970_v57, %v5928_v7  ;;  %v6510_v59 = vsel %vm3066_vm6, %v6476_v50, 0.0  ;;  %v6077_v57 = vpop.f32.mrf.mxu1  ;;  %v14452_v7 = vld [vmem:[#allocation31_spill] sm:$0xff] }
 0x60b   : > { %v13057_v24 = vadd.f32 %v12991_v14, %v6337_v12  ;;  %v6506_v6 = vsel %vm3066_vm6, %v6474_v42, 0.0  ;;  %v6340_v61 = vadd.f32 %v8942_v11, %v6131_v55  ;;  %v6479_v12 = vmul.f32 %v13064_v40, %v13064_v40 }
 0x60c   : > { %v6225_v58 = vpop.f32.mrf.mxu0  ;;  %v6408_v2 = vadd.f32 %v6407_v27, %v6406_v5  ;;  %v6507_v38 = vadd.f32 %v6506_v6, %v6505_v32  ;;  %v5929_v27 = vadd.f32 %v14452_v7, %v12956_v56  ;;  %v6415_v5 = vsel %vm3066_vm6, %v13064_v40, 0.0 }
 0x60d   : > { %v6477_v53 = vmul.f32 %v13057_v24, %v13057_v24  ;;  %v6338_v55 = vadd.f32 %v6225_v58, %v6129_v8  ;;  %v6411_v18 = vsel %vm3066_vm6, %v13057_v24, 0.0  ;;  %v13087_v3 = vadd.f32 %v12991_v14, %v6340_v61 }
 0x60e   : > { %v8945_v37 = vpop.f32.mrf.mxu0  ;;  %v6509_v60 = vadd.f32 %v6508_v4, %v6507_v38  ;;  %v6410_v25 = vadd.f32 %v6409_v1, %v6408_v2  ;;  %v14453_v4 = vld [vmem:[#allocation25_spill] sm:$0xff] }
 0x60f   : > { %v13090_v8 = vadd.f32 %v12991_v14, %v6338_v55  ;;  %v6512_v19 = vsel %vm3066_vm6, %v6477_v53, 0.0  ;;  %v6343_v11 = vadd.f32 %v8945_v37, %v6134_v52  ;;  %v13113_v1 = vadd.f32 %v13007_v10, %v14453_v4  ;;  %v8924_v53 = vpop.f32.mrf.mxu1 }
 0x610   : > { %v6238_v31 = vpop.f32.mrf.mxu0  ;;  %v6412_v34 = vadd.f32 %v6411_v18, %v6410_v25  ;;  %v6511_v54 = vadd.f32 %v6510_v59, %v6509_v60  ;;  %v6516_v55 = vsel %vm3066_vm6, %v6479_v12, 0.0  ;;  %v6417_v37 = vsel %vm3066_vm6, %v13087_v3, 0.0  ;;  %v14454_v18 = vld [vmem:[#allocation48_spill] sm:$0xff] }
 0x611   : > { %v6341_v45 = vadd.f32 %v6238_v31, %v6132_v9  ;;  %v6413_v35 = vsel %vm3066_vm6, %v13090_v8, 0.0  ;;  %v6478_v42 = vmul.f32 %v13090_v8, %v13090_v8  ;;  %v6480_v9 = vmul.f32 %v13087_v3, %v13087_v3 }
 0x612   : > { %v8946_v39 = vpop.f32.mrf.mxu0  ;;  %v6513_v32 = vadd.f32 %v6512_v19, %v6511_v54  ;;  %v6414_v50 = vadd.f32 %v6413_v35, %v6412_v34  ;;  %v13119_v60 = vadd.f32 %v12991_v14, %v6343_v11  ;;  %v13127_v10 = vadd.f32 %v13043_v43, %v5929_v27  ;;  %v6080_v11 = vpop.f32.mrf.mxu1 }
 0x613   : > { %v6514_v6 = vsel %vm3066_vm6, %v6478_v42, 0.0  ;;  %v13107_v61 = vadd.f32 %v12991_v14, %v6341_v45  ;;  %v6344_v58 = vadd.f32 %v8946_v39, %v13018_v33  ;;  %v5932_v31 = vadd.f32 %v14454_v18, %v12963_v51 }
 0x614   : > { %v6241_v52 = vpop.f32.mrf.mxu0  ;;  %v6416_v2 = vadd.f32 %v6415_v5, %v6414_v50  ;;  %v6515_v38 = vadd.f32 %v6514_v6, %v6513_v32  ;;  %v6518_v12 = vsel %vm3066_vm6, %v6480_v9, 0.0  ;;  %v6483_v51 = vmul.f32 %v13119_v60, %v13119_v60  ;;  %v14455_v6 = vld [vmem:[#allocation32_spill] sm:$0xff] }
 0x615   : > { %v6342_v56 = vadd.f32 %v6241_v52, %v13021_v26  ;;  %v6481_v33 = vmul.f32 %v13107_v61, %v13107_v61  ;;  %v6419_v34 = vsel %vm3066_vm6, %v13107_v61, 0.0  ;;  %v13135_v54 = vadd.f32 %v12991_v14, %v6344_v58 }
 0x616   : > { %v8949_v25 = vpop.f32.mrf.mxu0  ;;  %v6517_v48 = vadd.f32 %v6516_v55, %v6515_v38  ;;  %v6418_v59 = vadd.f32 %v6417_v37, %v6416_v2  ;;  %v13149_v58 = vadd.f32 %v13069_v49, %v14455_v6  ;;  %v6423_v52 = vsel %vm3066_vm6, %v13119_v60, 0.0  ;;  %v14458_v6 = vld [vmem:[#allocation23_spill] sm:$0xff] }
 0x617   : > { %v13124_v26 = vadd.f32 %v12991_v14, %v6342_v56  ;;  %v6520_v39 = vsel %vm3066_vm6, %v6481_v33, 0.0  ;;  %v6347_v7 = vadd.f32 %v8949_v25, %v13025_v22  ;;  %v6484_v2 = vmul.f32 %v13135_v54, %v13135_v54  ;;  %v8927_v33 = vpop.f32.mrf.mxu1 }
 0x618   : > { %v6254_v45 = vpop.f32.mrf.mxu0  ;;  %v6420_v19 = vadd.f32 %v6419_v34, %v6418_v59  ;;  %v6519_v35 = vadd.f32 %v6518_v12, %v6517_v48  ;;  %v6144_v37 = vadd.f32 %v6077_v57, %v5932_v31  ;;  %v6524_v49 = vsel %vm3066_vm6, %v6483_v51, 0.0 }
 0x619   : > { %v6421_v42 = vsel %vm3066_vm6, %v13124_v26, 0.0  ;;  %v6482_v43 = vmul.f32 %v13124_v26, %v13124_v26  ;;  %v6345_v27 = vadd.f32 %v6254_v45, %v13036_v21  ;;  %v6425_v25 = vsel %vm3066_vm6, %v13135_v54, 0.0 }
 0x61a   : > { %v8950_v5 = vpop.f32.mrf.mxu0  ;;  %v6521_v32 = vadd.f32 %v6520_v39, %v6519_v35  ;;  %v6422_v50 = vadd.f32 %v6421_v42, %v6420_v19  ;;  %v13164_v48 = vadd.f32 %v12991_v14, %v6347_v7  ;;  %v6526_v31 = vsel %vm3066_vm6, %v6484_v2, 0.0 }
 0x61b   : > { %v6522_v9 = vsel %vm3066_vm6, %v6482_v43, 0.0  ;;  %v13156_v38 = vadd.f32 %v12991_v14, %v6345_v27  ;;  %v6348_v22 = vadd.f32 %v8950_v5, %v13041_v46  ;;  %v14456_v46 = vld [vmem:[#allocation29_spill] sm:$0xff]  ;;  %v6093_v27 = vpop.f32.mrf.mxu1 }
 0x61c   : > { %v6257_v21 = vpop.f32.mrf.mxu0  ;;  %v6424_v56 = vadd.f32 %v6423_v52, %v6422_v50  ;;  %v6523_v4 = vadd.f32 %v6522_v9, %v6521_v32  ;;  %v5933_v12 = vadd.f32 %v14456_v46, %v12967_v63  ;;  %v5936_v52 = vadd.f32 %v14458_v6, %v12974_v62 }
 0x61d   : > { %v6346_v55 = vadd.f32 %v6257_v21, %v13067_v17  ;;  %v6485_v59 = vmul.f32 %v13156_v38, %v13156_v38  ;;  %v14457_v17 = vld [vmem:[#allocation50_spill] sm:$0xff]  ;;  %v6427_v19 = vsel %vm3066_vm6, %v13156_v38, 0.0  ;;  %v13175_v35 = vadd.f32 %v12991_v14, %v6348_v22 }
 0x61e   : > { %v8953_v18 = vpop.f32.mrf.mxu0  ;;  %v6525_v34 = vadd.f32 %v6524_v49, %v6523_v4  ;;  %v6426_v45 = vadd.f32 %v6425_v25, %v6424_v56  ;;  %v6147_v57 = vadd.f32 %v8924_v53, %v14457_v17  ;;  %v6487_v53 = vmul.f32 %v13164_v48, %v13164_v48 }
 0x61f   : > { %v13178_v42 = vadd.f32 %v12991_v14, %v6346_v55  ;;  %v6351_v63 = vadd.f32 %v8953_v18, %v13078_v0  ;;  %v6528_v5 = vsel %vm3066_vm6, %v6485_v59, 0.0  ;;  %v6431_v22 = vsel %vm3066_vm6, %v13164_v48, 0.0  ;;  %v8928_v18 = vpop.f32.mrf.mxu1 }
 0x620   : > { %v6270_v43 = vpop.f32.mrf.mxu0  ;;  %v6428_v51 = vadd.f32 %v6427_v19, %v6426_v45  ;;  %v6527_v39 = vadd.f32 %v6526_v31, %v6525_v34  ;;  %v6488_v21 = vmul.f32 %v13175_v35, %v13175_v35  ;;  %v6145_v59 = vadd.f32 %v6080_v11, %v5933_v12 }
 0x621   : > { %v6349_v7 = vadd.f32 %v6270_v43, %v13081_v13  ;;  %v6429_v32 = vsel %vm3066_vm6, %v13178_v42, 0.0  ;;  %v6486_v50 = vmul.f32 %v13178_v42, %v13178_v42  ;;  %v13201_v62 = vadd.f32 %v12991_v14, %v6351_v63  ;;  %v14459_v43 = vld [vmem:[#allocation24_spill] sm:$0xff] }
 0x622   : > { %v8954_v9 = vpop.f32.mrf.mxu0  ;;  %v6529_v2 = vadd.f32 %v6528_v5, %v6527_v39  ;;  %v6430_v0 = vadd.f32 %v6429_v32, %v6428_v51  ;;  %v6532_v46 = vsel %vm3066_vm6, %v6487_v53, 0.0  ;;  %v6433_v34 = vsel %vm3066_vm6, %v13175_v35, 0.0 }
 0x623   : > { %v13192_v13 = vadd.f32 %v12991_v14, %v6349_v7  ;;  %v6530_v56 = vsel %vm3066_vm6, %v6486_v50, 0.0  ;;  %v6352_v4 = vadd.f32 %v8954_v9, %v13113_v1  ;;  %v6150_v51 = vadd.f32 %v8927_v33, %v14459_v43  ;;  %v6096_v33 = vpop.f32.mrf.mxu1 }
 0x624   : > { %v6273_v55 = vpop.f32.mrf.mxu0  ;;  %v6432_v49 = vadd.f32 %v6431_v22, %v6430_v0  ;;  %v6531_v25 = vadd.f32 %v6530_v56, %v6529_v2  ;;  %v6148_v39 = vadd.f32 %v6093_v27, %v5936_v52  ;;  %v6534_v63 = vsel %vm3066_vm6, %v6488_v21, 0.0 }
 0x625   : > { %v6489_v45 = vmul.f32 %v13192_v13, %v13192_v13  ;;  %v6350_v17 = vadd.f32 %v6273_v55, %v13127_v10  ;;  %v6435_v11 = vsel %vm3066_vm6, %v13192_v13, 0.0  ;;  %v13214_v12 = vadd.f32 %v12991_v14, %v6352_v4  ;;  %v8931_v56 = vpop.f32.mrf.mxu1 }
 0x626   : > { %v8957_v31 = vpop.f32.mrf.mxu0  ;;  %v6533_v1 = vadd.f32 %v6532_v46, %v6531_v25  ;;  %v6434_v19 = vadd.f32 %v6433_v34, %v6432_v49  ;;  %v6491_v10 = vmul.f32 %v13201_v62, %v13201_v62  ;;  %v5937_v0 = vadd.f32 %v12917_v20, %v12982_v47 }
 0x627   : > { %v13217_v7 = vadd.f32 %v12991_v14, %v6350_v17  ;;  %v6536_v27 = vsel %vm3066_vm6, %v6489_v45, 0.0  ;;  %v6355_v52 = vadd.f32 %v8957_v31, %v13149_v58  ;;  %v6439_v22 = vsel %vm3066_vm6, %v13201_v62, 0.0 }
 0x628   : > { %v6286_v53 = vpop.f32.mrf.mxu0  ;;  %v6436_v5 = vadd.f32 %v6435_v11, %v6434_v19  ;;  %v6535_v32 = vadd.f32 %v6534_v63, %v6533_v1  ;;  %v6492_v4 = vmul.f32 %v13214_v12, %v13214_v12  ;;  %v6151_v20 = vadd.f32 %v8928_v18, %v12915_v30  ;;  %v6109_v11 = vpop.f32.mrf.mxu1 }
 0x629   : > { %v6353_v50 = vadd.f32 %v6286_v53, %v6144_v37  ;;  %v6437_v9 = vsel %vm3066_vm6, %v13217_v7, 0.0  ;;  %v6490_v6 = vmul.f32 %v13217_v7, %v13217_v7  ;;  %v6540_v47 = vsel %vm3066_vm6, %v6491_v10, 0.0 }
 0x62a   : > { %v8958_v2 = vpop.f32.mrf.mxu0  ;;  %v6537_v21 = vadd.f32 %v6536_v27, %v6535_v32  ;;  %v6438_v37 = vadd.f32 %v6437_v9, %v6436_v5  ;;  %v6441_v17 = vsel %vm3066_vm6, %v13214_v12, 0.0  ;;  %v13242_v31 = vadd.f32 %v12991_v14, %v6355_v52 }
 0x62b   : > { %v6538_v55 = vsel %vm3066_vm6, %v6490_v6, 0.0  ;;  %v13235_v49 = vadd.f32 %v12991_v14, %v6353_v50  ;;  %v6356_v25 = vadd.f32 %v8958_v2, %v6147_v57  ;;  %v6542_v30 = vsel %vm3066_vm6, %v6492_v4, 0.0 }
 0x62c   : > { %v6289_v58 = vpop.f32.mrf.mxu0  ;;  %v6440_v46 = vadd.f32 %v6439_v22, %v6438_v37  ;;  %v6539_v34 = vadd.f32 %v6538_v55, %v6537_v21  ;;  %v6495_v52 = vmul.f32 %v13242_v31, %v13242_v31 }
 0x62d   : > { %v6354_v45 = vadd.f32 %v6289_v58, %v6145_v59  ;;  %v6493_v1 = vmul.f32 %v13235_v49, %v13235_v49  ;;  %v6149_v59 = vadd.f32 %v6096_v33, %v5937_v0  ;;  %v6443_v18 = vsel %vm3066_vm6, %v13235_v49, 0.0  ;;  %v14460_v33 = vld [vmem:[#allocation15_spill] sm:$0xff] }
 0x62e   : > { %v8961_v19 = vpop.f32.mrf.mxu0  ;;  %v6541_v43 = vadd.f32 %v6540_v47, %v6539_v34  ;;  %v6442_v57 = vadd.f32 %v6441_v17, %v6440_v46  ;;  %v13253_v53 = vadd.f32 %v12991_v14, %v6356_v25  ;;  %v5940_v6 = vadd.f32 %v14460_v33, %v12986_v44  ;;  %v8932_v25 = vpop.f32.mrf.mxu1 }
 0x62f   : > { %v13247_v63 = vadd.f32 %v12991_v14, %v6354_v45  ;;  %v6359_v10 = vadd.f32 %v8961_v19, %v6150_v51  ;;  %v6544_v2 = vsel %vm3066_vm6, %v6493_v1, 0.0  ;;  %v14461_v51 = vld [vmem:[#allocation11_spill] sm:$0xff]  ;;  %v6447_v58 = vsel %vm3066_vm6, %v13242_v31, 0.0 }
 0x630   : > { %v6302_v5 = vpop.f32.mrf.mxu0  ;;  %v6444_v32 = vadd.f32 %v6443_v18, %v6442_v57  ;;  %v6543_v50 = vadd.f32 %v6542_v30, %v6541_v43  ;;  %v6154_v21 = vadd.f32 %v8931_v56, %v14461_v51  ;;  %v6496_v44 = vmul.f32 %v13253_v53, %v13253_v53 }
 0x631   : > { %v6445_v27 = vsel %vm3066_vm6, %v13247_v63, 0.0  ;;  %v6494_v9 = vmul.f32 %v13247_v63, %v13247_v63  ;;  %v6357_v0 = vadd.f32 %v6302_v5, %v6148_v39  ;;  %v13274_v56 = vadd.f32 %v12991_v14, %v6359_v10  ;;  %v6112_v10 = vpop.f32.mrf.mxu1 }
 0x632   : > { %v8962_v22 = vpop.f32.mrf.mxu0  ;;  %v6545_v37 = vadd.f32 %v6544_v2, %v6543_v50  ;;  %v6446_v4 = vadd.f32 %v6445_v27, %v6444_v32  ;;  %v6152_v1 = vadd.f32 %v6109_v11, %v5940_v6  ;;  %v6548_v19 = vsel %vm3066_vm6, %v6495_v52, 0.0 }
 0x633   : > { %v6546_v55 = vsel %vm3066_vm6, %v6494_v9, 0.0  ;;  %v13271_v46 = vadd.f32 %v12991_v14, %v6357_v0  ;;  %v6360_v34 = vadd.f32 %v8962_v22, %v6151_v20  ;;  %v6449_v43 = vsel %vm3066_vm6, %v13253_v53, 0.0 }
 0x634   : > { %v6305_v45 = vpop.f32.mrf.mxu0  ;;  %v6448_v39 = vadd.f32 %v6447_v58, %v6446_v4  ;;  %v6547_v47 = vadd.f32 %v6546_v55, %v6545_v37  ;;  %v5941_v20 = vadd.f32 %v12931_v16, %v13000_v15  ;;  %v6155_v18 = vadd.f32 %v8932_v25, %v12929_v28 }
 0x635   : > { %v6358_v17 = vadd.f32 %v6305_v45, %v6149_v59  ;;  %v6497_v57 = vmul.f32 %v13271_v46, %v13271_v46  ;;  %v6550_v59 = vsel %vm3066_vm6, %v6496_v44, 0.0  ;;  %v6451_v11 = vsel %vm3066_vm6, %v13271_v46, 0.0 }
 0x636   : > { %v8965_v30 = vpop.f32.mrf.mxu0  ;;  %v6549_v5 = vadd.f32 %v6548_v19, %v6547_v47  ;;  %v6450_v32 = vadd.f32 %v6449_v43, %v6448_v39  ;;  %v13288_v50 = vadd.f32 %v12991_v14, %v6360_v34  ;;  %v6499_v16 = vmul.f32 %v13274_v56, %v13274_v56 }
 0x637   : > { %v13291_v27 = vadd.f32 %v12991_v14, %v6358_v17  ;;  %v6552_v6 = vsel %vm3066_vm6, %v6497_v57, 0.0  ;;  %v6363_v0 = vadd.f32 %v8965_v30, %v6154_v21  ;;  %v6153_v51 = vadd.f32 %v6112_v10, %v5941_v20 }
 0x638   : > { %v6318_v9 = vpop.f32.mrf.mxu0  ;;  %v6452_v15 = vadd.f32 %v6451_v11, %v6450_v32  ;;  %v6551_v28 = vadd.f32 %v6550_v59, %v6549_v5  ;;  %v6455_v25 = vsel %vm3066_vm6, %v13274_v56, 0.0  ;;  %v6500_v58 = vmul.f32 %v13288_v50, %v13288_v50 }
 0x639   : > { %v6361_v33 = vadd.f32 %v6318_v9, %v6152_v1  ;;  %v6453_v52 = vsel %vm3066_vm6, %v13291_v27, 0.0  ;;  %v6498_v2 = vmul.f32 %v13291_v27, %v13291_v27  ;;  %v6556_v39 = vsel %vm3066_vm6, %v6499_v16, 0.0 }
 0x63a   : > { %v8966_v22 = vpop.f32.mrf.mxu0  ;;  %v6553_v37 = vadd.f32 %v6552_v6, %v6551_v28  ;;  %v6454_v4 = vadd.f32 %v6453_v52, %v6452_v15  ;;  %v6457_v17 = vsel %vm3066_vm6, %v13288_v50, 0.0  ;;  %v13312_v1 = vadd.f32 %v12991_v14, %v6363_v0 }
 0x63b   : > { %v13301_v55 = vadd.f32 %v12991_v14, %v6361_v33  ;;  %v6554_v44 = vsel %vm3066_vm6, %v6498_v2, 0.0  ;;  %v6364_v34 = vadd.f32 %v8966_v22, %v6155_v18  ;;  %v6558_v20 = vsel %vm3066_vm6, %v6500_v58, 0.0 }
 0x63c   : > { %v6321_v45 = vpop.f32.mrf.mxu0  ;;  %v6456_v21 = vadd.f32 %v6455_v25, %v6454_v4  ;;  %v6555_v47 = vadd.f32 %v6554_v44, %v6553_v37  ;;  %v6503_v11 = vmul.f32 %v13312_v1, %v13312_v1  ;;  %v6463_v6 = vsel %vm3066_vm6, %v13312_v1, 0.0 }
 0x63d   : > { %v6501_v19 = vmul.f32 %v13301_v55, %v13301_v55  ;;  %v6362_v43 = vadd.f32 %v6321_v45, %v6153_v51  ;;  %v6459_v18 = vsel %vm3066_vm6, %v13301_v55, 0.0  ;;  %v13320_v5 = vadd.f32 %v12991_v14, %v6364_v34 }
 0x63e   : > { %v6557_v57 = vadd.f32 %v6556_v39, %v6555_v47  ;;  %v6458_v30 = vadd.f32 %v6457_v17, %v6456_v21  ;;  %v6564_v22 = vsel %vm3066_vm6, %v6503_v11, 0.0 }
 0x63f   : > { %14462 = vst [vmem:[#allocation30_spill] sm:$0xff] %v13320_v5  ;;  %v13323_v32 = vadd.f32 %v12991_v14, %v6362_v43  ;;  %v6560_v9 = vsel %vm3066_vm6, %v6501_v19, 0.0  ;;  %v6504_v14 = vmul.f32 %v13320_v5, %v13320_v5  ;;  %v6465_v51 = vsel %vm3066_vm6, %v13320_v5, 0.0 }
 0x640   : > { %v6460_v10 = vadd.f32 %v6459_v18, %v6458_v30  ;;  %v6559_v59 = vadd.f32 %v6558_v20, %v6557_v57  ;;  %v6723_v18 = vld [vmem:[%s13972_s13] sm:$0xf] }
 0x641   : > { %14463 = vst [vmem:[#allocation14_spill] sm:$0xff] %v13323_v32  ;;  %v6461_v16 = vsel %vm3066_vm6, %v13323_v32, 0.0  ;;  %v6502_v15 = vmul.f32 %v13323_v32, %v13323_v32  ;;  %v6566_v25 = vsel %vm3066_vm6, %v6504_v14, 0.0  ;;  %v14465_v14 = vld [vmem:[#allocation17_spill] sm:$0xff] }
 0x642   : > { %v6561_v28 = vadd.f32 %v6560_v9, %v6559_v59  ;;  %v6462_v33 = vadd.f32 %v6461_v16, %v6460_v10  ;;  %v14464_v10 = vmov 0.0  }
 0x643   : > { %v6562_v52 = vsel %vm3066_vm6, %v6502_v15, 0.0  ;;  %v7252_v15 = vld [vmem:[%s13975_s16] sm:$0x3] }
 0x644   : > { %v6464_v2 = vadd.f32 %v6463_v6, %v6462_v33  ;;  %v6563_v0 = vadd.f32 %v6562_v52, %v6561_v28  ;;  %v7261_v6 = vsel %vm1029_vm0, %v7252_v15, 0  ;;  %v14466_v52 = vld [vmem:[#allocation18_spill] sm:$0xff] }
 0x646   : > { %v6466_v37 = vadd.f32 %v6465_v51, %v6464_v2  ;;  %v6565_v4 = vadd.f32 %v6564_v22, %v6563_v0  ;;  %v14467_v2 = vld [vmem:[#allocation20_spill] sm:$0xff]  ;;  %v14468_v0 = vld [vmem:[#allocation21_spill] sm:$0xff]  ;;  %v14469_v22 = vld [vmem:[#allocation22_spill] sm:$0xff] }
 0x647   : > { %v14470_v51 = vld [vmem:[#allocation3_spill] sm:$0xff] }
 0x648   : > { %v6467_v58 = vrot.slane %v6466_v37, 4  ;;  %v6567_v44 = vadd.f32 %v6566_v25, %v6565_v4  ;;  %v14472_v4 = vld [vmem:[#allocation5_spill] sm:$0xff]  ;;  %v14473_v25 = vld [vmem:[#allocation6_spill] sm:$0xff] }
 0x64a   : > { %v6468_v34 = vadd.f32 %v6467_v58, %v6466_v37  ;;  %v6568_v45 = vrot.slane %v6567_v44, 4  ;;  %v14471_v37 = vld [vmem:[#allocation4_spill] sm:$0xff]  ;;  %v14474_v58 = vld [vmem:[#allocation7_spill] sm:$0xff] }
 0x64c   : > { %v6469_v39 = vrot.slane %v6468_v34, 2  ;;  %v6569_v21 = vadd.f32 %v6568_v45, %v6567_v44  ;;  %v14475_v44 = vld [vmem:[#allocation8_spill] sm:$0xff]  ;;  %v14477_v45 = vld [vmem:[#allocation13_spill] sm:$0xff] }
 0x64e   : > { %v6470_v47 = vadd.f32 %v6469_v39, %v6468_v34  ;;  %v6570_v17 = vrot.slane %v6569_v21, 2  ;;  %v14476_v34 = vld [vmem:[#allocation10_spill] sm:$0xff]  ;;  %v14478_v39 = vld [vmem:[#allocation16_spill] sm:$0xff] }
 0x650   : > { %v6471_v19 = vrot.slane %v6470_v47, 1  ;;  %v6571_v43 = vadd.f32 %v6570_v17, %v6569_v21  ;;  %v14479_v21 = vld [vmem:[#allocation19_spill] sm:$0xff] }
 0x652   : > { %v6472_v57 = vadd.f32 %v6471_v19, %v6470_v47  ;;  %v6572_v30 = vrot.slane %v6571_v43, 1  ;;  %v14480_v47 = vld [vmem:[#allocation12_spill] sm:$0xff] }
 0x654   : > { %v6573_v20 = vadd.f32 %v6572_v30, %v6571_v43  ;;  %8970 = vmatmul.mubr.msk.f32.vlgmr.msra.gmra.mxu0 %vm3066_vm6, %v6472_v57 }
 0x656   : > { %8975 = vmatmul.mubr.msk.f32.vlgmr.msra.gmra.mxu1 %vm3066_vm6, %v6573_v20 }
 0x657   : > { %8978 = vmatpush3.msk.msra.mxu1 %vm3391_vm7, %v6723_v18  ;;  %8979 = vmatprep.mubr.msk.f32.mxu1 %vm9365_vm1, %v14464_v10 }
 0x658   : > { %8982 = vmatprep.subr.mxu1 %v14464_v10 }
 0x714   : > { %v6644_v59 = vpop.f32.mrf.mxu0 }
 0x715   : > { %v6648_v11 = vmul.f32 0.001953125, %v6644_v59 }
 0x716   : > { %v8971_v9 = vpop.f32.mrf.mxu0  ;;  %v6718_v16 = vpop.f32.mrf.mxu1 }
 0x717   : > { %8980 = vmatmul.mubr.msk.f32.vlgmr.msra.gmra.mxu1 %vm980_vm3, %v6648_v11  ;;  %v6722_v33 = vmul.f32 0.001953125, %v6718_v16 }
 0x718   : > { %8983 = vmatpush3.msk.msra.mxu1 %vm3391_vm7, %v6723_v18  ;;  %v8976_v28 = vpop.f32.mrf.mxu1  ;;  %8984 = vmatprep.mubr.msk.f32.mxu1 %vm9365_vm1, %v14464_v10 }
 0x719   : > { %9042 = vmatprep.subr.msk.bf16.mxu1 %vm1029_vm0, %v7252_v15  ;;  %v14481_v15 = vld [vmem:[#allocation26_spill] sm:$0xff] }
 0x71b   : > { %8985 = vmatmul.mubr.msk.f32.vlgmr.msra.gmra.mxu1 %vm980_vm3, %v6722_v33 }
 0x71c   : > { %8988 = vmatpush3.bf16.msra.mxu1 %v7261_v6  ;;  %8989 = vmatprep.mubr.msk.bf16.mxu1 %vm980_vm3, %v14465_v14 }
 0x71f   : > { %8990 = vmatmul.mubr.msk.bf16.vlgmr.msra.gmra.mxu1 %vm980_vm3, %v14466_v52 }
 0x720   : > { %8993 = vmatprep.mubr.msk.bf16.mxu1 %vm980_vm3, %v14467_v2 }
 0x727   : > { %8994 = vmatmul.mubr.msk.bf16.gmra.mxu1 %vm980_vm3, %v14468_v0 }
 0x728   : > { %8997 = vmatprep.mubr.msk.bf16.mxu1 %vm980_vm3, %v14469_v22 }
 0x72f   : > { %8998 = vmatmul.mubr.msk.bf16.gmra.mxu1 %vm980_vm3, %v14470_v51 }
 0x730   : > { %9001 = vmatprep.mubr.msk.bf16.mxu1 %vm980_vm3, %v14471_v37 }
 0x737   : > { %9002 = vmatmul.mubr.msk.bf16.gmra.mxu1 %vm980_vm3, %v14472_v4 }
 0x738   : > { %9005 = vmatprep.mubr.msk.bf16.mxu1 %vm980_vm3, %v14473_v25 }
 0x73f   : > { %9006 = vmatmul.mubr.msk.bf16.gmra.mxu1 %vm980_vm3, %v14474_v58 }
 0x740   : > { %9009 = vmatprep.mubr.msk.bf16.mxu1 %vm980_vm3, %v14475_v44 }
 0x747   : > { %9010 = vmatmul.mubr.msk.bf16.gmra.mxu1 %vm980_vm3, %v14476_v34 }
 0x748   : > { %9013 = vmatprep.mubr.msk.bf16.mxu1 %vm980_vm3, %v14477_v45 }
 0x74f   : > { %9014 = vmatmul.mubr.msk.bf16.gmra.mxu1 %vm980_vm3, %v14478_v39  ;;  %v13458_v39 = vld [vmem:[%s13969_s10] ss:$0 sm:$0xff] }
 0x750   : > { %9017 = vmatprep.mubr.msk.bf16.mxu1 %vm980_vm3, %v14479_v21 }
 0x757   : > { %9018 = vmatmul.mubr.msk.bf16.gmra.mxu1 %vm980_vm3, %v14480_v47 }
 0x7d7   : > { %v6796_v17 = vpop.f32.mrf.mxu1 }
 0x7d8   : > { %v6873_v43 = vmul.f32 %v6796_v17, %v6796_v17  ;;  %v13399_v28 = vrot.slane %v6796_v17, %v14481_v15 }
 0x7d9   : > { %v8981_v19 = vpop.f32.mrf.mxu1 }
 0x7da   : > { %v6882_v14 = vsub.f32 %v13010_v36, %v13399_v28  ;;  %v6880_v52 = vsub.f32 %v12995_v41, %v13399_v28  ;;  %v6883_v2 = vsub.f32 %v13030_v23, %v13399_v28  ;;  %v6881_v0 = vsub.f32 %v13033_v29, %v13399_v28  ;;  %v13426_v23 = vld [vmem:[%s13976_s17] ss:$0 sm:$0xff] }
 0x7db   : > { %v6869_v57 = vpop.f32.mrf.mxu1  ;;  %v6886_v22 = vsub.f32 %v13064_v40, %v13399_v28  ;;  %v6884_v51 = vsub.f32 %v13057_v24, %v13399_v28  ;;  %v6887_v37 = vsub.f32 %v13087_v3, %v13399_v28  ;;  %v6885_v36 = vsub.f32 %v13090_v8, %v13399_v28 }
 0x7dc   : > { %v6874_v30 = vsub.f32 %v6869_v57, %v6873_v43  ;;  %v6890_v41 = vsub.f32 %v13119_v60, %v13399_v28  ;;  %v6888_v40 = vsub.f32 %v13107_v61, %v13399_v28  ;;  %v6891_v24 = vsub.f32 %v13135_v54, %v13399_v28 }
 0x7dd   : > { %v8986_v20 = vpop.f32.mrf.mxu1  ;;  %v6889_v3 = vsub.f32 %v13124_v26, %v13399_v28  ;;  %v6894_v8 = vsub.f32 %v13164_v48, %v13399_v28  ;;  %v6892_v4 = vsub.f32 %v13156_v38, %v13399_v28  ;;  %v6895_v25 = vsub.f32 %v13175_v35, %v13399_v28 }
 0x7de   : > { %v6875_v18 = vmax.f32 %v6874_v30, 0.0  ;;  %v6893_v58 = vsub.f32 %v13178_v42, %v13399_v28  ;;  %v6898_v61 = vsub.f32 %v13201_v62, %v13399_v28 }
 0x7df   : > { %v8991_v10 = vpop.f32.mrf.mxu1 }
 0x7e0   : > { %v6912_v59 = vadd.f32 1e-05, %v6875_v18  ;;  %v13461_v21 = vadd.f32 %v8991_v10, %v13426_v23  ;;  %v13478_v10 = vld [vmem:[%s13970_s11] ss:$0 sm:$0xff] }
 0x7e1   : > { %v13392_v11 = vpop.f32.mrf.mxu1 }
 0x7e2   : > { %9225 = vrsqrt.f32 %v6912_v59 }
 0x7e3   : > { %v13394_v9 = vpop.f32.mrf.mxu1 }
 0x7e5   : > { %v13396_v16 = vpop.f32.mrf.mxu1 }
 0x7e7   : > { %v13401_v33 = vpop.f32.mrf.mxu1 }
 0x7e9   : > { %v13403_v6 = vpop.f32.mrf.mxu1 }
 0x7eb   : > { %v13428_v29 = vpop.f32.mrf.mxu1 }
 0x7ed   : > { %v13473_v18 = vpop.f32.mrf.mxu1 }
 0x7ef   : > { %v9226_v60 = vpop.eup %9225 }
 0x7f0   : > { %v13447_v54 = vrot.slane %v9226_v60, %v14481_v15 }
 0x7f2   : > { %v6920_v43 = vmul.f32 %v13447_v54, %v6882_v14  ;;  %v6918_v57 = vmul.f32 %v13447_v54, %v6880_v52  ;;  %v6921_v30 = vmul.f32 %v13447_v54, %v6883_v2  ;;  %v6919_v20 = vmul.f32 %v13447_v54, %v6881_v0 }
 0x7f3   : > { %v6924_v59 = vmul.f32 %v13447_v54, %v6886_v22  ;;  %v6922_v15 = vmul.f32 %v13447_v54, %v6884_v51  ;;  %v6925_v60 = vmul.f32 %v13447_v54, %v6887_v37  ;;  %v6923_v14 = vmul.f32 %v13447_v54, %v6885_v36 }
 0x7f4   : > { %v6959_v52 = vmul.f32 %v13458_v39, %v6920_v43  ;;  %v6957_v2 = vmul.f32 %v13458_v39, %v6918_v57  ;;  %v6960_v0 = vmul.f32 %v13458_v39, %v6921_v30  ;;  %v6958_v19 = vmul.f32 %v13458_v39, %v6919_v20  ;;  %v13504_v30 = vpop.f32.mrf.mxu1 }
 0x7f5   : > { %v6963_v17 = vmul.f32 %v13458_v39, %v6924_v59  ;;  %v6961_v47 = vmul.f32 %v13458_v39, %v6922_v15  ;;  %v6964_v22 = vmul.f32 %v13458_v39, %v6925_v60  ;;  %v6962_v51 = vmul.f32 %v13458_v39, %v6923_v14 }
 0x7f6   : > { %v13493_v37 = vadd.f32 %v13478_v10, %v6959_v52  ;;  %v13496_v36 = vadd.f32 %v13478_v10, %v6957_v2  ;;  %v13499_v43 = vadd.f32 %v13478_v10, %v6960_v0  ;;  %v13502_v57 = vadd.f32 %v13478_v10, %v6958_v19  ;;  %v13530_v34 = vpop.f32.mrf.mxu1 }
 0x7f7   : > { %v13507_v20 = vadd.f32 %v13478_v10, %v6963_v17  ;;  %v13510_v59 = vadd.f32 %v13478_v10, %v6961_v47  ;;  %v13513_v15 = vadd.f32 %v13478_v10, %v6964_v22  ;;  %v6928_v2 = vmul.f32 %v13447_v54, %v6890_v41 }
 0x7f8   : > { %v7936_v14 = vmul.f32 -1.442695, %v13493_v37  ;;  %v7934_v52 = vmul.f32 -1.442695, %v13496_v36  ;;  %v7937_v19 = vmul.f32 -1.442695, %v13499_v43  ;;  %v13523_v0 = vadd.f32 %v13478_v10, %v6962_v51 }
 0x7f9   : > { %v7935_v17 = vmul.f32 -1.442695, %v13502_v57  ;;  %v6926_v47 = vmul.f32 %v13447_v54, %v6888_v40  ;;  %v7940_v60 = vmul.f32 -1.442695, %v13507_v20  ;;  %v6967_v45 = vmul.f32 %v13458_v39, %v6928_v2 }
 0x7fa   : > { %9227 = vpow2.f32 %v7936_v14  ;;  %v7938_v44 = vmul.f32 -1.442695, %v13510_v59  ;;  %v6929_v40 = vmul.f32 %v13447_v54, %v6891_v24  ;;  %v7941_v22 = vmul.f32 -1.442695, %v13513_v15 }
 0x7fb   : > { %9229 = vpow2.f32 %v7934_v52  ;;  %v6965_v51 = vmul.f32 %v13458_v39, %v6926_v47  ;;  %v13539_v14 = vadd.f32 %v13478_v10, %v6967_v45  ;;  %v6927_v2 = vmul.f32 %v13447_v54, %v6889_v3 }
 0x7fc   : > { %9231 = vpow2.f32 %v7937_v19  ;;  %v7939_v52 = vmul.f32 -1.442695, %v13523_v0  ;;  %v6968_v47 = vmul.f32 %v13458_v39, %v6929_v40  ;;  %v13551_v19 = vpop.f32.mrf.mxu1  ;;  %v6932_v26 = vmul.f32 %v13447_v54, %v6894_v8 }
 0x7fd   : > { %9233 = vpow2.f32 %v7935_v17  ;;  %v13547_v41 = vadd.f32 %v13478_v10, %v6965_v51  ;;  %v7944_v24 = vmul.f32 -1.442695, %v13539_v14  ;;  %v6966_v45 = vmul.f32 %v13458_v39, %v6927_v2 }
 0x7fe   : > { %9235 = vpow2.f32 %v7940_v60  ;;  %v13560_v17 = vadd.f32 %v13478_v10, %v6968_v47  ;;  %v6971_v40 = vmul.f32 %v13458_v39, %v6932_v26  ;;  %v6930_v48 = vmul.f32 %v13447_v54, %v6892_v4  ;;  %v13580_v47 = vpop.f32.mrf.mxu1 }
 0x7ff   : > { %9237 = vpow2.f32 %v7938_v44  ;;  %v7942_v3 = vmul.f32 -1.442695, %v13547_v41  ;;  %v13565_v51 = vadd.f32 %v13478_v10, %v6966_v45  ;;  %v6933_v44 = vmul.f32 %v13447_v54, %v6895_v25 }
 0x800   : > { %9239 = vpow2.f32 %v7941_v22  ;;  %v7945_v8 = vmul.f32 -1.442695, %v13560_v17  ;;  %v13583_v38 = vadd.f32 %v13478_v10, %v6971_v40  ;;  %v6969_v4 = vmul.f32 %v13458_v39, %v6930_v48  ;;  %v13613_v40 = vpop.f32.mrf.mxu1 }
 0x801   : > { %9241 = vpow2.f32 %v7939_v52  ;;  %v7943_v2 = vmul.f32 -1.442695, %v13565_v51  ;;  %v13588_v52 = vadd.f32 %v13426_v23, %v13392_v11  ;;  %v6972_v35 = vmul.f32 %v13458_v39, %v6933_v44 }
 0x802   : > { %9243 = vpow2.f32 %v7944_v24  ;;  %v6931_v25 = vmul.f32 %v13447_v54, %v6893_v58  ;;  %v7948_v24 = vmul.f32 -1.442695, %v13583_v38  ;;  %v13597_v45 = vadd.f32 %v13478_v10, %v6969_v4 }
 0x803   : > { %9245 = vpow2.f32 %v7942_v3  ;;  %v13603_v11 = vadd.f32 %v13394_v9, %v13426_v23  ;;  %v13606_v3 = vadd.f32 %v13478_v10, %v6972_v35  ;;  %v13611_v58 = vadd.f32 %v13426_v23, %v13396_v16 }
 0x804   : > { %9247 = vpow2.f32 %v7945_v8  ;;  %v6970_v42 = vmul.f32 %v13458_v39, %v6931_v25  ;;  %v7946_v48 = vmul.f32 -1.442695, %v13597_v45  ;;  %v6936_v9 = vmul.f32 %v13447_v54, %v6898_v61 }
 0x805   : > { %9249 = vpow2.f32 %v7943_v2  ;;  %v13622_v44 = vadd.f32 %v13401_v33, %v13426_v23  ;;  %v13626_v2 = vadd.f32 %v13426_v23, %v13403_v6  ;;  %v7949_v16 = vmul.f32 -1.442695, %v13606_v3 }
 0x806   : > { %9251 = vpow2.f32 %v7948_v24  ;;  %v14482_v4 = vsub.f32 %v13192_v13, %v13399_v28  ;;  %v13635_v61 = vadd.f32 %v13428_v29, %v13426_v23  ;;  %v13638_v33 = vadd.f32 %v13478_v10, %v6970_v42  ;;  %v13652_v42 = vpop.f32.mrf.mxu1 }
 0x807   : > { %v9228_v8 = vpop.eup %9227  ;;  %9253 = vpow2.f32 %v7946_v48  ;;  %v13642_v26 = vadd.f32 %v13426_v23, %v13473_v18  ;;  %v14484_v13 = vsub.f32 %v13214_v12, %v13399_v28  ;;  %v13650_v48 = vadd.f32 %v13504_v30, %v13426_v23 }
 0x808   : > { %v6934_v35 = vmul.f32 %v13447_v54, %v14482_v4  ;;  %v9230_v25 = vpop.eup %9229  ;;  %v7126_v62 = vadd.f32 1.0, %v9228_v8  ;;  %14483 = vst [vmem:[#allocation34_spill] sm:$0xff] %v13638_v33  ;;  %9255 = vpow2.f32 %v7949_v16  ;;  %v13657_v16 = vadd.f32 %v13426_v23, %v13530_v34 }
 0x809   : > { %v9232_v24 = vpop.eup %9231  ;;  %v7124_v6 = vadd.f32 1.0, %v9230_v25  ;;  %v6937_v8 = vmul.f32 %v13447_v54, %v14484_v13  ;;  %v6975_v25 = vmul.f32 %v13458_v39, %v6936_v9  ;;  %v13662_v30 = vadd.f32 %v13551_v19, %v13426_v23 }
 0x80a   : > { %v9234_v4 = vpop.eup %9233  ;;  %9257 = vrcp.f32 %v7126_v62  ;;  %v7127_v29 = vadd.f32 1.0, %v9232_v24  ;;  %v6973_v12 = vmul.f32 %v13458_v39, %v6934_v35  ;;  %v7947_v24 = vmul.f32 -1.442695, %v13638_v33 }
 0x80b   : > { %v9236_v22 = vpop.eup %9235  ;;  %9259 = vrcp.f32 %v7124_v6  ;;  %v7125_v18 = vadd.f32 1.0, %v9234_v4  ;;  %v6976_v6 = vmul.f32 %v13458_v39, %v6937_v8  ;;  %v14485_v34 = vsub.f32 %v13217_v7, %v13399_v28 }
 0x80c   : > { %v9238_v13 = vpop.eup %9237  ;;  %9261 = vrcp.f32 %v7127_v29  ;;  %v7130_v62 = vadd.f32 1.0, %v9236_v22  ;;  %v13670_v22 = vpop.f32.mrf.mxu1  ;;  %v13673_v19 = vadd.f32 %v13478_v10, %v6975_v25  ;;  %v14487_v33 = vsub.f32 %v13242_v31, %v13399_v28 }
 0x80d   : > { %v9240_v60 = vpop.eup %9239  ;;  %9263 = vrcp.f32 %v7125_v18  ;;  %v7128_v9 = vadd.f32 1.0, %v9238_v13  ;;  %v6935_v4 = vmul.f32 %v13447_v54, %v14485_v34  ;;  %v13680_v7 = vadd.f32 %v13478_v10, %v6973_v12 }
 0x80e   : > { %v9242_v35 = vpop.eup %9241  ;;  %9265 = vrcp.f32 %v7130_v62  ;;  %v7131_v29 = vadd.f32 1.0, %v9240_v60  ;;  %14486 = vst [vmem:[#allocation36_spill] sm:$0xff] %v13673_v19  ;;  %v6940_v18 = vmul.f32 %v13447_v54, %v14487_v33  ;;  %v14489_v25 = vsub.f32 %v13235_v49, %v13399_v28 }
 0x80f   : > { %v9244_v13 = vpop.eup %9243  ;;  %9267 = vrcp.f32 %v7128_v9  ;;  %v7129_v8 = vadd.f32 1.0, %v9242_v35  ;;  %14488 = vst [vmem:[#allocation35_spill] sm:$0xff] %v13680_v7  ;;  %v6974_v34 = vmul.f32 %v13458_v39, %v6935_v4  ;;  %v13689_v9 = vadd.f32 %v13478_v10, %v6976_v6 }
 0x810   : > { %v9246_v62 = vpop.eup %9245  ;;  %9269 = vrcp.f32 %v7131_v29  ;;  %v7134_v60 = vadd.f32 1.0, %v9244_v13  ;;  %v6979_v32 = vmul.f32 %v13458_v39, %v6940_v18  ;;  %v6938_v31 = vmul.f32 %v13447_v54, %v14489_v25  ;;  %v13694_v29 = vpop.f32.mrf.mxu1 }
 0x811   : > { %v9248_v5 = vpop.eup %9247  ;;  %9271 = vrcp.f32 %v7129_v8  ;;  %v7132_v33 = vadd.f32 1.0, %v9246_v62  ;;  %14490 = vst [vmem:[#allocation39_spill] sm:$0xff] %v13689_v9  ;;  %v13692_v12 = vadd.f32 %v13478_v10, %v6974_v34  ;;  %v7952_v6 = vmul.f32 -1.442695, %v13673_v19 }
 0x812   : > { %v9250_v4 = vpop.eup %9249  ;;  %9273 = vrcp.f32 %v7134_v60  ;;  %v7135_v35 = vadd.f32 1.0, %v9248_v5  ;;  %v13697_v18 = vadd.f32 %v13478_v10, %v6979_v32  ;;  %v6977_v49 = vmul.f32 %v13458_v39, %v6938_v31 }
 0x813   : > { %14491 = vst [vmem:[#allocation42_spill] sm:$0xff] %v13692_v12  ;;  %v9252_v13 = vpop.eup %9251  ;;  %9275 = vrcp.f32 %v7132_v33  ;;  %v7133_v8 = vadd.f32 1.0, %v9250_v4  ;;  %v14493_v34 = vsub.f32 %v13253_v53, %v13399_v28  ;;  %v7950_v60 = vmul.f32 -1.442695, %v13680_v7 }
 0x814   : > { %14492 = vst [vmem:[#allocation44_spill] sm:$0xff] %v13697_v18  ;;  %9277 = vrcp.f32 %v7135_v35  ;;  %v7138_v5 = vadd.f32 1.0, %v9252_v13  ;;  %v13707_v32 = vadd.f32 %v13478_v10, %v6977_v49  ;;  %v9254_v25 = vpop.eup %9253  ;;  %v7953_v31 = vmul.f32 -1.442695, %v13689_v9  ;;  %v13716_v13 = vpop.f32.mrf.mxu1 }
 0x815   : > { %v6941_v62 = vmul.f32 %v13447_v54, %v14493_v34  ;;  %9279 = vrcp.f32 %v7133_v8  ;;  %v14494_v4 = vsub.f32 %v13247_v63, %v13399_v28  ;;  %v9256_v19 = vpop.eup %9255  ;;  %v7136_v35 = vadd.f32 1.0, %v9254_v25 }
 0x816   : > { %9281 = vrcp.f32 %v7138_v5  ;;  %v7951_v49 = vmul.f32 -1.442695, %v13692_v12  ;;  %v7956_v34 = vmul.f32 -1.442695, %v13697_v18  ;;  %v7139_v7 = vadd.f32 1.0, %v9256_v19 }
 0x817   : > { %v6980_v33 = vmul.f32 %v13458_v39, %v6941_v62  ;;  %v6939_v53 = vmul.f32 %v13447_v54, %v14494_v4  ;;  %v9258_v8 = vpop.eup %9257  ;;  %9283 = vpow2.f32 %v7947_v24  ;;  %v7954_v5 = vmul.f32 -1.442695, %v13707_v32 }
 0x818   : > { %v9260_v9 = vpop.eup %9259  ;;  %v7222_v4 = vmul.f32 %v9258_v8, %v13493_v37  ;;  %9285 = vrcp.f32 %v7136_v35  ;;  %v14495_v25 = vsub.f32 %v13274_v56, %v13399_v28  ;;  %v13742_v35 = vpop.f32.mrf.mxu1 }
 0x819   : > { %v13721_v62 = vadd.f32 %v13478_v10, %v6980_v33  ;;  %v6978_v63 = vmul.f32 %v13458_v39, %v6939_v53  ;;  %v9262_v18 = vpop.eup %9261  ;;  %v7220_v24 = vmul.f32 %v9260_v9, %v13496_v36  ;;  %9287 = vrcp.f32 %v7139_v7 }
 0x81a   : > { %v6944_v12 = vmul.f32 %v13447_v54, %v14495_v25  ;;  %v9264_v33 = vpop.eup %9263  ;;  %v7426_v56 = vadd.f32 %v13461_v21, %v7222_v4  ;;  %v7223_v53 = vmul.f32 %v9262_v18, %v13499_v43  ;;  %9289 = vpow2.f32 %v7952_v6  ;;  %v13767_v4 = vpop.f32.mrf.mxu1 }
 0x81b   : > { %v7957_v37 = vmul.f32 -1.442695, %v13721_v62  ;;  %v13738_v19 = vadd.f32 %v13478_v10, %v6978_v63  ;;  %v9266_v25 = vpop.eup %9265  ;;  %v7424_v36 = vadd.f32 %v13588_v52, %v7220_v24  ;;  %v7221_v7 = vmul.f32 %v9264_v33, %v13502_v57 }
 0x81c   : > { %v6983_v8 = vmul.f32 %v13458_v39, %v6944_v12  ;;  %9291 = vpow2.f32 %v7950_v60  ;;  %v9268_v63 = vpop.eup %9267  ;;  %7458 = vst.msk [vmem:[%s13733_s24 + $0x10] sm:$0xff] %vm3066_vm6, %v7426_v56  ;;  %v7427_v21 = vadd.f32 %v13603_v11, %v7223_v53  ;;  %v7226_v43 = vmul.f32 %v9266_v25, %v13507_v20 }
 0x81d   : > { %v7955_v9 = vmul.f32 -1.442695, %v13738_v19  ;;  %9293 = vpow2.f32 %v7953_v31  ;;  %v9270_v18 = vpop.eup %9269  ;;  %7456 = vst.msk [vmem:[%s13733_s24] sm:$0xff] %vm3066_vm6, %v7424_v36  ;;  %v7425_v57 = vadd.f32 %v13611_v58, %v7221_v7  ;;  %v7224_v52 = vmul.f32 %v9268_v63, %v13510_v59 }
 0x81e   : > { %v13753_v12 = vadd.f32 %v13478_v10, %v6983_v8  ;;  %9295 = vpow2.f32 %v7951_v49  ;;  %v14496_v6 = vsub.f32 %v13271_v46, %v13399_v28  ;;  %v9272_v20 = vpop.eup %9271  ;;  %7459 = vst.msk [vmem:[%s13733_s24 + $0x18] sm:$0xff] %vm3066_vm6, %v7427_v21  ;;  %v7430_v60 = vadd.f32 %v13622_v44, %v7226_v43 }
 0x81f   : > { %v7227_v31 = vmul.f32 %v9270_v18, %v13513_v15  ;;  %9297 = vpow2.f32 %v7956_v34  ;;  %v9274_v58 = vpop.eup %9273  ;;  %7457 = vst.msk [vmem:[%s13733_s24 + $0x8] sm:$0xff] %vm3066_vm6, %v7425_v57  ;;  %v7428_v46 = vadd.f32 %v13626_v2, %v7224_v52  ;;  %v7225_v49 = vmul.f32 %v9272_v20, %v13523_v0 }
 0x820   : > { %v6942_v11 = vmul.f32 %v13447_v54, %v14496_v6  ;;  %v7960_v59 = vmul.f32 -1.442695, %v13753_v12  ;;  %9299 = vpow2.f32 %v7954_v5  ;;  %v9276_v44 = vpop.eup %9275  ;;  %7462 = vst.msk [vmem:[%s13733_s24 + $0x30] sm:$0xff] %vm3066_vm6, %v7430_v60  ;;  %v7230_v34 = vmul.f32 %v9274_v58, %v13539_v14 }
 0x821   : > { %v7431_v15 = vadd.f32 %v13635_v61, %v7227_v31  ;;  %v7333_v33 = vadd.f32 %v13426_v23, %v13580_v47  ;;  %9301 = vpow2.f32 %v7957_v37  ;;  %v9278_v56 = vpop.eup %9277  ;;  %7460 = vst.msk [vmem:[%s13733_s24 + $0x20] sm:$0xff] %vm3066_vm6, %v7428_v46  ;;  %v7429_v0 = vadd.f32 %v13642_v26, %v7225_v49  ;;  %v13792_v37 = vpop.f32.mrf.mxu1 }
 0x822   : > { %v6981_v24 = vmul.f32 %v13458_v39, %v6942_v11  ;;  %v7228_v2 = vmul.f32 %v9276_v44, %v13547_v41  ;;  %9303 = vpow2.f32 %v7955_v9  ;;  %v9280_v61 = vpop.eup %9279  ;;  %v7434_v14 = vadd.f32 %v13650_v48, %v7230_v34 }
 0x823   : > { %7463 = vst.msk [vmem:[%s13733_s24 + $0x38] sm:$0xff] %vm3066_vm6, %v7431_v15  ;;  %v7231_v47 = vmul.f32 %v9278_v56, %v13560_v17  ;;  %9305 = vpow2.f32 %v7960_v59  ;;  %v14497_v26 = vsub.f32 %v13288_v50, %v13399_v28  ;;  %v9282_v53 = vpop.eup %9281  ;;  %7461 = vst.msk [vmem:[%s13733_s24 + $0x28] sm:$0xff] %vm3066_vm6, %v7429_v0  ;;  %v7229_v25 = vmul.f32 %v9280_v61, %v13565_v51  ;;  %v13825_v52 = vpop.f32.mrf.mxu1  ;;  %v14500_v15 = vld [vmem:[#allocation30_spill] sm:$0xff] }
 0x824   : > { %v13786_v5 = vadd.f32 %v13478_v10, %v6981_v24  ;;  %v7432_v8 = vadd.f32 %v13657_v16, %v7228_v2  ;;  %v7354_v17 = vadd.f32 %v13613_v40, %v13426_v23  ;;  %v9284_v36 = vpop.eup %9283  ;;  %7466 = vst.msk [vmem:[%s13733_s24 + $0x50] sm:$0xff] %vm3066_vm6, %v7434_v14  ;;  %v7234_v7 = vmul.f32 %v9282_v53, %v13583_v38 }
 0x825   : > { %v6945_v41 = vmul.f32 %v13447_v54, %v14497_v26  ;;  %v7435_v50 = vadd.f32 %v13662_v30, %v7231_v47  ;;  %v14498_v16 = vsub.f32 %v13291_v27, %v13399_v28  ;;  %v9286_v63 = vpop.eup %9285  ;;  %v7433_v40 = vadd.f32 %v7333_v33, %v7229_v25  ;;  %v13844_v44 = vpop.f32.mrf.mxu1  ;;  %v14501_v26 = vld [vmem:[#allocation14_spill] sm:$0xff] }
 0x826   : > { %v7958_v48 = vmul.f32 -1.442695, %v13786_v5  ;;  %7464 = vst.msk [vmem:[%s13733_s24 + $0x40] sm:$0xff] %vm3066_vm6, %v7432_v8  ;;  %v7137_v21 = vadd.f32 1.0, %v9284_v36  ;;  %v6908_v30 = vsub.f32 %v13301_v55, %v13399_v28  ;;  %v9288_v43 = vpop.eup %9287  ;;  %v7438_v38 = vadd.f32 %v7354_v17, %v7234_v7 }
 0x827   : > { %v6984_v9 = vmul.f32 %v13458_v39, %v6945_v41  ;;  %v6943_v51 = vmul.f32 %v13447_v54, %v14498_v16  ;;  %7467 = vst.msk [vmem:[%s13733_s24 + $0x58] sm:$0xff] %vm3066_vm6, %v7435_v50  ;;  %v7232_v18 = vmul.f32 %v9286_v63, %v13597_v45  ;;  %v7346_v27 = vadd.f32 %v13426_v23, %v13652_v42  ;;  %v9290_v6 = vpop.eup %9289  ;;  %v13861_v50 = vpop.f32.mrf.mxu1 }
 0x828   : > { %9307 = vpow2.f32 %v7958_v48  ;;  %v7357_v57 = vadd.f32 %v13670_v22, %v13426_v23  ;;  %7465 = vst.msk [vmem:[%s13733_s24 + $0x48] sm:$0xff] %vm3066_vm6, %v7433_v40  ;;  %v7235_v55 = vmul.f32 %v9288_v43, %v13606_v3  ;;  %v14499_v45 = vsub.f32 %v13312_v1, %v13399_v28  ;;  %7470 = vst.msk [vmem:[%s13733_s24 + $0x70] sm:$0xff] %vm3066_vm6, %v7438_v38 }
 0x829   : > { %9309 = vrcp.f32 %v7137_v21  ;;  %v6982_v11 = vmul.f32 %v13458_v39, %v6943_v51  ;;  %v9292_v42 = vpop.eup %9291  ;;  %v7436_v22 = vadd.f32 %v7346_v27, %v7232_v18  ;;  %v7142_v60 = vadd.f32 1.0, %v9290_v6  ;;  %v7380_v38 = vpop.f32.mrf.mxu1 }
 0x82a   : > { %v6948_v20 = vmul.f32 %v13447_v54, %v14499_v45  ;;  %v13838_v31 = vadd.f32 %v13478_v10, %v6984_v9  ;;  %v9294_v59 = vpop.eup %9293  ;;  %v7439_v58 = vadd.f32 %v7357_v57, %v7235_v55  ;;  %v7140_v3 = vadd.f32 1.0, %v9292_v42 }
 0x82b   : > { %v6946_v49 = vmul.f32 %v13447_v54, %v6908_v30  ;;  %v9296_v24 = vpop.eup %9295  ;;  %7468 = vst.msk [vmem:[%s13733_s24 + $0x60] sm:$0xff] %vm3066_vm6, %v7436_v22  ;;  %9311 = vrcp.f32 %v7142_v60  ;;  %v7143_v1 = vadd.f32 1.0, %v9294_v59  ;;  %v6911_v34 = vsub.f32 %v14500_v15, %v13399_v28  ;;  %v9015_v42 = vpop.f32.mrf.mxu1  ;;  %v14503_v59 = vld [vmem:[#allocation36_spill] sm:$0xff] }
 0x82c   : > { %v6987_v46 = vmul.f32 %v13458_v39, %v6948_v20  ;;  %v9298_v33 = vpop.eup %9297  ;;  %7471 = vst.msk [vmem:[%s13733_s24 + $0x78] sm:$0xff] %vm3066_vm6, %v7439_v58  ;;  %9313 = vrcp.f32 %v7140_v3  ;;  %v7141_v56 = vadd.f32 1.0, %v9296_v24  ;;  %v13851_v0 = vadd.f32 %v13478_v10, %v6982_v11  ;;  %v14502_v11 = vld [vmem:[#allocation34_spill] sm:$0xff] }
 0x82d   : > { %v6985_v2 = vmul.f32 %v13458_v39, %v6946_v49  ;;  %v9300_v61 = vpop.eup %9299  ;;  %9315 = vrcp.f32 %v7143_v1  ;;  %v7146_v14 = vadd.f32 1.0, %v9298_v33  ;;  %v6949_v47 = vmul.f32 %v13447_v54, %v6911_v34  ;;  %v14505_v34 = vld [vmem:[#allocation39_spill] sm:$0xff] }
 0x82e   : > { %v6909_v41 = vsub.f32 %v14501_v26, %v13399_v28  ;;  %v9302_v53 = vpop.eup %9301  ;;  %9317 = vrcp.f32 %v7141_v56  ;;  %v7144_v8 = vadd.f32 1.0, %v9300_v61  ;;  %v7961_v25 = vmul.f32 -1.442695, %v13838_v31 }
 0x82f   : > { %v13859_v17 = vadd.f32 %v13478_v10, %v6987_v46  ;;  %v9304_v48 = vpop.eup %9303  ;;  %9319 = vrcp.f32 %v7146_v14  ;;  %v7147_v36 = vadd.f32 1.0, %v9302_v53  ;;  %v6988_v7 = vmul.f32 %v13458_v39, %v6949_v47  ;;  %v14506_v14 = vld [vmem:[#allocation42_spill] sm:$0xff]  ;;  %v14507_v53 = vld [vmem:[#allocation44_spill] sm:$0xff] }
 0x830   : > { %v6947_v9 = vmul.f32 %v13447_v54, %v6909_v41  ;;  %v9306_v16 = vpop.eup %9305  ;;  %9321 = vrcp.f32 %v7144_v8  ;;  %v7145_v28 = vadd.f32 1.0, %v9304_v48  ;;  %v7959_v51 = vmul.f32 -1.442695, %v13851_v0 }
 0x831   : > { %v13867_v63 = vadd.f32 %v13478_v10, %v6985_v2  ;;  %9323 = vrcp.f32 %v7147_v36  ;;  %v7150_v40 = vadd.f32 1.0, %v9306_v16  ;;  %v13870_v21 = vadd.f32 %v13478_v10, %v6988_v7 }
 0x832   : > { %v6986_v30 = vmul.f32 %v13458_v39, %v6947_v9  ;;  %9325 = vrcp.f32 %v7145_v28  ;;  %v7964_v54 = vmul.f32 -1.442695, %v13859_v17  ;;  %v7349_v45 = vadd.f32 %v13426_v23, %v13694_v29  ;;  %v14504_v29 = vld [vmem:[#allocation35_spill] sm:$0xff] }
 0x833   : > { %9327 = vrcp.f32 %v7150_v40  ;;  %v7962_v57 = vmul.f32 -1.442695, %v13867_v63  ;;  %v7965_v55 = vmul.f32 -1.442695, %v13870_v21  ;;  %v7370_v3 = vadd.f32 %v13716_v13, %v13426_v23  ;;  %v7393_v13 = vpop.f32.mrf.mxu1 }
 0x834   : > { %v13875_v18 = vadd.f32 %v13478_v10, %v6986_v30  ;;  %9329 = vpow2.f32 %v7961_v25  ;;  %v7362_v24 = vadd.f32 %v13426_v23, %v13742_v35  ;;  %v7373_v56 = vadd.f32 %v13767_v4, %v13426_v23 }
 0x835   : > { %v9308_v43 = vpop.eup %9307  ;;  %9331 = vpow2.f32 %v7959_v51  ;;  %v7365_v26 = vadd.f32 %v13426_v23, %v13792_v37  ;;  %v7386_v25 = vadd.f32 %v13825_v52, %v13426_v23  ;;  %v7378_v37 = vadd.f32 %v13426_v23, %v13844_v44  ;;  %v9016_v28 = vpop.f32.mrf.mxu1 }
 0x836   : > { %v7148_v27 = vadd.f32 1.0, %v9308_v43  ;;  %v9310_v6 = vpop.eup %9309  ;;  %v7963_v20 = vmul.f32 -1.442695, %v13875_v18  ;;  %v7389_v52 = vadd.f32 %v13861_v50, %v13426_v23  ;;  %v7381_v44 = vadd.f32 %v13426_v23, %v7380_v38 }
 0x837   : > { %v7233_v39 = vmul.f32 %v9310_v6, %v14502_v11 }
 0x838   : > { %9333 = vrcp.f32 %v7148_v27  ;;  %v9312_v10 = vpop.eup %9311 }
 0x839   : > { %9335 = vpow2.f32 %v7964_v54  ;;  %v7437_v22 = vadd.f32 %v7349_v45, %v7233_v39  ;;  %v9314_v60 = vpop.eup %9313  ;;  %v7238_v58 = vmul.f32 %v9312_v10, %v14503_v59  ;;  %v7402_v54 = vadd.f32 %v9015_v42, %v13426_v23 }
 0x83a   : > { %9337 = vpow2.f32 %v7962_v57  ;;  %v9316_v46 = vpop.eup %9315  ;;  %v7236_v49 = vmul.f32 %v9314_v60, %v14504_v29  ;;  %v7394_v39 = vadd.f32 %v13426_v23, %v7393_v13 }
 0x83b   : > { %9339 = vpow2.f32 %v7965_v55  ;;  %7469 = vst.msk [vmem:[%s13733_s24 + $0x68] sm:$0xff] %vm3066_vm6, %v7437_v22  ;;  %v9318_v1 = vpop.eup %9317  ;;  %v7442_v15 = vadd.f32 %v7370_v3, %v7238_v58  ;;  %v7239_v33 = vmul.f32 %v9316_v46, %v14505_v34  ;;  %v7396_v55 = vpop.f32.mrf.mxu1 }
 0x83c   : > { %9341 = vpow2.f32 %v7963_v20  ;;  %v9320_v2 = vpop.eup %9319  ;;  %v7440_v61 = vadd.f32 %v7362_v24, %v7236_v49  ;;  %v7237_v47 = vmul.f32 %v9318_v1, %v14506_v14  ;;  %v7405_v1 = vadd.f32 %v9016_v28, %v13426_v23 }
 0x83d   : > { %v9322_v41 = vpop.eup %9321  ;;  %7474 = vst.msk [vmem:[%s13733_s24 + $0x90] sm:$0xff] %vm3066_vm6, %v7442_v15  ;;  %v7443_v35 = vadd.f32 %v7373_v56, %v7239_v33  ;;  %v7242_v8 = vmul.f32 %v9320_v2, %v14507_v53  ;;  %v9019_v59 = vpop.f32.mrf.mxu1  ;;  %v7397_v34 = vadd.f32 %v13426_v23, %v7396_v55 }
 0x83e   : > { %v9324_v4 = vpop.eup %9323  ;;  %7472 = vst.msk [vmem:[%s13733_s24 + $0x80] sm:$0xff] %vm3066_vm6, %v7440_v61  ;;  %v7441_v48 = vadd.f32 %v7365_v26, %v7237_v47  ;;  %v7240_v36 = vmul.f32 %v9322_v41, %v13707_v32  ;;  %v7418_v33 = vadd.f32 %v9019_v59, %v13426_v23 }
 0x83f   : > { %v9326_v7 = vpop.eup %9325  ;;  %7475 = vst.msk [vmem:[%s13733_s24 + $0x98] sm:$0xff] %vm3066_vm6, %v7443_v35  ;;  %v7446_v9 = vadd.f32 %v7386_v25, %v7242_v8  ;;  %v7243_v16 = vmul.f32 %v9324_v4, %v13721_v62 }
 0x840   : > { %v9328_v51 = vpop.eup %9327  ;;  %7473 = vst.msk [vmem:[%s13733_s24 + $0x88] sm:$0xff] %vm3066_vm6, %v7441_v48  ;;  %v7444_v40 = vadd.f32 %v7378_v37, %v7240_v36  ;;  %v7241_v32 = vmul.f32 %v9326_v7, %v13738_v19 }
 0x841   : > { %v9330_v30 = vpop.eup %9329  ;;  %7478 = vst.msk [vmem:[%s13733_s24 + $0xb0] sm:$0xff] %vm3066_vm6, %v7446_v9  ;;  %v7447_v43 = vadd.f32 %v7389_v52, %v7243_v16  ;;  %v7246_v62 = vmul.f32 %v9328_v51, %v13753_v12 }
 0x842   : > { %v9332_v50 = vpop.eup %9331  ;;  %7476 = vst.msk [vmem:[%s13733_s24 + $0xa0] sm:$0xff] %vm3066_vm6, %v7444_v40  ;;  %v7445_v27 = vadd.f32 %v7381_v44, %v7241_v32  ;;  %v7151_v57 = vadd.f32 1.0, %v9330_v30 }
 0x843   : > { %7479 = vst.msk [vmem:[%s13733_s24 + $0xb8] sm:$0xff] %vm3066_vm6, %v7447_v43  ;;  %v7450_v19 = vadd.f32 %v7402_v54, %v7246_v62  ;;  %v7149_v38 = vadd.f32 1.0, %v9332_v50 }
 0x844   : > { %7477 = vst.msk [vmem:[%s13733_s24 + $0xa8] sm:$0xff] %vm3066_vm6, %v7445_v27  ;;  %9343 = vrcp.f32 %v7151_v57 }
 0x845   : > { %v9334_v6 = vpop.eup %9333  ;;  %7482 = vst.msk [vmem:[%s13733_s24 + $0xd0] sm:$0xff] %vm3066_vm6, %v7450_v19  ;;  %9345 = vrcp.f32 %v7149_v38 }
 0x846   : > { %v9336_v11 = vpop.eup %9335  ;;  %v7244_v12 = vmul.f32 %v9334_v6, %v13786_v5  ;;  %v7409_v5 = vpop.f32.mrf.mxu1 }
 0x847   : > { %v9338_v45 = vpop.eup %9337  ;;  %v7154_v20 = vadd.f32 1.0, %v9336_v11  ;;  %v7410_v61 = vadd.f32 %v13426_v23, %v7409_v5 }
 0x848   : > { %v9340_v42 = vpop.eup %9339  ;;  %v7448_v10 = vadd.f32 %v7394_v39, %v7244_v12  ;;  %v7152_v22 = vadd.f32 1.0, %v9338_v45  ;;  %v9020_v46 = vpop.f32.mrf.mxu1 }
 0x849   : > { %v9342_v60 = vpop.eup %9341  ;;  %9347 = vrcp.f32 %v7154_v20  ;;  %v7155_v58 = vadd.f32 1.0, %v9340_v42  ;;  %v7421_v26 = vadd.f32 %v9020_v46, %v13426_v23 }
 0x84a   : > { %7480 = vst.msk [vmem:[%s13733_s24 + $0xc0] sm:$0xff] %vm3066_vm6, %v7448_v10  ;;  %9349 = vrcp.f32 %v7152_v22  ;;  %v7153_v3 = vadd.f32 1.0, %v9342_v60  ;;  %v7412_v56 = vpop.f32.mrf.mxu1 }
 0x84b   : > { %9351 = vrcp.f32 %v7155_v58  ;;  %v7413_v35 = vadd.f32 %v13426_v23, %v7412_v56 }
 0x84c   : > { %9353 = vrcp.f32 %v7153_v3 }
 0x851   : > { %v9344_v29 = vpop.eup %9343 }
 0x852   : > { %v9346_v49 = vpop.eup %9345  ;;  %v7247_v24 = vmul.f32 %v9344_v29, %v13838_v31 }
 0x853   : > { %v7245_v15 = vmul.f32 %v9346_v49, %v13851_v0 }
 0x854   : > { %v7451_v2 = vadd.f32 %v7405_v1, %v7247_v24 }
 0x855   : > { %v7449_v47 = vadd.f32 %v7397_v34, %v7245_v15 }
 0x856   : > { %v9348_v13 = vpop.eup %9347  ;;  %7483 = vst.msk [vmem:[%s13733_s24 + $0xd8] sm:$0xff] %vm3066_vm6, %v7451_v2 }
 0x857   : > { %v9350_v14 = vpop.eup %9349  ;;  %v7250_v31 = vmul.f32 %v9348_v13, %v13859_v17  ;;  %7481 = vst.msk [vmem:[%s13733_s24 + $0xc8] sm:$0xff] %vm3066_vm6, %v7449_v47 }
 0x858   : > { %v9352_v0 = vpop.eup %9351  ;;  %v7248_v41 = vmul.f32 %v9350_v14, %v13867_v63 }
 0x859   : > { %v9354_v53 = vpop.eup %9353  ;;  %v7454_v8 = vadd.f32 %v7418_v33, %v7250_v31  ;;  %v7251_v25 = vmul.f32 %v9352_v0, %v13870_v21 }
 0x85a   : > { %v7452_v4 = vadd.f32 %v7410_v61, %v7248_v41  ;;  %v7249_v17 = vmul.f32 %v9354_v53, %v13875_v18 }
 0x85b   : > { %7486 = vst.msk [vmem:[%s13733_s24 + $0xf0] sm:$0xff] %vm3066_vm6, %v7454_v8  ;;  %v7455_v48 = vadd.f32 %v7421_v26, %v7251_v25 }
 0x85c   : > { %7484 = vst.msk [vmem:[%s13733_s24 + $0xe0] sm:$0xff] %vm3066_vm6, %v7452_v4  ;;  %v7453_v36 = vadd.f32 %v7413_v35, %v7249_v17 }
 0x85d   : > { %7487 = vst.msk [vmem:[%s13733_s24 + $0xf8] sm:$0xff] %vm3066_vm6, %v7455_v48 }
 0x85e   : > { %7485 = vst.msk [vmem:[%s13733_s24 + $0xe8] sm:$0xff] %vm3066_vm6, %v7453_v36 }
 0x85f PF: > { %s28_s27 = sadd.s32 1, %s9362_s27  }
 0x860   : > { %p25_p4 = scmp.ge.s32.totalorder %s28_s27, 4  }
 0x862   :  { %27 = sbr.rel (!%p25_p4) target bundleno = 4 (0x4), region = 143 }

</bundles_post_ra>
